<compile_context>
chip_gen: v5e
topology: v5e:2x2
jax: 0.10.0
libtpu: 0.0.40
codegen_flags: <defaults>
</compile_context>

<pallas_src>
import functools

import jax
import jax.numpy as jnp
from jax.experimental import pallas as pl
from jax.experimental.pallas import tpu as pltpu


def _vmem_spec():
    return pl.BlockSpec(memory_space=pltpu.MemorySpace.VMEM)


def _gru_cell(gi_r, gi_z, gi_n, h, whh_r, whh_z, whh_n, bhh_r, bhh_z, bhh_n):
    """PyTorch GRU cell given precomputed input-gate terms (gate order r, z, n)."""
    gh_r = jnp.dot(h, whh_r, preferred_element_type=jnp.float32) + bhh_r
    gh_z = jnp.dot(h, whh_z, preferred_element_type=jnp.float32) + bhh_z
    gh_n = jnp.dot(h, whh_n, preferred_element_type=jnp.float32) + bhh_n
    r = jax.nn.sigmoid(gi_r + gh_r)
    z = jax.nn.sigmoid(gi_z + gh_z)
    n = jnp.tanh(gi_n + r * gh_n)
    return (1.0 - z) * n + z * h


# --------------------------- Fused encoder kernel ----------------------------
def encoder_kernel(emb_ref, wih_ref, whh_ref, bih_ref, bhh_ref, w1_ref, b1_ref,
                   enc_out_ref, enc_proj_ref, *, seq_len, batch, hidden_dim):
    """GRU over the whole source sequence; also emits W1@enc_out + b1 (hoisted)."""
    # Hoist all weight loads out of the (unrolled) time loop.
    wih_r, wih_z, wih_n = wih_ref[0], wih_ref[1], wih_ref[2]
    whh_r, whh_z, whh_n = whh_ref[0], whh_ref[1], whh_ref[2]
    bih_r, bih_z, bih_n = bih_ref[0], bih_ref[1], bih_ref[2]
    bhh_r, bhh_z, bhh_n = bhh_ref[0], bhh_ref[1], bhh_ref[2]
    w1 = w1_ref[...]
    b1 = b1_ref[...]

    h = jnp.zeros((batch, hidden_dim), jnp.float32)
    # seq_len is a small static int -> fully unrolled straight-line code.
    for t in range(seq_len):
        x = emb_ref[t]                                                       # (B, E)
        gi_r = jnp.dot(x, wih_r, preferred_element_type=jnp.float32) + bih_r
        gi_z = jnp.dot(x, wih_z, preferred_element_type=jnp.float32) + bih_z
        gi_n = jnp.dot(x, wih_n, preferred_element_type=jnp.float32) + bih_n
        h = _gru_cell(gi_r, gi_z, gi_n, h,
                      whh_r, whh_z, whh_n, bhh_r, bhh_z, bhh_n)              # (B, H)
        enc_out_ref[t] = h
        # Decoder-invariant additive-attention projection (hoisted out of decoder loop).
        enc_proj_ref[t] = jnp.dot(h, w1, preferred_element_type=jnp.float32) + b1


# --------------------------- Fused decoder kernel ----------------------------
def decoder_kernel(onehot0_ref, enc_out_ref, enc_proj_ref,
                   wih_e_ref, wih_c_ref, whh_ref, bih_ref, bhh_ref,
                   w2_ref, b2_ref, v_ref, out_wh_ref, out_wc_ref, out_b_ref,
                   emb_ref, logits_ref, *, max_len, seq_len, batch, vpad):
    """Attention + GRU + output projection + greedy argmax + embedding, all in VMEM."""
    enc = enc_out_ref[...]        # (S, B, H)
    enc_proj = enc_proj_ref[...]  # (S, B, H)  == W1 @ enc + b1, precomputed
    v = v_ref[...]                # (1, 1, H)

    # Hoist all loop-invariant loads.
    wih_e_r, wih_e_z, wih_e_n = wih_e_ref[0], wih_e_ref[1], wih_e_ref[2]
    wih_c_r, wih_c_z, wih_c_n = wih_c_ref[0], wih_c_ref[1], wih_c_ref[2]
    whh_r, whh_z, whh_n = whh_ref[0], whh_ref[1], whh_ref[2]
    bih_r, bih_z, bih_n = bih_ref[0], bih_ref[1], bih_ref[2]
    bhh_r, bhh_z, bhh_n = bhh_ref[0], bhh_ref[1], bhh_ref[2]
    w2 = w2_ref[...]
    b2 = b2_ref[...]
    out_wh = out_wh_ref[...]
    out_wc = out_wc_ref[...]
    out_b = out_b_ref[...]
    emb_table = emb_ref[...]      # (Vpad, E)

    h = enc[seq_len - 1]          # final encoder hidden (single-layer GRU) -> (B, H)
    one_hot = onehot0_ref[...]    # (B, Vpad) one-hot of tgt[:, 0]
    lane = jax.lax.broadcasted_iota(jnp.int32, (batch, vpad), 1)  # loop-invariant

    for t in range(max_len):
        # ---- additive attention (softmax over S) ----
        dec_proj = jnp.dot(h, w2, preferred_element_type=jnp.float32) + b2      # (B, H)
        e = jnp.tanh(enc_proj + dec_proj[None])                  # (S, B, H)
        scores = jnp.sum(e * v, axis=2, keepdims=True)           # (S, B, 1)
        m = jnp.max(scores, axis=0, keepdims=True)
        p = jnp.exp(scores - m)
        denom = jnp.sum(p, axis=0, keepdims=True)
        attn = p * pl.reciprocal(denom, approx=True)             # EUP reciprocal
        context = jnp.sum(attn * enc, axis=0)                    # (B, H)

        # ---- prev-token embedding as one-hot @ table (MXU, no gather) ----
        embedded = jnp.dot(one_hot, emb_table, preferred_element_type=jnp.float32)  # (B, E)

        # ---- GRU step on concat([embedded, context]) via row-split, per-gate weights ----
        gi_r = (jnp.dot(embedded, wih_e_r, preferred_element_type=jnp.float32)
                + jnp.dot(context, wih_c_r, preferred_element_type=jnp.float32) + bih_r)
        gi_z = (jnp.dot(embedded, wih_e_z, preferred_element_type=jnp.float32)
                + jnp.dot(context, wih_c_z, preferred_element_type=jnp.float32) + bih_z)
        gi_n = (jnp.dot(embedded, wih_e_n, preferred_element_type=jnp.float32)
                + jnp.dot(context, wih_c_n, preferred_element_type=jnp.float32) + bih_n)
        h = _gru_cell(gi_r, gi_z, gi_n, h,
                      whh_r, whh_z, whh_n, bhh_r, bhh_z, bhh_n)

        # ---- output projection: concat([h, context]) @ W_out + b (row-split, lane-padded) ----
        logits = (jnp.dot(h, out_wh, preferred_element_type=jnp.float32)
                  + jnp.dot(context, out_wc, preferred_element_type=jnp.float32)
                  + out_b)                                        # (B, Vpad); padded cols = -1e30
        logits_ref[t] = logits                                    # lane-dense 128-wide store

        # ---- greedy argmax -> next-token one-hot (first-max tie-break like torch.argmax) ----
        max_val = jnp.max(logits, axis=1, keepdims=True)
        first_arg = jnp.min(jnp.where(logits == max_val, lane, vpad),
                            axis=1, keepdims=True)
        one_hot = (lane == first_arg).astype(jnp.float32)


# ------------------------------- Forward --------------------------------------
@functools.partial(jax.jit, static_argnames=("target_vocab",))
def seq_model_forward(params, src, tgt, *, target_vocab):
    """Matches SeqModel.forward with teacher_forcing_ratio=0.0 (greedy feedback)."""
    B, S_src = src.shape
    max_len = tgt.shape[1]
    H = params["att_w1"].shape[0]
    vpad = params["out_b"].shape[-1]

    # Encoder embedding lookup: one XLA gather, outside the sequential kernel.
    emb = jnp.take(params["enc_emb"], src, axis=0)             # (B, S, E)
    emb = jnp.transpose(emb, (1, 0, 2))                         # (S, B, E) time-major

    enc_out, enc_proj = pl.pallas_call(
        functools.partial(encoder_kernel, seq_len=S_src, batch=B, hidden_dim=H),
        out_shape=(jax.ShapeDtypeStruct((S_src, B, H), jnp.float32),
                   jax.ShapeDtypeStruct((S_src, B, H), jnp.float32)),
        in_specs=[_vmem_spec()] * 7,
        out_specs=(_vmem_spec(), _vmem_spec()),
    )(emb, params["enc_wih"], params["enc_whh"], params["enc_bih"],
      params["enc_bhh"], params["att_w1"], params["att_b1"])

    onehot0 = jax.nn.one_hot(tgt[:, 0], vpad, dtype=jnp.float32)   # (B, Vpad)

    logits_all = pl.pallas_call(
        functools.partial(decoder_kernel, max_len=max_len, seq_len=S_src,
                          batch=B, vpad=vpad),
        out_shape=jax.ShapeDtypeStruct((max_len, B, vpad), jnp.float32),
        in_specs=[_vmem_spec()] * 15,
        out_specs=_vmem_spec(),
    )(onehot0, enc_out, enc_proj,
      params["dec_wih_e"], params["dec_wih_c"], params["dec_whh"],
      params["dec_bih"], params["dec_bhh"],
      params["att_w2"], params["att_b2"], params["att_v"],
      params["out_w_h"], params["out_w_c"], params["out_b"],
      params["dec_emb_pad"])

    # (T, B, Vpad) -> (B, T, V)
    return jnp.transpose(logits_all, (1, 0, 2))[:, :, :target_vocab]


# ------------------------------ Parameters -------------------------------------
def init_params(key, input_vocab, target_vocab, emb_dim, hidden_dim, vpad):
    ks = jax.random.split(key, 20)
    H, E, V = hidden_dim, emb_dim, target_vocab
    bound = 1.0 / float(hidden_dim) ** 0.5

    def u(k, shape):
        return jax.random.uniform(k, shape, jnp.float32, -bound, bound)

    dec_emb = jax.random.normal(ks[10], (V, E), jnp.float32)
    dec_emb_pad = jnp.zeros((vpad, E), jnp.float32).at[:V].set(dec_emb)

    out_w_h = jnp.zeros((H, vpad), jnp.float32).at[:, :V].set(u(ks[15], (H, V)))
    out_w_c = jnp.zeros((H, vpad), jnp.float32).at[:, :V].set(u(ks[16], (H, V)))
    # Padded vocab columns get -1e30 bias so the in-kernel argmax never selects them.
    out_b = jnp.full((1, vpad), -1e30, jnp.float32).at[:, :V].set(u(ks[17], (1, V)))

    # NOTE: only jnp arrays in this dict (static config like hidden_dim is derived
    # from shapes / passed as a static argument, never traced).
    return {
        # Encoder
        "enc_emb": jax.random.normal(ks[0], (input_vocab, E), jnp.float32),
        "enc_wih": u(ks[1], (3, E, H)),       # per-gate stacked (r, z, n)
        "enc_whh": u(ks[2], (3, H, H)),
        "enc_bih": u(ks[3], (3, 1, H)),
        "enc_bhh": u(ks[4], (3, 1, H)),
        # Decoder GRU (input = [embedded | context] -> row-split weights)
        "dec_emb_pad": dec_emb_pad,           # (Vpad, E), rows >= V are zero
        "dec_wih_e": u(ks[5], (3, E, H)),
        "dec_wih_c": u(ks[6], (3, H, H)),
        "dec_whh": u(ks[7], (3, H, H)),
        "dec_bih": u(ks[8], (3, 1, H)),
        "dec_bhh": u(ks[9], (3, 1, H)),
        # Attention
        "att_w1": u(ks[11], (H, H)),
        "att_b1": u(ks[12], (1, H)),
        "att_w2": u(ks[13], (H, H)),
        "att_b2": u(ks[14], (1, H)),
        "att_v": u(ks[18], (1, 1, H)),        # nn.Linear(H, 1, bias=False) weight
        # Output layer Linear(2H, V), split [output | context], lane-padded to Vpad
        "out_w_h": out_w_h,
        "out_w_c": out_w_c,
        "out_b": out_b,
    }


# --------------------------------- Main -----------------------------------------
if __name__ == "__main__":
    INPUT_VOCAB = 50
    TARGET_VOCAB = 40
    EMB_DIM = 32
    HIDDEN_DIM = 32
    VPAD = 128          # lane-padded logits width
    B = 2
    S_SRC = 8
    S_TGT = 8

    key = jax.random.PRNGKey(0)
    k_param, k_src, k_tgt = jax.random.split(key, 3)

    params = init_params(k_param, INPUT_VOCAB, TARGET_VOCAB, EMB_DIM, HIDDEN_DIM, VPAD)
    src = jax.random.randint(k_src, (B, S_SRC), 0, INPUT_VOCAB, dtype=jnp.int32)
    tgt = jax.random.randint(k_tgt, (B, S_TGT), 0, TARGET_VOCAB, dtype=jnp.int32)

    outputs = seq_model_forward(params, src, tgt, target_vocab=TARGET_VOCAB)
    jax.block_until_ready(outputs)

    assert outputs.shape == (B, S_TGT, TARGET_VOCAB)
    assert bool(jnp.all(jnp.isfinite(outputs)))
    print("KERNEL_OK")
</pallas_src>

<mosaic_0001>
module attributes {stable_mosaic.version = 11 : i64} {
  func.func @encoder_kernel(%arg0: memref<8x2x32xf32, #tpu.memory_space<vmem>>, %arg1: memref<3x32x32xf32, #tpu.memory_space<vmem>>, %arg2: memref<3x32x32xf32, #tpu.memory_space<vmem>>, %arg3: memref<3x1x32xf32, #tpu.memory_space<vmem>>, %arg4: memref<3x1x32xf32, #tpu.memory_space<vmem>>, %arg5: memref<32x32xf32, #tpu.memory_space<vmem>>, %arg6: memref<1x32xf32, #tpu.memory_space<vmem>>, %arg7: memref<8x2x32xf32, #tpu.memory_space<vmem>>, %arg8: memref<8x2x32xf32, #tpu.memory_space<vmem>>) attributes {dimension_semantics = [], scalar_prefetch = 0 : i64, scratch_operands = 0 : i64, tpu.core_type = #tpu.core_type<tc>} {
    %c0 = arith.constant 0 : index
    %c0_0 = arith.constant 0 : index
    %c0_1 = arith.constant 0 : index
    %0 = vector.load %arg1[%c0, %c0_0, %c0_1] : memref<3x32x32xf32, #tpu.memory_space<vmem>>, vector<1x32x32xf32>
    %1 = vector.shape_cast %0 : vector<1x32x32xf32> to vector<32x32xf32>
    %c1 = arith.constant 1 : index
    %c0_2 = arith.constant 0 : index
    %c0_3 = arith.constant 0 : index
    %2 = vector.load %arg1[%c1, %c0_2, %c0_3] : memref<3x32x32xf32, #tpu.memory_space<vmem>>, vector<1x32x32xf32>
    %3 = vector.shape_cast %2 : vector<1x32x32xf32> to vector<32x32xf32>
    %c2 = arith.constant 2 : index
    %c0_4 = arith.constant 0 : index
    %c0_5 = arith.constant 0 : index
    %4 = vector.load %arg1[%c2, %c0_4, %c0_5] : memref<3x32x32xf32, #tpu.memory_space<vmem>>, vector<1x32x32xf32>
    %5 = vector.shape_cast %4 : vector<1x32x32xf32> to vector<32x32xf32>
    %c0_6 = arith.constant 0 : index
    %c0_7 = arith.constant 0 : index
    %c0_8 = arith.constant 0 : index
    %6 = vector.load %arg2[%c0_6, %c0_7, %c0_8] : memref<3x32x32xf32, #tpu.memory_space<vmem>>, vector<1x32x32xf32>
    %7 = vector.shape_cast %6 : vector<1x32x32xf32> to vector<32x32xf32>
    %c1_9 = arith.constant 1 : index
    %c0_10 = arith.constant 0 : index
    %c0_11 = arith.constant 0 : index
    %8 = vector.load %arg2[%c1_9, %c0_10, %c0_11] : memref<3x32x32xf32, #tpu.memory_space<vmem>>, vector<1x32x32xf32>
    %9 = vector.shape_cast %8 : vector<1x32x32xf32> to vector<32x32xf32>
    %c2_12 = arith.constant 2 : index
    %c0_13 = arith.constant 0 : index
    %c0_14 = arith.constant 0 : index
    %10 = vector.load %arg2[%c2_12, %c0_13, %c0_14] : memref<3x32x32xf32, #tpu.memory_space<vmem>>, vector<1x32x32xf32>
    %11 = vector.shape_cast %10 : vector<1x32x32xf32> to vector<32x32xf32>
    %c0_15 = arith.constant 0 : index
    %c0_16 = arith.constant 0 : index
    %c0_17 = arith.constant 0 : index
    %12 = vector.load %arg3[%c0_15, %c0_16, %c0_17] : memref<3x1x32xf32, #tpu.memory_space<vmem>>, vector<1x1x32xf32>
    %13 = vector.shape_cast %12 : vector<1x1x32xf32> to vector<1x32xf32>
    %c1_18 = arith.constant 1 : index
    %c0_19 = arith.constant 0 : index
    %c0_20 = arith.constant 0 : index
    %14 = vector.load %arg3[%c1_18, %c0_19, %c0_20] : memref<3x1x32xf32, #tpu.memory_space<vmem>>, vector<1x1x32xf32>
    %15 = vector.shape_cast %14 : vector<1x1x32xf32> to vector<1x32xf32>
    %c2_21 = arith.constant 2 : index
    %c0_22 = arith.constant 0 : index
    %c0_23 = arith.constant 0 : index
    %16 = vector.load %arg3[%c2_21, %c0_22, %c0_23] : memref<3x1x32xf32, #tpu.memory_space<vmem>>, vector<1x1x32xf32>
    %17 = vector.shape_cast %16 : vector<1x1x32xf32> to vector<1x32xf32>
    %c0_24 = arith.constant 0 : index
    %c0_25 = arith.constant 0 : index
    %c0_26 = arith.constant 0 : index
    %18 = vector.load %arg4[%c0_24, %c0_25, %c0_26] : memref<3x1x32xf32, #tpu.memory_space<vmem>>, vector<1x1x32xf32>
    %19 = vector.shape_cast %18 : vector<1x1x32xf32> to vector<1x32xf32>
    %c1_27 = arith.constant 1 : index
    %c0_28 = arith.constant 0 : index
    %c0_29 = arith.constant 0 : index
    %20 = vector.load %arg4[%c1_27, %c0_28, %c0_29] : memref<3x1x32xf32, #tpu.memory_space<vmem>>, vector<1x1x32xf32>
    %21 = vector.shape_cast %20 : vector<1x1x32xf32> to vector<1x32xf32>
    %c2_30 = arith.constant 2 : index
    %c0_31 = arith.constant 0 : index
    %c0_32 = arith.constant 0 : index
    %22 = vector.load %arg4[%c2_30, %c0_31, %c0_32] : memref<3x1x32xf32, #tpu.memory_space<vmem>>, vector<1x1x32xf32>
    %23 = vector.shape_cast %22 : vector<1x1x32xf32> to vector<1x32xf32>
    %c0_33 = arith.constant 0 : index
    %c0_34 = arith.constant 0 : index
    %24 = vector.load %arg5[%c0_33, %c0_34] : memref<32x32xf32, #tpu.memory_space<vmem>>, vector<32x32xf32>
    %c0_35 = arith.constant 0 : index
    %c0_36 = arith.constant 0 : index
    %25 = vector.load %arg6[%c0_35, %c0_36] : memref<1x32xf32, #tpu.memory_space<vmem>>, vector<1x32xf32>
    %cst = arith.constant 0.000000e+00 : f32
    %26 = vector.broadcast %cst : f32 to vector<2x32xf32>
    %c0_37 = arith.constant 0 : index
    %c0_38 = arith.constant 0 : index
    %c0_39 = arith.constant 0 : index
    %27 = vector.load %arg0[%c0_37, %c0_38, %c0_39] : memref<8x2x32xf32, #tpu.memory_space<vmem>>, vector<1x2x32xf32>
    %28 = vector.shape_cast %27 : vector<1x2x32xf32> to vector<2x32xf32>
    %cst_40 = arith.constant dense<0.000000e+00> : vector<2x32xf32>
    %29 = tpu.matmul %28, %1, %cst_40 {dimension_numbers = #tpu.dot_dimension_numbers<[1], [0], [0], [1], [0, 0, 1, 1], [], []>} : vector<2x32xf32>, vector<32x32xf32>, vector<2x32xf32> -> vector<2x32xf32>
    %30 = vector.broadcast %13 : vector<1x32xf32> to vector<2x32xf32>
    %31 = arith.addf %29, %30 : vector<2x32xf32>
    %cst_41 = arith.constant dense<0.000000e+00> : vector<2x32xf32>
    %32 = tpu.matmul %28, %3, %cst_41 {dimension_numbers = #tpu.dot_dimension_numbers<[1], [0], [0], [1], [0, 0, 1, 1], [], []>} : vector<2x32xf32>, vector<32x32xf32>, vector<2x32xf32> -> vector<2x32xf32>
    %33 = vector.broadcast %15 : vector<1x32xf32> to vector<2x32xf32>
    %34 = arith.addf %32, %33 : vector<2x32xf32>
    %cst_42 = arith.constant dense<0.000000e+00> : vector<2x32xf32>
    %35 = tpu.matmul %28, %5, %cst_42 {dimension_numbers = #tpu.dot_dimension_numbers<[1], [0], [0], [1], [0, 0, 1, 1], [], []>} : vector<2x32xf32>, vector<32x32xf32>, vector<2x32xf32> -> vector<2x32xf32>
    %36 = vector.broadcast %17 : vector<1x32xf32> to vector<2x32xf32>
    %37 = arith.addf %35, %36 : vector<2x32xf32>
    %cst_43 = arith.constant dense<0.000000e+00> : vector<2x32xf32>
    %38 = tpu.matmul %26, %7, %cst_43 {dimension_numbers = #tpu.dot_dimension_numbers<[1], [0], [0], [1], [0, 0, 1, 1], [], []>} : vector<2x32xf32>, vector<32x32xf32>, vector<2x32xf32> -> vector<2x32xf32>
    %39 = vector.broadcast %19 : vector<1x32xf32> to vector<2x32xf32>
    %40 = arith.addf %38, %39 : vector<2x32xf32>
    %cst_44 = arith.constant dense<0.000000e+00> : vector<2x32xf32>
    %41 = tpu.matmul %26, %9, %cst_44 {dimension_numbers = #tpu.dot_dimension_numbers<[1], [0], [0], [1], [0, 0, 1, 1], [], []>} : vector<2x32xf32>, vector<32x32xf32>, vector<2x32xf32> -> vector<2x32xf32>
    %42 = vector.broadcast %21 : vector<1x32xf32> to vector<2x32xf32>
    %43 = arith.addf %41, %42 : vector<2x32xf32>
    %cst_45 = arith.constant dense<0.000000e+00> : vector<2x32xf32>
    %44 = tpu.matmul %26, %11, %cst_45 {dimension_numbers = #tpu.dot_dimension_numbers<[1], [0], [0], [1], [0, 0, 1, 1], [], []>} : vector<2x32xf32>, vector<32x32xf32>, vector<2x32xf32> -> vector<2x32xf32>
    %45 = vector.broadcast %23 : vector<1x32xf32> to vector<2x32xf32>
    %46 = arith.addf %44, %45 : vector<2x32xf32>
    %47 = arith.addf %31, %40 : vector<2x32xf32>
    %48 = arith.negf %47 : vector<2x32xf32>
    %49 = math.exp %48 : vector<2x32xf32>
    %cst_46 = arith.constant 1.000000e+00 : f32
    %50 = vector.broadcast %cst_46 : f32 to vector<2x32xf32>
    %51 = arith.addf %50, %49 : vector<2x32xf32>
    %52 = arith.divf %50, %51 : vector<2x32xf32>
    %53 = arith.addf %34, %43 : vector<2x32xf32>
    %54 = arith.negf %53 : vector<2x32xf32>
    %55 = math.exp %54 : vector<2x32xf32>
    %cst_47 = arith.constant 1.000000e+00 : f32
    %56 = vector.broadcast %cst_47 : f32 to vector<2x32xf32>
    %57 = arith.addf %56, %55 : vector<2x32xf32>
    %58 = arith.divf %56, %57 : vector<2x32xf32>
    %59 = arith.mulf %52, %46 : vector<2x32xf32>
    %60 = arith.addf %37, %59 : vector<2x32xf32>
    %61 = math.tanh %60 : vector<2x32xf32>
    %cst_48 = arith.constant 1.000000e+00 : f32
    %62 = vector.broadcast %cst_48 : f32 to vector<2x32xf32>
    %63 = arith.subf %62, %58 : vector<2x32xf32>
    %64 = arith.mulf %63, %61 : vector<2x32xf32>
    %65 = arith.mulf %58, %26 : vector<2x32xf32>
    %66 = arith.addf %64, %65 : vector<2x32xf32>
    %c0_49 = arith.constant 0 : index
    %c0_50 = arith.constant 0 : index
    %c0_51 = arith.constant 0 : index
    %67 = vector.load %arg7[%c0_49, %c0_50, %c0_51] : memref<8x2x32xf32, #tpu.memory_space<vmem>>, vector<1x2x32xf32>
    %68 = vector.shape_cast %67 : vector<1x2x32xf32> to vector<2x32xf32>
    %69 = vector.shape_cast %66 : vector<2x32xf32> to vector<1x2x32xf32>
    tpu.vector_store %arg7[%c0_49, %c0_50, %c0_51], %69 {strides = array<i32>} : memref<8x2x32xf32, #tpu.memory_space<vmem>>, vector<1x2x32xf32>,
    %cst_52 = arith.constant dense<0.000000e+00> : vector<2x32xf32>
    %70 = tpu.matmul %66, %24, %cst_52 {dimension_numbers = #tpu.dot_dimension_numbers<[1], [0], [0], [1], [0, 0, 1, 1], [], []>} : vector<2x32xf32>, vector<32x32xf32>, vector<2x32xf32> -> vector<2x32xf32>
    %71 = vector.broadcast %25 : vector<1x32xf32> to vector<2x32xf32>
    %72 = arith.addf %70, %71 : vector<2x32xf32>
    %c0_53 = arith.constant 0 : index
    %c0_54 = arith.constant 0 : index
    %c0_55 = arith.constant 0 : index
    %73 = vector.load %arg8[%c0_53, %c0_54, %c0_55] : memref<8x2x32xf32, #tpu.memory_space<vmem>>, vector<1x2x32xf32>
    %74 = vector.shape_cast %73 : vector<1x2x32xf32> to vector<2x32xf32>
    %75 = vector.shape_cast %72 : vector<2x32xf32> to vector<1x2x32xf32>
    tpu.vector_store %arg8[%c0_53, %c0_54, %c0_55], %75 {strides = array<i32>} : memref<8x2x32xf32, #tpu.memory_space<vmem>>, vector<1x2x32xf32>,
    %c1_56 = arith.constant 1 : index
    %c0_57 = arith.constant 0 : index
    %c0_58 = arith.constant 0 : index
    %76 = vector.load %arg0[%c1_56, %c0_57, %c0_58] : memref<8x2x32xf32, #tpu.memory_space<vmem>>, vector<1x2x32xf32>
    %77 = vector.shape_cast %76 : vector<1x2x32xf32> to vector<2x32xf32>
    %cst_59 = arith.constant dense<0.000000e+00> : vector<2x32xf32>
    %78 = tpu.matmul %77, %1, %cst_59 {dimension_numbers = #tpu.dot_dimension_numbers<[1], [0], [0], [1], [0, 0, 1, 1], [], []>} : vector<2x32xf32>, vector<32x32xf32>, vector<2x32xf32> -> vector<2x32xf32>
    %79 = vector.broadcast %13 : vector<1x32xf32> to vector<2x32xf32>
    %80 = arith.addf %78, %79 : vector<2x32xf32>
    %cst_60 = arith.constant dense<0.000000e+00> : vector<2x32xf32>
    %81 = tpu.matmul %77, %3, %cst_60 {dimension_numbers = #tpu.dot_dimension_numbers<[1], [0], [0], [1], [0, 0, 1, 1], [], []>} : vector<2x32xf32>, vector<32x32xf32>, vector<2x32xf32> -> vector<2x32xf32>
    %82 = vector.broadcast %15 : vector<1x32xf32> to vector<2x32xf32>
    %83 = arith.addf %81, %82 : vector<2x32xf32>
    %cst_61 = arith.constant dense<0.000000e+00> : vector<2x32xf32>
    %84 = tpu.matmul %77, %5, %cst_61 {dimension_numbers = #tpu.dot_dimension_numbers<[1], [0], [0], [1], [0, 0, 1, 1], [], []>} : vector<2x32xf32>, vector<32x32xf32>, vector<2x32xf32> -> vector<2x32xf32>
    %85 = vector.broadcast %17 : vector<1x32xf32> to vector<2x32xf32>
    %86 = arith.addf %84, %85 : vector<2x32xf32>
    %cst_62 = arith.constant dense<0.000000e+00> : vector<2x32xf32>
    %87 = tpu.matmul %66, %7, %cst_62 {dimension_numbers = #tpu.dot_dimension_numbers<[1], [0], [0], [1], [0, 0, 1, 1], [], []>} : vector<2x32xf32>, vector<32x32xf32>, vector<2x32xf32> -> vector<2x32xf32>
    %88 = vector.broadcast %19 : vector<1x32xf32> to vector<2x32xf32>
    %89 = arith.addf %87, %88 : vector<2x32xf32>
    %cst_63 = arith.constant dense<0.000000e+00> : vector<2x32xf32>
    %90 = tpu.matmul %66, %9, %cst_63 {dimension_numbers = #tpu.dot_dimension_numbers<[1], [0], [0], [1], [0, 0, 1, 1], [], []>} : vector<2x32xf32>, vector<32x32xf32>, vector<2x32xf32> -> vector<2x32xf32>
    %91 = vector.broadcast %21 : vector<1x32xf32> to vector<2x32xf32>
    %92 = arith.addf %90, %91 : vector<2x32xf32>
    %cst_64 = arith.constant dense<0.000000e+00> : vector<2x32xf32>
    %93 = tpu.matmul %66, %11, %cst_64 {dimension_numbers = #tpu.dot_dimension_numbers<[1], [0], [0], [1], [0, 0, 1, 1], [], []>} : vector<2x32xf32>, vector<32x32xf32>, vector<2x32xf32> -> vector<2x32xf32>
    %94 = vector.broadcast %23 : vector<1x32xf32> to vector<2x32xf32>
    %95 = arith.addf %93, %94 : vector<2x32xf32>
    %96 = arith.addf %80, %89 : vector<2x32xf32>
    %97 = arith.negf %96 : vector<2x32xf32>
    %98 = math.exp %97 : vector<2x32xf32>
    %cst_65 = arith.constant 1.000000e+00 : f32
    %99 = vector.broadcast %cst_65 : f32 to vector<2x32xf32>
    %100 = arith.addf %99, %98 : vector<2x32xf32>
    %101 = arith.divf %99, %100 : vector<2x32xf32>
    %102 = arith.addf %83, %92 : vector<2x32xf32>
    %103 = arith.negf %102 : vector<2x32xf32>
    %104 = math.exp %103 : vector<2x32xf32>
    %cst_66 = arith.constant 1.000000e+00 : f32
    %105 = vector.broadcast %cst_66 : f32 to vector<2x32xf32>
    %106 = arith.addf %105, %104 : vector<2x32xf32>
    %107 = arith.divf %105, %106 : vector<2x32xf32>
    %108 = arith.mulf %101, %95 : vector<2x32xf32>
    %109 = arith.addf %86, %108 : vector<2x32xf32>
    %110 = math.tanh %109 : vector<2x32xf32>
    %cst_67 = arith.constant 1.000000e+00 : f32
    %111 = vector.broadcast %cst_67 : f32 to vector<2x32xf32>
    %112 = arith.subf %111, %107 : vector<2x32xf32>
    %113 = arith.mulf %112, %110 : vector<2x32xf32>
    %114 = arith.mulf %107, %66 : vector<2x32xf32>
    %115 = arith.addf %113, %114 : vector<2x32xf32>
    %c1_68 = arith.constant 1 : index
    %c0_69 = arith.constant 0 : index
    %c0_70 = arith.constant 0 : index
    %116 = vector.load %arg7[%c1_68, %c0_69, %c0_70] : memref<8x2x32xf32, #tpu.memory_space<vmem>>, vector<1x2x32xf32>
    %117 = vector.shape_cast %116 : vector<1x2x32xf32> to vector<2x32xf32>
    %118 = vector.shape_cast %115 : vector<2x32xf32> to vector<1x2x32xf32>
    tpu.vector_store %arg7[%c1_68, %c0_69, %c0_70], %118 {strides = array<i32>} : memref<8x2x32xf32, #tpu.memory_space<vmem>>, vector<1x2x32xf32>,
    %cst_71 = arith.constant dense<0.000000e+00> : vector<2x32xf32>
    %119 = tpu.matmul %115, %24, %cst_71 {dimension_numbers = #tpu.dot_dimension_numbers<[1], [0], [0], [1], [0, 0, 1, 1], [], []>} : vector<2x32xf32>, vector<32x32xf32>, vector<2x32xf32> -> vector<2x32xf32>
    %120 = vector.broadcast %25 : vector<1x32xf32> to vector<2x32xf32>
    %121 = arith.addf %119, %120 : vector<2x32xf32>
    %c1_72 = arith.constant 1 : index
    %c0_73 = arith.constant 0 : index
    %c0_74 = arith.constant 0 : index
    %122 = vector.load %arg8[%c1_72, %c0_73, %c0_74] : memref<8x2x32xf32, #tpu.memory_space<vmem>>, vector<1x2x32xf32>
    %123 = vector.shape_cast %122 : vector<1x2x32xf32> to vector<2x32xf32>
    %124 = vector.shape_cast %121 : vector<2x32xf32> to vector<1x2x32xf32>
    tpu.vector_store %arg8[%c1_72, %c0_73, %c0_74], %124 {strides = array<i32>} : memref<8x2x32xf32, #tpu.memory_space<vmem>>, vector<1x2x32xf32>,
    %c2_75 = arith.constant 2 : index
    %c0_76 = arith.constant 0 : index
    %c0_77 = arith.constant 0 : index
    %125 = vector.load %arg0[%c2_75, %c0_76, %c0_77] : memref<8x2x32xf32, #tpu.memory_space<vmem>>, vector<1x2x32xf32>
    %126 = vector.shape_cast %125 : vector<1x2x32xf32> to vector<2x32xf32>
    %cst_78 = arith.constant dense<0.000000e+00> : vector<2x32xf32>
    %127 = tpu.matmul %126, %1, %cst_78 {dimension_numbers = #tpu.dot_dimension_numbers<[1], [0], [0], [1], [0, 0, 1, 1], [], []>} : vector<2x32xf32>, vector<32x32xf32>, vector<2x32xf32> -> vector<2x32xf32>
    %128 = vector.broadcast %13 : vector<1x32xf32> to vector<2x32xf32>
    %129 = arith.addf %127, %128 : vector<2x32xf32>
    %cst_79 = arith.constant dense<0.000000e+00> : vector<2x32xf32>
    %130 = tpu.matmul %126, %3, %cst_79 {dimension_numbers = #tpu.dot_dimension_numbers<[1], [0], [0], [1], [0, 0, 1, 1], [], []>} : vector<2x32xf32>, vector<32x32xf32>, vector<2x32xf32> -> vector<2x32xf32>
    %131 = vector.broadcast %15 : vector<1x32xf32> to vector<2x32xf32>
    %132 = arith.addf %130, %131 : vector<2x32xf32>
    %cst_80 = arith.constant dense<0.000000e+00> : vector<2x32xf32>
    %133 = tpu.matmul %126, %5, %cst_80 {dimension_numbers = #tpu.dot_dimension_numbers<[1], [0], [0], [1], [0, 0, 1, 1], [], []>} : vector<2x32xf32>, vector<32x32xf32>, vector<2x32xf32> -> vector<2x32xf32>
    %134 = vector.broadcast %17 : vector<1x32xf32> to vector<2x32xf32>
    %135 = arith.addf %133, %134 : vector<2x32xf32>
    %cst_81 = arith.constant dense<0.000000e+00> : vector<2x32xf32>
    %136 = tpu.matmul %115, %7, %cst_81 {dimension_numbers = #tpu.dot_dimension_numbers<[1], [0], [0], [1], [0, 0, 1, 1], [], []>} : vector<2x32xf32>, vector<32x32xf32>, vector<2x32xf32> -> vector<2x32xf32>
    %137 = vector.broadcast %19 : vector<1x32xf32> to vector<2x32xf32>
    %138 = arith.addf %136, %137 : vector<2x32xf32>
    %cst_82 = arith.constant dense<0.000000e+00> : vector<2x32xf32>
    %139 = tpu.matmul %115, %9, %cst_82 {dimension_numbers = #tpu.dot_dimension_numbers<[1], [0], [0], [1], [0, 0, 1, 1], [], []>} : vector<2x32xf32>, vector<32x32xf32>, vector<2x32xf32> -> vector<2x32xf32>
    %140 = vector.broadcast %21 : vector<1x32xf32> to vector<2x32xf32>
    %141 = arith.addf %139, %140 : vector<2x32xf32>
    %cst_83 = arith.constant dense<0.000000e+00> : vector<2x32xf32>
    %142 = tpu.matmul %115, %11, %cst_83 {dimension_numbers = #tpu.dot_dimension_numbers<[1], [0], [0], [1], [0, 0, 1, 1], [], []>} : vector<2x32xf32>, vector<32x32xf32>, vector<2x32xf32> -> vector<2x32xf32>
    %143 = vector.broadcast %23 : vector<1x32xf32> to vector<2x32xf32>
    %144 = arith.addf %142, %143 : vector<2x32xf32>
    %145 = arith.addf %129, %138 : vector<2x32xf32>
    %146 = arith.negf %145 : vector<2x32xf32>
    %147 = math.exp %146 : vector<2x32xf32>
    %cst_84 = arith.constant 1.000000e+00 : f32
    %148 = vector.broadcast %cst_84 : f32 to vector<2x32xf32>
    %149 = arith.addf %148, %147 : vector<2x32xf32>
    %150 = arith.divf %148, %149 : vector<2x32xf32>
    %151 = arith.addf %132, %141 : vector<2x32xf32>
    %152 = arith.negf %151 : vector<2x32xf32>
    %153 = math.exp %152 : vector<2x32xf32>
    %cst_85 = arith.constant 1.000000e+00 : f32
    %154 = vector.broadcast %cst_85 : f32 to vector<2x32xf32>
    %155 = arith.addf %154, %153 : vector<2x32xf32>
    %156 = arith.divf %154, %155 : vector<2x32xf32>
    %157 = arith.mulf %150, %144 : vector<2x32xf32>
    %158 = arith.addf %135, %157 : vector<2x32xf32>
    %159 = math.tanh %158 : vector<2x32xf32>
    %cst_86 = arith.constant 1.000000e+00 : f32
    %160 = vector.broadcast %cst_86 : f32 to vector<2x32xf32>
    %161 = arith.subf %160, %156 : vector<2x32xf32>
    %162 = arith.mulf %161, %159 : vector<2x32xf32>
    %163 = arith.mulf %156, %115 : vector<2x32xf32>
    %164 = arith.addf %162, %163 : vector<2x32xf32>
    %c2_87 = arith.constant 2 : index
    %c0_88 = arith.constant 0 : index
    %c0_89 = arith.constant 0 : index
    %165 = vector.load %arg7[%c2_87, %c0_88, %c0_89] : memref<8x2x32xf32, #tpu.memory_space<vmem>>, vector<1x2x32xf32>
    %166 = vector.shape_cast %165 : vector<1x2x32xf32> to vector<2x32xf32>
    %167 = vector.shape_cast %164 : vector<2x32xf32> to vector<1x2x32xf32>
    tpu.vector_store %arg7[%c2_87, %c0_88, %c0_89], %167 {strides = array<i32>} : memref<8x2x32xf32, #tpu.memory_space<vmem>>, vector<1x2x32xf32>,
    %cst_90 = arith.constant dense<0.000000e+00> : vector<2x32xf32>
    %168 = tpu.matmul %164, %24, %cst_90 {dimension_numbers = #tpu.dot_dimension_numbers<[1], [0], [0], [1], [0, 0, 1, 1], [], []>} : vector<2x32xf32>, vector<32x32xf32>, vector<2x32xf32> -> vector<2x32xf32>
    %169 = vector.broadcast %25 : vector<1x32xf32> to vector<2x32xf32>
    %170 = arith.addf %168, %169 : vector<2x32xf32>
    %c2_91 = arith.constant 2 : index
    %c0_92 = arith.constant 0 : index
    %c0_93 = arith.constant 0 : index
    %171 = vector.load %arg8[%c2_91, %c0_92, %c0_93] : memref<8x2x32xf32, #tpu.memory_space<vmem>>, vector<1x2x32xf32>
    %172 = vector.shape_cast %171 : vector<1x2x32xf32> to vector<2x32xf32>
    %173 = vector.shape_cast %170 : vector<2x32xf32> to vector<1x2x32xf32>
    tpu.vector_store %arg8[%c2_91, %c0_92, %c0_93], %173 {strides = array<i32>} : memref<8x2x32xf32, #tpu.memory_space<vmem>>, vector<1x2x32xf32>,
    %c3 = arith.constant 3 : index
    %c0_94 = arith.constant 0 : index
    %c0_95 = arith.constant 0 : index
    %174 = vector.load %arg0[%c3, %c0_94, %c0_95] : memref<8x2x32xf32, #tpu.memory_space<vmem>>, vector<1x2x32xf32>
    %175 = vector.shape_cast %174 : vector<1x2x32xf32> to vector<2x32xf32>
    %cst_96 = arith.constant dense<0.000000e+00> : vector<2x32xf32>
    %176 = tpu.matmul %175, %1, %cst_96 {dimension_numbers = #tpu.dot_dimension_numbers<[1], [0], [0], [1], [0, 0, 1, 1], [], []>} : vector<2x32xf32>, vector<32x32xf32>, vector<2x32xf32> -> vector<2x32xf32>
    %177 = vector.broadcast %13 : vector<1x32xf32> to vector<2x32xf32>
    %178 = arith.addf %176, %177 : vector<2x32xf32>
    %cst_97 = arith.constant dense<0.000000e+00> : vector<2x32xf32>
    %179 = tpu.matmul %175, %3, %cst_97 {dimension_numbers = #tpu.dot_dimension_numbers<[1], [0], [0], [1], [0, 0, 1, 1], [], []>} : vector<2x32xf32>, vector<32x32xf32>, vector<2x32xf32> -> vector<2x32xf32>
    %180 = vector.broadcast %15 : vector<1x32xf32> to vector<2x32xf32>
    %181 = arith.addf %179, %180 : vector<2x32xf32>
    %cst_98 = arith.constant dense<0.000000e+00> : vector<2x32xf32>
    %182 = tpu.matmul %175, %5, %cst_98 {dimension_numbers = #tpu.dot_dimension_numbers<[1], [0], [0], [1], [0, 0, 1, 1], [], []>} : vector<2x32xf32>, vector<32x32xf32>, vector<2x32xf32> -> vector<2x32xf32>
    %183 = vector.broadcast %17 : vector<1x32xf32> to vector<2x32xf32>
    %184 = arith.addf %182, %183 : vector<2x32xf32>
    %cst_99 = arith.constant dense<0.000000e+00> : vector<2x32xf32>
    %185 = tpu.matmul %164, %7, %cst_99 {dimension_numbers = #tpu.dot_dimension_numbers<[1], [0], [0], [1], [0, 0, 1, 1], [], []>} : vector<2x32xf32>, vector<32x32xf32>, vector<2x32xf32> -> vector<2x32xf32>
    %186 = vector.broadcast %19 : vector<1x32xf32> to vector<2x32xf32>
    %187 = arith.addf %185, %186 : vector<2x32xf32>
    %cst_100 = arith.constant dense<0.000000e+00> : vector<2x32xf32>
    %188 = tpu.matmul %164, %9, %cst_100 {dimension_numbers = #tpu.dot_dimension_numbers<[1], [0], [0], [1], [0, 0, 1, 1], [], []>} : vector<2x32xf32>, vector<32x32xf32>, vector<2x32xf32> -> vector<2x32xf32>
    %189 = vector.broadcast %21 : vector<1x32xf32> to vector<2x32xf32>
    %190 = arith.addf %188, %189 : vector<2x32xf32>
    %cst_101 = arith.constant dense<0.000000e+00> : vector<2x32xf32>
    %191 = tpu.matmul %164, %11, %cst_101 {dimension_numbers = #tpu.dot_dimension_numbers<[1], [0], [0], [1], [0, 0, 1, 1], [], []>} : vector<2x32xf32>, vector<32x32xf32>, vector<2x32xf32> -> vector<2x32xf32>
    %192 = vector.broadcast %23 : vector<1x32xf32> to vector<2x32xf32>
    %193 = arith.addf %191, %192 : vector<2x32xf32>
    %194 = arith.addf %178, %187 : vector<2x32xf32>
    %195 = arith.negf %194 : vector<2x32xf32>
    %196 = math.exp %195 : vector<2x32xf32>
    %cst_102 = arith.constant 1.000000e+00 : f32
    %197 = vector.broadcast %cst_102 : f32 to vector<2x32xf32>
    %198 = arith.addf %197, %196 : vector<2x32xf32>
    %199 = arith.divf %197, %198 : vector<2x32xf32>
    %200 = arith.addf %181, %190 : vector<2x32xf32>
    %201 = arith.negf %200 : vector<2x32xf32>
    %202 = math.exp %201 : vector<2x32xf32>
    %cst_103 = arith.constant 1.000000e+00 : f32
    %203 = vector.broadcast %cst_103 : f32 to vector<2x32xf32>
    %204 = arith.addf %203, %202 : vector<2x32xf32>
    %205 = arith.divf %203, %204 : vector<2x32xf32>
    %206 = arith.mulf %199, %193 : vector<2x32xf32>
    %207 = arith.addf %184, %206 : vector<2x32xf32>
    %208 = math.tanh %207 : vector<2x32xf32>
    %cst_104 = arith.constant 1.000000e+00 : f32
    %209 = vector.broadcast %cst_104 : f32 to vector<2x32xf32>
    %210 = arith.subf %209, %205 : vector<2x32xf32>
    %211 = arith.mulf %210, %208 : vector<2x32xf32>
    %212 = arith.mulf %205, %164 : vector<2x32xf32>
    %213 = arith.addf %211, %212 : vector<2x32xf32>
    %c3_105 = arith.constant 3 : index
    %c0_106 = arith.constant 0 : index
    %c0_107 = arith.constant 0 : index
    %214 = vector.load %arg7[%c3_105, %c0_106, %c0_107] : memref<8x2x32xf32, #tpu.memory_space<vmem>>, vector<1x2x32xf32>
    %215 = vector.shape_cast %214 : vector<1x2x32xf32> to vector<2x32xf32>
    %216 = vector.shape_cast %213 : vector<2x32xf32> to vector<1x2x32xf32>
    tpu.vector_store %arg7[%c3_105, %c0_106, %c0_107], %216 {strides = array<i32>} : memref<8x2x32xf32, #tpu.memory_space<vmem>>, vector<1x2x32xf32>,
    %cst_108 = arith.constant dense<0.000000e+00> : vector<2x32xf32>
    %217 = tpu.matmul %213, %24, %cst_108 {dimension_numbers = #tpu.dot_dimension_numbers<[1], [0], [0], [1], [0, 0, 1, 1], [], []>} : vector<2x32xf32>, vector<32x32xf32>, vector<2x32xf32> -> vector<2x32xf32>
    %218 = vector.broadcast %25 : vector<1x32xf32> to vector<2x32xf32>
    %219 = arith.addf %217, %218 : vector<2x32xf32>
    %c3_109 = arith.constant 3 : index
    %c0_110 = arith.constant 0 : index
    %c0_111 = arith.constant 0 : index
    %220 = vector.load %arg8[%c3_109, %c0_110, %c0_111] : memref<8x2x32xf32, #tpu.memory_space<vmem>>, vector<1x2x32xf32>
    %221 = vector.shape_cast %220 : vector<1x2x32xf32> to vector<2x32xf32>
    %222 = vector.shape_cast %219 : vector<2x32xf32> to vector<1x2x32xf32>
    tpu.vector_store %arg8[%c3_109, %c0_110, %c0_111], %222 {strides = array<i32>} : memref<8x2x32xf32, #tpu.memory_space<vmem>>, vector<1x2x32xf32>,
    %c4 = arith.constant 4 : index
    %c0_112 = arith.constant 0 : index
    %c0_113 = arith.constant 0 : index
    %223 = vector.load %arg0[%c4, %c0_112, %c0_113] : memref<8x2x32xf32, #tpu.memory_space<vmem>>, vector<1x2x32xf32>
    %224 = vector.shape_cast %223 : vector<1x2x32xf32> to vector<2x32xf32>
    %cst_114 = arith.constant dense<0.000000e+00> : vector<2x32xf32>
    %225 = tpu.matmul %224, %1, %cst_114 {dimension_numbers = #tpu.dot_dimension_numbers<[1], [0], [0], [1], [0, 0, 1, 1], [], []>} : vector<2x32xf32>, vector<32x32xf32>, vector<2x32xf32> -> vector<2x32xf32>
    %226 = vector.broadcast %13 : vector<1x32xf32> to vector<2x32xf32>
    %227 = arith.addf %225, %226 : vector<2x32xf32>
    %cst_115 = arith.constant dense<0.000000e+00> : vector<2x32xf32>
    %228 = tpu.matmul %224, %3, %cst_115 {dimension_numbers = #tpu.dot_dimension_numbers<[1], [0], [0], [1], [0, 0, 1, 1], [], []>} : vector<2x32xf32>, vector<32x32xf32>, vector<2x32xf32> -> vector<2x32xf32>
    %229 = vector.broadcast %15 : vector<1x32xf32> to vector<2x32xf32>
    %230 = arith.addf %228, %229 : vector<2x32xf32>
    %cst_116 = arith.constant dense<0.000000e+00> : vector<2x32xf32>
    %231 = tpu.matmul %224, %5, %cst_116 {dimension_numbers = #tpu.dot_dimension_numbers<[1], [0], [0], [1], [0, 0, 1, 1], [], []>} : vector<2x32xf32>, vector<32x32xf32>, vector<2x32xf32> -> vector<2x32xf32>
    %232 = vector.broadcast %17 : vector<1x32xf32> to vector<2x32xf32>
    %233 = arith.addf %231, %232 : vector<2x32xf32>
    %cst_117 = arith.constant dense<0.000000e+00> : vector<2x32xf32>
    %234 = tpu.matmul %213, %7, %cst_117 {dimension_numbers = #tpu.dot_dimension_numbers<[1], [0], [0], [1], [0, 0, 1, 1], [], []>} : vector<2x32xf32>, vector<32x32xf32>, vector<2x32xf32> -> vector<2x32xf32>
    %235 = vector.broadcast %19 : vector<1x32xf32> to vector<2x32xf32>
    %236 = arith.addf %234, %235 : vector<2x32xf32>
    %cst_118 = arith.constant dense<0.000000e+00> : vector<2x32xf32>
    %237 = tpu.matmul %213, %9, %cst_118 {dimension_numbers = #tpu.dot_dimension_numbers<[1], [0], [0], [1], [0, 0, 1, 1], [], []>} : vector<2x32xf32>, vector<32x32xf32>, vector<2x32xf32> -> vector<2x32xf32>
    %238 = vector.broadcast %21 : vector<1x32xf32> to vector<2x32xf32>
    %239 = arith.addf %237, %238 : vector<2x32xf32>
    %cst_119 = arith.constant dense<0.000000e+00> : vector<2x32xf32>
    %240 = tpu.matmul %213, %11, %cst_119 {dimension_numbers = #tpu.dot_dimension_numbers<[1], [0], [0], [1], [0, 0, 1, 1], [], []>} : vector<2x32xf32>, vector<32x32xf32>, vector<2x32xf32> -> vector<2x32xf32>
    %241 = vector.broadcast %23 : vector<1x32xf32> to vector<2x32xf32>
    %242 = arith.addf %240, %241 : vector<2x32xf32>
    %243 = arith.addf %227, %236 : vector<2x32xf32>
    %244 = arith.negf %243 : vector<2x32xf32>
    %245 = math.exp %244 : vector<2x32xf32>
    %cst_120 = arith.constant 1.000000e+00 : f32
    %246 = vector.broadcast %cst_120 : f32 to vector<2x32xf32>
    %247 = arith.addf %246, %245 : vector<2x32xf32>
    %248 = arith.divf %246, %247 : vector<2x32xf32>
    %249 = arith.addf %230, %239 : vector<2x32xf32>
    %250 = arith.negf %249 : vector<2x32xf32>
    %251 = math.exp %250 : vector<2x32xf32>
    %cst_121 = arith.constant 1.000000e+00 : f32
    %252 = vector.broadcast %cst_121 : f32 to vector<2x32xf32>
    %253 = arith.addf %252, %251 : vector<2x32xf32>
    %254 = arith.divf %252, %253 : vector<2x32xf32>
    %255 = arith.mulf %248, %242 : vector<2x32xf32>
    %256 = arith.addf %233, %255 : vector<2x32xf32>
    %257 = math.tanh %256 : vector<2x32xf32>
    %cst_122 = arith.constant 1.000000e+00 : f32
    %258 = vector.broadcast %cst_122 : f32 to vector<2x32xf32>
    %259 = arith.subf %258, %254 : vector<2x32xf32>
    %260 = arith.mulf %259, %257 : vector<2x32xf32>
    %261 = arith.mulf %254, %213 : vector<2x32xf32>
    %262 = arith.addf %260, %261 : vector<2x32xf32>
    %c4_123 = arith.constant 4 : index
    %c0_124 = arith.constant 0 : index
    %c0_125 = arith.constant 0 : index
    %263 = vector.load %arg7[%c4_123, %c0_124, %c0_125] : memref<8x2x32xf32, #tpu.memory_space<vmem>>, vector<1x2x32xf32>
    %264 = vector.shape_cast %263 : vector<1x2x32xf32> to vector<2x32xf32>
    %265 = vector.shape_cast %262 : vector<2x32xf32> to vector<1x2x32xf32>
    tpu.vector_store %arg7[%c4_123, %c0_124, %c0_125], %265 {strides = array<i32>} : memref<8x2x32xf32, #tpu.memory_space<vmem>>, vector<1x2x32xf32>,
    %cst_126 = arith.constant dense<0.000000e+00> : vector<2x32xf32>
    %266 = tpu.matmul %262, %24, %cst_126 {dimension_numbers = #tpu.dot_dimension_numbers<[1], [0], [0], [1], [0, 0, 1, 1], [], []>} : vector<2x32xf32>, vector<32x32xf32>, vector<2x32xf32> -> vector<2x32xf32>
    %267 = vector.broadcast %25 : vector<1x32xf32> to vector<2x32xf32>
    %268 = arith.addf %266, %267 : vector<2x32xf32>
    %c4_127 = arith.constant 4 : index
    %c0_128 = arith.constant 0 : index
    %c0_129 = arith.constant 0 : index
    %269 = vector.load %arg8[%c4_127, %c0_128, %c0_129] : memref<8x2x32xf32, #tpu.memory_space<vmem>>, vector<1x2x32xf32>
    %270 = vector.shape_cast %269 : vector<1x2x32xf32> to vector<2x32xf32>
    %271 = vector.shape_cast %268 : vector<2x32xf32> to vector<1x2x32xf32>
    tpu.vector_store %arg8[%c4_127, %c0_128, %c0_129], %271 {strides = array<i32>} : memref<8x2x32xf32, #tpu.memory_space<vmem>>, vector<1x2x32xf32>,
    %c5 = arith.constant 5 : index
    %c0_130 = arith.constant 0 : index
    %c0_131 = arith.constant 0 : index
    %272 = vector.load %arg0[%c5, %c0_130, %c0_131] : memref<8x2x32xf32, #tpu.memory_space<vmem>>, vector<1x2x32xf32>
    %273 = vector.shape_cast %272 : vector<1x2x32xf32> to vector<2x32xf32>
    %cst_132 = arith.constant dense<0.000000e+00> : vector<2x32xf32>
    %274 = tpu.matmul %273, %1, %cst_132 {dimension_numbers = #tpu.dot_dimension_numbers<[1], [0], [0], [1], [0, 0, 1, 1], [], []>} : vector<2x32xf32>, vector<32x32xf32>, vector<2x32xf32> -> vector<2x32xf32>
    %275 = vector.broadcast %13 : vector<1x32xf32> to vector<2x32xf32>
    %276 = arith.addf %274, %275 : vector<2x32xf32>
    %cst_133 = arith.constant dense<0.000000e+00> : vector<2x32xf32>
    %277 = tpu.matmul %273, %3, %cst_133 {dimension_numbers = #tpu.dot_dimension_numbers<[1], [0], [0], [1], [0, 0, 1, 1], [], []>} : vector<2x32xf32>, vector<32x32xf32>, vector<2x32xf32> -> vector<2x32xf32>
    %278 = vector.broadcast %15 : vector<1x32xf32> to vector<2x32xf32>
    %279 = arith.addf %277, %278 : vector<2x32xf32>
    %cst_134 = arith.constant dense<0.000000e+00> : vector<2x32xf32>
    %280 = tpu.matmul %273, %5, %cst_134 {dimension_numbers = #tpu.dot_dimension_numbers<[1], [0], [0], [1], [0, 0, 1, 1], [], []>} : vector<2x32xf32>, vector<32x32xf32>, vector<2x32xf32> -> vector<2x32xf32>
    %281 = vector.broadcast %17 : vector<1x32xf32> to vector<2x32xf32>
    %282 = arith.addf %280, %281 : vector<2x32xf32>
    %cst_135 = arith.constant dense<0.000000e+00> : vector<2x32xf32>
    %283 = tpu.matmul %262, %7, %cst_135 {dimension_numbers = #tpu.dot_dimension_numbers<[1], [0], [0], [1], [0, 0, 1, 1], [], []>} : vector<2x32xf32>, vector<32x32xf32>, vector<2x32xf32> -> vector<2x32xf32>
    %284 = vector.broadcast %19 : vector<1x32xf32> to vector<2x32xf32>
    %285 = arith.addf %283, %284 : vector<2x32xf32>
    %cst_136 = arith.constant dense<0.000000e+00> : vector<2x32xf32>
    %286 = tpu.matmul %262, %9, %cst_136 {dimension_numbers = #tpu.dot_dimension_numbers<[1], [0], [0], [1], [0, 0, 1, 1], [], []>} : vector<2x32xf32>, vector<32x32xf32>, vector<2x32xf32> -> vector<2x32xf32>
    %287 = vector.broadcast %21 : vector<1x32xf32> to vector<2x32xf32>
    %288 = arith.addf %286, %287 : vector<2x32xf32>
    %cst_137 = arith.constant dense<0.000000e+00> : vector<2x32xf32>
    %289 = tpu.matmul %262, %11, %cst_137 {dimension_numbers = #tpu.dot_dimension_numbers<[1], [0], [0], [1], [0, 0, 1, 1], [], []>} : vector<2x32xf32>, vector<32x32xf32>, vector<2x32xf32> -> vector<2x32xf32>
    %290 = vector.broadcast %23 : vector<1x32xf32> to vector<2x32xf32>
    %291 = arith.addf %289, %290 : vector<2x32xf32>
    %292 = arith.addf %276, %285 : vector<2x32xf32>
    %293 = arith.negf %292 : vector<2x32xf32>
    %294 = math.exp %293 : vector<2x32xf32>
    %cst_138 = arith.constant 1.000000e+00 : f32
    %295 = vector.broadcast %cst_138 : f32 to vector<2x32xf32>
    %296 = arith.addf %295, %294 : vector<2x32xf32>
    %297 = arith.divf %295, %296 : vector<2x32xf32>
    %298 = arith.addf %279, %288 : vector<2x32xf32>
    %299 = arith.negf %298 : vector<2x32xf32>
    %300 = math.exp %299 : vector<2x32xf32>
    %cst_139 = arith.constant 1.000000e+00 : f32
    %301 = vector.broadcast %cst_139 : f32 to vector<2x32xf32>
    %302 = arith.addf %301, %300 : vector<2x32xf32>
    %303 = arith.divf %301, %302 : vector<2x32xf32>
    %304 = arith.mulf %297, %291 : vector<2x32xf32>
    %305 = arith.addf %282, %304 : vector<2x32xf32>
    %306 = math.tanh %305 : vector<2x32xf32>
    %cst_140 = arith.constant 1.000000e+00 : f32
    %307 = vector.broadcast %cst_140 : f32 to vector<2x32xf32>
    %308 = arith.subf %307, %303 : vector<2x32xf32>
    %309 = arith.mulf %308, %306 : vector<2x32xf32>
    %310 = arith.mulf %303, %262 : vector<2x32xf32>
    %311 = arith.addf %309, %310 : vector<2x32xf32>
    %c5_141 = arith.constant 5 : index
    %c0_142 = arith.constant 0 : index
    %c0_143 = arith.constant 0 : index
    %312 = vector.load %arg7[%c5_141, %c0_142, %c0_143] : memref<8x2x32xf32, #tpu.memory_space<vmem>>, vector<1x2x32xf32>
    %313 = vector.shape_cast %312 : vector<1x2x32xf32> to vector<2x32xf32>
    %314 = vector.shape_cast %311 : vector<2x32xf32> to vector<1x2x32xf32>
    tpu.vector_store %arg7[%c5_141, %c0_142, %c0_143], %314 {strides = array<i32>} : memref<8x2x32xf32, #tpu.memory_space<vmem>>, vector<1x2x32xf32>,
    %cst_144 = arith.constant dense<0.000000e+00> : vector<2x32xf32>
    %315 = tpu.matmul %311, %24, %cst_144 {dimension_numbers = #tpu.dot_dimension_numbers<[1], [0], [0], [1], [0, 0, 1, 1], [], []>} : vector<2x32xf32>, vector<32x32xf32>, vector<2x32xf32> -> vector<2x32xf32>
    %316 = vector.broadcast %25 : vector<1x32xf32> to vector<2x32xf32>
    %317 = arith.addf %315, %316 : vector<2x32xf32>
    %c5_145 = arith.constant 5 : index
    %c0_146 = arith.constant 0 : index
    %c0_147 = arith.constant 0 : index
    %318 = vector.load %arg8[%c5_145, %c0_146, %c0_147] : memref<8x2x32xf32, #tpu.memory_space<vmem>>, vector<1x2x32xf32>
    %319 = vector.shape_cast %318 : vector<1x2x32xf32> to vector<2x32xf32>
    %320 = vector.shape_cast %317 : vector<2x32xf32> to vector<1x2x32xf32>
    tpu.vector_store %arg8[%c5_145, %c0_146, %c0_147], %320 {strides = array<i32>} : memref<8x2x32xf32, #tpu.memory_space<vmem>>, vector<1x2x32xf32>,
    %c6 = arith.constant 6 : index
    %c0_148 = arith.constant 0 : index
    %c0_149 = arith.constant 0 : index
    %321 = vector.load %arg0[%c6, %c0_148, %c0_149] : memref<8x2x32xf32, #tpu.memory_space<vmem>>, vector<1x2x32xf32>
    %322 = vector.shape_cast %321 : vector<1x2x32xf32> to vector<2x32xf32>
    %cst_150 = arith.constant dense<0.000000e+00> : vector<2x32xf32>
    %323 = tpu.matmul %322, %1, %cst_150 {dimension_numbers = #tpu.dot_dimension_numbers<[1], [0], [0], [1], [0, 0, 1, 1], [], []>} : vector<2x32xf32>, vector<32x32xf32>, vector<2x32xf32> -> vector<2x32xf32>
    %324 = vector.broadcast %13 : vector<1x32xf32> to vector<2x32xf32>
    %325 = arith.addf %323, %324 : vector<2x32xf32>
    %cst_151 = arith.constant dense<0.000000e+00> : vector<2x32xf32>
    %326 = tpu.matmul %322, %3, %cst_151 {dimension_numbers = #tpu.dot_dimension_numbers<[1], [0], [0], [1], [0, 0, 1, 1], [], []>} : vector<2x32xf32>, vector<32x32xf32>, vector<2x32xf32> -> vector<2x32xf32>
    %327 = vector.broadcast %15 : vector<1x32xf32> to vector<2x32xf32>
    %328 = arith.addf %326, %327 : vector<2x32xf32>
    %cst_152 = arith.constant dense<0.000000e+00> : vector<2x32xf32>
    %329 = tpu.matmul %322, %5, %cst_152 {dimension_numbers = #tpu.dot_dimension_numbers<[1], [0], [0], [1], [0, 0, 1, 1], [], []>} : vector<2x32xf32>, vector<32x32xf32>, vector<2x32xf32> -> vector<2x32xf32>
    %330 = vector.broadcast %17 : vector<1x32xf32> to vector<2x32xf32>
    %331 = arith.addf %329, %330 : vector<2x32xf32>
    %cst_153 = arith.constant dense<0.000000e+00> : vector<2x32xf32>
    %332 = tpu.matmul %311, %7, %cst_153 {dimension_numbers = #tpu.dot_dimension_numbers<[1], [0], [0], [1], [0, 0, 1, 1], [], []>} : vector<2x32xf32>, vector<32x32xf32>, vector<2x32xf32> -> vector<2x32xf32>
    %333 = vector.broadcast %19 : vector<1x32xf32> to vector<2x32xf32>
    %334 = arith.addf %332, %333 : vector<2x32xf32>
    %cst_154 = arith.constant dense<0.000000e+00> : vector<2x32xf32>
    %335 = tpu.matmul %311, %9, %cst_154 {dimension_numbers = #tpu.dot_dimension_numbers<[1], [0], [0], [1], [0, 0, 1, 1], [], []>} : vector<2x32xf32>, vector<32x32xf32>, vector<2x32xf32> -> vector<2x32xf32>
    %336 = vector.broadcast %21 : vector<1x32xf32> to vector<2x32xf32>
    %337 = arith.addf %335, %336 : vector<2x32xf32>
    %cst_155 = arith.constant dense<0.000000e+00> : vector<2x32xf32>
    %338 = tpu.matmul %311, %11, %cst_155 {dimension_numbers = #tpu.dot_dimension_numbers<[1], [0], [0], [1], [0, 0, 1, 1], [], []>} : vector<2x32xf32>, vector<32x32xf32>, vector<2x32xf32> -> vector<2x32xf32>
    %339 = vector.broadcast %23 : vector<1x32xf32> to vector<2x32xf32>
    %340 = arith.addf %338, %339 : vector<2x32xf32>
    %341 = arith.addf %325, %334 : vector<2x32xf32>
    %342 = arith.negf %341 : vector<2x32xf32>
    %343 = math.exp %342 : vector<2x32xf32>
    %cst_156 = arith.constant 1.000000e+00 : f32
    %344 = vector.broadcast %cst_156 : f32 to vector<2x32xf32>
    %345 = arith.addf %344, %343 : vector<2x32xf32>
    %346 = arith.divf %344, %345 : vector<2x32xf32>
    %347 = arith.addf %328, %337 : vector<2x32xf32>
    %348 = arith.negf %347 : vector<2x32xf32>
    %349 = math.exp %348 : vector<2x32xf32>
    %cst_157 = arith.constant 1.000000e+00 : f32
    %350 = vector.broadcast %cst_157 : f32 to vector<2x32xf32>
    %351 = arith.addf %350, %349 : vector<2x32xf32>
    %352 = arith.divf %350, %351 : vector<2x32xf32>
    %353 = arith.mulf %346, %340 : vector<2x32xf32>
    %354 = arith.addf %331, %353 : vector<2x32xf32>
    %355 = math.tanh %354 : vector<2x32xf32>
    %cst_158 = arith.constant 1.000000e+00 : f32
    %356 = vector.broadcast %cst_158 : f32 to vector<2x32xf32>
    %357 = arith.subf %356, %352 : vector<2x32xf32>
    %358 = arith.mulf %357, %355 : vector<2x32xf32>
    %359 = arith.mulf %352, %311 : vector<2x32xf32>
    %360 = arith.addf %358, %359 : vector<2x32xf32>
    %c6_159 = arith.constant 6 : index
    %c0_160 = arith.constant 0 : index
    %c0_161 = arith.constant 0 : index
    %361 = vector.load %arg7[%c6_159, %c0_160, %c0_161] : memref<8x2x32xf32, #tpu.memory_space<vmem>>, vector<1x2x32xf32>
    %362 = vector.shape_cast %361 : vector<1x2x32xf32> to vector<2x32xf32>
    %363 = vector.shape_cast %360 : vector<2x32xf32> to vector<1x2x32xf32>
    tpu.vector_store %arg7[%c6_159, %c0_160, %c0_161], %363 {strides = array<i32>} : memref<8x2x32xf32, #tpu.memory_space<vmem>>, vector<1x2x32xf32>,
    %cst_162 = arith.constant dense<0.000000e+00> : vector<2x32xf32>
    %364 = tpu.matmul %360, %24, %cst_162 {dimension_numbers = #tpu.dot_dimension_numbers<[1], [0], [0], [1], [0, 0, 1, 1], [], []>} : vector<2x32xf32>, vector<32x32xf32>, vector<2x32xf32> -> vector<2x32xf32>
    %365 = vector.broadcast %25 : vector<1x32xf32> to vector<2x32xf32>
    %366 = arith.addf %364, %365 : vector<2x32xf32>
    %c6_163 = arith.constant 6 : index
    %c0_164 = arith.constant 0 : index
    %c0_165 = arith.constant 0 : index
    %367 = vector.load %arg8[%c6_163, %c0_164, %c0_165] : memref<8x2x32xf32, #tpu.memory_space<vmem>>, vector<1x2x32xf32>
    %368 = vector.shape_cast %367 : vector<1x2x32xf32> to vector<2x32xf32>
    %369 = vector.shape_cast %366 : vector<2x32xf32> to vector<1x2x32xf32>
    tpu.vector_store %arg8[%c6_163, %c0_164, %c0_165], %369 {strides = array<i32>} : memref<8x2x32xf32, #tpu.memory_space<vmem>>, vector<1x2x32xf32>,
    %c7 = arith.constant 7 : index
    %c0_166 = arith.constant 0 : index
    %c0_167 = arith.constant 0 : index
    %370 = vector.load %arg0[%c7, %c0_166, %c0_167] : memref<8x2x32xf32, #tpu.memory_space<vmem>>, vector<1x2x32xf32>
    %371 = vector.shape_cast %370 : vector<1x2x32xf32> to vector<2x32xf32>
    %cst_168 = arith.constant dense<0.000000e+00> : vector<2x32xf32>
    %372 = tpu.matmul %371, %1, %cst_168 {dimension_numbers = #tpu.dot_dimension_numbers<[1], [0], [0], [1], [0, 0, 1, 1], [], []>} : vector<2x32xf32>, vector<32x32xf32>, vector<2x32xf32> -> vector<2x32xf32>
    %373 = vector.broadcast %13 : vector<1x32xf32> to vector<2x32xf32>
    %374 = arith.addf %372, %373 : vector<2x32xf32>
    %cst_169 = arith.constant dense<0.000000e+00> : vector<2x32xf32>
    %375 = tpu.matmul %371, %3, %cst_169 {dimension_numbers = #tpu.dot_dimension_numbers<[1], [0], [0], [1], [0, 0, 1, 1], [], []>} : vector<2x32xf32>, vector<32x32xf32>, vector<2x32xf32> -> vector<2x32xf32>
    %376 = vector.broadcast %15 : vector<1x32xf32> to vector<2x32xf32>
    %377 = arith.addf %375, %376 : vector<2x32xf32>
    %cst_170 = arith.constant dense<0.000000e+00> : vector<2x32xf32>
    %378 = tpu.matmul %371, %5, %cst_170 {dimension_numbers = #tpu.dot_dimension_numbers<[1], [0], [0], [1], [0, 0, 1, 1], [], []>} : vector<2x32xf32>, vector<32x32xf32>, vector<2x32xf32> -> vector<2x32xf32>
    %379 = vector.broadcast %17 : vector<1x32xf32> to vector<2x32xf32>
    %380 = arith.addf %378, %379 : vector<2x32xf32>
    %cst_171 = arith.constant dense<0.000000e+00> : vector<2x32xf32>
    %381 = tpu.matmul %360, %7, %cst_171 {dimension_numbers = #tpu.dot_dimension_numbers<[1], [0], [0], [1], [0, 0, 1, 1], [], []>} : vector<2x32xf32>, vector<32x32xf32>, vector<2x32xf32> -> vector<2x32xf32>
    %382 = vector.broadcast %19 : vector<1x32xf32> to vector<2x32xf32>
    %383 = arith.addf %381, %382 : vector<2x32xf32>
    %cst_172 = arith.constant dense<0.000000e+00> : vector<2x32xf32>
    %384 = tpu.matmul %360, %9, %cst_172 {dimension_numbers = #tpu.dot_dimension_numbers<[1], [0], [0], [1], [0, 0, 1, 1], [], []>} : vector<2x32xf32>, vector<32x32xf32>, vector<2x32xf32> -> vector<2x32xf32>
    %385 = vector.broadcast %21 : vector<1x32xf32> to vector<2x32xf32>
    %386 = arith.addf %384, %385 : vector<2x32xf32>
    %cst_173 = arith.constant dense<0.000000e+00> : vector<2x32xf32>
    %387 = tpu.matmul %360, %11, %cst_173 {dimension_numbers = #tpu.dot_dimension_numbers<[1], [0], [0], [1], [0, 0, 1, 1], [], []>} : vector<2x32xf32>, vector<32x32xf32>, vector<2x32xf32> -> vector<2x32xf32>
    %388 = vector.broadcast %23 : vector<1x32xf32> to vector<2x32xf32>
    %389 = arith.addf %387, %388 : vector<2x32xf32>
    %390 = arith.addf %374, %383 : vector<2x32xf32>
    %391 = arith.negf %390 : vector<2x32xf32>
    %392 = math.exp %391 : vector<2x32xf32>
    %cst_174 = arith.constant 1.000000e+00 : f32
    %393 = vector.broadcast %cst_174 : f32 to vector<2x32xf32>
    %394 = arith.addf %393, %392 : vector<2x32xf32>
    %395 = arith.divf %393, %394 : vector<2x32xf32>
    %396 = arith.addf %377, %386 : vector<2x32xf32>
    %397 = arith.negf %396 : vector<2x32xf32>
    %398 = math.exp %397 : vector<2x32xf32>
    %cst_175 = arith.constant 1.000000e+00 : f32
    %399 = vector.broadcast %cst_175 : f32 to vector<2x32xf32>
    %400 = arith.addf %399, %398 : vector<2x32xf32>
    %401 = arith.divf %399, %400 : vector<2x32xf32>
    %402 = arith.mulf %395, %389 : vector<2x32xf32>
    %403 = arith.addf %380, %402 : vector<2x32xf32>
    %404 = math.tanh %403 : vector<2x32xf32>
    %cst_176 = arith.constant 1.000000e+00 : f32
    %405 = vector.broadcast %cst_176 : f32 to vector<2x32xf32>
    %406 = arith.subf %405, %401 : vector<2x32xf32>
    %407 = arith.mulf %406, %404 : vector<2x32xf32>
    %408 = arith.mulf %401, %360 : vector<2x32xf32>
    %409 = arith.addf %407, %408 : vector<2x32xf32>
    %c7_177 = arith.constant 7 : index
    %c0_178 = arith.constant 0 : index
    %c0_179 = arith.constant 0 : index
    %410 = vector.load %arg7[%c7_177, %c0_178, %c0_179] : memref<8x2x32xf32, #tpu.memory_space<vmem>>, vector<1x2x32xf32>
    %411 = vector.shape_cast %410 : vector<1x2x32xf32> to vector<2x32xf32>
    %412 = vector.shape_cast %409 : vector<2x32xf32> to vector<1x2x32xf32>
    tpu.vector_store %arg7[%c7_177, %c0_178, %c0_179], %412 {strides = array<i32>} : memref<8x2x32xf32, #tpu.memory_space<vmem>>, vector<1x2x32xf32>,
    %cst_180 = arith.constant dense<0.000000e+00> : vector<2x32xf32>
    %413 = tpu.matmul %409, %24, %cst_180 {dimension_numbers = #tpu.dot_dimension_numbers<[1], [0], [0], [1], [0, 0, 1, 1], [], []>} : vector<2x32xf32>, vector<32x32xf32>, vector<2x32xf32> -> vector<2x32xf32>
    %414 = vector.broadcast %25 : vector<1x32xf32> to vector<2x32xf32>
    %415 = arith.addf %413, %414 : vector<2x32xf32>
    %c7_181 = arith.constant 7 : index
    %c0_182 = arith.constant 0 : index
    %c0_183 = arith.constant 0 : index
    %416 = vector.load %arg8[%c7_181, %c0_182, %c0_183] : memref<8x2x32xf32, #tpu.memory_space<vmem>>, vector<1x2x32xf32>
    %417 = vector.shape_cast %416 : vector<1x2x32xf32> to vector<2x32xf32>
    %418 = vector.shape_cast %415 : vector<2x32xf32> to vector<1x2x32xf32>
    tpu.vector_store %arg8[%c7_181, %c0_182, %c0_183], %418 {strides = array<i32>} : memref<8x2x32xf32, #tpu.memory_space<vmem>>, vector<1x2x32xf32>,
    return
  }
}

module attributes {stable_mosaic.version = 11 : i64} {
  func.func @decoder_kernel(%arg0: memref<2x128xf32, #tpu.memory_space<vmem>>, %arg1: memref<8x2x32xf32, #tpu.memory_space<vmem>>, %arg2: memref<8x2x32xf32, #tpu.memory_space<vmem>>, %arg3: memref<3x32x32xf32, #tpu.memory_space<vmem>>, %arg4: memref<3x32x32xf32, #tpu.memory_space<vmem>>, %arg5: memref<3x32x32xf32, #tpu.memory_space<vmem>>, %arg6: memref<3x1x32xf32, #tpu.memory_space<vmem>>, %arg7: memref<3x1x32xf32, #tpu.memory_space<vmem>>, %arg8: memref<32x32xf32, #tpu.memory_space<vmem>>, %arg9: memref<1x32xf32, #tpu.memory_space<vmem>>, %arg10: memref<1x1x32xf32, #tpu.memory_space<vmem>>, %arg11: memref<32x128xf32, #tpu.memory_space<vmem>>, %arg12: memref<32x128xf32, #tpu.memory_space<vmem>>, %arg13: memref<1x128xf32, #tpu.memory_space<vmem>>, %arg14: memref<128x32xf32, #tpu.memory_space<vmem>>, %arg15: memref<8x2x128xf32, #tpu.memory_space<vmem>>) attributes {dimension_semantics = [], scalar_prefetch = 0 : i64, scratch_operands = 0 : i64, tpu.core_type = #tpu.core_type<tc>} {
    %c0 = arith.constant 0 : index
    %c0_0 = arith.constant 0 : index
    %c0_1 = arith.constant 0 : index
    %0 = vector.load %arg1[%c0, %c0_0, %c0_1] : memref<8x2x32xf32, #tpu.memory_space<vmem>>, vector<8x2x32xf32>
    %c0_2 = arith.constant 0 : index
    %c0_3 = arith.constant 0 : index
    %c0_4 = arith.constant 0 : index
    %1 = vector.load %arg2[%c0_2, %c0_3, %c0_4] : memref<8x2x32xf32, #tpu.memory_space<vmem>>, vector<8x2x32xf32>
    %c0_5 = arith.constant 0 : index
    %c0_6 = arith.constant 0 : index
    %c0_7 = arith.constant 0 : index
    %2 = vector.load %arg10[%c0_5, %c0_6, %c0_7] : memref<1x1x32xf32, #tpu.memory_space<vmem>>, vector<1x1x32xf32>
    %c0_8 = arith.constant 0 : index
    %c0_9 = arith.constant 0 : index
    %c0_10 = arith.constant 0 : index
    %3 = vector.load %arg3[%c0_8, %c0_9, %c0_10] : memref<3x32x32xf32, #tpu.memory_space<vmem>>, vector<1x32x32xf32>
    %4 = vector.shape_cast %3 : vector<1x32x32xf32> to vector<32x32xf32>
    %c1 = arith.constant 1 : index
    %c0_11 = arith.constant 0 : index
    %c0_12 = arith.constant 0 : index
    %5 = vector.load %arg3[%c1, %c0_11, %c0_12] : memref<3x32x32xf32, #tpu.memory_space<vmem>>, vector<1x32x32xf32>
    %6 = vector.shape_cast %5 : vector<1x32x32xf32> to vector<32x32xf32>
    %c2 = arith.constant 2 : index
    %c0_13 = arith.constant 0 : index
    %c0_14 = arith.constant 0 : index
    %7 = vector.load %arg3[%c2, %c0_13, %c0_14] : memref<3x32x32xf32, #tpu.memory_space<vmem>>, vector<1x32x32xf32>
    %8 = vector.shape_cast %7 : vector<1x32x32xf32> to vector<32x32xf32>
    %c0_15 = arith.constant 0 : index
    %c0_16 = arith.constant 0 : index
    %c0_17 = arith.constant 0 : index
    %9 = vector.load %arg4[%c0_15, %c0_16, %c0_17] : memref<3x32x32xf32, #tpu.memory_space<vmem>>, vector<1x32x32xf32>
    %10 = vector.shape_cast %9 : vector<1x32x32xf32> to vector<32x32xf32>
    %c1_18 = arith.constant 1 : index
    %c0_19 = arith.constant 0 : index
    %c0_20 = arith.constant 0 : index
    %11 = vector.load %arg4[%c1_18, %c0_19, %c0_20] : memref<3x32x32xf32, #tpu.memory_space<vmem>>, vector<1x32x32xf32>
    %12 = vector.shape_cast %11 : vector<1x32x32xf32> to vector<32x32xf32>
    %c2_21 = arith.constant 2 : index
    %c0_22 = arith.constant 0 : index
    %c0_23 = arith.constant 0 : index
    %13 = vector.load %arg4[%c2_21, %c0_22, %c0_23] : memref<3x32x32xf32, #tpu.memory_space<vmem>>, vector<1x32x32xf32>
    %14 = vector.shape_cast %13 : vector<1x32x32xf32> to vector<32x32xf32>
    %c0_24 = arith.constant 0 : index
    %c0_25 = arith.constant 0 : index
    %c0_26 = arith.constant 0 : index
    %15 = vector.load %arg5[%c0_24, %c0_25, %c0_26] : memref<3x32x32xf32, #tpu.memory_space<vmem>>, vector<1x32x32xf32>
    %16 = vector.shape_cast %15 : vector<1x32x32xf32> to vector<32x32xf32>
    %c1_27 = arith.constant 1 : index
    %c0_28 = arith.constant 0 : index
    %c0_29 = arith.constant 0 : index
    %17 = vector.load %arg5[%c1_27, %c0_28, %c0_29] : memref<3x32x32xf32, #tpu.memory_space<vmem>>, vector<1x32x32xf32>
    %18 = vector.shape_cast %17 : vector<1x32x32xf32> to vector<32x32xf32>
    %c2_30 = arith.constant 2 : index
    %c0_31 = arith.constant 0 : index
    %c0_32 = arith.constant 0 : index
    %19 = vector.load %arg5[%c2_30, %c0_31, %c0_32] : memref<3x32x32xf32, #tpu.memory_space<vmem>>, vector<1x32x32xf32>
    %20 = vector.shape_cast %19 : vector<1x32x32xf32> to vector<32x32xf32>
    %c0_33 = arith.constant 0 : index
    %c0_34 = arith.constant 0 : index
    %c0_35 = arith.constant 0 : index
    %21 = vector.load %arg6[%c0_33, %c0_34, %c0_35] : memref<3x1x32xf32, #tpu.memory_space<vmem>>, vector<1x1x32xf32>
    %22 = vector.shape_cast %21 : vector<1x1x32xf32> to vector<1x32xf32>
    %c1_36 = arith.constant 1 : index
    %c0_37 = arith.constant 0 : index
    %c0_38 = arith.constant 0 : index
    %23 = vector.load %arg6[%c1_36, %c0_37, %c0_38] : memref<3x1x32xf32, #tpu.memory_space<vmem>>, vector<1x1x32xf32>
    %24 = vector.shape_cast %23 : vector<1x1x32xf32> to vector<1x32xf32>
    %c2_39 = arith.constant 2 : index
    %c0_40 = arith.constant 0 : index
    %c0_41 = arith.constant 0 : index
    %25 = vector.load %arg6[%c2_39, %c0_40, %c0_41] : memref<3x1x32xf32, #tpu.memory_space<vmem>>, vector<1x1x32xf32>
    %26 = vector.shape_cast %25 : vector<1x1x32xf32> to vector<1x32xf32>
    %c0_42 = arith.constant 0 : index
    %c0_43 = arith.constant 0 : index
    %c0_44 = arith.constant 0 : index
    %27 = vector.load %arg7[%c0_42, %c0_43, %c0_44] : memref<3x1x32xf32, #tpu.memory_space<vmem>>, vector<1x1x32xf32>
    %28 = vector.shape_cast %27 : vector<1x1x32xf32> to vector<1x32xf32>
    %c1_45 = arith.constant 1 : index
    %c0_46 = arith.constant 0 : index
    %c0_47 = arith.constant 0 : index
    %29 = vector.load %arg7[%c1_45, %c0_46, %c0_47] : memref<3x1x32xf32, #tpu.memory_space<vmem>>, vector<1x1x32xf32>
    %30 = vector.shape_cast %29 : vector<1x1x32xf32> to vector<1x32xf32>
    %c2_48 = arith.constant 2 : index
    %c0_49 = arith.constant 0 : index
    %c0_50 = arith.constant 0 : index
    %31 = vector.load %arg7[%c2_48, %c0_49, %c0_50] : memref<3x1x32xf32, #tpu.memory_space<vmem>>, vector<1x1x32xf32>
    %32 = vector.shape_cast %31 : vector<1x1x32xf32> to vector<1x32xf32>
    %c0_51 = arith.constant 0 : index
    %c0_52 = arith.constant 0 : index
    %33 = vector.load %arg8[%c0_51, %c0_52] : memref<32x32xf32, #tpu.memory_space<vmem>>, vector<32x32xf32>
    %c0_53 = arith.constant 0 : index
    %c0_54 = arith.constant 0 : index
    %34 = vector.load %arg9[%c0_53, %c0_54] : memref<1x32xf32, #tpu.memory_space<vmem>>, vector<1x32xf32>
    %c0_55 = arith.constant 0 : index
    %c0_56 = arith.constant 0 : index
    %35 = vector.load %arg11[%c0_55, %c0_56] : memref<32x128xf32, #tpu.memory_space<vmem>>, vector<32x128xf32>
    %c0_57 = arith.constant 0 : index
    %c0_58 = arith.constant 0 : index
    %36 = vector.load %arg12[%c0_57, %c0_58] : memref<32x128xf32, #tpu.memory_space<vmem>>, vector<32x128xf32>
    %c0_59 = arith.constant 0 : index
    %c0_60 = arith.constant 0 : index
    %37 = vector.load %arg13[%c0_59, %c0_60] : memref<1x128xf32, #tpu.memory_space<vmem>>, vector<1x128xf32>
    %c0_61 = arith.constant 0 : index
    %c0_62 = arith.constant 0 : index
    %38 = vector.load %arg14[%c0_61, %c0_62] : memref<128x32xf32, #tpu.memory_space<vmem>>, vector<128x32xf32>
    %39 = vector.extract_strided_slice %0 {offsets = [7, 0, 0], sizes = [1, 2, 32], strides = [1, 1, 1]} : vector<8x2x32xf32> to vector<1x2x32xf32>
    %40 = vector.shape_cast %39 : vector<1x2x32xf32> to vector<2x32xf32>
    %c0_63 = arith.constant 0 : index
    %c0_64 = arith.constant 0 : index
    %41 = vector.load %arg0[%c0_63, %c0_64] : memref<2x128xf32, #tpu.memory_space<vmem>>, vector<2x128xf32>
    %42 = tpu.iota {dimensions = array<i32: 1>} : vector<2x128xi32>
    %cst = arith.constant dense<0.000000e+00> : vector<2x32xf32>
    %43 = tpu.matmul %40, %33, %cst {dimension_numbers = #tpu.dot_dimension_numbers<[1], [0], [0], [1], [0, 0, 1, 1], [], []>} : vector<2x32xf32>, vector<32x32xf32>, vector<2x32xf32> -> vector<2x32xf32>
    %44 = vector.broadcast %34 : vector<1x32xf32> to vector<2x32xf32>
    %45 = arith.addf %43, %44 : vector<2x32xf32>
    %46 = vector.shape_cast %45 : vector<2x32xf32> to vector<1x2x32xf32>
    %47 = vector.broadcast %46 : vector<1x2x32xf32> to vector<8x2x32xf32>
    %48 = arith.addf %1, %47 : vector<8x2x32xf32>
    %49 = math.tanh %48 : vector<8x2x32xf32>
    %50 = vector.broadcast %2 : vector<1x1x32xf32> to vector<8x2x32xf32>
    %51 = arith.mulf %49, %50 : vector<8x2x32xf32>
    %cst_65 = arith.constant dense<0.000000e+00> : vector<8x2xf32>
    %52 = vector.multi_reduction <add>, %51, %cst_65 [2] : vector<8x2x32xf32> to vector<8x2xf32>
    %53 = vector.shape_cast %52 : vector<8x2xf32> to vector<8x2x1xf32>
    %cst_66 = arith.constant dense<0xFF800000> : vector<2x1xf32>
    %54 = vector.multi_reduction <maximumf>, %53, %cst_66 [0] : vector<8x2x1xf32> to vector<2x1xf32>
    %55 = vector.shape_cast %54 : vector<2x1xf32> to vector<1x2x1xf32>
    %56 = vector.broadcast %55 : vector<1x2x1xf32> to vector<8x2x1xf32>
    %57 = arith.subf %53, %56 : vector<8x2x1xf32>
    %58 = math.exp %57 : vector<8x2x1xf32>
    %cst_67 = arith.constant dense<0.000000e+00> : vector<2x1xf32>
    %59 = vector.multi_reduction <add>, %58, %cst_67 [0] : vector<8x2x1xf32> to vector<2x1xf32>
    %60 = vector.shape_cast %59 : vector<2x1xf32> to vector<1x2x1xf32>
    %61 = tpu.reciprocal %60 {approx = true} : vector<1x2x1xf32> -> vector<1x2x1xf32>
    %62 = vector.broadcast %61 : vector<1x2x1xf32> to vector<8x2x1xf32>
    %63 = arith.mulf %58, %62 : vector<8x2x1xf32>
    %64 = vector.broadcast %63 : vector<8x2x1xf32> to vector<8x2x32xf32>
    %65 = arith.mulf %64, %0 : vector<8x2x32xf32>
    %cst_68 = arith.constant dense<0.000000e+00> : vector<2x32xf32>
    %66 = vector.multi_reduction <add>, %65, %cst_68 [0] : vector<8x2x32xf32> to vector<2x32xf32>
    %cst_69 = arith.constant dense<0.000000e+00> : vector<2x32xf32>
    %67 = tpu.matmul %41, %38, %cst_69 {dimension_numbers = #tpu.dot_dimension_numbers<[1], [0], [0], [1], [0, 0, 1, 1], [], []>} : vector<2x128xf32>, vector<128x32xf32>, vector<2x32xf32> -> vector<2x32xf32>
    %cst_70 = arith.constant dense<0.000000e+00> : vector<2x32xf32>
    %68 = tpu.matmul %67, %4, %cst_70 {dimension_numbers = #tpu.dot_dimension_numbers<[1], [0], [0], [1], [0, 0, 1, 1], [], []>} : vector<2x32xf32>, vector<32x32xf32>, vector<2x32xf32> -> vector<2x32xf32>
    %cst_71 = arith.constant dense<0.000000e+00> : vector<2x32xf32>
    %69 = tpu.matmul %66, %10, %cst_71 {dimension_numbers = #tpu.dot_dimension_numbers<[1], [0], [0], [1], [0, 0, 1, 1], [], []>} : vector<2x32xf32>, vector<32x32xf32>, vector<2x32xf32> -> vector<2x32xf32>
    %70 = arith.addf %68, %69 : vector<2x32xf32>
    %71 = vector.broadcast %22 : vector<1x32xf32> to vector<2x32xf32>
    %72 = arith.addf %70, %71 : vector<2x32xf32>
    %cst_72 = arith.constant dense<0.000000e+00> : vector<2x32xf32>
    %73 = tpu.matmul %67, %6, %cst_72 {dimension_numbers = #tpu.dot_dimension_numbers<[1], [0], [0], [1], [0, 0, 1, 1], [], []>} : vector<2x32xf32>, vector<32x32xf32>, vector<2x32xf32> -> vector<2x32xf32>
    %cst_73 = arith.constant dense<0.000000e+00> : vector<2x32xf32>
    %74 = tpu.matmul %66, %12, %cst_73 {dimension_numbers = #tpu.dot_dimension_numbers<[1], [0], [0], [1], [0, 0, 1, 1], [], []>} : vector<2x32xf32>, vector<32x32xf32>, vector<2x32xf32> -> vector<2x32xf32>
    %75 = arith.addf %73, %74 : vector<2x32xf32>
    %76 = vector.broadcast %24 : vector<1x32xf32> to vector<2x32xf32>
    %77 = arith.addf %75, %76 : vector<2x32xf32>
    %cst_74 = arith.constant dense<0.000000e+00> : vector<2x32xf32>
    %78 = tpu.matmul %67, %8, %cst_74 {dimension_numbers = #tpu.dot_dimension_numbers<[1], [0], [0], [1], [0, 0, 1, 1], [], []>} : vector<2x32xf32>, vector<32x32xf32>, vector<2x32xf32> -> vector<2x32xf32>
    %cst_75 = arith.constant dense<0.000000e+00> : vector<2x32xf32>
    %79 = tpu.matmul %66, %14, %cst_75 {dimension_numbers = #tpu.dot_dimension_numbers<[1], [0], [0], [1], [0, 0, 1, 1], [], []>} : vector<2x32xf32>, vector<32x32xf32>, vector<2x32xf32> -> vector<2x32xf32>
    %80 = arith.addf %78, %79 : vector<2x32xf32>
    %81 = vector.broadcast %26 : vector<1x32xf32> to vector<2x32xf32>
    %82 = arith.addf %80, %81 : vector<2x32xf32>
    %cst_76 = arith.constant dense<0.000000e+00> : vector<2x32xf32>
    %83 = tpu.matmul %40, %16, %cst_76 {dimension_numbers = #tpu.dot_dimension_numbers<[1], [0], [0], [1], [0, 0, 1, 1], [], []>} : vector<2x32xf32>, vector<32x32xf32>, vector<2x32xf32> -> vector<2x32xf32>
    %84 = vector.broadcast %28 : vector<1x32xf32> to vector<2x32xf32>
    %85 = arith.addf %83, %84 : vector<2x32xf32>
    %cst_77 = arith.constant dense<0.000000e+00> : vector<2x32xf32>
    %86 = tpu.matmul %40, %18, %cst_77 {dimension_numbers = #tpu.dot_dimension_numbers<[1], [0], [0], [1], [0, 0, 1, 1], [], []>} : vector<2x32xf32>, vector<32x32xf32>, vector<2x32xf32> -> vector<2x32xf32>
    %87 = vector.broadcast %30 : vector<1x32xf32> to vector<2x32xf32>
    %88 = arith.addf %86, %87 : vector<2x32xf32>
    %cst_78 = arith.constant dense<0.000000e+00> : vector<2x32xf32>
    %89 = tpu.matmul %40, %20, %cst_78 {dimension_numbers = #tpu.dot_dimension_numbers<[1], [0], [0], [1], [0, 0, 1, 1], [], []>} : vector<2x32xf32>, vector<32x32xf32>, vector<2x32xf32> -> vector<2x32xf32>
    %90 = vector.broadcast %32 : vector<1x32xf32> to vector<2x32xf32>
    %91 = arith.addf %89, %90 : vector<2x32xf32>
    %92 = arith.addf %72, %85 : vector<2x32xf32>
    %93 = arith.negf %92 : vector<2x32xf32>
    %94 = math.exp %93 : vector<2x32xf32>
    %cst_79 = arith.constant 1.000000e+00 : f32
    %95 = vector.broadcast %cst_79 : f32 to vector<2x32xf32>
    %96 = arith.addf %95, %94 : vector<2x32xf32>
    %97 = arith.divf %95, %96 : vector<2x32xf32>
    %98 = arith.addf %77, %88 : vector<2x32xf32>
    %99 = arith.negf %98 : vector<2x32xf32>
    %100 = math.exp %99 : vector<2x32xf32>
    %cst_80 = arith.constant 1.000000e+00 : f32
    %101 = vector.broadcast %cst_80 : f32 to vector<2x32xf32>
    %102 = arith.addf %101, %100 : vector<2x32xf32>
    %103 = arith.divf %101, %102 : vector<2x32xf32>
    %104 = arith.mulf %97, %91 : vector<2x32xf32>
    %105 = arith.addf %82, %104 : vector<2x32xf32>
    %106 = math.tanh %105 : vector<2x32xf32>
    %cst_81 = arith.constant 1.000000e+00 : f32
    %107 = vector.broadcast %cst_81 : f32 to vector<2x32xf32>
    %108 = arith.subf %107, %103 : vector<2x32xf32>
    %109 = arith.mulf %108, %106 : vector<2x32xf32>
    %110 = arith.mulf %103, %40 : vector<2x32xf32>
    %111 = arith.addf %109, %110 : vector<2x32xf32>
    %cst_82 = arith.constant dense<0.000000e+00> : vector<2x128xf32>
    %112 = tpu.matmul %111, %35, %cst_82 {dimension_numbers = #tpu.dot_dimension_numbers<[1], [0], [0], [1], [0, 0, 1, 1], [], []>} : vector<2x32xf32>, vector<32x128xf32>, vector<2x128xf32> -> vector<2x128xf32>
    %cst_83 = arith.constant dense<0.000000e+00> : vector<2x128xf32>
    %113 = tpu.matmul %66, %36, %cst_83 {dimension_numbers = #tpu.dot_dimension_numbers<[1], [0], [0], [1], [0, 0, 1, 1], [], []>} : vector<2x32xf32>, vector<32x128xf32>, vector<2x128xf32> -> vector<2x128xf32>
    %114 = arith.addf %112, %113 : vector<2x128xf32>
    %115 = vector.broadcast %37 : vector<1x128xf32> to vector<2x128xf32>
    %116 = arith.addf %114, %115 : vector<2x128xf32>
    %c0_84 = arith.constant 0 : index
    %c0_85 = arith.constant 0 : index
    %c0_86 = arith.constant 0 : index
    %117 = vector.load %arg15[%c0_84, %c0_85, %c0_86] : memref<8x2x128xf32, #tpu.memory_space<vmem>>, vector<1x2x128xf32>
    %118 = vector.shape_cast %117 : vector<1x2x128xf32> to vector<2x128xf32>
    %119 = vector.shape_cast %116 : vector<2x128xf32> to vector<1x2x128xf32>
    tpu.vector_store %arg15[%c0_84, %c0_85, %c0_86], %119 {strides = array<i32>} : memref<8x2x128xf32, #tpu.memory_space<vmem>>, vector<1x2x128xf32>,
    %cst_87 = arith.constant dense<0xFF800000> : vector<2xf32>
    %120 = vector.multi_reduction <maximumf>, %116, %cst_87 [1] : vector<2x128xf32> to vector<2xf32>
    %121 = vector.shape_cast %120 : vector<2xf32> to vector<2x1xf32>
    %122 = vector.broadcast %121 : vector<2x1xf32> to vector<2x128xf32>
    %123 = arith.cmpf oeq, %116, %122 : vector<2x128xf32>
    %c128_i32 = arith.constant 128 : i32
    %124 = vector.broadcast %c128_i32 : i32 to vector<2x128xi32>
    %125 = arith.select %123, %42, %124 : vector<2x128xi1>, vector<2x128xi32>
    %cst_88 = arith.constant dense<2147483647> : vector<2xi32>
    %126 = vector.multi_reduction <minsi>, %125, %cst_88 [1] : vector<2x128xi32> to vector<2xi32>
    %127 = vector.shape_cast %126 : vector<2xi32> to vector<2x1xi32>
    %128 = vector.broadcast %127 : vector<2x1xi32> to vector<2x128xi32>
    %129 = arith.cmpi eq, %42, %128 : vector<2x128xi32>
    %130 = arith.extui %129 : vector<2x128xi1> to vector<2x128xi32>
    %131 = arith.sitofp %130 : vector<2x128xi32> to vector<2x128xf32>
    %cst_89 = arith.constant dense<0.000000e+00> : vector<2x32xf32>
    %132 = tpu.matmul %111, %33, %cst_89 {dimension_numbers = #tpu.dot_dimension_numbers<[1], [0], [0], [1], [0, 0, 1, 1], [], []>} : vector<2x32xf32>, vector<32x32xf32>, vector<2x32xf32> -> vector<2x32xf32>
    %133 = vector.broadcast %34 : vector<1x32xf32> to vector<2x32xf32>
    %134 = arith.addf %132, %133 : vector<2x32xf32>
    %135 = vector.shape_cast %134 : vector<2x32xf32> to vector<1x2x32xf32>
    %136 = vector.broadcast %135 : vector<1x2x32xf32> to vector<8x2x32xf32>
    %137 = arith.addf %1, %136 : vector<8x2x32xf32>
    %138 = math.tanh %137 : vector<8x2x32xf32>
    %139 = vector.broadcast %2 : vector<1x1x32xf32> to vector<8x2x32xf32>
    %140 = arith.mulf %138, %139 : vector<8x2x32xf32>
    %cst_90 = arith.constant dense<0.000000e+00> : vector<8x2xf32>
    %141 = vector.multi_reduction <add>, %140, %cst_90 [2] : vector<8x2x32xf32> to vector<8x2xf32>
    %142 = vector.shape_cast %141 : vector<8x2xf32> to vector<8x2x1xf32>
    %cst_91 = arith.constant dense<0xFF800000> : vector<2x1xf32>
    %143 = vector.multi_reduction <maximumf>, %142, %cst_91 [0] : vector<8x2x1xf32> to vector<2x1xf32>
    %144 = vector.shape_cast %143 : vector<2x1xf32> to vector<1x2x1xf32>
    %145 = vector.broadcast %144 : vector<1x2x1xf32> to vector<8x2x1xf32>
    %146 = arith.subf %142, %145 : vector<8x2x1xf32>
    %147 = math.exp %146 : vector<8x2x1xf32>
    %cst_92 = arith.constant dense<0.000000e+00> : vector<2x1xf32>
    %148 = vector.multi_reduction <add>, %147, %cst_92 [0] : vector<8x2x1xf32> to vector<2x1xf32>
    %149 = vector.shape_cast %148 : vector<2x1xf32> to vector<1x2x1xf32>
    %150 = tpu.reciprocal %149 {approx = true} : vector<1x2x1xf32> -> vector<1x2x1xf32>
    %151 = vector.broadcast %150 : vector<1x2x1xf32> to vector<8x2x1xf32>
    %152 = arith.mulf %147, %151 : vector<8x2x1xf32>
    %153 = vector.broadcast %152 : vector<8x2x1xf32> to vector<8x2x32xf32>
    %154 = arith.mulf %153, %0 : vector<8x2x32xf32>
    %cst_93 = arith.constant dense<0.000000e+00> : vector<2x32xf32>
    %155 = vector.multi_reduction <add>, %154, %cst_93 [0] : vector<8x2x32xf32> to vector<2x32xf32>
    %cst_94 = arith.constant dense<0.000000e+00> : vector<2x32xf32>
    %156 = tpu.matmul %131, %38, %cst_94 {dimension_numbers = #tpu.dot_dimension_numbers<[1], [0], [0], [1], [0, 0, 1, 1], [], []>} : vector<2x128xf32>, vector<128x32xf32>, vector<2x32xf32> -> vector<2x32xf32>
    %cst_95 = arith.constant dense<0.000000e+00> : vector<2x32xf32>
    %157 = tpu.matmul %156, %4, %cst_95 {dimension_numbers = #tpu.dot_dimension_numbers<[1], [0], [0], [1], [0, 0, 1, 1], [], []>} : vector<2x32xf32>, vector<32x32xf32>, vector<2x32xf32> -> vector<2x32xf32>
    %cst_96 = arith.constant dense<0.000000e+00> : vector<2x32xf32>
    %158 = tpu.matmul %155, %10, %cst_96 {dimension_numbers = #tpu.dot_dimension_numbers<[1], [0], [0], [1], [0, 0, 1, 1], [], []>} : vector<2x32xf32>, vector<32x32xf32>, vector<2x32xf32> -> vector<2x32xf32>
    %159 = arith.addf %157, %158 : vector<2x32xf32>
    %160 = vector.broadcast %22 : vector<1x32xf32> to vector<2x32xf32>
    %161 = arith.addf %159, %160 : vector<2x32xf32>
    %cst_97 = arith.constant dense<0.000000e+00> : vector<2x32xf32>
    %162 = tpu.matmul %156, %6, %cst_97 {dimension_numbers = #tpu.dot_dimension_numbers<[1], [0], [0], [1], [0, 0, 1, 1], [], []>} : vector<2x32xf32>, vector<32x32xf32>, vector<2x32xf32> -> vector<2x32xf32>
    %cst_98 = arith.constant dense<0.000000e+00> : vector<2x32xf32>
    %163 = tpu.matmul %155, %12, %cst_98 {dimension_numbers = #tpu.dot_dimension_numbers<[1], [0], [0], [1], [0, 0, 1, 1], [], []>} : vector<2x32xf32>, vector<32x32xf32>, vector<2x32xf32> -> vector<2x32xf32>
    %164 = arith.addf %162, %163 : vector<2x32xf32>
    %165 = vector.broadcast %24 : vector<1x32xf32> to vector<2x32xf32>
    %166 = arith.addf %164, %165 : vector<2x32xf32>
    %cst_99 = arith.constant dense<0.000000e+00> : vector<2x32xf32>
    %167 = tpu.matmul %156, %8, %cst_99 {dimension_numbers = #tpu.dot_dimension_numbers<[1], [0], [0], [1], [0, 0, 1, 1], [], []>} : vector<2x32xf32>, vector<32x32xf32>, vector<2x32xf32> -> vector<2x32xf32>
    %cst_100 = arith.constant dense<0.000000e+00> : vector<2x32xf32>
    %168 = tpu.matmul %155, %14, %cst_100 {dimension_numbers = #tpu.dot_dimension_numbers<[1], [0], [0], [1], [0, 0, 1, 1], [], []>} : vector<2x32xf32>, vector<32x32xf32>, vector<2x32xf32> -> vector<2x32xf32>
    %169 = arith.addf %167, %168 : vector<2x32xf32>
    %170 = vector.broadcast %26 : vector<1x32xf32> to vector<2x32xf32>
    %171 = arith.addf %169, %170 : vector<2x32xf32>
    %cst_101 = arith.constant dense<0.000000e+00> : vector<2x32xf32>
    %172 = tpu.matmul %111, %16, %cst_101 {dimension_numbers = #tpu.dot_dimension_numbers<[1], [0], [0], [1], [0, 0, 1, 1], [], []>} : vector<2x32xf32>, vector<32x32xf32>, vector<2x32xf32> -> vector<2x32xf32>
    %173 = vector.broadcast %28 : vector<1x32xf32> to vector<2x32xf32>
    %174 = arith.addf %172, %173 : vector<2x32xf32>
    %cst_102 = arith.constant dense<0.000000e+00> : vector<2x32xf32>
    %175 = tpu.matmul %111, %18, %cst_102 {dimension_numbers = #tpu.dot_dimension_numbers<[1], [0], [0], [1], [0, 0, 1, 1], [], []>} : vector<2x32xf32>, vector<32x32xf32>, vector<2x32xf32> -> vector<2x32xf32>
    %176 = vector.broadcast %30 : vector<1x32xf32> to vector<2x32xf32>
    %177 = arith.addf %175, %176 : vector<2x32xf32>
    %cst_103 = arith.constant dense<0.000000e+00> : vector<2x32xf32>
    %178 = tpu.matmul %111, %20, %cst_103 {dimension_numbers = #tpu.dot_dimension_numbers<[1], [0], [0], [1], [0, 0, 1, 1], [], []>} : vector<2x32xf32>, vector<32x32xf32>, vector<2x32xf32> -> vector<2x32xf32>
    %179 = vector.broadcast %32 : vector<1x32xf32> to vector<2x32xf32>
    %180 = arith.addf %178, %179 : vector<2x32xf32>
    %181 = arith.addf %161, %174 : vector<2x32xf32>
    %182 = arith.negf %181 : vector<2x32xf32>
    %183 = math.exp %182 : vector<2x32xf32>
    %cst_104 = arith.constant 1.000000e+00 : f32
    %184 = vector.broadcast %cst_104 : f32 to vector<2x32xf32>
    %185 = arith.addf %184, %183 : vector<2x32xf32>
    %186 = arith.divf %184, %185 : vector<2x32xf32>
    %187 = arith.addf %166, %177 : vector<2x32xf32>
    %188 = arith.negf %187 : vector<2x32xf32>
    %189 = math.exp %188 : vector<2x32xf32>
    %cst_105 = arith.constant 1.000000e+00 : f32
    %190 = vector.broadcast %cst_105 : f32 to vector<2x32xf32>
    %191 = arith.addf %190, %189 : vector<2x32xf32>
    %192 = arith.divf %190, %191 : vector<2x32xf32>
    %193 = arith.mulf %186, %180 : vector<2x32xf32>
    %194 = arith.addf %171, %193 : vector<2x32xf32>
    %195 = math.tanh %194 : vector<2x32xf32>
    %cst_106 = arith.constant 1.000000e+00 : f32
    %196 = vector.broadcast %cst_106 : f32 to vector<2x32xf32>
    %197 = arith.subf %196, %192 : vector<2x32xf32>
    %198 = arith.mulf %197, %195 : vector<2x32xf32>
    %199 = arith.mulf %192, %111 : vector<2x32xf32>
    %200 = arith.addf %198, %199 : vector<2x32xf32>
    %cst_107 = arith.constant dense<0.000000e+00> : vector<2x128xf32>
    %201 = tpu.matmul %200, %35, %cst_107 {dimension_numbers = #tpu.dot_dimension_numbers<[1], [0], [0], [1], [0, 0, 1, 1], [], []>} : vector<2x32xf32>, vector<32x128xf32>, vector<2x128xf32> -> vector<2x128xf32>
    %cst_108 = arith.constant dense<0.000000e+00> : vector<2x128xf32>
    %202 = tpu.matmul %155, %36, %cst_108 {dimension_numbers = #tpu.dot_dimension_numbers<[1], [0], [0], [1], [0, 0, 1, 1], [], []>} : vector<2x32xf32>, vector<32x128xf32>, vector<2x128xf32> -> vector<2x128xf32>
    %203 = arith.addf %201, %202 : vector<2x128xf32>
    %204 = vector.broadcast %37 : vector<1x128xf32> to vector<2x128xf32>
    %205 = arith.addf %203, %204 : vector<2x128xf32>
    %c1_109 = arith.constant 1 : index
    %c0_110 = arith.constant 0 : index
    %c0_111 = arith.constant 0 : index
    %206 = vector.load %arg15[%c1_109, %c0_110, %c0_111] : memref<8x2x128xf32, #tpu.memory_space<vmem>>, vector<1x2x128xf32>
    %207 = vector.shape_cast %206 : vector<1x2x128xf32> to vector<2x128xf32>
    %208 = vector.shape_cast %205 : vector<2x128xf32> to vector<1x2x128xf32>
    tpu.vector_store %arg15[%c1_109, %c0_110, %c0_111], %208 {strides = array<i32>} : memref<8x2x128xf32, #tpu.memory_space<vmem>>, vector<1x2x128xf32>,
    %cst_112 = arith.constant dense<0xFF800000> : vector<2xf32>
    %209 = vector.multi_reduction <maximumf>, %205, %cst_112 [1] : vector<2x128xf32> to vector<2xf32>
    %210 = vector.shape_cast %209 : vector<2xf32> to vector<2x1xf32>
    %211 = vector.broadcast %210 : vector<2x1xf32> to vector<2x128xf32>
    %212 = arith.cmpf oeq, %205, %211 : vector<2x128xf32>
    %c128_i32_113 = arith.constant 128 : i32
    %213 = vector.broadcast %c128_i32_113 : i32 to vector<2x128xi32>
    %214 = arith.select %212, %42, %213 : vector<2x128xi1>, vector<2x128xi32>
    %cst_114 = arith.constant dense<2147483647> : vector<2xi32>
    %215 = vector.multi_reduction <minsi>, %214, %cst_114 [1] : vector<2x128xi32> to vector<2xi32>
    %216 = vector.shape_cast %215 : vector<2xi32> to vector<2x1xi32>
    %217 = vector.broadcast %216 : vector<2x1xi32> to vector<2x128xi32>
    %218 = arith.cmpi eq, %42, %217 : vector<2x128xi32>
    %219 = arith.extui %218 : vector<2x128xi1> to vector<2x128xi32>
    %220 = arith.sitofp %219 : vector<2x128xi32> to vector<2x128xf32>
    %cst_115 = arith.constant dense<0.000000e+00> : vector<2x32xf32>
    %221 = tpu.matmul %200, %33, %cst_115 {dimension_numbers = #tpu.dot_dimension_numbers<[1], [0], [0], [1], [0, 0, 1, 1], [], []>} : vector<2x32xf32>, vector<32x32xf32>, vector<2x32xf32> -> vector<2x32xf32>
    %222 = vector.broadcast %34 : vector<1x32xf32> to vector<2x32xf32>
    %223 = arith.addf %221, %222 : vector<2x32xf32>
    %224 = vector.shape_cast %223 : vector<2x32xf32> to vector<1x2x32xf32>
    %225 = vector.broadcast %224 : vector<1x2x32xf32> to vector<8x2x32xf32>
    %226 = arith.addf %1, %225 : vector<8x2x32xf32>
    %227 = math.tanh %226 : vector<8x2x32xf32>
    %228 = vector.broadcast %2 : vector<1x1x32xf32> to vector<8x2x32xf32>
    %229 = arith.mulf %227, %228 : vector<8x2x32xf32>
    %cst_116 = arith.constant dense<0.000000e+00> : vector<8x2xf32>
    %230 = vector.multi_reduction <add>, %229, %cst_116 [2] : vector<8x2x32xf32> to vector<8x2xf32>
    %231 = vector.shape_cast %230 : vector<8x2xf32> to vector<8x2x1xf32>
    %cst_117 = arith.constant dense<0xFF800000> : vector<2x1xf32>
    %232 = vector.multi_reduction <maximumf>, %231, %cst_117 [0] : vector<8x2x1xf32> to vector<2x1xf32>
    %233 = vector.shape_cast %232 : vector<2x1xf32> to vector<1x2x1xf32>
    %234 = vector.broadcast %233 : vector<1x2x1xf32> to vector<8x2x1xf32>
    %235 = arith.subf %231, %234 : vector<8x2x1xf32>
    %236 = math.exp %235 : vector<8x2x1xf32>
    %cst_118 = arith.constant dense<0.000000e+00> : vector<2x1xf32>
    %237 = vector.multi_reduction <add>, %236, %cst_118 [0] : vector<8x2x1xf32> to vector<2x1xf32>
    %238 = vector.shape_cast %237 : vector<2x1xf32> to vector<1x2x1xf32>
    %239 = tpu.reciprocal %238 {approx = true} : vector<1x2x1xf32> -> vector<1x2x1xf32>
    %240 = vector.broadcast %239 : vector<1x2x1xf32> to vector<8x2x1xf32>
    %241 = arith.mulf %236, %240 : vector<8x2x1xf32>
    %242 = vector.broadcast %241 : vector<8x2x1xf32> to vector<8x2x32xf32>
    %243 = arith.mulf %242, %0 : vector<8x2x32xf32>
    %cst_119 = arith.constant dense<0.000000e+00> : vector<2x32xf32>
    %244 = vector.multi_reduction <add>, %243, %cst_119 [0] : vector<8x2x32xf32> to vector<2x32xf32>
    %cst_120 = arith.constant dense<0.000000e+00> : vector<2x32xf32>
    %245 = tpu.matmul %220, %38, %cst_120 {dimension_numbers = #tpu.dot_dimension_numbers<[1], [0], [0], [1], [0, 0, 1, 1], [], []>} : vector<2x128xf32>, vector<128x32xf32>, vector<2x32xf32> -> vector<2x32xf32>
    %cst_121 = arith.constant dense<0.000000e+00> : vector<2x32xf32>
    %246 = tpu.matmul %245, %4, %cst_121 {dimension_numbers = #tpu.dot_dimension_numbers<[1], [0], [0], [1], [0, 0, 1, 1], [], []>} : vector<2x32xf32>, vector<32x32xf32>, vector<2x32xf32> -> vector<2x32xf32>
    %cst_122 = arith.constant dense<0.000000e+00> : vector<2x32xf32>
    %247 = tpu.matmul %244, %10, %cst_122 {dimension_numbers = #tpu.dot_dimension_numbers<[1], [0], [0], [1], [0, 0, 1, 1], [], []>} : vector<2x32xf32>, vector<32x32xf32>, vector<2x32xf32> -> vector<2x32xf32>
    %248 = arith.addf %246, %247 : vector<2x32xf32>
    %249 = vector.broadcast %22 : vector<1x32xf32> to vector<2x32xf32>
    %250 = arith.addf %248, %249 : vector<2x32xf32>
    %cst_123 = arith.constant dense<0.000000e+00> : vector<2x32xf32>
    %251 = tpu.matmul %245, %6, %cst_123 {dimension_numbers = #tpu.dot_dimension_numbers<[1], [0], [0], [1], [0, 0, 1, 1], [], []>} : vector<2x32xf32>, vector<32x32xf32>, vector<2x32xf32> -> vector<2x32xf32>
    %cst_124 = arith.constant dense<0.000000e+00> : vector<2x32xf32>
    %252 = tpu.matmul %244, %12, %cst_124 {dimension_numbers = #tpu.dot_dimension_numbers<[1], [0], [0], [1], [0, 0, 1, 1], [], []>} : vector<2x32xf32>, vector<32x32xf32>, vector<2x32xf32> -> vector<2x32xf32>
    %253 = arith.addf %251, %252 : vector<2x32xf32>
    %254 = vector.broadcast %24 : vector<1x32xf32> to vector<2x32xf32>
    %255 = arith.addf %253, %254 : vector<2x32xf32>
    %cst_125 = arith.constant dense<0.000000e+00> : vector<2x32xf32>
    %256 = tpu.matmul %245, %8, %cst_125 {dimension_numbers = #tpu.dot_dimension_numbers<[1], [0], [0], [1], [0, 0, 1, 1], [], []>} : vector<2x32xf32>, vector<32x32xf32>, vector<2x32xf32> -> vector<2x32xf32>
    %cst_126 = arith.constant dense<0.000000e+00> : vector<2x32xf32>
    %257 = tpu.matmul %244, %14, %cst_126 {dimension_numbers = #tpu.dot_dimension_numbers<[1], [0], [0], [1], [0, 0, 1, 1], [], []>} : vector<2x32xf32>, vector<32x32xf32>, vector<2x32xf32> -> vector<2x32xf32>
    %258 = arith.addf %256, %257 : vector<2x32xf32>
    %259 = vector.broadcast %26 : vector<1x32xf32> to vector<2x32xf32>
    %260 = arith.addf %258, %259 : vector<2x32xf32>
    %cst_127 = arith.constant dense<0.000000e+00> : vector<2x32xf32>
    %261 = tpu.matmul %200, %16, %cst_127 {dimension_numbers = #tpu.dot_dimension_numbers<[1], [0], [0], [1], [0, 0, 1, 1], [], []>} : vector<2x32xf32>, vector<32x32xf32>, vector<2x32xf32> -> vector<2x32xf32>
    %262 = vector.broadcast %28 : vector<1x32xf32> to vector<2x32xf32>
    %263 = arith.addf %261, %262 : vector<2x32xf32>
    %cst_128 = arith.constant dense<0.000000e+00> : vector<2x32xf32>
    %264 = tpu.matmul %200, %18, %cst_128 {dimension_numbers = #tpu.dot_dimension_numbers<[1], [0], [0], [1], [0, 0, 1, 1], [], []>} : vector<2x32xf32>, vector<32x32xf32>, vector<2x32xf32> -> vector<2x32xf32>
    %265 = vector.broadcast %30 : vector<1x32xf32> to vector<2x32xf32>
    %266 = arith.addf %264, %265 : vector<2x32xf32>
    %cst_129 = arith.constant dense<0.000000e+00> : vector<2x32xf32>
    %267 = tpu.matmul %200, %20, %cst_129 {dimension_numbers = #tpu.dot_dimension_numbers<[1], [0], [0], [1], [0, 0, 1, 1], [], []>} : vector<2x32xf32>, vector<32x32xf32>, vector<2x32xf32> -> vector<2x32xf32>
    %268 = vector.broadcast %32 : vector<1x32xf32> to vector<2x32xf32>
    %269 = arith.addf %267, %268 : vector<2x32xf32>
    %270 = arith.addf %250, %263 : vector<2x32xf32>
    %271 = arith.negf %270 : vector<2x32xf32>
    %272 = math.exp %271 : vector<2x32xf32>
    %cst_130 = arith.constant 1.000000e+00 : f32
    %273 = vector.broadcast %cst_130 : f32 to vector<2x32xf32>
    %274 = arith.addf %273, %272 : vector<2x32xf32>
    %275 = arith.divf %273, %274 : vector<2x32xf32>
    %276 = arith.addf %255, %266 : vector<2x32xf32>
    %277 = arith.negf %276 : vector<2x32xf32>
    %278 = math.exp %277 : vector<2x32xf32>
    %cst_131 = arith.constant 1.000000e+00 : f32
    %279 = vector.broadcast %cst_131 : f32 to vector<2x32xf32>
    %280 = arith.addf %279, %278 : vector<2x32xf32>
    %281 = arith.divf %279, %280 : vector<2x32xf32>
    %282 = arith.mulf %275, %269 : vector<2x32xf32>
    %283 = arith.addf %260, %282 : vector<2x32xf32>
    %284 = math.tanh %283 : vector<2x32xf32>
    %cst_132 = arith.constant 1.000000e+00 : f32
    %285 = vector.broadcast %cst_132 : f32 to vector<2x32xf32>
    %286 = arith.subf %285, %281 : vector<2x32xf32>
    %287 = arith.mulf %286, %284 : vector<2x32xf32>
    %288 = arith.mulf %281, %200 : vector<2x32xf32>
    %289 = arith.addf %287, %288 : vector<2x32xf32>
    %cst_133 = arith.constant dense<0.000000e+00> : vector<2x128xf32>
    %290 = tpu.matmul %289, %35, %cst_133 {dimension_numbers = #tpu.dot_dimension_numbers<[1], [0], [0], [1], [0, 0, 1, 1], [], []>} : vector<2x32xf32>, vector<32x128xf32>, vector<2x128xf32> -> vector<2x128xf32>
    %cst_134 = arith.constant dense<0.000000e+00> : vector<2x128xf32>
    %291 = tpu.matmul %244, %36, %cst_134 {dimension_numbers = #tpu.dot_dimension_numbers<[1], [0], [0], [1], [0, 0, 1, 1], [], []>} : vector<2x32xf32>, vector<32x128xf32>, vector<2x128xf32> -> vector<2x128xf32>
    %292 = arith.addf %290, %291 : vector<2x128xf32>
    %293 = vector.broadcast %37 : vector<1x128xf32> to vector<2x128xf32>
    %294 = arith.addf %292, %293 : vector<2x128xf32>
    %c2_135 = arith.constant 2 : index
    %c0_136 = arith.constant 0 : index
    %c0_137 = arith.constant 0 : index
    %295 = vector.load %arg15[%c2_135, %c0_136, %c0_137] : memref<8x2x128xf32, #tpu.memory_space<vmem>>, vector<1x2x128xf32>
    %296 = vector.shape_cast %295 : vector<1x2x128xf32> to vector<2x128xf32>
    %297 = vector.shape_cast %294 : vector<2x128xf32> to vector<1x2x128xf32>
    tpu.vector_store %arg15[%c2_135, %c0_136, %c0_137], %297 {strides = array<i32>} : memref<8x2x128xf32, #tpu.memory_space<vmem>>, vector<1x2x128xf32>,
    %cst_138 = arith.constant dense<0xFF800000> : vector<2xf32>
    %298 = vector.multi_reduction <maximumf>, %294, %cst_138 [1] : vector<2x128xf32> to vector<2xf32>
    %299 = vector.shape_cast %298 : vector<2xf32> to vector<2x1xf32>
    %300 = vector.broadcast %299 : vector<2x1xf32> to vector<2x128xf32>
    %301 = arith.cmpf oeq, %294, %300 : vector<2x128xf32>
    %c128_i32_139 = arith.constant 128 : i32
    %302 = vector.broadcast %c128_i32_139 : i32 to vector<2x128xi32>
    %303 = arith.select %301, %42, %302 : vector<2x128xi1>, vector<2x128xi32>
    %cst_140 = arith.constant dense<2147483647> : vector<2xi32>
    %304 = vector.multi_reduction <minsi>, %303, %cst_140 [1] : vector<2x128xi32> to vector<2xi32>
    %305 = vector.shape_cast %304 : vector<2xi32> to vector<2x1xi32>
    %306 = vector.broadcast %305 : vector<2x1xi32> to vector<2x128xi32>
    %307 = arith.cmpi eq, %42, %306 : vector<2x128xi32>
    %308 = arith.extui %307 : vector<2x128xi1> to vector<2x128xi32>
    %309 = arith.sitofp %308 : vector<2x128xi32> to vector<2x128xf32>
    %cst_141 = arith.constant dense<0.000000e+00> : vector<2x32xf32>
    %310 = tpu.matmul %289, %33, %cst_141 {dimension_numbers = #tpu.dot_dimension_numbers<[1], [0], [0], [1], [0, 0, 1, 1], [], []>} : vector<2x32xf32>, vector<32x32xf32>, vector<2x32xf32> -> vector<2x32xf32>
    %311 = vector.broadcast %34 : vector<1x32xf32> to vector<2x32xf32>
    %312 = arith.addf %310, %311 : vector<2x32xf32>
    %313 = vector.shape_cast %312 : vector<2x32xf32> to vector<1x2x32xf32>
    %314 = vector.broadcast %313 : vector<1x2x32xf32> to vector<8x2x32xf32>
    %315 = arith.addf %1, %314 : vector<8x2x32xf32>
    %316 = math.tanh %315 : vector<8x2x32xf32>
    %317 = vector.broadcast %2 : vector<1x1x32xf32> to vector<8x2x32xf32>
    %318 = arith.mulf %316, %317 : vector<8x2x32xf32>
    %cst_142 = arith.constant dense<0.000000e+00> : vector<8x2xf32>
    %319 = vector.multi_reduction <add>, %318, %cst_142 [2] : vector<8x2x32xf32> to vector<8x2xf32>
    %320 = vector.shape_cast %319 : vector<8x2xf32> to vector<8x2x1xf32>
    %cst_143 = arith.constant dense<0xFF800000> : vector<2x1xf32>
    %321 = vector.multi_reduction <maximumf>, %320, %cst_143 [0] : vector<8x2x1xf32> to vector<2x1xf32>
    %322 = vector.shape_cast %321 : vector<2x1xf32> to vector<1x2x1xf32>
    %323 = vector.broadcast %322 : vector<1x2x1xf32> to vector<8x2x1xf32>
    %324 = arith.subf %320, %323 : vector<8x2x1xf32>
    %325 = math.exp %324 : vector<8x2x1xf32>
    %cst_144 = arith.constant dense<0.000000e+00> : vector<2x1xf32>
    %326 = vector.multi_reduction <add>, %325, %cst_144 [0] : vector<8x2x1xf32> to vector<2x1xf32>
    %327 = vector.shape_cast %326 : vector<2x1xf32> to vector<1x2x1xf32>
    %328 = tpu.reciprocal %327 {approx = true} : vector<1x2x1xf32> -> vector<1x2x1xf32>
    %329 = vector.broadcast %328 : vector<1x2x1xf32> to vector<8x2x1xf32>
    %330 = arith.mulf %325, %329 : vector<8x2x1xf32>
    %331 = vector.broadcast %330 : vector<8x2x1xf32> to vector<8x2x32xf32>
    %332 = arith.mulf %331, %0 : vector<8x2x32xf32>
    %cst_145 = arith.constant dense<0.000000e+00> : vector<2x32xf32>
    %333 = vector.multi_reduction <add>, %332, %cst_145 [0] : vector<8x2x32xf32> to vector<2x32xf32>
    %cst_146 = arith.constant dense<0.000000e+00> : vector<2x32xf32>
    %334 = tpu.matmul %309, %38, %cst_146 {dimension_numbers = #tpu.dot_dimension_numbers<[1], [0], [0], [1], [0, 0, 1, 1], [], []>} : vector<2x128xf32>, vector<128x32xf32>, vector<2x32xf32> -> vector<2x32xf32>
    %cst_147 = arith.constant dense<0.000000e+00> : vector<2x32xf32>
    %335 = tpu.matmul %334, %4, %cst_147 {dimension_numbers = #tpu.dot_dimension_numbers<[1], [0], [0], [1], [0, 0, 1, 1], [], []>} : vector<2x32xf32>, vector<32x32xf32>, vector<2x32xf32> -> vector<2x32xf32>
    %cst_148 = arith.constant dense<0.000000e+00> : vector<2x32xf32>
    %336 = tpu.matmul %333, %10, %cst_148 {dimension_numbers = #tpu.dot_dimension_numbers<[1], [0], [0], [1], [0, 0, 1, 1], [], []>} : vector<2x32xf32>, vector<32x32xf32>, vector<2x32xf32> -> vector<2x32xf32>
    %337 = arith.addf %335, %336 : vector<2x32xf32>
    %338 = vector.broadcast %22 : vector<1x32xf32> to vector<2x32xf32>
    %339 = arith.addf %337, %338 : vector<2x32xf32>
    %cst_149 = arith.constant dense<0.000000e+00> : vector<2x32xf32>
    %340 = tpu.matmul %334, %6, %cst_149 {dimension_numbers = #tpu.dot_dimension_numbers<[1], [0], [0], [1], [0, 0, 1, 1], [], []>} : vector<2x32xf32>, vector<32x32xf32>, vector<2x32xf32> -> vector<2x32xf32>
    %cst_150 = arith.constant dense<0.000000e+00> : vector<2x32xf32>
    %341 = tpu.matmul %333, %12, %cst_150 {dimension_numbers = #tpu.dot_dimension_numbers<[1], [0], [0], [1], [0, 0, 1, 1], [], []>} : vector<2x32xf32>, vector<32x32xf32>, vector<2x32xf32> -> vector<2x32xf32>
    %342 = arith.addf %340, %341 : vector<2x32xf32>
    %343 = vector.broadcast %24 : vector<1x32xf32> to vector<2x32xf32>
    %344 = arith.addf %342, %343 : vector<2x32xf32>
    %cst_151 = arith.constant dense<0.000000e+00> : vector<2x32xf32>
    %345 = tpu.matmul %334, %8, %cst_151 {dimension_numbers = #tpu.dot_dimension_numbers<[1], [0], [0], [1], [0, 0, 1, 1], [], []>} : vector<2x32xf32>, vector<32x32xf32>, vector<2x32xf32> -> vector<2x32xf32>
    %cst_152 = arith.constant dense<0.000000e+00> : vector<2x32xf32>
    %346 = tpu.matmul %333, %14, %cst_152 {dimension_numbers = #tpu.dot_dimension_numbers<[1], [0], [0], [1], [0, 0, 1, 1], [], []>} : vector<2x32xf32>, vector<32x32xf32>, vector<2x32xf32> -> vector<2x32xf32>
    %347 = arith.addf %345, %346 : vector<2x32xf32>
    %348 = vector.broadcast %26 : vector<1x32xf32> to vector<2x32xf32>
    %349 = arith.addf %347, %348 : vector<2x32xf32>
    %cst_153 = arith.constant dense<0.000000e+00> : vector<2x32xf32>
    %350 = tpu.matmul %289, %16, %cst_153 {dimension_numbers = #tpu.dot_dimension_numbers<[1], [0], [0], [1], [0, 0, 1, 1], [], []>} : vector<2x32xf32>, vector<32x32xf32>, vector<2x32xf32> -> vector<2x32xf32>
    %351 = vector.broadcast %28 : vector<1x32xf32> to vector<2x32xf32>
    %352 = arith.addf %350, %351 : vector<2x32xf32>
    %cst_154 = arith.constant dense<0.000000e+00> : vector<2x32xf32>
    %353 = tpu.matmul %289, %18, %cst_154 {dimension_numbers = #tpu.dot_dimension_numbers<[1], [0], [0], [1], [0, 0, 1, 1], [], []>} : vector<2x32xf32>, vector<32x32xf32>, vector<2x32xf32> -> vector<2x32xf32>
    %354 = vector.broadcast %30 : vector<1x32xf32> to vector<2x32xf32>
    %355 = arith.addf %353, %354 : vector<2x32xf32>
    %cst_155 = arith.constant dense<0.000000e+00> : vector<2x32xf32>
    %356 = tpu.matmul %289, %20, %cst_155 {dimension_numbers = #tpu.dot_dimension_numbers<[1], [0], [0], [1], [0, 0, 1, 1], [], []>} : vector<2x32xf32>, vector<32x32xf32>, vector<2x32xf32> -> vector<2x32xf32>
    %357 = vector.broadcast %32 : vector<1x32xf32> to vector<2x32xf32>
    %358 = arith.addf %356, %357 : vector<2x32xf32>
    %359 = arith.addf %339, %352 : vector<2x32xf32>
    %360 = arith.negf %359 : vector<2x32xf32>
    %361 = math.exp %360 : vector<2x32xf32>
    %cst_156 = arith.constant 1.000000e+00 : f32
    %362 = vector.broadcast %cst_156 : f32 to vector<2x32xf32>
    %363 = arith.addf %362, %361 : vector<2x32xf32>
    %364 = arith.divf %362, %363 : vector<2x32xf32>
    %365 = arith.addf %344, %355 : vector<2x32xf32>
    %366 = arith.negf %365 : vector<2x32xf32>
    %367 = math.exp %366 : vector<2x32xf32>
    %cst_157 = arith.constant 1.000000e+00 : f32
    %368 = vector.broadcast %cst_157 : f32 to vector<2x32xf32>
    %369 = arith.addf %368, %367 : vector<2x32xf32>
    %370 = arith.divf %368, %369 : vector<2x32xf32>
    %371 = arith.mulf %364, %358 : vector<2x32xf32>
    %372 = arith.addf %349, %371 : vector<2x32xf32>
    %373 = math.tanh %372 : vector<2x32xf32>
    %cst_158 = arith.constant 1.000000e+00 : f32
    %374 = vector.broadcast %cst_158 : f32 to vector<2x32xf32>
    %375 = arith.subf %374, %370 : vector<2x32xf32>
    %376 = arith.mulf %375, %373 : vector<2x32xf32>
    %377 = arith.mulf %370, %289 : vector<2x32xf32>
    %378 = arith.addf %376, %377 : vector<2x32xf32>
    %cst_159 = arith.constant dense<0.000000e+00> : vector<2x128xf32>
    %379 = tpu.matmul %378, %35, %cst_159 {dimension_numbers = #tpu.dot_dimension_numbers<[1], [0], [0], [1], [0, 0, 1, 1], [], []>} : vector<2x32xf32>, vector<32x128xf32>, vector<2x128xf32> -> vector<2x128xf32>
    %cst_160 = arith.constant dense<0.000000e+00> : vector<2x128xf32>
    %380 = tpu.matmul %333, %36, %cst_160 {dimension_numbers = #tpu.dot_dimension_numbers<[1], [0], [0], [1], [0, 0, 1, 1], [], []>} : vector<2x32xf32>, vector<32x128xf32>, vector<2x128xf32> -> vector<2x128xf32>
    %381 = arith.addf %379, %380 : vector<2x128xf32>
    %382 = vector.broadcast %37 : vector<1x128xf32> to vector<2x128xf32>
    %383 = arith.addf %381, %382 : vector<2x128xf32>
    %c3 = arith.constant 3 : index
    %c0_161 = arith.constant 0 : index
    %c0_162 = arith.constant 0 : index
    %384 = vector.load %arg15[%c3, %c0_161, %c0_162] : memref<8x2x128xf32, #tpu.memory_space<vmem>>, vector<1x2x128xf32>
    %385 = vector.shape_cast %384 : vector<1x2x128xf32> to vector<2x128xf32>
    %386 = vector.shape_cast %383 : vector<2x128xf32> to vector<1x2x128xf32>
    tpu.vector_store %arg15[%c3, %c0_161, %c0_162], %386 {strides = array<i32>} : memref<8x2x128xf32, #tpu.memory_space<vmem>>, vector<1x2x128xf32>,
    %cst_163 = arith.constant dense<0xFF800000> : vector<2xf32>
    %387 = vector.multi_reduction <maximumf>, %383, %cst_163 [1] : vector<2x128xf32> to vector<2xf32>
    %388 = vector.shape_cast %387 : vector<2xf32> to vector<2x1xf32>
    %389 = vector.broadcast %388 : vector<2x1xf32> to vector<2x128xf32>
    %390 = arith.cmpf oeq, %383, %389 : vector<2x128xf32>
    %c128_i32_164 = arith.constant 128 : i32
    %391 = vector.broadcast %c128_i32_164 : i32 to vector<2x128xi32>
    %392 = arith.select %390, %42, %391 : vector<2x128xi1>, vector<2x128xi32>
    %cst_165 = arith.constant dense<2147483647> : vector<2xi32>
    %393 = vector.multi_reduction <minsi>, %392, %cst_165 [1] : vector<2x128xi32> to vector<2xi32>
    %394 = vector.shape_cast %393 : vector<2xi32> to vector<2x1xi32>
    %395 = vector.broadcast %394 : vector<2x1xi32> to vector<2x128xi32>
    %396 = arith.cmpi eq, %42, %395 : vector<2x128xi32>
    %397 = arith.extui %396 : vector<2x128xi1> to vector<2x128xi32>
    %398 = arith.sitofp %397 : vector<2x128xi32> to vector<2x128xf32>
    %cst_166 = arith.constant dense<0.000000e+00> : vector<2x32xf32>
    %399 = tpu.matmul %378, %33, %cst_166 {dimension_numbers = #tpu.dot_dimension_numbers<[1], [0], [0], [1], [0, 0, 1, 1], [], []>} : vector<2x32xf32>, vector<32x32xf32>, vector<2x32xf32> -> vector<2x32xf32>
    %400 = vector.broadcast %34 : vector<1x32xf32> to vector<2x32xf32>
    %401 = arith.addf %399, %400 : vector<2x32xf32>
    %402 = vector.shape_cast %401 : vector<2x32xf32> to vector<1x2x32xf32>
    %403 = vector.broadcast %402 : vector<1x2x32xf32> to vector<8x2x32xf32>
    %404 = arith.addf %1, %403 : vector<8x2x32xf32>
    %405 = math.tanh %404 : vector<8x2x32xf32>
    %406 = vector.broadcast %2 : vector<1x1x32xf32> to vector<8x2x32xf32>
    %407 = arith.mulf %405, %406 : vector<8x2x32xf32>
    %cst_167 = arith.constant dense<0.000000e+00> : vector<8x2xf32>
    %408 = vector.multi_reduction <add>, %407, %cst_167 [2] : vector<8x2x32xf32> to vector<8x2xf32>
    %409 = vector.shape_cast %408 : vector<8x2xf32> to vector<8x2x1xf32>
    %cst_168 = arith.constant dense<0xFF800000> : vector<2x1xf32>
    %410 = vector.multi_reduction <maximumf>, %409, %cst_168 [0] : vector<8x2x1xf32> to vector<2x1xf32>
    %411 = vector.shape_cast %410 : vector<2x1xf32> to vector<1x2x1xf32>
    %412 = vector.broadcast %411 : vector<1x2x1xf32> to vector<8x2x1xf32>
    %413 = arith.subf %409, %412 : vector<8x2x1xf32>
    %414 = math.exp %413 : vector<8x2x1xf32>
    %cst_169 = arith.constant dense<0.000000e+00> : vector<2x1xf32>
    %415 = vector.multi_reduction <add>, %414, %cst_169 [0] : vector<8x2x1xf32> to vector<2x1xf32>
    %416 = vector.shape_cast %415 : vector<2x1xf32> to vector<1x2x1xf32>
    %417 = tpu.reciprocal %416 {approx = true} : vector<1x2x1xf32> -> vector<1x2x1xf32>
    %418 = vector.broadcast %417 : vector<1x2x1xf32> to vector<8x2x1xf32>
    %419 = arith.mulf %414, %418 : vector<8x2x1xf32>
    %420 = vector.broadcast %419 : vector<8x2x1xf32> to vector<8x2x32xf32>
    %421 = arith.mulf %420, %0 : vector<8x2x32xf32>
    %cst_170 = arith.constant dense<0.000000e+00> : vector<2x32xf32>
    %422 = vector.multi_reduction <add>, %421, %cst_170 [0] : vector<8x2x32xf32> to vector<2x32xf32>
    %cst_171 = arith.constant dense<0.000000e+00> : vector<2x32xf32>
    %423 = tpu.matmul %398, %38, %cst_171 {dimension_numbers = #tpu.dot_dimension_numbers<[1], [0], [0], [1], [0, 0, 1, 1], [], []>} : vector<2x128xf32>, vector<128x32xf32>, vector<2x32xf32> -> vector<2x32xf32>
    %cst_172 = arith.constant dense<0.000000e+00> : vector<2x32xf32>
    %424 = tpu.matmul %423, %4, %cst_172 {dimension_numbers = #tpu.dot_dimension_numbers<[1], [0], [0], [1], [0, 0, 1, 1], [], []>} : vector<2x32xf32>, vector<32x32xf32>, vector<2x32xf32> -> vector<2x32xf32>
    %cst_173 = arith.constant dense<0.000000e+00> : vector<2x32xf32>
    %425 = tpu.matmul %422, %10, %cst_173 {dimension_numbers = #tpu.dot_dimension_numbers<[1], [0], [0], [1], [0, 0, 1, 1], [], []>} : vector<2x32xf32>, vector<32x32xf32>, vector<2x32xf32> -> vector<2x32xf32>
    %426 = arith.addf %424, %425 : vector<2x32xf32>
    %427 = vector.broadcast %22 : vector<1x32xf32> to vector<2x32xf32>
    %428 = arith.addf %426, %427 : vector<2x32xf32>
    %cst_174 = arith.constant dense<0.000000e+00> : vector<2x32xf32>
    %429 = tpu.matmul %423, %6, %cst_174 {dimension_numbers = #tpu.dot_dimension_numbers<[1], [0], [0], [1], [0, 0, 1, 1], [], []>} : vector<2x32xf32>, vector<32x32xf32>, vector<2x32xf32> -> vector<2x32xf32>
    %cst_175 = arith.constant dense<0.000000e+00> : vector<2x32xf32>
    %430 = tpu.matmul %422, %12, %cst_175 {dimension_numbers = #tpu.dot_dimension_numbers<[1], [0], [0], [1], [0, 0, 1, 1], [], []>} : vector<2x32xf32>, vector<32x32xf32>, vector<2x32xf32> -> vector<2x32xf32>
    %431 = arith.addf %429, %430 : vector<2x32xf32>
    %432 = vector.broadcast %24 : vector<1x32xf32> to vector<2x32xf32>
    %433 = arith.addf %431, %432 : vector<2x32xf32>
    %cst_176 = arith.constant dense<0.000000e+00> : vector<2x32xf32>
    %434 = tpu.matmul %423, %8, %cst_176 {dimension_numbers = #tpu.dot_dimension_numbers<[1], [0], [0], [1], [0, 0, 1, 1], [], []>} : vector<2x32xf32>, vector<32x32xf32>, vector<2x32xf32> -> vector<2x32xf32>
    %cst_177 = arith.constant dense<0.000000e+00> : vector<2x32xf32>
    %435 = tpu.matmul %422, %14, %cst_177 {dimension_numbers = #tpu.dot_dimension_numbers<[1], [0], [0], [1], [0, 0, 1, 1], [], []>} : vector<2x32xf32>, vector<32x32xf32>, vector<2x32xf32> -> vector<2x32xf32>
    %436 = arith.addf %434, %435 : vector<2x32xf32>
    %437 = vector.broadcast %26 : vector<1x32xf32> to vector<2x32xf32>
    %438 = arith.addf %436, %437 : vector<2x32xf32>
    %cst_178 = arith.constant dense<0.000000e+00> : vector<2x32xf32>
    %439 = tpu.matmul %378, %16, %cst_178 {dimension_numbers = #tpu.dot_dimension_numbers<[1], [0], [0], [1], [0, 0, 1, 1], [], []>} : vector<2x32xf32>, vector<32x32xf32>, vector<2x32xf32> -> vector<2x32xf32>
    %440 = vector.broadcast %28 : vector<1x32xf32> to vector<2x32xf32>
    %441 = arith.addf %439, %440 : vector<2x32xf32>
    %cst_179 = arith.constant dense<0.000000e+00> : vector<2x32xf32>
    %442 = tpu.matmul %378, %18, %cst_179 {dimension_numbers = #tpu.dot_dimension_numbers<[1], [0], [0], [1], [0, 0, 1, 1], [], []>} : vector<2x32xf32>, vector<32x32xf32>, vector<2x32xf32> -> vector<2x32xf32>
    %443 = vector.broadcast %30 : vector<1x32xf32> to vector<2x32xf32>
    %444 = arith.addf %442, %443 : vector<2x32xf32>
    %cst_180 = arith.constant dense<0.000000e+00> : vector<2x32xf32>
    %445 = tpu.matmul %378, %20, %cst_180 {dimension_numbers = #tpu.dot_dimension_numbers<[1], [0], [0], [1], [0, 0, 1, 1], [], []>} : vector<2x32xf32>, vector<32x32xf32>, vector<2x32xf32> -> vector<2x32xf32>
    %446 = vector.broadcast %32 : vector<1x32xf32> to vector<2x32xf32>
    %447 = arith.addf %445, %446 : vector<2x32xf32>
    %448 = arith.addf %428, %441 : vector<2x32xf32>
    %449 = arith.negf %448 : vector<2x32xf32>
    %450 = math.exp %449 : vector<2x32xf32>
    %cst_181 = arith.constant 1.000000e+00 : f32
    %451 = vector.broadcast %cst_181 : f32 to vector<2x32xf32>
    %452 = arith.addf %451, %450 : vector<2x32xf32>
    %453 = arith.divf %451, %452 : vector<2x32xf32>
    %454 = arith.addf %433, %444 : vector<2x32xf32>
    %455 = arith.negf %454 : vector<2x32xf32>
    %456 = math.exp %455 : vector<2x32xf32>
    %cst_182 = arith.constant 1.000000e+00 : f32
    %457 = vector.broadcast %cst_182 : f32 to vector<2x32xf32>
    %458 = arith.addf %457, %456 : vector<2x32xf32>
    %459 = arith.divf %457, %458 : vector<2x32xf32>
    %460 = arith.mulf %453, %447 : vector<2x32xf32>
    %461 = arith.addf %438, %460 : vector<2x32xf32>
    %462 = math.tanh %461 : vector<2x32xf32>
    %cst_183 = arith.constant 1.000000e+00 : f32
    %463 = vector.broadcast %cst_183 : f32 to vector<2x32xf32>
    %464 = arith.subf %463, %459 : vector<2x32xf32>
    %465 = arith.mulf %464, %462 : vector<2x32xf32>
    %466 = arith.mulf %459, %378 : vector<2x32xf32>
    %467 = arith.addf %465, %466 : vector<2x32xf32>
    %cst_184 = arith.constant dense<0.000000e+00> : vector<2x128xf32>
    %468 = tpu.matmul %467, %35, %cst_184 {dimension_numbers = #tpu.dot_dimension_numbers<[1], [0], [0], [1], [0, 0, 1, 1], [], []>} : vector<2x32xf32>, vector<32x128xf32>, vector<2x128xf32> -> vector<2x128xf32>
    %cst_185 = arith.constant dense<0.000000e+00> : vector<2x128xf32>
    %469 = tpu.matmul %422, %36, %cst_185 {dimension_numbers = #tpu.dot_dimension_numbers<[1], [0], [0], [1], [0, 0, 1, 1], [], []>} : vector<2x32xf32>, vector<32x128xf32>, vector<2x128xf32> -> vector<2x128xf32>
    %470 = arith.addf %468, %469 : vector<2x128xf32>
    %471 = vector.broadcast %37 : vector<1x128xf32> to vector<2x128xf32>
    %472 = arith.addf %470, %471 : vector<2x128xf32>
    %c4 = arith.constant 4 : index
    %c0_186 = arith.constant 0 : index
    %c0_187 = arith.constant 0 : index
    %473 = vector.load %arg15[%c4, %c0_186, %c0_187] : memref<8x2x128xf32, #tpu.memory_space<vmem>>, vector<1x2x128xf32>
    %474 = vector.shape_cast %473 : vector<1x2x128xf32> to vector<2x128xf32>
    %475 = vector.shape_cast %472 : vector<2x128xf32> to vector<1x2x128xf32>
    tpu.vector_store %arg15[%c4, %c0_186, %c0_187], %475 {strides = array<i32>} : memref<8x2x128xf32, #tpu.memory_space<vmem>>, vector<1x2x128xf32>,
    %cst_188 = arith.constant dense<0xFF800000> : vector<2xf32>
    %476 = vector.multi_reduction <maximumf>, %472, %cst_188 [1] : vector<2x128xf32> to vector<2xf32>
    %477 = vector.shape_cast %476 : vector<2xf32> to vector<2x1xf32>
    %478 = vector.broadcast %477 : vector<2x1xf32> to vector<2x128xf32>
    %479 = arith.cmpf oeq, %472, %478 : vector<2x128xf32>
    %c128_i32_189 = arith.constant 128 : i32
    %480 = vector.broadcast %c128_i32_189 : i32 to vector<2x128xi32>
    %481 = arith.select %479, %42, %480 : vector<2x128xi1>, vector<2x128xi32>
    %cst_190 = arith.constant dense<2147483647> : vector<2xi32>
    %482 = vector.multi_reduction <minsi>, %481, %cst_190 [1] : vector<2x128xi32> to vector<2xi32>
    %483 = vector.shape_cast %482 : vector<2xi32> to vector<2x1xi32>
    %484 = vector.broadcast %483 : vector<2x1xi32> to vector<2x128xi32>
    %485 = arith.cmpi eq, %42, %484 : vector<2x128xi32>
    %486 = arith.extui %485 : vector<2x128xi1> to vector<2x128xi32>
    %487 = arith.sitofp %486 : vector<2x128xi32> to vector<2x128xf32>
    %cst_191 = arith.constant dense<0.000000e+00> : vector<2x32xf32>
    %488 = tpu.matmul %467, %33, %cst_191 {dimension_numbers = #tpu.dot_dimension_numbers<[1], [0], [0], [1], [0, 0, 1, 1], [], []>} : vector<2x32xf32>, vector<32x32xf32>, vector<2x32xf32> -> vector<2x32xf32>
    %489 = vector.broadcast %34 : vector<1x32xf32> to vector<2x32xf32>
    %490 = arith.addf %488, %489 : vector<2x32xf32>
    %491 = vector.shape_cast %490 : vector<2x32xf32> to vector<1x2x32xf32>
    %492 = vector.broadcast %491 : vector<1x2x32xf32> to vector<8x2x32xf32>
    %493 = arith.addf %1, %492 : vector<8x2x32xf32>
    %494 = math.tanh %493 : vector<8x2x32xf32>
    %495 = vector.broadcast %2 : vector<1x1x32xf32> to vector<8x2x32xf32>
    %496 = arith.mulf %494, %495 : vector<8x2x32xf32>
    %cst_192 = arith.constant dense<0.000000e+00> : vector<8x2xf32>
    %497 = vector.multi_reduction <add>, %496, %cst_192 [2] : vector<8x2x32xf32> to vector<8x2xf32>
    %498 = vector.shape_cast %497 : vector<8x2xf32> to vector<8x2x1xf32>
    %cst_193 = arith.constant dense<0xFF800000> : vector<2x1xf32>
    %499 = vector.multi_reduction <maximumf>, %498, %cst_193 [0] : vector<8x2x1xf32> to vector<2x1xf32>
    %500 = vector.shape_cast %499 : vector<2x1xf32> to vector<1x2x1xf32>
    %501 = vector.broadcast %500 : vector<1x2x1xf32> to vector<8x2x1xf32>
    %502 = arith.subf %498, %501 : vector<8x2x1xf32>
    %503 = math.exp %502 : vector<8x2x1xf32>
    %cst_194 = arith.constant dense<0.000000e+00> : vector<2x1xf32>
    %504 = vector.multi_reduction <add>, %503, %cst_194 [0] : vector<8x2x1xf32> to vector<2x1xf32>
    %505 = vector.shape_cast %504 : vector<2x1xf32> to vector<1x2x1xf32>
    %506 = tpu.reciprocal %505 {approx = true} : vector<1x2x1xf32> -> vector<1x2x1xf32>
    %507 = vector.broadcast %506 : vector<1x2x1xf32> to vector<8x2x1xf32>
    %508 = arith.mulf %503, %507 : vector<8x2x1xf32>
    %509 = vector.broadcast %508 : vector<8x2x1xf32> to vector<8x2x32xf32>
    %510 = arith.mulf %509, %0 : vector<8x2x32xf32>
    %cst_195 = arith.constant dense<0.000000e+00> : vector<2x32xf32>
    %511 = vector.multi_reduction <add>, %510, %cst_195 [0] : vector<8x2x32xf32> to vector<2x32xf32>
    %cst_196 = arith.constant dense<0.000000e+00> : vector<2x32xf32>
    %512 = tpu.matmul %487, %38, %cst_196 {dimension_numbers = #tpu.dot_dimension_numbers<[1], [0], [0], [1], [0, 0, 1, 1], [], []>} : vector<2x128xf32>, vector<128x32xf32>, vector<2x32xf32> -> vector<2x32xf32>
    %cst_197 = arith.constant dense<0.000000e+00> : vector<2x32xf32>
    %513 = tpu.matmul %512, %4, %cst_197 {dimension_numbers = #tpu.dot_dimension_numbers<[1], [0], [0], [1], [0, 0, 1, 1], [], []>} : vector<2x32xf32>, vector<32x32xf32>, vector<2x32xf32> -> vector<2x32xf32>
    %cst_198 = arith.constant dense<0.000000e+00> : vector<2x32xf32>
    %514 = tpu.matmul %511, %10, %cst_198 {dimension_numbers = #tpu.dot_dimension_numbers<[1], [0], [0], [1], [0, 0, 1, 1], [], []>} : vector<2x32xf32>, vector<32x32xf32>, vector<2x32xf32> -> vector<2x32xf32>
    %515 = arith.addf %513, %514 : vector<2x32xf32>
    %516 = vector.broadcast %22 : vector<1x32xf32> to vector<2x32xf32>
    %517 = arith.addf %515, %516 : vector<2x32xf32>
    %cst_199 = arith.constant dense<0.000000e+00> : vector<2x32xf32>
    %518 = tpu.matmul %512, %6, %cst_199 {dimension_numbers = #tpu.dot_dimension_numbers<[1], [0], [0], [1], [0, 0, 1, 1], [], []>} : vector<2x32xf32>, vector<32x32xf32>, vector<2x32xf32> -> vector<2x32xf32>
    %cst_200 = arith.constant dense<0.000000e+00> : vector<2x32xf32>
    %519 = tpu.matmul %511, %12, %cst_200 {dimension_numbers = #tpu.dot_dimension_numbers<[1], [0], [0], [1], [0, 0, 1, 1], [], []>} : vector<2x32xf32>, vector<32x32xf32>, vector<2x32xf32> -> vector<2x32xf32>
    %520 = arith.addf %518, %519 : vector<2x32xf32>
    %521 = vector.broadcast %24 : vector<1x32xf32> to vector<2x32xf32>
    %522 = arith.addf %520, %521 : vector<2x32xf32>
    %cst_201 = arith.constant dense<0.000000e+00> : vector<2x32xf32>
    %523 = tpu.matmul %512, %8, %cst_201 {dimension_numbers = #tpu.dot_dimension_numbers<[1], [0], [0], [1], [0, 0, 1, 1], [], []>} : vector<2x32xf32>, vector<32x32xf32>, vector<2x32xf32> -> vector<2x32xf32>
    %cst_202 = arith.constant dense<0.000000e+00> : vector<2x32xf32>
    %524 = tpu.matmul %511, %14, %cst_202 {dimension_numbers = #tpu.dot_dimension_numbers<[1], [0], [0], [1], [0, 0, 1, 1], [], []>} : vector<2x32xf32>, vector<32x32xf32>, vector<2x32xf32> -> vector<2x32xf32>
    %525 = arith.addf %523, %524 : vector<2x32xf32>
    %526 = vector.broadcast %26 : vector<1x32xf32> to vector<2x32xf32>
    %527 = arith.addf %525, %526 : vector<2x32xf32>
    %cst_203 = arith.constant dense<0.000000e+00> : vector<2x32xf32>
    %528 = tpu.matmul %467, %16, %cst_203 {dimension_numbers = #tpu.dot_dimension_numbers<[1], [0], [0], [1], [0, 0, 1, 1], [], []>} : vector<2x32xf32>, vector<32x32xf32>, vector<2x32xf32> -> vector<2x32xf32>
    %529 = vector.broadcast %28 : vector<1x32xf32> to vector<2x32xf32>
    %530 = arith.addf %528, %529 : vector<2x32xf32>
    %cst_204 = arith.constant dense<0.000000e+00> : vector<2x32xf32>
    %531 = tpu.matmul %467, %18, %cst_204 {dimension_numbers = #tpu.dot_dimension_numbers<[1], [0], [0], [1], [0, 0, 1, 1], [], []>} : vector<2x32xf32>, vector<32x32xf32>, vector<2x32xf32> -> vector<2x32xf32>
    %532 = vector.broadcast %30 : vector<1x32xf32> to vector<2x32xf32>
    %533 = arith.addf %531, %532 : vector<2x32xf32>
    %cst_205 = arith.constant dense<0.000000e+00> : vector<2x32xf32>
    %534 = tpu.matmul %467, %20, %cst_205 {dimension_numbers = #tpu.dot_dimension_numbers<[1], [0], [0], [1], [0, 0, 1, 1], [], []>} : vector<2x32xf32>, vector<32x32xf32>, vector<2x32xf32> -> vector<2x32xf32>
    %535 = vector.broadcast %32 : vector<1x32xf32> to vector<2x32xf32>
    %536 = arith.addf %534, %535 : vector<2x32xf32>
    %537 = arith.addf %517, %530 : vector<2x32xf32>
    %538 = arith.negf %537 : vector<2x32xf32>
    %539 = math.exp %538 : vector<2x32xf32>
    %cst_206 = arith.constant 1.000000e+00 : f32
    %540 = vector.broadcast %cst_206 : f32 to vector<2x32xf32>
    %541 = arith.addf %540, %539 : vector<2x32xf32>
    %542 = arith.divf %540, %541 : vector<2x32xf32>
    %543 = arith.addf %522, %533 : vector<2x32xf32>
    %544 = arith.negf %543 : vector<2x32xf32>
    %545 = math.exp %544 : vector<2x32xf32>
    %cst_207 = arith.constant 1.000000e+00 : f32
    %546 = vector.broadcast %cst_207 : f32 to vector<2x32xf32>
    %547 = arith.addf %546, %545 : vector<2x32xf32>
    %548 = arith.divf %546, %547 : vector<2x32xf32>
    %549 = arith.mulf %542, %536 : vector<2x32xf32>
    %550 = arith.addf %527, %549 : vector<2x32xf32>
    %551 = math.tanh %550 : vector<2x32xf32>
    %cst_208 = arith.constant 1.000000e+00 : f32
    %552 = vector.broadcast %cst_208 : f32 to vector<2x32xf32>
    %553 = arith.subf %552, %548 : vector<2x32xf32>
    %554 = arith.mulf %553, %551 : vector<2x32xf32>
    %555 = arith.mulf %548, %467 : vector<2x32xf32>
    %556 = arith.addf %554, %555 : vector<2x32xf32>
    %cst_209 = arith.constant dense<0.000000e+00> : vector<2x128xf32>
    %557 = tpu.matmul %556, %35, %cst_209 {dimension_numbers = #tpu.dot_dimension_numbers<[1], [0], [0], [1], [0, 0, 1, 1], [], []>} : vector<2x32xf32>, vector<32x128xf32>, vector<2x128xf32> -> vector<2x128xf32>
    %cst_210 = arith.constant dense<0.000000e+00> : vector<2x128xf32>
    %558 = tpu.matmul %511, %36, %cst_210 {dimension_numbers = #tpu.dot_dimension_numbers<[1], [0], [0], [1], [0, 0, 1, 1], [], []>} : vector<2x32xf32>, vector<32x128xf32>, vector<2x128xf32> -> vector<2x128xf32>
    %559 = arith.addf %557, %558 : vector<2x128xf32>
    %560 = vector.broadcast %37 : vector<1x128xf32> to vector<2x128xf32>
    %561 = arith.addf %559, %560 : vector<2x128xf32>
    %c5 = arith.constant 5 : index
    %c0_211 = arith.constant 0 : index
    %c0_212 = arith.constant 0 : index
    %562 = vector.load %arg15[%c5, %c0_211, %c0_212] : memref<8x2x128xf32, #tpu.memory_space<vmem>>, vector<1x2x128xf32>
    %563 = vector.shape_cast %562 : vector<1x2x128xf32> to vector<2x128xf32>
    %564 = vector.shape_cast %561 : vector<2x128xf32> to vector<1x2x128xf32>
    tpu.vector_store %arg15[%c5, %c0_211, %c0_212], %564 {strides = array<i32>} : memref<8x2x128xf32, #tpu.memory_space<vmem>>, vector<1x2x128xf32>,
    %cst_213 = arith.constant dense<0xFF800000> : vector<2xf32>
    %565 = vector.multi_reduction <maximumf>, %561, %cst_213 [1] : vector<2x128xf32> to vector<2xf32>
    %566 = vector.shape_cast %565 : vector<2xf32> to vector<2x1xf32>
    %567 = vector.broadcast %566 : vector<2x1xf32> to vector<2x128xf32>
    %568 = arith.cmpf oeq, %561, %567 : vector<2x128xf32>
    %c128_i32_214 = arith.constant 128 : i32
    %569 = vector.broadcast %c128_i32_214 : i32 to vector<2x128xi32>
    %570 = arith.select %568, %42, %569 : vector<2x128xi1>, vector<2x128xi32>
    %cst_215 = arith.constant dense<2147483647> : vector<2xi32>
    %571 = vector.multi_reduction <minsi>, %570, %cst_215 [1] : vector<2x128xi32> to vector<2xi32>
    %572 = vector.shape_cast %571 : vector<2xi32> to vector<2x1xi32>
    %573 = vector.broadcast %572 : vector<2x1xi32> to vector<2x128xi32>
    %574 = arith.cmpi eq, %42, %573 : vector<2x128xi32>
    %575 = arith.extui %574 : vector<2x128xi1> to vector<2x128xi32>
    %576 = arith.sitofp %575 : vector<2x128xi32> to vector<2x128xf32>
    %cst_216 = arith.constant dense<0.000000e+00> : vector<2x32xf32>
    %577 = tpu.matmul %556, %33, %cst_216 {dimension_numbers = #tpu.dot_dimension_numbers<[1], [0], [0], [1], [0, 0, 1, 1], [], []>} : vector<2x32xf32>, vector<32x32xf32>, vector<2x32xf32> -> vector<2x32xf32>
    %578 = vector.broadcast %34 : vector<1x32xf32> to vector<2x32xf32>
    %579 = arith.addf %577, %578 : vector<2x32xf32>
    %580 = vector.shape_cast %579 : vector<2x32xf32> to vector<1x2x32xf32>
    %581 = vector.broadcast %580 : vector<1x2x32xf32> to vector<8x2x32xf32>
    %582 = arith.addf %1, %581 : vector<8x2x32xf32>
    %583 = math.tanh %582 : vector<8x2x32xf32>
    %584 = vector.broadcast %2 : vector<1x1x32xf32> to vector<8x2x32xf32>
    %585 = arith.mulf %583, %584 : vector<8x2x32xf32>
    %cst_217 = arith.constant dense<0.000000e+00> : vector<8x2xf32>
    %586 = vector.multi_reduction <add>, %585, %cst_217 [2] : vector<8x2x32xf32> to vector<8x2xf32>
    %587 = vector.shape_cast %586 : vector<8x2xf32> to vector<8x2x1xf32>
    %cst_218 = arith.constant dense<0xFF800000> : vector<2x1xf32>
    %588 = vector.multi_reduction <maximumf>, %587, %cst_218 [0] : vector<8x2x1xf32> to vector<2x1xf32>
    %589 = vector.shape_cast %588 : vector<2x1xf32> to vector<1x2x1xf32>
    %590 = vector.broadcast %589 : vector<1x2x1xf32> to vector<8x2x1xf32>
    %591 = arith.subf %587, %590 : vector<8x2x1xf32>
    %592 = math.exp %591 : vector<8x2x1xf32>
    %cst_219 = arith.constant dense<0.000000e+00> : vector<2x1xf32>
    %593 = vector.multi_reduction <add>, %592, %cst_219 [0] : vector<8x2x1xf32> to vector<2x1xf32>
    %594 = vector.shape_cast %593 : vector<2x1xf32> to vector<1x2x1xf32>
    %595 = tpu.reciprocal %594 {approx = true} : vector<1x2x1xf32> -> vector<1x2x1xf32>
    %596 = vector.broadcast %595 : vector<1x2x1xf32> to vector<8x2x1xf32>
    %597 = arith.mulf %592, %596 : vector<8x2x1xf32>
    %598 = vector.broadcast %597 : vector<8x2x1xf32> to vector<8x2x32xf32>
    %599 = arith.mulf %598, %0 : vector<8x2x32xf32>
    %cst_220 = arith.constant dense<0.000000e+00> : vector<2x32xf32>
    %600 = vector.multi_reduction <add>, %599, %cst_220 [0] : vector<8x2x32xf32> to vector<2x32xf32>
    %cst_221 = arith.constant dense<0.000000e+00> : vector<2x32xf32>
    %601 = tpu.matmul %576, %38, %cst_221 {dimension_numbers = #tpu.dot_dimension_numbers<[1], [0], [0], [1], [0, 0, 1, 1], [], []>} : vector<2x128xf32>, vector<128x32xf32>, vector<2x32xf32> -> vector<2x32xf32>
    %cst_222 = arith.constant dense<0.000000e+00> : vector<2x32xf32>
    %602 = tpu.matmul %601, %4, %cst_222 {dimension_numbers = #tpu.dot_dimension_numbers<[1], [0], [0], [1], [0, 0, 1, 1], [], []>} : vector<2x32xf32>, vector<32x32xf32>, vector<2x32xf32> -> vector<2x32xf32>
    %cst_223 = arith.constant dense<0.000000e+00> : vector<2x32xf32>
    %603 = tpu.matmul %600, %10, %cst_223 {dimension_numbers = #tpu.dot_dimension_numbers<[1], [0], [0], [1], [0, 0, 1, 1], [], []>} : vector<2x32xf32>, vector<32x32xf32>, vector<2x32xf32> -> vector<2x32xf32>
    %604 = arith.addf %602, %603 : vector<2x32xf32>
    %605 = vector.broadcast %22 : vector<1x32xf32> to vector<2x32xf32>
    %606 = arith.addf %604, %605 : vector<2x32xf32>
    %cst_224 = arith.constant dense<0.000000e+00> : vector<2x32xf32>
    %607 = tpu.matmul %601, %6, %cst_224 {dimension_numbers = #tpu.dot_dimension_numbers<[1], [0], [0], [1], [0, 0, 1, 1], [], []>} : vector<2x32xf32>, vector<32x32xf32>, vector<2x32xf32> -> vector<2x32xf32>
    %cst_225 = arith.constant dense<0.000000e+00> : vector<2x32xf32>
    %608 = tpu.matmul %600, %12, %cst_225 {dimension_numbers = #tpu.dot_dimension_numbers<[1], [0], [0], [1], [0, 0, 1, 1], [], []>} : vector<2x32xf32>, vector<32x32xf32>, vector<2x32xf32> -> vector<2x32xf32>
    %609 = arith.addf %607, %608 : vector<2x32xf32>
    %610 = vector.broadcast %24 : vector<1x32xf32> to vector<2x32xf32>
    %611 = arith.addf %609, %610 : vector<2x32xf32>
    %cst_226 = arith.constant dense<0.000000e+00> : vector<2x32xf32>
    %612 = tpu.matmul %601, %8, %cst_226 {dimension_numbers = #tpu.dot_dimension_numbers<[1], [0], [0], [1], [0, 0, 1, 1], [], []>} : vector<2x32xf32>, vector<32x32xf32>, vector<2x32xf32> -> vector<2x32xf32>
    %cst_227 = arith.constant dense<0.000000e+00> : vector<2x32xf32>
    %613 = tpu.matmul %600, %14, %cst_227 {dimension_numbers = #tpu.dot_dimension_numbers<[1], [0], [0], [1], [0, 0, 1, 1], [], []>} : vector<2x32xf32>, vector<32x32xf32>, vector<2x32xf32> -> vector<2x32xf32>
    %614 = arith.addf %612, %613 : vector<2x32xf32>
    %615 = vector.broadcast %26 : vector<1x32xf32> to vector<2x32xf32>
    %616 = arith.addf %614, %615 : vector<2x32xf32>
    %cst_228 = arith.constant dense<0.000000e+00> : vector<2x32xf32>
    %617 = tpu.matmul %556, %16, %cst_228 {dimension_numbers = #tpu.dot_dimension_numbers<[1], [0], [0], [1], [0, 0, 1, 1], [], []>} : vector<2x32xf32>, vector<32x32xf32>, vector<2x32xf32> -> vector<2x32xf32>
    %618 = vector.broadcast %28 : vector<1x32xf32> to vector<2x32xf32>
    %619 = arith.addf %617, %618 : vector<2x32xf32>
    %cst_229 = arith.constant dense<0.000000e+00> : vector<2x32xf32>
    %620 = tpu.matmul %556, %18, %cst_229 {dimension_numbers = #tpu.dot_dimension_numbers<[1], [0], [0], [1], [0, 0, 1, 1], [], []>} : vector<2x32xf32>, vector<32x32xf32>, vector<2x32xf32> -> vector<2x32xf32>
    %621 = vector.broadcast %30 : vector<1x32xf32> to vector<2x32xf32>
    %622 = arith.addf %620, %621 : vector<2x32xf32>
    %cst_230 = arith.constant dense<0.000000e+00> : vector<2x32xf32>
    %623 = tpu.matmul %556, %20, %cst_230 {dimension_numbers = #tpu.dot_dimension_numbers<[1], [0], [0], [1], [0, 0, 1, 1], [], []>} : vector<2x32xf32>, vector<32x32xf32>, vector<2x32xf32> -> vector<2x32xf32>
    %624 = vector.broadcast %32 : vector<1x32xf32> to vector<2x32xf32>
    %625 = arith.addf %623, %624 : vector<2x32xf32>
    %626 = arith.addf %606, %619 : vector<2x32xf32>
    %627 = arith.negf %626 : vector<2x32xf32>
    %628 = math.exp %627 : vector<2x32xf32>
    %cst_231 = arith.constant 1.000000e+00 : f32
    %629 = vector.broadcast %cst_231 : f32 to vector<2x32xf32>
    %630 = arith.addf %629, %628 : vector<2x32xf32>
    %631 = arith.divf %629, %630 : vector<2x32xf32>
    %632 = arith.addf %611, %622 : vector<2x32xf32>
    %633 = arith.negf %632 : vector<2x32xf32>
    %634 = math.exp %633 : vector<2x32xf32>
    %cst_232 = arith.constant 1.000000e+00 : f32
    %635 = vector.broadcast %cst_232 : f32 to vector<2x32xf32>
    %636 = arith.addf %635, %634 : vector<2x32xf32>
    %637 = arith.divf %635, %636 : vector<2x32xf32>
    %638 = arith.mulf %631, %625 : vector<2x32xf32>
    %639 = arith.addf %616, %638 : vector<2x32xf32>
    %640 = math.tanh %639 : vector<2x32xf32>
    %cst_233 = arith.constant 1.000000e+00 : f32
    %641 = vector.broadcast %cst_233 : f32 to vector<2x32xf32>
    %642 = arith.subf %641, %637 : vector<2x32xf32>
    %643 = arith.mulf %642, %640 : vector<2x32xf32>
    %644 = arith.mulf %637, %556 : vector<2x32xf32>
    %645 = arith.addf %643, %644 : vector<2x32xf32>
    %cst_234 = arith.constant dense<0.000000e+00> : vector<2x128xf32>
    %646 = tpu.matmul %645, %35, %cst_234 {dimension_numbers = #tpu.dot_dimension_numbers<[1], [0], [0], [1], [0, 0, 1, 1], [], []>} : vector<2x32xf32>, vector<32x128xf32>, vector<2x128xf32> -> vector<2x128xf32>
    %cst_235 = arith.constant dense<0.000000e+00> : vector<2x128xf32>
    %647 = tpu.matmul %600, %36, %cst_235 {dimension_numbers = #tpu.dot_dimension_numbers<[1], [0], [0], [1], [0, 0, 1, 1], [], []>} : vector<2x32xf32>, vector<32x128xf32>, vector<2x128xf32> -> vector<2x128xf32>
    %648 = arith.addf %646, %647 : vector<2x128xf32>
    %649 = vector.broadcast %37 : vector<1x128xf32> to vector<2x128xf32>
    %650 = arith.addf %648, %649 : vector<2x128xf32>
    %c6 = arith.constant 6 : index
    %c0_236 = arith.constant 0 : index
    %c0_237 = arith.constant 0 : index
    %651 = vector.load %arg15[%c6, %c0_236, %c0_237] : memref<8x2x128xf32, #tpu.memory_space<vmem>>, vector<1x2x128xf32>
    %652 = vector.shape_cast %651 : vector<1x2x128xf32> to vector<2x128xf32>
    %653 = vector.shape_cast %650 : vector<2x128xf32> to vector<1x2x128xf32>
    tpu.vector_store %arg15[%c6, %c0_236, %c0_237], %653 {strides = array<i32>} : memref<8x2x128xf32, #tpu.memory_space<vmem>>, vector<1x2x128xf32>,
    %cst_238 = arith.constant dense<0xFF800000> : vector<2xf32>
    %654 = vector.multi_reduction <maximumf>, %650, %cst_238 [1] : vector<2x128xf32> to vector<2xf32>
    %655 = vector.shape_cast %654 : vector<2xf32> to vector<2x1xf32>
    %656 = vector.broadcast %655 : vector<2x1xf32> to vector<2x128xf32>
    %657 = arith.cmpf oeq, %650, %656 : vector<2x128xf32>
    %c128_i32_239 = arith.constant 128 : i32
    %658 = vector.broadcast %c128_i32_239 : i32 to vector<2x128xi32>
    %659 = arith.select %657, %42, %658 : vector<2x128xi1>, vector<2x128xi32>
    %cst_240 = arith.constant dense<2147483647> : vector<2xi32>
    %660 = vector.multi_reduction <minsi>, %659, %cst_240 [1] : vector<2x128xi32> to vector<2xi32>
    %661 = vector.shape_cast %660 : vector<2xi32> to vector<2x1xi32>
    %662 = vector.broadcast %661 : vector<2x1xi32> to vector<2x128xi32>
    %663 = arith.cmpi eq, %42, %662 : vector<2x128xi32>
    %664 = arith.extui %663 : vector<2x128xi1> to vector<2x128xi32>
    %665 = arith.sitofp %664 : vector<2x128xi32> to vector<2x128xf32>
    %cst_241 = arith.constant dense<0.000000e+00> : vector<2x32xf32>
    %666 = tpu.matmul %645, %33, %cst_241 {dimension_numbers = #tpu.dot_dimension_numbers<[1], [0], [0], [1], [0, 0, 1, 1], [], []>} : vector<2x32xf32>, vector<32x32xf32>, vector<2x32xf32> -> vector<2x32xf32>
    %667 = vector.broadcast %34 : vector<1x32xf32> to vector<2x32xf32>
    %668 = arith.addf %666, %667 : vector<2x32xf32>
    %669 = vector.shape_cast %668 : vector<2x32xf32> to vector<1x2x32xf32>
    %670 = vector.broadcast %669 : vector<1x2x32xf32> to vector<8x2x32xf32>
    %671 = arith.addf %1, %670 : vector<8x2x32xf32>
    %672 = math.tanh %671 : vector<8x2x32xf32>
    %673 = vector.broadcast %2 : vector<1x1x32xf32> to vector<8x2x32xf32>
    %674 = arith.mulf %672, %673 : vector<8x2x32xf32>
    %cst_242 = arith.constant dense<0.000000e+00> : vector<8x2xf32>
    %675 = vector.multi_reduction <add>, %674, %cst_242 [2] : vector<8x2x32xf32> to vector<8x2xf32>
    %676 = vector.shape_cast %675 : vector<8x2xf32> to vector<8x2x1xf32>
    %cst_243 = arith.constant dense<0xFF800000> : vector<2x1xf32>
    %677 = vector.multi_reduction <maximumf>, %676, %cst_243 [0] : vector<8x2x1xf32> to vector<2x1xf32>
    %678 = vector.shape_cast %677 : vector<2x1xf32> to vector<1x2x1xf32>
    %679 = vector.broadcast %678 : vector<1x2x1xf32> to vector<8x2x1xf32>
    %680 = arith.subf %676, %679 : vector<8x2x1xf32>
    %681 = math.exp %680 : vector<8x2x1xf32>
    %cst_244 = arith.constant dense<0.000000e+00> : vector<2x1xf32>
    %682 = vector.multi_reduction <add>, %681, %cst_244 [0] : vector<8x2x1xf32> to vector<2x1xf32>
    %683 = vector.shape_cast %682 : vector<2x1xf32> to vector<1x2x1xf32>
    %684 = tpu.reciprocal %683 {approx = true} : vector<1x2x1xf32> -> vector<1x2x1xf32>
    %685 = vector.broadcast %684 : vector<1x2x1xf32> to vector<8x2x1xf32>
    %686 = arith.mulf %681, %685 : vector<8x2x1xf32>
    %687 = vector.broadcast %686 : vector<8x2x1xf32> to vector<8x2x32xf32>
    %688 = arith.mulf %687, %0 : vector<8x2x32xf32>
    %cst_245 = arith.constant dense<0.000000e+00> : vector<2x32xf32>
    %689 = vector.multi_reduction <add>, %688, %cst_245 [0] : vector<8x2x32xf32> to vector<2x32xf32>
    %cst_246 = arith.constant dense<0.000000e+00> : vector<2x32xf32>
    %690 = tpu.matmul %665, %38, %cst_246 {dimension_numbers = #tpu.dot_dimension_numbers<[1], [0], [0], [1], [0, 0, 1, 1], [], []>} : vector<2x128xf32>, vector<128x32xf32>, vector<2x32xf32> -> vector<2x32xf32>
    %cst_247 = arith.constant dense<0.000000e+00> : vector<2x32xf32>
    %691 = tpu.matmul %690, %4, %cst_247 {dimension_numbers = #tpu.dot_dimension_numbers<[1], [0], [0], [1], [0, 0, 1, 1], [], []>} : vector<2x32xf32>, vector<32x32xf32>, vector<2x32xf32> -> vector<2x32xf32>
    %cst_248 = arith.constant dense<0.000000e+00> : vector<2x32xf32>
    %692 = tpu.matmul %689, %10, %cst_248 {dimension_numbers = #tpu.dot_dimension_numbers<[1], [0], [0], [1], [0, 0, 1, 1], [], []>} : vector<2x32xf32>, vector<32x32xf32>, vector<2x32xf32> -> vector<2x32xf32>
    %693 = arith.addf %691, %692 : vector<2x32xf32>
    %694 = vector.broadcast %22 : vector<1x32xf32> to vector<2x32xf32>
    %695 = arith.addf %693, %694 : vector<2x32xf32>
    %cst_249 = arith.constant dense<0.000000e+00> : vector<2x32xf32>
    %696 = tpu.matmul %690, %6, %cst_249 {dimension_numbers = #tpu.dot_dimension_numbers<[1], [0], [0], [1], [0, 0, 1, 1], [], []>} : vector<2x32xf32>, vector<32x32xf32>, vector<2x32xf32> -> vector<2x32xf32>
    %cst_250 = arith.constant dense<0.000000e+00> : vector<2x32xf32>
    %697 = tpu.matmul %689, %12, %cst_250 {dimension_numbers = #tpu.dot_dimension_numbers<[1], [0], [0], [1], [0, 0, 1, 1], [], []>} : vector<2x32xf32>, vector<32x32xf32>, vector<2x32xf32> -> vector<2x32xf32>
    %698 = arith.addf %696, %697 : vector<2x32xf32>
    %699 = vector.broadcast %24 : vector<1x32xf32> to vector<2x32xf32>
    %700 = arith.addf %698, %699 : vector<2x32xf32>
    %cst_251 = arith.constant dense<0.000000e+00> : vector<2x32xf32>
    %701 = tpu.matmul %690, %8, %cst_251 {dimension_numbers = #tpu.dot_dimension_numbers<[1], [0], [0], [1], [0, 0, 1, 1], [], []>} : vector<2x32xf32>, vector<32x32xf32>, vector<2x32xf32> -> vector<2x32xf32>
    %cst_252 = arith.constant dense<0.000000e+00> : vector<2x32xf32>
    %702 = tpu.matmul %689, %14, %cst_252 {dimension_numbers = #tpu.dot_dimension_numbers<[1], [0], [0], [1], [0, 0, 1, 1], [], []>} : vector<2x32xf32>, vector<32x32xf32>, vector<2x32xf32> -> vector<2x32xf32>
    %703 = arith.addf %701, %702 : vector<2x32xf32>
    %704 = vector.broadcast %26 : vector<1x32xf32> to vector<2x32xf32>
    %705 = arith.addf %703, %704 : vector<2x32xf32>
    %cst_253 = arith.constant dense<0.000000e+00> : vector<2x32xf32>
    %706 = tpu.matmul %645, %16, %cst_253 {dimension_numbers = #tpu.dot_dimension_numbers<[1], [0], [0], [1], [0, 0, 1, 1], [], []>} : vector<2x32xf32>, vector<32x32xf32>, vector<2x32xf32> -> vector<2x32xf32>
    %707 = vector.broadcast %28 : vector<1x32xf32> to vector<2x32xf32>
    %708 = arith.addf %706, %707 : vector<2x32xf32>
    %cst_254 = arith.constant dense<0.000000e+00> : vector<2x32xf32>
    %709 = tpu.matmul %645, %18, %cst_254 {dimension_numbers = #tpu.dot_dimension_numbers<[1], [0], [0], [1], [0, 0, 1, 1], [], []>} : vector<2x32xf32>, vector<32x32xf32>, vector<2x32xf32> -> vector<2x32xf32>
    %710 = vector.broadcast %30 : vector<1x32xf32> to vector<2x32xf32>
    %711 = arith.addf %709, %710 : vector<2x32xf32>
    %cst_255 = arith.constant dense<0.000000e+00> : vector<2x32xf32>
    %712 = tpu.matmul %645, %20, %cst_255 {dimension_numbers = #tpu.dot_dimension_numbers<[1], [0], [0], [1], [0, 0, 1, 1], [], []>} : vector<2x32xf32>, vector<32x32xf32>, vector<2x32xf32> -> vector<2x32xf32>
    %713 = vector.broadcast %32 : vector<1x32xf32> to vector<2x32xf32>
    %714 = arith.addf %712, %713 : vector<2x32xf32>
    %715 = arith.addf %695, %708 : vector<2x32xf32>
    %716 = arith.negf %715 : vector<2x32xf32>
    %717 = math.exp %716 : vector<2x32xf32>
    %cst_256 = arith.constant 1.000000e+00 : f32
    %718 = vector.broadcast %cst_256 : f32 to vector<2x32xf32>
    %719 = arith.addf %718, %717 : vector<2x32xf32>
    %720 = arith.divf %718, %719 : vector<2x32xf32>
    %721 = arith.addf %700, %711 : vector<2x32xf32>
    %722 = arith.negf %721 : vector<2x32xf32>
    %723 = math.exp %722 : vector<2x32xf32>
    %cst_257 = arith.constant 1.000000e+00 : f32
    %724 = vector.broadcast %cst_257 : f32 to vector<2x32xf32>
    %725 = arith.addf %724, %723 : vector<2x32xf32>
    %726 = arith.divf %724, %725 : vector<2x32xf32>
    %727 = arith.mulf %720, %714 : vector<2x32xf32>
    %728 = arith.addf %705, %727 : vector<2x32xf32>
    %729 = math.tanh %728 : vector<2x32xf32>
    %cst_258 = arith.constant 1.000000e+00 : f32
    %730 = vector.broadcast %cst_258 : f32 to vector<2x32xf32>
    %731 = arith.subf %730, %726 : vector<2x32xf32>
    %732 = arith.mulf %731, %729 : vector<2x32xf32>
    %733 = arith.mulf %726, %645 : vector<2x32xf32>
    %734 = arith.addf %732, %733 : vector<2x32xf32>
    %cst_259 = arith.constant dense<0.000000e+00> : vector<2x128xf32>
    %735 = tpu.matmul %734, %35, %cst_259 {dimension_numbers = #tpu.dot_dimension_numbers<[1], [0], [0], [1], [0, 0, 1, 1], [], []>} : vector<2x32xf32>, vector<32x128xf32>, vector<2x128xf32> -> vector<2x128xf32>
    %cst_260 = arith.constant dense<0.000000e+00> : vector<2x128xf32>
    %736 = tpu.matmul %689, %36, %cst_260 {dimension_numbers = #tpu.dot_dimension_numbers<[1], [0], [0], [1], [0, 0, 1, 1], [], []>} : vector<2x32xf32>, vector<32x128xf32>, vector<2x128xf32> -> vector<2x128xf32>
    %737 = arith.addf %735, %736 : vector<2x128xf32>
    %738 = vector.broadcast %37 : vector<1x128xf32> to vector<2x128xf32>
    %739 = arith.addf %737, %738 : vector<2x128xf32>
    %c7 = arith.constant 7 : index
    %c0_261 = arith.constant 0 : index
    %c0_262 = arith.constant 0 : index
    %740 = vector.load %arg15[%c7, %c0_261, %c0_262] : memref<8x2x128xf32, #tpu.memory_space<vmem>>, vector<1x2x128xf32>
    %741 = vector.shape_cast %740 : vector<1x2x128xf32> to vector<2x128xf32>
    %742 = vector.shape_cast %739 : vector<2x128xf32> to vector<1x2x128xf32>
    tpu.vector_store %arg15[%c7, %c0_261, %c0_262], %742 {strides = array<i32>} : memref<8x2x128xf32, #tpu.memory_space<vmem>>, vector<1x2x128xf32>,
    return
  }
}

</mosaic_0001>

<bundles_post_ra>
// kernel: seq_model_forward.2
= control target key start
LH: loop header
LB: loop body
LE: loop exit
PB: predicated region body
PF: predicated region fallthrough
CT: control target
= control target key end

     0   :  { %vm75_vm0 = vcmask 261120   ;;  %v1927_v16 = vmov 0.0   ;;  %vm264_vm9 = vcmask 254976   ;;  %s2785_s1 = inlined_call_operand.vmem [shape: f32[3,32,32], index: 1, kind: input, shape index: {}]   ;;  %s2786_s2 = inlined_call_operand.vmem [shape: f32[3,32,32], index: 2, kind: input, shape index: {}]   ;;  %s2787_s0 = inlined_call_operand.vmem [shape: f32[8,2,32], index: 0, kind: input, shape index: {}]   ;;  %s2788_s3 = inlined_call_operand.vmem [shape: f32[3,1,32], index: 3, kind: input, shape index: {}]   ;;  %s2789_s4 = inlined_call_operand.vmem [shape: f32[3,1,32], index: 4, kind: input, shape index: {}]   ;;  %s2790_s5 = inlined_call_operand.vmem [shape: f32[32,32], index: 5, kind: input, shape index: {}]   ;;  %s2791_s7 = inlined_call_operand.vmem [shape: f32[8,2,32], index: 7, kind: output, shape index: {0}]   ;;  %s2792_s6 = inlined_call_operand.vmem [shape: f32[1,32], index: 6, kind: input, shape index: {}]   ;;  %s2793_s8 = inlined_call_operand.vmem [shape: f32[8,2,32], index: 8, kind: output, shape index: {1}]  }
   0x1   :  { %v1976_v0 = vld [vmem:[%s2785_s1 + $0x18] sm:$0xff]  ;;  %v1986_v2 = vld [vmem:[%s2785_s1 + $0x10] sm:$0xff]  ;;  %v1998_v4 = vld [vmem:[%s2785_s1 + $0x8] sm:$0xff] }
   0x2   :  { %v1981_v1 = vld [vmem:[%s2786_s2 + $0x18] sm:$0xff]  ;;  %91 = vmatpush.msra.mxu0 %v1976_v0  ;;  %v1993_v3 = vld [vmem:[%s2786_s2 + $0x10] sm:$0xff]  ;;  %v2003_v5 = vld [vmem:[%s2786_s2 + $0x8] sm:$0xff] }
   0x3   :  { %163 = vmatpush.msra.mxu3 %v1981_v1  ;;  %v2010_v6 = vld [vmem:[%s2785_s1 + $0x38] sm:$0xff]  ;;  %v2015_v7 = vld [vmem:[%s2785_s1 + $0x30] sm:$0xff]  ;;  %v2020_v8 = vld [vmem:[%s2785_s1] sm:$0xff] }
   0x4   :  { %92 = vmatpush.msra.mxu0 %v1986_v2  ;;  %v2025_v9 = vld [vmem:[%s2786_s2] sm:$0xff]  ;;  %114 = vmatpush.msra.mxu1 %v2010_v6  ;;  %v2036_v11 = vld [vmem:[%s2785_s1 + $0x58] sm:$0xff]  ;;  %v2047_v13 = vld [vmem:[%s2785_s1 + $0x28] sm:$0xff] }
   0x5   :  { %164 = vmatpush.msra.mxu3 %v1993_v3  ;;  %v71_v10 = vld [vmem:[%s2787_s0] sm:$0x3]  ;;  %v2041_v12 = vld [vmem:[%s2786_s2 + $0x38] sm:$0xff]  ;;  %137 = vmatpush.msra.mxu2 %v2036_v11  ;;  %v2055_v14 = vld [vmem:[%s2786_s2 + $0x30] sm:$0xff] }
   0x6   :  { %93 = vmatpush.msra.mxu0 %v1998_v4  ;;  %115 = vmatpush.msra.mxu1 %v2015_v7  ;;  %v2060_v15 = vld [vmem:[%s2785_s1 + $0x50] sm:$0xff]  ;;  %v2066_v17 = vld [vmem:[%s2786_s2 + $0x28] sm:$0xff]  ;;  %v2071_v18 = vld [vmem:[%s2785_s1 + $0x20] sm:$0xff] }
   0x7   :  { %165 = vmatpush.msra.mxu3 %v2003_v5  ;;  %v2076_v19 = vld [vmem:[%s2785_s1 + $0x48] sm:$0xff]  ;;  %138 = vmatpush.msra.mxu2 %v2060_v15  ;;  %v2084_v20 = vld [vmem:[%s2786_s2 + $0x58] sm:$0xff]  ;;  %v2092_v21 = vld [vmem:[%s2785_s1 + $0x40] sm:$0xff] }
   0x8   :  { %94 = vmatpush.msra.mxu0 %v2020_v8  ;;  %116 = vmatpush.msra.mxu1 %v2047_v13  ;;  %v2097_v22 = vld [vmem:[%s2786_s2 + $0x20] sm:$0xff]  ;;  %v2104_v23 = vld [vmem:[%s2786_s2 + $0x50] sm:$0xff]  ;;  %v2112_v24 = vld [vmem:[%s2786_s2 + $0x48] sm:$0xff] }
   0x9   :  { %166 = vmatpush.msra.mxu3 %v2025_v9  ;;  %1714 = vmatmul.msk.f32.vlgmr.msra.gmra.mxu0 %vm75_vm0, %v71_v10  ;;  %v2121_v25 = vld [vmem:[%s2786_s2 + $0x40] sm:$0xff]  ;;  %v2173_v43 = vld [vmem:[%s2790_s5 + $0x18] sm:$0xff]  ;;  %v2182_v44 = vld [vmem:[%s2790_s5 + $0x10] sm:$0xff] }
   0xa   :  { %167 = vmatmul.f32.vlgmr.msra.gmra.mxu3 %v1927_v16  ;;  %186 = vmatpush.msrb.mxu0 %v2041_v12  ;;  %v2146_v27 = vld [vmem:[%s2788_s3] ss:$0 sm:$0xff]  ;;  %v2156_v29 = vld [vmem:[%s2788_s3 + $0x1] ss:$0 sm:$0xff]  ;;  %v1720_v42 = vld [vmem:[%s2787_s0 + $0x2] sm:$0x3] }
   0xb   :  { %310 = vmatpush.msrb.mxu3 %v1976_v0  ;;  %117 = vmatpush.msra.mxu1 %v2071_v18  ;;  %v2151_v28 = vld [vmem:[%s2789_s4] ss:$0 sm:$0xff]  ;;  %v2162_v32 = vld [vmem:[%s2789_s4 + $0x1] ss:$0 sm:$0xff]  ;;  %v2191_v46 = vld [vmem:[%s2790_s5 + $0x8] sm:$0xff] }
   0xc   :  { %187 = vmatpush.msrb.mxu0 %v2055_v14  ;;  %1715 = vmatmul.msk.f32.vlgmr.msra.gmra.mxu1 %vm75_vm0, %v71_v10  ;;  %v2200_v49 = vld [vmem:[%s2790_s5] sm:$0xff] }
   0xd   :  { %139 = vmatpush.msra.mxu2 %v2076_v19  ;;  %209 = vmatpush.msrb.mxu1 %v2084_v20  ;;  %v2219_v55 = vld [vmem:[%s2789_s4 + $0x2] ss:$0 sm:$0xff] }
   0xe   :  { %188 = vmatpush.msrb.mxu0 %v2066_v17  ;;  %311 = vmatpush.msrb.mxu3 %v1986_v2  ;;  %v2225_v62 = vld [vmem:[%s2788_s3 + $0x2] ss:$0 sm:$0xff] }
   0xf   :  { %140 = vmatpush.msra.mxu2 %v2092_v21  ;;  %210 = vmatpush.msrb.mxu1 %v2104_v23 }
  0x10   :  { %189 = vmatpush.msrb.mxu0 %v2097_v22  ;;  %1716 = vmatmul.msk.f32.vlgmr.msra.gmra.mxu2 %vm75_vm0, %v71_v10 }
  0x11   :  { %190 = vmatmul.f32.vlgmr.msrb.gmra.mxu0 %v1927_v16  ;;  %211 = vmatpush.msrb.mxu1 %v2112_v24 }
  0x12   :  { %330 = vmatpush.msra.mxu0 %v2010_v6  ;;  %312 = vmatpush.msrb.mxu3 %v1998_v4 }
  0x13   :  { %212 = vmatpush.msrb.mxu1 %v2121_v25  ;;  %284 = vmatpush.msrb.mxu2 %v2173_v43 }
  0x14   :  { %331 = vmatpush.msra.mxu0 %v2015_v7  ;;  %213 = vmatmul.f32.vlgmr.msrb.gmra.mxu1 %v1927_v16 }
  0x15   :  { %313 = vmatpush.msrb.mxu3 %v2020_v8  ;;  %350 = vmatpush.msra.mxu1 %v2036_v11 }
  0x16   :  { %332 = vmatpush.msra.mxu0 %v2047_v13  ;;  %1721 = vmatmul.msk.f32.vlgmr.msrb.gmra.mxu3 %vm75_vm0, %v1720_v42 }
  0x17   :  { %390 = vmatpush.msra.mxu3 %v2041_v12  ;;  %351 = vmatpush.msra.mxu1 %v2060_v15 }
  0x18   :  { %333 = vmatpush.msra.mxu0 %v2071_v18  ;;  %285 = vmatpush.msrb.mxu2 %v2182_v44 }
  0x19   :  { %391 = vmatpush.msra.mxu3 %v2055_v14  ;;  %352 = vmatpush.msra.mxu1 %v2076_v19 }
  0x1a   :  { %410 = vmatpush.msrb.mxu0 %v2084_v20  ;;  %286 = vmatpush.msrb.mxu2 %v2191_v46 }
  0x1b   :  { %392 = vmatpush.msra.mxu3 %v2066_v17  ;;  %353 = vmatpush.msra.mxu1 %v2092_v21 }
  0x1c   :  { %411 = vmatpush.msrb.mxu0 %v2104_v23  ;;  %1723 = vmatmul.msk.f32.vlgmr.msra.gmra.mxu1 %vm75_vm0, %v1720_v42 }
  0x1d   :  { %393 = vmatpush.msra.mxu3 %v2097_v22  ;;  %1722 = vmatmul.msk.f32.vlgmr.msra.gmra.mxu0 %vm75_vm0, %v1720_v42 }
  0x1e   :  { %412 = vmatpush.msrb.mxu0 %v2112_v24  ;;  %482 = vmatpush.msrb.mxu1 %v2173_v43 }
  0x1f   :  { %529 = vmatpush.msrb.mxu3 %v2010_v6  ;;  %287 = vmatpush.msrb.mxu2 %v2200_v49 }
  0x20   :  { %413 = vmatpush.msrb.mxu0 %v2121_v25  ;;  %483 = vmatpush.msrb.mxu1 %v2182_v44 }
  0x21   :  { %530 = vmatpush.msrb.mxu3 %v2015_v7  ;;  %370 = vmatpush.msra.mxu2 %v1981_v1 }
  0x22   :  { %549 = vmatpush.msra.mxu0 %v2036_v11  ;;  %484 = vmatpush.msrb.mxu1 %v2191_v46 }
  0x23   :  { %531 = vmatpush.msrb.mxu3 %v2047_v13  ;;  %371 = vmatpush.msra.mxu2 %v1993_v3 }
  0x24   :  { %550 = vmatpush.msra.mxu0 %v2060_v15  ;;  %485 = vmatpush.msrb.mxu1 %v2200_v49 }
  0x25   :  { %532 = vmatpush.msrb.mxu3 %v2071_v18  ;;  %372 = vmatpush.msra.mxu2 %v2003_v5 }
  0x26   :  { %551 = vmatpush.msra.mxu0 %v2076_v19  ;;  %569 = vmatpush.msra.mxu1 %v1981_v1 }
  0x27   :  { %373 = vmatpush.msra.mxu2 %v2025_v9 }
  0x28   :  { %552 = vmatpush.msra.mxu0 %v2092_v21  ;;  %570 = vmatpush.msra.mxu1 %v1993_v3 }
  0x2a   :  { %571 = vmatpush.msra.mxu1 %v2003_v5 }
  0x2c   :  { %572 = vmatpush.msra.mxu1 %v2025_v9 }
  0x86   :  { %v96_v26 = vpop.f32.mrf.mxu0 }
  0x87   :  { %v97_v31 = vadd.f32 %v2146_v27, %v96_v26 }
  0x89   :  { %v119_v30 = vpop.f32.mrf.mxu1 }
  0x8a   :  { %v120_v35 = vadd.f32 %v2156_v29, %v119_v30 }
  0x8d   :  { %v168_v33 = vpop.f32.mrf.mxu3 }
  0x8e   :  { %v169_v34 = vadd.f32 %v2151_v28, %v168_v33  ;;  %v191_v36 = vpop.f32.mrf.mxu0 }
  0x8f   :  { %v192_v38 = vadd.f32 %v2162_v32, %v191_v36 }
  0x90   :  { %v217_v37 = vadd.f32 %v169_v34, %v97_v31 }
  0x91   :  { %v237_v40 = vadd.f32 %v192_v38, %v120_v35  ;;  %v214_v57 = vpop.f32.mrf.mxu1 }
  0x92   :  { %v1717_v39 = vmul.f32 -1.442695, %v217_v37  ;;  %v215_v16 = vadd.f32 %v2219_v55, %v214_v57 }
  0x93   :  { %v1718_v41 = vmul.f32 -1.442695, %v237_v40  ;;  %v142_v63 = vpop.f32.mrf.mxu2 }
  0x94   :  { %1812 = vpow2.f32 %v1717_v39  ;;  %v143_v33 = vadd.f32 %v2225_v62, %v142_v63 }
  0x95   :  { %1814 = vpow2.f32 %v1718_v41 }
  0x9a   :  { %v1813_v45 = vpop.eup %1812 }
  0x9b   :  { %v221_v47 = vadd.f32 1.0, %v1813_v45  ;;  %v1815_v48 = vpop.eup %1814 }
  0x9c   :  { %v241_v50 = vadd.f32 1.0, %v1815_v48 }
  0x9d   :  { %1816 = vrcp.f32 %v221_v47  ;;  %v233_v58 = vand.u32 2147483648, %v221_v47  ;;  %v231_v61 = vand.u32 2147483647, %v221_v47  ;;  %vm227_vm2 = vweird.f32 %v221_v47 }
  0x9e   :  { %1818 = vrcp.f32 %v241_v50  ;;  %vm247_vm5 = vweird.f32 %v241_v50  ;;  %v253_v36 = vand.u32 2147483648, %v241_v50  ;;  %v251_v38 = vand.u32 2147483647, %v241_v50 }
  0x9f   :  { %v234_v30 = vor.u32 1.1754944e-38, %v233_v58  ;;  %vm232_vm4 = vcmp.eq.f32.partialorder %v231_v61, 8.507059e+37 }
  0xa0   :  { %v254_v41 = vor.u32 1.1754944e-38, %v253_v36  ;;  %vm252_vm8 = vcmp.eq.f32.partialorder %v251_v38, 8.507059e+37 }
  0xa3   :  { %v1817_v51 = vpop.eup %1816 }
  0xa4   :  { %v223_v52 = vmul.f32 %v1817_v51, %v221_v47  ;;  %v1819_v53 = vpop.eup %1818  ;;  %vm228_vm1 = vweird.f32 %v1817_v51 }
  0xa5   :  { %v243_v54 = vmul.f32 %v1819_v53, %v241_v50  ;;  %vm229_vm3 = vmor %vm227_vm2, %vm228_vm1  ;;  %vm248_vm6 = vweird.f32 %v1819_v53  ;;  %v315_v50 = vpop.f32.mrf.mxu3 }
  0xa6   :  { %v224_v56 = vsub.f32 1.0, %v223_v52  ;;  %vm249_vm7 = vmor %vm247_vm5, %vm248_vm6 }
  0xa7   :  { %v244_v59 = vsub.f32 1.0, %v243_v54  ;;  %v335_v54 = vpop.f32.mrf.mxu0 }
  0xa8   :  { %v225_v60 = vmul.f32 %v1817_v51, %v224_v56  ;;  %v336_v56 = vadd.f32 %v2156_v29, %v335_v54 }
  0xa9   :  { %v245_v10 = vmul.f32 %v1819_v53, %v244_v59 }
  0xaa   :  { %v226_v26 = vadd.f32 %v1817_v51, %v225_v60 }
  0xab   :  { %v246_v35 = vadd.f32 %v1819_v53, %v245_v10  ;;  %v316_v10 = vadd.f32 %v2146_v27, %v315_v50 }
  0xac   :  { %v230_v31 = vsel %vm229_vm3, %v1817_v51, %v226_v26 }
  0xad   :  { %v235_v34 = vsel %vm232_vm4, %v234_v30, %v230_v31  ;;  %v250_v40 = vsel %vm249_vm7, %v1819_v53, %v246_v35  ;;  %v2263_v53 = vld [vmem:[%s2792_s6] ss:$0 sm:$0xff]  ;;  %v1732_v35 = vld [vmem:[%s2787_s0 + $0x4] sm:$0x3] }
  0xae   :  { %v257_v37 = vmul.f32 %v235_v34, %v215_v16  ;;  %v255_v42 = vsel %vm252_vm8, %v254_v41, %v250_v40 }
  0xaf   :  { %v260_v45 = vsub.f32 1.0, %v255_v42  ;;  %v262_v51 = vmul.f32 0.0, %v255_v42 }
  0xb0   :  { %v258_v39 = vadd.f32 %v257_v37, %v143_v33 }
  0xb2   :  { %1820 = vtanh.f32 %v258_v39 }
  0xb8   :  { %v1821_v47 = vpop.eup %1820 }
  0xb9   :  { %v261_v48 = vmul.f32 %v1821_v47, %v260_v45 }
  0xbb   :  { %v2229_v52 = vadd.f32 %v262_v51, %v261_v48 }
  0xbd   :  { %265 = vst.msk [vmem:[%s2791_s7] sm:$0x3] %vm264_vm9, %v2229_v52  ;;  %1719 = vmatmul.msk.f32.vlgmr.msrb.gmra.mxu2 %vm75_vm0, %v2229_v52  ;;  %1725 = vmatmul.msk.f32.vlgmr.msra.gmra.mxu3 %vm75_vm0, %v2229_v52 }
  0xbe   :  { %1726 = vmatmul.msk.f32.vlgmr.msrb.gmra.mxu0 %vm75_vm0, %v2229_v52  ;;  %509 = vmatpush.msrb.mxu2 %v1976_v0 }
  0xbf   :  { %609 = vmatpush.msra.mxu3 %v2084_v20  ;;  %681 = vmatpush.msrb.mxu0 %v2173_v43 }
  0xc0   :  { %510 = vmatpush.msrb.mxu2 %v1986_v2 }
  0xc1   :  { %610 = vmatpush.msra.mxu3 %v2104_v23  ;;  %682 = vmatpush.msrb.mxu0 %v2182_v44 }
  0xc2   :  { %511 = vmatpush.msrb.mxu2 %v1998_v4 }
  0xc3   :  { %611 = vmatpush.msra.mxu3 %v2112_v24  ;;  %683 = vmatpush.msrb.mxu0 %v2191_v46 }
  0xc4   :  { %512 = vmatpush.msrb.mxu2 %v2020_v8 }
  0xc5   :  { %1724 = vmatmul.msk.f32.vlgmr.msra.gmra.mxu2 %vm75_vm0, %v2229_v52  ;;  %612 = vmatpush.msra.mxu3 %v2121_v25 }
  0xc6   :  { %589 = vmatpush.msra.mxu2 %v2041_v12  ;;  %684 = vmatpush.msrb.mxu0 %v2200_v49 }
  0xc7   :  { %1734 = vmatmul.msk.f32.vlgmr.msrb.gmra.mxu3 %vm75_vm0, %v1732_v35  ;;  %1735 = vmatmul.msk.f32.vlgmr.msra.gmra.mxu0 %vm75_vm0, %v1732_v35 }
  0xc8   :  { %590 = vmatpush.msra.mxu2 %v2055_v14  ;;  %768 = vmatpush.msra.mxu0 %v1981_v1 }
  0xc9   :  { %748 = vmatpush.msrb.mxu3 %v2036_v11 }
  0xca   :  { %591 = vmatpush.msra.mxu2 %v2066_v17  ;;  %769 = vmatpush.msra.mxu0 %v1993_v3 }
  0xcb   :  { %749 = vmatpush.msrb.mxu3 %v2060_v15 }
  0xcc   :  { %592 = vmatpush.msra.mxu2 %v2097_v22  ;;  %770 = vmatpush.msra.mxu0 %v2003_v5 }
  0xcd   :  { %1733 = vmatmul.msk.f32.vlgmr.msrb.gmra.mxu2 %vm75_vm0, %v1732_v35  ;;  %750 = vmatpush.msrb.mxu3 %v2076_v19 }
  0xce   :  { %728 = vmatpush.msrb.mxu2 %v2010_v6  ;;  %771 = vmatpush.msra.mxu0 %v2025_v9 }
  0xcf   :  { %751 = vmatpush.msrb.mxu3 %v2092_v21 }
  0xd0   :  { %729 = vmatpush.msrb.mxu2 %v2015_v7 }
  0xd2   :  { %730 = vmatpush.msrb.mxu2 %v2047_v13 }
  0xd4   :  { %731 = vmatpush.msrb.mxu2 %v2071_v18 }
 0x13b   :  { %v415_v50 = vpop.f32.mrf.mxu0 }
 0x140   :  { %v289_v57 = vpop.f32.mrf.mxu2  ;;  %v395_v58 = vpop.f32.mrf.mxu3 }
 0x141   :  { %v290_v59 = vadd.f32 %v2263_v53, %v289_v57  ;;  %v396_v60 = vadd.f32 %v2162_v32, %v395_v58 }
 0x143   :  { %292 = vst.msk [vmem:[%s2793_s8] sm:$0x3] %vm264_vm9, %v290_v59  ;;  %v438_v61 = vadd.f32 %v396_v60, %v336_v56  ;;  %v355_v56 = vpop.f32.mrf.mxu1  ;;  %v416_v59 = vadd.f32 %v2219_v55, %v415_v50 }
 0x144   :  { %v356_v60 = vadd.f32 %v2225_v62, %v355_v56 }
 0x145   :  { %v1728_v63 = vmul.f32 -1.442695, %v438_v61 }
 0x147   :  { %1822 = vpow2.f32 %v1728_v63 }
 0x148   :  { %v375_v16 = vpop.f32.mrf.mxu2 }
 0x149   :  { %v376_v26 = vadd.f32 %v2151_v28, %v375_v16 }
 0x14b   :  { %v418_v30 = vadd.f32 %v376_v26, %v316_v10 }
 0x14d   :  { %v1823_v31 = vpop.eup %1822  ;;  %v1727_v33 = vmul.f32 -1.442695, %v418_v30 }
 0x14e   :  { %v442_v34 = vadd.f32 1.0, %v1823_v31 }
 0x14f   :  { %1824 = vpow2.f32 %v1727_v33 }
 0x150   :  { %1826 = vrcp.f32 %v442_v34  ;;  %v454_v16 = vand.u32 2147483648, %v442_v34  ;;  %vm448_vm15 = vweird.f32 %v442_v34  ;;  %v452_v30 = vand.u32 2147483647, %v442_v34 }
 0x152   :  { %v455_v35 = vor.u32 1.1754944e-38, %v454_v16  ;;  %vm453_vm2 = vcmp.eq.f32.partialorder %v452_v30, 8.507059e+37 }
 0x155   :  { %v1825_v36 = vpop.eup %1824 }
 0x156   :  { %v422_v37 = vadd.f32 1.0, %v1825_v36  ;;  %v1827_v38 = vpop.eup %1826 }
 0x157   :  { %v444_v39 = vmul.f32 %v1827_v38, %v442_v34  ;;  %vm449_vm14 = vweird.f32 %v1827_v38 }
 0x158   :  { %1828 = vrcp.f32 %v422_v37  ;;  %v434_v47 = vand.u32 2147483648, %v422_v37  ;;  %v432_v51 = vand.u32 2147483647, %v422_v37  ;;  %vm428_vm11 = vweird.f32 %v422_v37  ;;  %vm450_vm1 = vmor %vm448_vm15, %vm449_vm14 }
 0x159   :  { %v445_v42 = vsub.f32 1.0, %v444_v39 }
 0x15a   :  { %v435_v58 = vor.u32 1.1754944e-38, %v434_v47  ;;  %vm433_vm13 = vcmp.eq.f32.partialorder %v432_v51, 8.507059e+37 }
 0x15b   :  { %v446_v54 = vmul.f32 %v1827_v38, %v445_v42 }
 0x15d   :  { %v447_v10 = vadd.f32 %v1827_v38, %v446_v54 }
 0x15e   :  { %v1829_v40 = vpop.eup %1828 }
 0x15f   :  { %v424_v41 = vmul.f32 %v1829_v40, %v422_v37  ;;  %vm429_vm10 = vweird.f32 %v1829_v40  ;;  %v451_v33 = vsel %vm450_vm1, %v1827_v38, %v447_v10 }
 0x160   :  { %vm430_vm12 = vmor %vm428_vm11, %vm429_vm10  ;;  %v456_v36 = vsel %vm453_vm2, %v455_v35, %v451_v33 }
 0x161   :  { %v425_v45 = vsub.f32 1.0, %v424_v41  ;;  %v461_v37 = vsub.f32 1.0, %v456_v36 }
 0x163   :  { %v426_v48 = vmul.f32 %v1829_v40, %v425_v45  ;;  %v534_v45 = vpop.f32.mrf.mxu3 }
 0x164   :  { %v535_v47 = vadd.f32 %v2156_v29, %v534_v45 }
 0x165   :  { %v427_v57 = vadd.f32 %v1829_v40, %v426_v48 }
 0x167   :  { %v431_v61 = vsel %vm430_vm12, %v1829_v40, %v427_v57  ;;  %v463_v40 = vmul.f32 %v456_v36, %v2229_v52  ;;  %v514_v52 = vpop.f32.mrf.mxu2 }
 0x168   :  { %v436_v63 = vsel %vm433_vm13, %v435_v58, %v431_v61  ;;  %v515_v51 = vadd.f32 %v2146_v27, %v514_v52  ;;  %v1744_v61 = vld [vmem:[%s2787_s0 + $0x6] sm:$0x3] }
 0x169   :  { %v458_v26 = vmul.f32 %v436_v63, %v416_v59 }
 0x16b   :  { %v459_v31 = vadd.f32 %v458_v26, %v356_v60 }
 0x16d   :  { %1830 = vtanh.f32 %v459_v31 }
 0x173   :  { %v1831_v39 = vpop.eup %1830 }
 0x174   :  { %v462_v41 = vmul.f32 %v1831_v39, %v461_v37 }
 0x176   :  { %v2295_v42 = vadd.f32 %v463_v40, %v462_v41 }
 0x178   :  { %1729 = vst.msk [vmem:[%s2791_s7 + $0x2] sm:$0x3] %vm264_vm9, %v2295_v42  ;;  %1730 = vmatmul.msk.f32.vlgmr.msrb.gmra.mxu1 %vm75_vm0, %v2295_v42  ;;  %1737 = vmatmul.msk.f32.vlgmr.msra.gmra.mxu2 %vm75_vm0, %v2295_v42 }
 0x179   :  { %1738 = vmatmul.msk.f32.vlgmr.msra.gmra.mxu3 %vm75_vm0, %v2295_v42  ;;  %708 = vmatpush.msrb.mxu1 %v1976_v0 }
 0x17a   :  { %808 = vmatpush.msra.mxu2 %v2084_v20  ;;  %880 = vmatpush.msra.mxu3 %v2173_v43 }
 0x17b   :  { %709 = vmatpush.msrb.mxu1 %v1986_v2 }
 0x17c   :  { %809 = vmatpush.msra.mxu2 %v2104_v23  ;;  %881 = vmatpush.msra.mxu3 %v2182_v44 }
 0x17d   :  { %710 = vmatpush.msrb.mxu1 %v1998_v4 }
 0x17e   :  { %810 = vmatpush.msra.mxu2 %v2112_v24  ;;  %882 = vmatpush.msra.mxu3 %v2191_v46 }
 0x17f   :  { %711 = vmatpush.msrb.mxu1 %v2020_v8 }
 0x180   :  { %1736 = vmatmul.msk.f32.vlgmr.msra.gmra.mxu1 %vm75_vm0, %v2295_v42  ;;  %811 = vmatpush.msra.mxu2 %v2121_v25 }
 0x181   :  { %788 = vmatpush.msra.mxu1 %v2041_v12  ;;  %883 = vmatpush.msra.mxu3 %v2200_v49 }
 0x182   :  { %1746 = vmatmul.msk.f32.vlgmr.msrb.gmra.mxu2 %vm75_vm0, %v1744_v61  ;;  %1747 = vmatmul.msk.f32.vlgmr.msrb.gmra.mxu3 %vm75_vm0, %v1744_v61 }
 0x183   :  { %789 = vmatpush.msra.mxu1 %v2055_v14  ;;  %967 = vmatpush.msrb.mxu3 %v1981_v1 }
 0x184   :  { %947 = vmatpush.msrb.mxu2 %v2036_v11 }
 0x185   :  { %790 = vmatpush.msra.mxu1 %v2066_v17  ;;  %968 = vmatpush.msrb.mxu3 %v1993_v3 }
 0x186   :  { %948 = vmatpush.msrb.mxu2 %v2060_v15 }
 0x187   :  { %791 = vmatpush.msra.mxu1 %v2097_v22  ;;  %969 = vmatpush.msrb.mxu3 %v2003_v5 }
 0x188   :  { %1745 = vmatmul.msk.f32.vlgmr.msrb.gmra.mxu1 %vm75_vm0, %v1744_v61  ;;  %949 = vmatpush.msrb.mxu2 %v2076_v19 }
 0x189   :  { %927 = vmatpush.msrb.mxu1 %v2010_v6  ;;  %970 = vmatpush.msrb.mxu3 %v2025_v9 }
 0x18a   :  { %950 = vmatpush.msrb.mxu2 %v2092_v21 }
 0x18b   :  { %928 = vmatpush.msrb.mxu1 %v2015_v7 }
 0x18d   :  { %929 = vmatpush.msrb.mxu1 %v2047_v13 }
 0x18f   :  { %930 = vmatpush.msrb.mxu1 %v2071_v18 }
 0x1f5   :  { %v487_v34 = vpop.f32.mrf.mxu1 }
 0x1f6   :  { %v488_v38 = vadd.f32 %v2263_v53, %v487_v34 }
 0x1f8   :  { %1731 = vst.msk [vmem:[%s2793_s8 + $0x2] sm:$0x3] %vm264_vm9, %v488_v38  ;;  %v554_v38 = vpop.f32.mrf.mxu0 }
 0x1fb   :  { %v594_v48 = vpop.f32.mrf.mxu2 }
 0x1fc   :  { %v595_v50 = vadd.f32 %v2162_v32, %v594_v48  ;;  %v614_v34 = vpop.f32.mrf.mxu3 }
 0x1fd   :  { %v574_v54 = vpop.f32.mrf.mxu1  ;;  %v615_v48 = vadd.f32 %v2219_v55, %v614_v34 }
 0x1fe   :  { %v637_v56 = vadd.f32 %v595_v50, %v535_v47  ;;  %v575_v57 = vadd.f32 %v2151_v28, %v574_v54 }
 0x200   :  { %v1740_v58 = vmul.f32 -1.442695, %v637_v56  ;;  %v617_v59 = vadd.f32 %v575_v57, %v515_v51  ;;  %v555_v51 = vadd.f32 %v2225_v62, %v554_v38 }
 0x202   :  { %1832 = vpow2.f32 %v1740_v58  ;;  %v1739_v60 = vmul.f32 -1.442695, %v617_v59 }
 0x204   :  { %1834 = vpow2.f32 %v1739_v60 }
 0x208   :  { %v1833_v63 = vpop.eup %1832 }
 0x209   :  { %v641_v10 = vadd.f32 1.0, %v1833_v63 }
 0x20a   :  { %v1835_v16 = vpop.eup %1834 }
 0x20b   :  { %1836 = vrcp.f32 %v641_v10  ;;  %v621_v26 = vadd.f32 1.0, %v1835_v16  ;;  %v653_v57 = vand.u32 2147483648, %v641_v10  ;;  %vm647_vm8 = vweird.f32 %v641_v10 }
 0x20c   :  { %v651_v59 = vand.u32 2147483647, %v641_v10 }
 0x20d   :  { %1838 = vrcp.f32 %v621_v26  ;;  %v633_v39 = vand.u32 2147483648, %v621_v26  ;;  %v631_v40 = vand.u32 2147483647, %v621_v26  ;;  %vm627_vm4 = vweird.f32 %v621_v26 }
 0x20e   :  { %v654_v63 = vor.u32 1.1754944e-38, %v653_v57  ;;  %vm652_vm11 = vcmp.eq.f32.partialorder %v651_v59, 8.507059e+37 }
 0x20f   :  { %v634_v47 = vor.u32 1.1754944e-38, %v633_v39  ;;  %vm632_vm6 = vcmp.eq.f32.partialorder %v631_v40, 8.507059e+37 }
 0x211   :  { %v1837_v30 = vpop.eup %1836 }
 0x212   :  { %v643_v31 = vmul.f32 %v1837_v30, %v641_v10  ;;  %vm648_vm7 = vweird.f32 %v1837_v30  ;;  %v733_v10 = vpop.f32.mrf.mxu2 }
 0x213   :  { %v1839_v33 = vpop.eup %1838  ;;  %vm649_vm10 = vmor %vm647_vm8, %vm648_vm7 }
 0x214   :  { %v623_v35 = vmul.f32 %v1839_v33, %v621_v26  ;;  %v644_v36 = vsub.f32 1.0, %v643_v31  ;;  %vm628_vm3 = vweird.f32 %v1839_v33 }
 0x215   :  { %vm629_vm5 = vmor %vm627_vm4, %vm628_vm3 }
 0x216   :  { %v624_v37 = vsub.f32 1.0, %v623_v35  ;;  %v645_v52 = vmul.f32 %v1837_v30, %v644_v36 }
 0x218   :  { %v625_v41 = vmul.f32 %v1839_v33, %v624_v37  ;;  %v646_v56 = vadd.f32 %v1837_v30, %v645_v52 }
 0x21a   :  { %v626_v45 = vadd.f32 %v1839_v33, %v625_v41  ;;  %v650_v61 = vsel %vm649_vm10, %v1837_v30, %v646_v56  ;;  %v734_v30 = vadd.f32 %v2156_v29, %v733_v10  ;;  %v1756_v56 = vld [vmem:[%s2787_s0 + $0x8] sm:$0x3] }
 0x21b   :  { %v655_v16 = vsel %vm652_vm11, %v654_v63, %v650_v61  ;;  %v753_v63 = vpop.f32.mrf.mxu3 }
 0x21c   :  { %v630_v50 = vsel %vm629_vm5, %v1839_v33, %v626_v45  ;;  %v660_v26 = vsub.f32 1.0, %v655_v16  ;;  %v662_v33 = vmul.f32 %v655_v16, %v2295_v42  ;;  %v713_v42 = vpop.f32.mrf.mxu1 }
 0x21d   :  { %v635_v54 = vsel %vm632_vm6, %v634_v47, %v630_v50  ;;  %v714_v38 = vadd.f32 %v2146_v27, %v713_v42 }
 0x21e   :  { %v657_v58 = vmul.f32 %v635_v54, %v615_v48 }
 0x220   :  { %v658_v60 = vadd.f32 %v657_v58, %v555_v51 }
 0x222   :  { %1840 = vtanh.f32 %v658_v60 }
 0x228   :  { %v1841_v31 = vpop.eup %1840 }
 0x229   :  { %v661_v35 = vmul.f32 %v1841_v31, %v660_v26  ;;  %v754_v26 = vadd.f32 %v2225_v62, %v753_v63 }
 0x22b   :  { %v2356_v36 = vadd.f32 %v662_v33, %v661_v35 }
 0x22d   :  { %1741 = vst.msk [vmem:[%s2791_s7 + $0x4] sm:$0x3] %vm264_vm9, %v2356_v36  ;;  %1742 = vmatmul.msk.f32.vlgmr.msrb.gmra.mxu0 %vm75_vm0, %v2356_v36  ;;  %1749 = vmatmul.msk.f32.vlgmr.msra.gmra.mxu1 %vm75_vm0, %v2356_v36 }
 0x22e   :  { %1750 = vmatmul.msk.f32.vlgmr.msra.gmra.mxu2 %vm75_vm0, %v2356_v36  ;;  %907 = vmatpush.msrb.mxu0 %v1976_v0 }
 0x22f   :  { %1007 = vmatpush.msra.mxu1 %v2084_v20  ;;  %1079 = vmatpush.msra.mxu2 %v2173_v43 }
 0x230   :  { %908 = vmatpush.msrb.mxu0 %v1986_v2 }
 0x231   :  { %1008 = vmatpush.msra.mxu1 %v2104_v23  ;;  %1080 = vmatpush.msra.mxu2 %v2182_v44 }
 0x232   :  { %909 = vmatpush.msrb.mxu0 %v1998_v4 }
 0x233   :  { %1009 = vmatpush.msra.mxu1 %v2112_v24  ;;  %1081 = vmatpush.msra.mxu2 %v2191_v46 }
 0x234   :  { %910 = vmatpush.msrb.mxu0 %v2020_v8 }
 0x235   :  { %1748 = vmatmul.msk.f32.vlgmr.msra.gmra.mxu0 %vm75_vm0, %v2356_v36  ;;  %1010 = vmatpush.msra.mxu1 %v2121_v25 }
 0x236   :  { %987 = vmatpush.msra.mxu0 %v2041_v12  ;;  %1082 = vmatpush.msra.mxu2 %v2200_v49 }
 0x237   :  { %1758 = vmatmul.msk.f32.vlgmr.msrb.gmra.mxu1 %vm75_vm0, %v1756_v56  ;;  %1759 = vmatmul.msk.f32.vlgmr.msrb.gmra.mxu2 %vm75_vm0, %v1756_v56 }
 0x238   :  { %988 = vmatpush.msra.mxu0 %v2055_v14  ;;  %1166 = vmatpush.msrb.mxu2 %v1981_v1 }
 0x239   :  { %1146 = vmatpush.msrb.mxu1 %v2036_v11 }
 0x23a   :  { %989 = vmatpush.msra.mxu0 %v2066_v17  ;;  %1167 = vmatpush.msrb.mxu2 %v1993_v3 }
 0x23b   :  { %1147 = vmatpush.msrb.mxu1 %v2060_v15 }
 0x23c   :  { %990 = vmatpush.msra.mxu0 %v2097_v22  ;;  %1168 = vmatpush.msrb.mxu2 %v2003_v5 }
 0x23d   :  { %1757 = vmatmul.msk.f32.vlgmr.msrb.gmra.mxu0 %vm75_vm0, %v1756_v56  ;;  %1148 = vmatpush.msrb.mxu1 %v2076_v19 }
 0x23e   :  { %1126 = vmatpush.msrb.mxu0 %v2010_v6  ;;  %1169 = vmatpush.msrb.mxu2 %v2025_v9 }
 0x23f   :  { %1149 = vmatpush.msrb.mxu1 %v2092_v21 }
 0x240   :  { %1127 = vmatpush.msrb.mxu0 %v2015_v7 }
 0x242   :  { %1128 = vmatpush.msrb.mxu0 %v2047_v13 }
 0x244   :  { %1129 = vmatpush.msrb.mxu0 %v2071_v18 }
 0x2aa   :  { %v686_v37 = vpop.f32.mrf.mxu0  ;;  %v793_v39 = vpop.f32.mrf.mxu1 }
 0x2ab   :  { %v687_v41 = vadd.f32 %v2263_v53, %v686_v37  ;;  %v794_v40 = vadd.f32 %v2162_v32, %v793_v39 }
 0x2ad   :  { %1743 = vst.msk [vmem:[%s2793_s8 + $0x4] sm:$0x3] %vm264_vm9, %v687_v41  ;;  %v836_v52 = vadd.f32 %v794_v40, %v734_v30 }
 0x2af   :  { %v1752_v34 = vmul.f32 -1.442695, %v836_v52 }
 0x2b1   :  { %1842 = vpow2.f32 %v1752_v34  ;;  %v813_v61 = vpop.f32.mrf.mxu2 }
 0x2b2   :  { %v773_v45 = vpop.f32.mrf.mxu0  ;;  %v814_v9 = vadd.f32 %v2219_v55, %v813_v61 }
 0x2b3   :  { %v774_v47 = vadd.f32 %v2151_v28, %v773_v45 }
 0x2b5   :  { %v816_v48 = vadd.f32 %v774_v47, %v714_v38 }
 0x2b7   :  { %v1843_v51 = vpop.eup %1842  ;;  %v1751_v50 = vmul.f32 -1.442695, %v816_v48 }
 0x2b8   :  { %v840_v54 = vadd.f32 1.0, %v1843_v51  ;;  %v1768_v51 = vld [vmem:[%s2787_s0 + $0xa] sm:$0x3] }
 0x2b9   :  { %1844 = vpow2.f32 %v1751_v50  ;;  %v2481_v50 = vld [vmem:[%s2785_s1 + $0x58] sm:$0xff] }
 0x2ba   :  { %1846 = vrcp.f32 %v840_v54  ;;  %v852_v42 = vand.u32 2147483648, %v840_v54  ;;  %vm846_vm2 = vweird.f32 %v840_v54  ;;  %v850_v30 = vand.u32 2147483647, %v840_v54 }
 0x2bc   :  { %v853_v41 = vor.u32 1.1754944e-38, %v852_v42  ;;  %vm851_vm4 = vcmp.eq.f32.partialorder %v850_v30, 8.507059e+37 }
 0x2bf   :  { %v1845_v57 = vpop.eup %1844 }
 0x2c0   :  { %v820_v58 = vadd.f32 1.0, %v1845_v57  ;;  %v1847_v1 = vpop.eup %1846  ;;  %v2493_v57 = vld [vmem:[%s2786_s2 + $0x10] sm:$0xff] }
 0x2c1   :  { %v842_v6 = vmul.f32 %v1847_v1, %v840_v54  ;;  %vm847_vm1 = vweird.f32 %v1847_v1  ;;  %v2487_v54 = vld [vmem:[%s2785_s1 + $0x30] sm:$0xff] }
 0x2c2   :  { %1848 = vrcp.f32 %v820_v58  ;;  %v832_v59 = vand.u32 2147483648, %v820_v58  ;;  %v830_v13 = vand.u32 2147483647, %v820_v58  ;;  %vm826_vm13 = vweird.f32 %v820_v58  ;;  %vm848_vm3 = vmor %vm846_vm2, %vm847_vm1 }
 0x2c3   :  { %v843_v11 = vsub.f32 1.0, %v842_v6  ;;  %v2505_v6 = vld [vmem:[%s2785_s1 + $0x28] sm:$0xff] }
 0x2c4   :  { %v833_v18 = vor.u32 1.1754944e-38, %v832_v59  ;;  %vm831_vm15 = vcmp.eq.f32.partialorder %v830_v13, 8.507059e+37 }
 0x2c5   :  { %v844_v5 = vmul.f32 %v1847_v1, %v843_v11 }
 0x2c7   :  { %v845_v33 = vadd.f32 %v1847_v1, %v844_v5 }
 0x2c8   :  { %v1849_v7 = vpop.eup %1848 }
 0x2c9   :  { %v822_v3 = vmul.f32 %v1849_v7, %v820_v58  ;;  %vm827_vm12 = vweird.f32 %v1849_v7  ;;  %v849_v39 = vsel %vm848_vm3, %v1847_v1, %v845_v33  ;;  %v2499_v58 = vld [vmem:[%s2785_s1 + $0x50] sm:$0xff] }
 0x2ca   :  { %vm828_vm14 = vmor %vm826_vm13, %vm827_vm12  ;;  %v854_v40 = vsel %vm851_vm4, %v853_v41, %v849_v39 }
 0x2cb   :  { %v823_v15 = vsub.f32 1.0, %v822_v3  ;;  %v859_v52 = vsub.f32 1.0, %v854_v40  ;;  %v861_v45 = vmul.f32 %v854_v40, %v2356_v36  ;;  %v2518_v3 = vld [vmem:[%s2785_s1 + $0x20] sm:$0xff] }
 0x2cd   :  { %v824_v60 = vmul.f32 %v1849_v7, %v823_v15  ;;  %v2524_v15 = vld [vmem:[%s2786_s2] sm:$0xff] }
 0x2cf   :  { %v825_v16 = vadd.f32 %v1849_v7, %v824_v60 }
 0x2d1   :  { %v829_v31 = vsel %vm828_vm14, %v1849_v7, %v825_v16  ;;  %v2511_v7 = vld [vmem:[%s2786_s2 + $0x8] sm:$0xff] }
 0x2d2   :  { %v834_v35 = vsel %vm831_vm15, %v833_v18, %v829_v31 }
 0x2d3   :  { %v856_v10 = vmul.f32 %v834_v35, %v814_v9 }
 0x2d5   :  { %v857_v37 = vadd.f32 %v856_v10, %v754_v26  ;;  %v952_v26 = vpop.f32.mrf.mxu2 }
 0x2d7   :  { %1850 = vtanh.f32 %v857_v37 }
 0x2dd   :  { %v1851_v34 = vpop.eup %1850 }
 0x2de   :  { %v860_v38 = vmul.f32 %v1851_v34, %v859_v52 }
 0x2e0   :  { %v2417_v47 = vadd.f32 %v861_v45, %v860_v38 }
 0x2e2   :  { %1753 = vst.msk [vmem:[%s2791_s7 + $0x6] sm:$0x3] %vm264_vm9, %v2417_v47  ;;  %1754 = vmatmul.msk.f32.vlgmr.msra.gmra.mxu3 %vm75_vm0, %v2417_v47  ;;  %1761 = vmatmul.msk.f32.vlgmr.msra.gmra.mxu0 %vm75_vm0, %v2417_v47 }
 0x2e3   :  { %1762 = vmatmul.msk.f32.vlgmr.msra.gmra.mxu1 %vm75_vm0, %v2417_v47  ;;  %1106 = vmatpush.msra.mxu3 %v1976_v0  ;;  %v912_v0 = vpop.f32.mrf.mxu0 }
 0x2e4   :  { %1206 = vmatpush.msra.mxu0 %v2084_v20  ;;  %1278 = vmatpush.msra.mxu1 %v2173_v43 }
 0x2e5   :  { %1107 = vmatpush.msra.mxu3 %v1986_v2  ;;  %v932_v2 = vpop.f32.mrf.mxu1 }
 0x2e6   :  { %1207 = vmatpush.msra.mxu0 %v2104_v23  ;;  %1279 = vmatpush.msra.mxu1 %v2182_v44 }
 0x2e7   :  { %1108 = vmatpush.msra.mxu3 %v1998_v4  ;;  %v933_v4 = vadd.f32 %v2156_v29, %v932_v2 }
 0x2e8   :  { %1208 = vmatpush.msra.mxu0 %v2112_v24  ;;  %1280 = vmatpush.msra.mxu1 %v2191_v46 }
 0x2e9   :  { %1109 = vmatpush.msra.mxu3 %v2020_v8 }
 0x2ea   :  { %1760 = vmatmul.msk.f32.vlgmr.msrb.gmra.mxu3 %vm75_vm0, %v2417_v47  ;;  %1209 = vmatpush.msra.mxu0 %v2121_v25 }
 0x2eb   :  { %1186 = vmatpush.msrb.mxu3 %v2041_v12  ;;  %1281 = vmatpush.msra.mxu1 %v2200_v49 }
 0x2ec   :  { %1770 = vmatmul.msk.f32.vlgmr.msrb.gmra.mxu0 %vm75_vm0, %v1768_v51  ;;  %1771 = vmatmul.msk.f32.vlgmr.msrb.gmra.mxu1 %vm75_vm0, %v1768_v51 }
 0x2ed   :  { %1187 = vmatpush.msrb.mxu3 %v2055_v14  ;;  %v913_v14 = vadd.f32 %v2146_v27, %v912_v0  ;;  %v2468_v27 = vld [vmem:[%s2785_s1 + $0x38] sm:$0xff]  ;;  %1345 = vmatpush.msrb.mxu0 %v2481_v50 }
 0x2ef   :  { %1188 = vmatpush.msrb.mxu3 %v2066_v17  ;;  %1346 = vmatpush.msrb.mxu0 %v2499_v58 }
 0x2f1   :  { %1189 = vmatpush.msrb.mxu3 %v2097_v22  ;;  %1347 = vmatpush.msrb.mxu0 %v2076_v19 }
 0x2f2   :  { %1769 = vmatmul.msk.f32.vlgmr.msra.gmra.mxu3 %vm75_vm0, %v1768_v51  ;;  %v2636_v51 = vld [vmem:[%s2789_s4 + $0x1] ss:$0 sm:$0xff] }
 0x2f3   :  { %1325 = vmatpush.msra.mxu3 %v2468_v27  ;;  %1348 = vmatpush.msrb.mxu0 %v2092_v21  ;;  %v953_v21 = vadd.f32 %v2225_v62, %v952_v26 }
 0x2f5   :  { %1326 = vmatpush.msra.mxu3 %v2487_v54 }
 0x2f7   :  { %1327 = vmatpush.msra.mxu3 %v2505_v6 }
 0x2f9   :  { %1328 = vmatpush.msra.mxu3 %v2518_v3 }
 0x35f   :  { %v992_v8 = vpop.f32.mrf.mxu0 }
 0x360   :  { %v993_v20 = vadd.f32 %v2162_v32, %v992_v8  ;;  %v1012_v9 = vpop.f32.mrf.mxu1  ;;  %v2564_v8 = vld [vmem:[%s2785_s1 + $0x10] sm:$0xff] }
 0x361   :  { %v1013_v33 = vadd.f32 %v2219_v55, %v1012_v9  ;;  %v1780_v9 = vld [vmem:[%s2787_s0 + $0xc] sm:$0x3] }
 0x362   :  { %v1035_v23 = vadd.f32 %v993_v20, %v933_v4  ;;  %v2557_v4 = vld [vmem:[%s2786_s2 + $0x58] sm:$0xff]  ;;  %v2570_v20 = vld [vmem:[%s2786_s2 + $0x50] sm:$0xff] }
 0x364   :  { %v1764_v12 = vmul.f32 -1.442695, %v1035_v23  ;;  %v2583_v23 = vld [vmem:[%s2786_s2 + $0x48] sm:$0xff] }
 0x365   :  { %v885_v24 = vpop.f32.mrf.mxu3 }
 0x366   :  { %v886_v25 = vadd.f32 %v2263_v53, %v885_v24  ;;  %1852 = vpow2.f32 %v1764_v12  ;;  %v2598_v24 = vld [vmem:[%s2786_s2 + $0x40] sm:$0xff]  ;;  %v2617_v12 = vld [vmem:[%s2786_s2 + $0x28] sm:$0xff] }
 0x368   :  { %1755 = vst.msk [vmem:[%s2793_s8 + $0x6] sm:$0x3] %vm264_vm9, %v886_v25  ;;  %v2611_v25 = vld [vmem:[%s2786_s2 + $0x30] sm:$0xff] }
 0x36c   :  { %v1853_v36 = vpop.eup %1852 }
 0x36d   :  { %v972_v17 = vpop.f32.mrf.mxu3  ;;  %v2457_v32 = vadd.f32 1.0, %v1853_v36 }
 0x36e   :  { %v973_v22 = vadd.f32 %v2151_v28, %v972_v17  ;;  %v2475_v28 = vld [vmem:[%s2786_s2 + $0x18] sm:$0xff]  ;;  %v1131_v17 = vpop.f32.mrf.mxu0 }
 0x36f   :  { %1365 = vmatpush.msrb.mxu1 %v2475_v28  ;;  %v1051_v37 = vand.u32 2147483648, %v2457_v32  ;;  %vm1045_vm11 = vweird.f32 %v2457_v32  ;;  %v1049_v41 = vand.u32 2147483647, %v2457_v32 }
 0x370   :  { %v1015_v29 = vadd.f32 %v973_v22, %v913_v14  ;;  %v2623_v14 = vld [vmem:[%s2786_s2 + $0x20] sm:$0xff] }
 0x371   :  { %1366 = vmatpush.msrb.mxu1 %v2493_v57  ;;  %v1052_v34 = vor.u32 1.1754944e-38, %v1051_v37  ;;  %vm1050_vm13 = vcmp.eq.f32.partialorder %v1049_v41, 8.507059e+37  ;;  %v2629_v22 = vld [vmem:[%s2788_s3 + $0x1] ss:$0 sm:$0xff]  ;;  %v2680_v37 = vld [vmem:[%s2789_s4 + $0x2] ss:$0 sm:$0xff] }
 0x372   :  { %v1763_v48 = vmul.f32 -1.442695, %v1015_v29  ;;  %v1132_v29 = vadd.f32 %v2629_v22, %v1131_v17  ;;  %v2686_v41 = vld [vmem:[%s2788_s3 + $0x2] ss:$0 sm:$0xff] }
 0x373   :  { %1367 = vmatpush.msrb.mxu1 %v2511_v7 }
 0x374   :  { %1854 = vpow2.f32 %v1763_v48 }
 0x375   :  { %1856 = vrcp.f32 %v2457_v32  ;;  %1368 = vmatpush.msrb.mxu1 %v2524_v15 }
 0x37a   :  { %v1855_v56 = vpop.eup %1854 }
 0x37b   :  { %v1019_v1 = vadd.f32 1.0, %v1855_v56  ;;  %v1857_v11 = vpop.eup %1856 }
 0x37c   :  { %v1041_v19 = vmul.f32 %v1857_v11, %v2457_v32  ;;  %vm1046_vm10 = vweird.f32 %v1857_v11 }
 0x37d   :  { %1858 = vrcp.f32 %v1019_v1  ;;  %v1031_v61 = vand.u32 2147483648, %v1019_v1  ;;  %v1029_v16 = vand.u32 2147483647, %v1019_v1  ;;  %vm1025_vm6 = vweird.f32 %v1019_v1  ;;  %vm1047_vm12 = vmor %vm1045_vm11, %vm1046_vm10 }
 0x37e   :  { %v1042_v13 = vsub.f32 1.0, %v1041_v19  ;;  %v2646_v19 = vld [vmem:[%s2788_s3] ss:$0 sm:$0xff] }
 0x37f   :  { %v1032_v35 = vor.u32 1.1754944e-38, %v1031_v61  ;;  %vm1030_vm8 = vcmp.eq.f32.partialorder %v1029_v16, 8.507059e+37 }
 0x380   :  { %v1043_v18 = vmul.f32 %v1857_v11, %v1042_v13  ;;  %v2652_v13 = vld [vmem:[%s2789_s4] ss:$0 sm:$0xff] }
 0x382   :  { %v1044_v30 = vadd.f32 %v1857_v11, %v1043_v18 }
 0x383   :  { %v1859_v59 = vpop.eup %1858 }
 0x384   :  { %v1021_v60 = vmul.f32 %v1859_v59, %v1019_v1  ;;  %vm1026_vm5 = vweird.f32 %v1859_v59  ;;  %v1048_v52 = vsel %vm1047_vm12, %v1857_v11, %v1044_v30 }
 0x385   :  { %vm1027_vm7 = vmor %vm1025_vm6, %vm1026_vm5  ;;  %v1053_v55 = vsel %vm1050_vm13, %v1052_v34, %v1048_v52 }
 0x386   :  { %v1022_v5 = vsub.f32 1.0, %v1021_v60  ;;  %v1058_v62 = vsub.f32 1.0, %v1053_v55  ;;  %v1060_v0 = vmul.f32 %v1053_v55, %v2417_v47  ;;  %v2551_v47 = vld [vmem:[%s2785_s1 + $0x18] sm:$0xff] }
 0x388   :  { %v1023_v63 = vmul.f32 %v1859_v59, %v1022_v5 }
 0x38a   :  { %v1024_v31 = vadd.f32 %v1859_v59, %v1023_v63 }
 0x38c   :  { %v1028_v42 = vsel %vm1027_vm7, %v1859_v59, %v1024_v31 }
 0x38d   :  { %v1033_v10 = vsel %vm1030_vm8, %v1032_v35, %v1028_v42 }
 0x38e   :  { %v1055_v39 = vmul.f32 %v1033_v10, %v1013_v33 }
 0x390   :  { %v1056_v40 = vadd.f32 %v1055_v39, %v953_v21 }
 0x392   :  { %1860 = vtanh.f32 %v1056_v40 }
 0x398   :  { %v1861_v38 = vpop.eup %1860 }
 0x399   :  { %v1059_v45 = vmul.f32 %v1861_v38, %v1058_v62 }
 0x39b   :  { %v2535_v2 = vadd.f32 %v1060_v0, %v1059_v45 }
 0x39d   :  { %1765 = vst.msk [vmem:[%s2791_s7 + $0x8] sm:$0x3] %vm264_vm9, %v2535_v2  ;;  %1766 = vmatmul.msk.f32.vlgmr.msra.gmra.mxu2 %vm75_vm0, %v2535_v2  ;;  %1773 = vmatmul.msk.f32.vlgmr.msrb.gmra.mxu3 %vm75_vm0, %v2535_v2 }
 0x39e   :  { %1774 = vmatmul.msk.f32.vlgmr.msra.gmra.mxu0 %vm75_vm0, %v2535_v2  ;;  %1305 = vmatpush.msra.mxu2 %v2551_v47 }
 0x39f   :  { %1405 = vmatpush.msrb.mxu3 %v2557_v4  ;;  %1477 = vmatpush.msra.mxu0 %v2173_v43  ;;  %v2577_v43 = vld [vmem:[%s2785_s1 + $0x8] sm:$0xff] }
 0x3a0   :  { %1306 = vmatpush.msra.mxu2 %v2564_v8 }
 0x3a1   :  { %1406 = vmatpush.msrb.mxu3 %v2570_v20  ;;  %1478 = vmatpush.msra.mxu0 %v2182_v44  ;;  %v2590_v44 = vld [vmem:[%s2785_s1] sm:$0xff] }
 0x3a2   :  { %1307 = vmatpush.msra.mxu2 %v2577_v43 }
 0x3a3   :  { %1407 = vmatpush.msrb.mxu3 %v2583_v23  ;;  %1479 = vmatpush.msra.mxu0 %v2191_v46  ;;  %v2604_v46 = vld [vmem:[%s2786_s2 + $0x38] sm:$0xff] }
 0x3a4   :  { %1308 = vmatpush.msra.mxu2 %v2590_v44 }
 0x3a5   :  { %1772 = vmatmul.msk.f32.vlgmr.msrb.gmra.mxu2 %vm75_vm0, %v2535_v2  ;;  %1408 = vmatpush.msrb.mxu3 %v2598_v24 }
 0x3a6   :  { %1385 = vmatpush.msrb.mxu2 %v2604_v46  ;;  %1480 = vmatpush.msra.mxu0 %v2200_v49  ;;  %v1111_v49 = vpop.f32.mrf.mxu3 }
 0x3a7   :  { %v1112_v59 = vadd.f32 %v2646_v19, %v1111_v49  ;;  %1782 = vmatmul.msk.f32.vlgmr.msra.gmra.mxu3 %vm75_vm0, %v1780_v9  ;;  %1783 = vmatmul.msk.f32.vlgmr.msrb.gmra.mxu0 %vm75_vm0, %v1780_v9 }
 0x3a8   :  { %1386 = vmatpush.msrb.mxu2 %v2611_v25  ;;  %1564 = vmatpush.msrb.mxu0 %v2475_v28 }
 0x3a9   :  { %1544 = vmatpush.msra.mxu3 %v2481_v50  ;;  %v1919_v50 = vld [vmem:[%s2785_s1 + $0x40] sm:$0xff] }
 0x3aa   :  { %1387 = vmatpush.msrb.mxu2 %v2617_v12  ;;  %1565 = vmatpush.msrb.mxu0 %v2493_v57 }
 0x3ab   :  { %1545 = vmatpush.msra.mxu3 %v2499_v58 }
 0x3ac   :  { %1388 = vmatpush.msrb.mxu2 %v2623_v14  ;;  %1566 = vmatpush.msrb.mxu0 %v2511_v7 }
 0x3ad   :  { %1781 = vmatmul.msk.f32.vlgmr.msra.gmra.mxu2 %vm75_vm0, %v1780_v9 }
 0x3ae   :  { %1524 = vmatpush.msra.mxu2 %v2468_v27  ;;  %v1918_v27 = vld [vmem:[%s2785_s1 + $0x48] sm:$0xff]  ;;  %1567 = vmatpush.msrb.mxu0 %v2524_v15 }
 0x3af   :  { %1546 = vmatpush.msra.mxu3 %v1918_v27 }
 0x3b0   :  { %1525 = vmatpush.msra.mxu2 %v2487_v54 }
 0x3b1   :  { %1547 = vmatpush.msra.mxu3 %v1919_v50 }
 0x3b2   :  { %1526 = vmatpush.msra.mxu2 %v2505_v6 }
 0x3b4   :  { %1527 = vmatpush.msra.mxu2 %v2518_v3  ;;  %v1151_v3 = vpop.f32.mrf.mxu1 }
 0x3b5   :  { %v1152_v40 = vadd.f32 %v2686_v41, %v1151_v3 }
 0x41b   :  { %v1211_v42 = vpop.f32.mrf.mxu0 }
 0x41c   :  { %v1212_v39 = vadd.f32 %v2680_v37, %v1211_v42 }
 0x420   :  { %v1084_v36 = vpop.f32.mrf.mxu2  ;;  %v1191_v48 = vpop.f32.mrf.mxu3 }
 0x421   :  { %v1085_v32 = vadd.f32 %v2263_v53, %v1084_v36  ;;  %v1192_v56 = vadd.f32 %v2636_v51, %v1191_v48 }
 0x423   :  { %1767 = vst.msk [vmem:[%s2793_s8 + $0x8] sm:$0x3] %vm264_vm9, %v1085_v32  ;;  %v1234_v1 = vadd.f32 %v1192_v56, %v1132_v29 }
 0x425   :  { %v1776_v11 = vmul.f32 -1.442695, %v1234_v1 }
 0x427   :  { %1862 = vpow2.f32 %v1776_v11  ;;  %v1923_v11 = vld [vmem:[%s2790_s5 + $0x10] sm:$0xff] }
 0x428   :  { %v1171_v60 = vpop.f32.mrf.mxu2 }
 0x429   :  { %v1172_v5 = vadd.f32 %v2652_v13, %v1171_v60 }
 0x42b   :  { %v1214_v61 = vadd.f32 %v1172_v5, %v1112_v59 }
 0x42d   :  { %v1863_v63 = vpop.eup %1862  ;;  %v1775_v16 = vmul.f32 -1.442695, %v1214_v61  ;;  %v1792_v61 = vld [vmem:[%s2787_s0 + $0xe] sm:$0x3] }
 0x42e   :  { %v1238_v18 = vadd.f32 1.0, %v1863_v63 }
 0x42f   :  { %1864 = vpow2.f32 %v1775_v16 }
 0x430   :  { %1866 = vrcp.f32 %v1238_v18  ;;  %v1250_v62 = vand.u32 2147483648, %v1238_v18  ;;  %vm1244_vm4 = vweird.f32 %v1238_v18  ;;  %v1248_v45 = vand.u32 2147483647, %v1238_v18 }
 0x432   :  { %v1251_v17 = vor.u32 1.1754944e-38, %v1250_v62  ;;  %vm1249_vm6 = vcmp.eq.f32.partialorder %v1248_v45, 8.507059e+37 }
 0x435   :  { %v1865_v26 = vpop.eup %1864 }
 0x436   :  { %v1218_v31 = vadd.f32 1.0, %v1865_v26  ;;  %v1867_v28 = vpop.eup %1866 }
 0x437   :  { %v1240_v54 = vmul.f32 %v1867_v28, %v1238_v18  ;;  %vm1245_vm3 = vweird.f32 %v1867_v28 }
 0x438   :  { %1868 = vrcp.f32 %v1218_v31  ;;  %v1230_v35 = vand.u32 2147483648, %v1218_v31  ;;  %v1228_v21 = vand.u32 2147483647, %v1218_v31  ;;  %vm1224_vm15 = vweird.f32 %v1218_v31  ;;  %vm1246_vm5 = vmor %vm1244_vm4, %vm1245_vm3 }
 0x439   :  { %v1241_v6 = vsub.f32 1.0, %v1240_v54 }
 0x43a   :  { %v1231_v15 = vor.u32 1.1754944e-38, %v1230_v35  ;;  %vm1229_vm2 = vcmp.eq.f32.partialorder %v1228_v21, 8.507059e+37 }
 0x43b   :  { %v1242_v10 = vmul.f32 %v1867_v28, %v1241_v6 }
 0x43d   :  { %v1243_v55 = vadd.f32 %v1867_v28, %v1242_v10 }
 0x43e   :  { %v1869_v57 = vpop.eup %1868 }
 0x43f   :  { %v1220_v58 = vmul.f32 %v1869_v57, %v1218_v31  ;;  %vm1225_vm14 = vweird.f32 %v1869_v57  ;;  %v1247_v49 = vsel %vm1246_vm5, %v1867_v28, %v1243_v55 }
 0x440   :  { %vm1226_vm1 = vmor %vm1224_vm15, %vm1225_vm14  ;;  %v1252_v29 = vsel %vm1249_vm6, %v1251_v17, %v1247_v49 }
 0x441   :  { %v1221_v7 = vsub.f32 1.0, %v1220_v58  ;;  %v1257_v36 = vsub.f32 1.0, %v1252_v29  ;;  %v1259_v56 = vmul.f32 %v1252_v29, %v2535_v2  ;;  %v1922_v2 = vld [vmem:[%s2790_s5 + $0x18] sm:$0xff] }
 0x443   :  { %v1222_v33 = vmul.f32 %v1869_v57, %v1221_v7 }
 0x445   :  { %v1223_v30 = vadd.f32 %v1869_v57, %v1222_v33  ;;  %v1350_v33 = vpop.f32.mrf.mxu0 }
 0x446   :  { %v1351_v3 = vadd.f32 %v2686_v41, %v1350_v33 }
 0x447   :  { %v1227_v52 = vsel %vm1226_vm1, %v1869_v57, %v1223_v30 }
 0x448   :  { %v1232_v34 = vsel %vm1229_vm2, %v1231_v15, %v1227_v52 }
 0x449   :  { %v1254_v38 = vmul.f32 %v1232_v34, %v1212_v39 }
 0x44b   :  { %v1255_v0 = vadd.f32 %v1254_v38, %v1152_v40 }
 0x44d   :  { %1870 = vtanh.f32 %v1255_v0 }
 0x453   :  { %v1871_v48 = vpop.eup %1870 }
 0x454   :  { %v1258_v32 = vmul.f32 %v1871_v48, %v1257_v36 }
 0x456   :  { %v2690_v1 = vadd.f32 %v1259_v56, %v1258_v32 }
 0x458   :  { %1777 = vst.msk [vmem:[%s2791_s7 + $0xa] sm:$0x3] %vm264_vm9, %v2690_v1  ;;  %1778 = vmatmul.msk.f32.vlgmr.msra.gmra.mxu1 %vm75_vm0, %v2690_v1  ;;  %1785 = vmatmul.msk.f32.vlgmr.msrb.gmra.mxu2 %vm75_vm0, %v2690_v1 }
 0x459   :  { %1786 = vmatmul.msk.f32.vlgmr.msrb.gmra.mxu3 %vm75_vm0, %v2690_v1  ;;  %1504 = vmatpush.msra.mxu1 %v2551_v47  ;;  %v1924_v47 = vld [vmem:[%s2790_s5 + $0x8] sm:$0xff] }
 0x45a   :  { %1604 = vmatpush.msrb.mxu2 %v2557_v4  ;;  %1676 = vmatpush.msrb.mxu3 %v1922_v2  ;;  %v1925_v4 = vld [vmem:[%s2790_s5] sm:$0xff] }
 0x45b   :  { %1505 = vmatpush.msra.mxu1 %v2564_v8  ;;  %v1310_v8 = vpop.f32.mrf.mxu2 }
 0x45c   :  { %1605 = vmatpush.msrb.mxu2 %v2570_v20  ;;  %1677 = vmatpush.msrb.mxu3 %v1923_v11  ;;  %v1926_v11 = vld [vmem:[%s2792_s6] ss:$0 sm:$0xff] }
 0x45d   :  { %1506 = vmatpush.msra.mxu1 %v2577_v43 }
 0x45e   :  { %1606 = vmatpush.msrb.mxu2 %v2583_v23  ;;  %1678 = vmatpush.msrb.mxu3 %v1924_v47  ;;  %v1330_v23 = vpop.f32.mrf.mxu3 }
 0x45f   :  { %1507 = vmatpush.msra.mxu1 %v2590_v44  ;;  %v1331_v44 = vadd.f32 %v2629_v22, %v1330_v23 }
 0x460   :  { %1784 = vmatmul.msk.f32.vlgmr.msrb.gmra.mxu1 %vm75_vm0, %v2690_v1  ;;  %1607 = vmatpush.msrb.mxu2 %v2598_v24 }
 0x461   :  { %1584 = vmatpush.msrb.mxu1 %v2604_v46  ;;  %1679 = vmatpush.msrb.mxu3 %v1925_v4  ;;  %v1311_v46 = vadd.f32 %v2646_v19, %v1310_v8 }
 0x462   :  { %1794 = vmatmul.msk.f32.vlgmr.msra.gmra.mxu2 %vm75_vm0, %v1792_v61  ;;  %1795 = vmatmul.msk.f32.vlgmr.msra.gmra.mxu3 %vm75_vm0, %v1792_v61 }
 0x463   :  { %1585 = vmatpush.msrb.mxu1 %v2611_v25 }
 0x465   :  { %1586 = vmatpush.msrb.mxu1 %v2617_v12 }
 0x467   :  { %1587 = vmatpush.msrb.mxu1 %v2623_v14 }
 0x468   :  { %1793 = vmatmul.msk.f32.vlgmr.msra.gmra.mxu1 %vm75_vm0, %v1792_v61 }
 0x4d5   :  { %v1283_v20 = vpop.f32.mrf.mxu1 }
 0x4d6   :  { %v1284_v43 = vadd.f32 %v2263_v53, %v1283_v20 }
 0x4d8   :  { %1779 = vst.msk [vmem:[%s2793_s8 + $0xa] sm:$0x3] %vm264_vm9, %v1284_v43 }
 0x4db   :  { %v1390_v24 = vpop.f32.mrf.mxu2 }
 0x4dc   :  { %v1391_v25 = vadd.f32 %v2636_v51, %v1390_v24  ;;  %v1410_v35 = vpop.f32.mrf.mxu3 }
 0x4dd   :  { %v1370_v12 = vpop.f32.mrf.mxu1  ;;  %v1411_v10 = vadd.f32 %v2680_v37, %v1410_v35 }
 0x4de   :  { %v1433_v59 = vadd.f32 %v1391_v25, %v1331_v44  ;;  %v1371_v14 = vadd.f32 %v2652_v13, %v1370_v12 }
 0x4e0   :  { %v1788_v60 = vmul.f32 -1.442695, %v1433_v59  ;;  %v1413_v5 = vadd.f32 %v1371_v14, %v1311_v46 }
 0x4e2   :  { %1872 = vpow2.f32 %v1788_v60  ;;  %v1787_v53 = vmul.f32 -1.442695, %v1413_v5 }
 0x4e4   :  { %1874 = vpow2.f32 %v1787_v53 }
 0x4e5   :  { %v1509_v48 = vpop.f32.mrf.mxu1  ;;  %v1529_v32 = vpop.f32.mrf.mxu2 }
 0x4e6   :  { %v1530_v56 = vadd.f32 %v2629_v22, %v1529_v32  ;;  %v1510_v43 = vadd.f32 %v2646_v19, %v1509_v48 }
 0x4e8   :  { %v1873_v63 = vpop.eup %1872 }
 0x4e9   :  { %v1437_v16 = vadd.f32 1.0, %v1873_v63 }
 0x4ea   :  { %v1875_v18 = vpop.eup %1874 }
 0x4eb   :  { %1876 = vrcp.f32 %v1437_v16  ;;  %v1417_v9 = vadd.f32 1.0, %v1875_v18  ;;  %v1449_v40 = vand.u32 2147483648, %v1437_v16  ;;  %vm1443_vm13 = vweird.f32 %v1437_v16 }
 0x4ec   :  { %v1447_v34 = vand.u32 2147483647, %v1437_v16 }
 0x4ed   :  { %1878 = vrcp.f32 %v1417_v9  ;;  %v1429_v57 = vand.u32 2147483648, %v1417_v9  ;;  %v1427_v6 = vand.u32 2147483647, %v1417_v9  ;;  %vm1423_vm8 = vweird.f32 %v1417_v9 }
 0x4ee   :  { %v1450_v38 = vor.u32 1.1754944e-38, %v1449_v40  ;;  %vm1448_vm15 = vcmp.eq.f32.partialorder %v1447_v34, 8.507059e+37 }
 0x4ef   :  { %v1430_v42 = vor.u32 1.1754944e-38, %v1429_v57  ;;  %vm1428_vm11 = vcmp.eq.f32.partialorder %v1427_v6, 8.507059e+37 }
 0x4f1   :  { %v1877_v26 = vpop.eup %1876 }
 0x4f2   :  { %v1439_v31 = vmul.f32 %v1877_v26, %v1437_v16  ;;  %vm1444_vm12 = vweird.f32 %v1877_v26 }
 0x4f3   :  { %v1879_v27 = vpop.eup %1878  ;;  %vm1445_vm14 = vmor %vm1443_vm13, %vm1444_vm12 }
 0x4f4   :  { %v1419_v28 = vmul.f32 %v1879_v27, %v1417_v9  ;;  %v1440_v50 = vsub.f32 1.0, %v1439_v31  ;;  %vm1424_vm7 = vweird.f32 %v1879_v27  ;;  %v1549_v9 = vpop.f32.mrf.mxu3 }
 0x4f5   :  { %vm1425_vm10 = vmor %vm1423_vm8, %vm1424_vm7 }
 0x4f6   :  { %v1420_v54 = vsub.f32 1.0, %v1419_v28  ;;  %v1441_v7 = vmul.f32 %v1877_v26, %v1440_v50  ;;  %v1550_v28 = vadd.f32 %v2686_v41, %v1549_v9 }
 0x4f8   :  { %v1421_v58 = vmul.f32 %v1879_v27, %v1420_v54  ;;  %v1442_v39 = vadd.f32 %v1877_v26, %v1441_v7 }
 0x4fa   :  { %v1422_v21 = vadd.f32 %v1879_v27, %v1421_v58  ;;  %v1446_v62 = vsel %vm1445_vm14, %v1877_v26, %v1442_v39 }
 0x4fb   :  { %v1451_v45 = vsel %vm1448_vm15, %v1450_v38, %v1446_v62 }
 0x4fc   :  { %v1426_v30 = vsel %vm1425_vm10, %v1879_v27, %v1422_v21  ;;  %v1456_v0 = vsub.f32 1.0, %v1451_v45  ;;  %v1458_v29 = vmul.f32 %v1451_v45, %v2690_v1 }
 0x4fd   :  { %v1431_v15 = vsel %vm1428_vm11, %v1430_v42, %v1426_v30 }
 0x4fe   :  { %v1453_v52 = vmul.f32 %v1431_v15, %v1411_v10 }
 0x500   :  { %v1454_v55 = vadd.f32 %v1453_v52, %v1351_v3 }
 0x502   :  { %1880 = vtanh.f32 %v1454_v55 }
 0x508   :  { %v1881_v49 = vpop.eup %1880 }
 0x509   :  { %v1457_v17 = vmul.f32 %v1881_v49, %v1456_v0 }
 0x50b   :  { %v2747_v36 = vadd.f32 %v1458_v29, %v1457_v17 }
 0x50d   :  { %1789 = vst.msk [vmem:[%s2791_s7 + $0xc] sm:$0x3] %vm264_vm9, %v2747_v36  ;;  %1790 = vmatmul.msk.f32.vlgmr.msra.gmra.mxu0 %vm75_vm0, %v2747_v36  ;;  %1797 = vmatmul.msk.f32.vlgmr.msrb.gmra.mxu1 %vm75_vm0, %v2747_v36 }
 0x50e   :  { %1798 = vmatmul.msk.f32.vlgmr.msrb.gmra.mxu2 %vm75_vm0, %v2747_v36 }
 0x515   :  { %1796 = vmatmul.msk.f32.vlgmr.msrb.gmra.mxu0 %vm75_vm0, %v2747_v36 }
 0x58a   :  { %v1482_v1 = vpop.f32.mrf.mxu0  ;;  %v1589_v2 = vpop.f32.mrf.mxu1 }
 0x58b   :  { %v1483_v47 = vadd.f32 %v1926_v11, %v1482_v1  ;;  %v1590_v4 = vadd.f32 %v2636_v51, %v1589_v2 }
 0x58d   :  { %1791 = vst.msk [vmem:[%s2793_s8 + $0xc] sm:$0x3] %vm264_vm9, %v1483_v47  ;;  %v1632_v8 = vadd.f32 %v1590_v4, %v1530_v56 }
 0x58f   :  { %v1800_v20 = vmul.f32 -1.442695, %v1632_v8 }
 0x591   :  { %1882 = vpow2.f32 %v1800_v20  ;;  %v1609_v18 = vpop.f32.mrf.mxu2 }
 0x592   :  { %v1569_v22 = vpop.f32.mrf.mxu0  ;;  %v1610_v27 = vadd.f32 %v2680_v37, %v1609_v18 }
 0x593   :  { %v1570_v23 = vadd.f32 %v2652_v13, %v1569_v22 }
 0x595   :  { %v1612_v44 = vadd.f32 %v1570_v23, %v1510_v43 }
 0x597   :  { %v1883_v24 = vpop.eup %1882  ;;  %v1799_v46 = vmul.f32 -1.442695, %v1612_v44 }
 0x598   :  { %v1636_v25 = vadd.f32 1.0, %v1883_v24 }
 0x599   :  { %1884 = vpow2.f32 %v1799_v46 }
 0x59a   :  { %1886 = vrcp.f32 %v1636_v25  ;;  %v1648_v58 = vand.u32 2147483648, %v1636_v25  ;;  %vm1642_vm6 = vweird.f32 %v1636_v25  ;;  %v1646_v7 = vand.u32 2147483647, %v1636_v25 }
 0x59c   :  { %v1649_v21 = vor.u32 1.1754944e-38, %v1648_v58  ;;  %vm1647_vm8 = vcmp.eq.f32.partialorder %v1646_v7, 8.507059e+37 }
 0x59f   :  { %v1885_v51 = vpop.eup %1884 }
 0x5a0   :  { %v1616_v12 = vadd.f32 1.0, %v1885_v51  ;;  %v1887_v59 = vpop.eup %1886 }
 0x5a1   :  { %v1638_v14 = vmul.f32 %v1887_v59, %v1636_v25  ;;  %vm1643_vm5 = vweird.f32 %v1887_v59 }
 0x5a2   :  { %1888 = vrcp.f32 %v1616_v12  ;;  %v1628_v19 = vand.u32 2147483648, %v1616_v12  ;;  %v1626_v16 = vand.u32 2147483647, %v1616_v12  ;;  %vm1622_vm2 = vweird.f32 %v1616_v12  ;;  %vm1644_vm7 = vmor %vm1642_vm6, %vm1643_vm5 }
 0x5a3   :  { %v1639_v53 = vsub.f32 1.0, %v1638_v14 }
 0x5a4   :  { %v1629_v31 = vor.u32 1.1754944e-38, %v1628_v19  ;;  %vm1627_vm4 = vcmp.eq.f32.partialorder %v1626_v16, 8.507059e+37 }
 0x5a5   :  { %v1640_v13 = vmul.f32 %v1887_v59, %v1639_v53 }
 0x5a7   :  { %v1641_v57 = vadd.f32 %v1887_v59, %v1640_v13 }
 0x5a8   :  { %v1889_v60 = vpop.eup %1888 }
 0x5a9   :  { %v1618_v5 = vmul.f32 %v1889_v60, %v1616_v12  ;;  %vm1623_vm1 = vweird.f32 %v1889_v60  ;;  %v1645_v33 = vsel %vm1644_vm7, %v1887_v59, %v1641_v57 }
 0x5aa   :  { %vm1624_vm3 = vmor %vm1622_vm2, %vm1623_vm1  ;;  %v1650_v42 = vsel %vm1647_vm8, %v1649_v21, %v1645_v33 }
 0x5ab   :  { %v1619_v61 = vsub.f32 1.0, %v1618_v5  ;;  %v1655_v10 = vsub.f32 1.0, %v1650_v42  ;;  %v1657_v41 = vmul.f32 %v1650_v42, %v2747_v36 }
 0x5ad   :  { %v1620_v63 = vmul.f32 %v1889_v60, %v1619_v61 }
 0x5af   :  { %v1621_v26 = vadd.f32 %v1889_v60, %v1620_v63 }
 0x5b1   :  { %v1625_v50 = vsel %vm1624_vm3, %v1889_v60, %v1621_v26 }
 0x5b2   :  { %v1630_v54 = vsel %vm1627_vm4, %v1629_v31, %v1625_v50 }
 0x5b3   :  { %v1652_v6 = vmul.f32 %v1630_v54, %v1610_v27 }
 0x5b5   :  { %v1653_v35 = vadd.f32 %v1652_v6, %v1550_v28 }
 0x5b7   :  { %1890 = vtanh.f32 %v1653_v35 }
 0x5bd   :  { %v1891_v37 = vpop.eup %1890 }
 0x5be   :  { %v1656_v3 = vmul.f32 %v1891_v37, %v1655_v10 }
 0x5c0   :  { %v1658_v30 = vadd.f32 %v1657_v41, %v1656_v3 }
 0x5c2   :  { %1801 = vst.msk [vmem:[%s2791_s7 + $0xe] sm:$0x3] %vm264_vm9, %v1658_v30  ;;  %1802 = vmatmul.msk.f32.vlgmr.msrb.gmra.mxu3 %vm75_vm0, %v1658_v30 }
 0x645   :  { %v1681_v15 = vpop.f32.mrf.mxu3 }
 0x646   :  { %v1682_v39 = vadd.f32 %v1926_v11, %v1681_v15 }
 0x648   :  { %1803 = vst.msk [vmem:[%s2793_s8 + $0xe] sm:$0x3] %vm264_vm9, %v1682_v39 }

// kernel: seq_model_forward.3
= control target key start
LH: loop header
LB: loop body
LE: loop exit
PB: predicated region body
PF: predicated region fallthrough
CT: control target
= control target key end

     0   :  { %20 = vsyncpa [#allocation3], 0  ;;  %s7633_s0 = inlined_call_operand.vmem [shape: f32[2,128], index: 0, kind: input, shape index: {}]   ;;  %s7634_s1 = inlined_call_operand.vmem [shape: f32[8,2,32], index: 1, kind: input, shape index: {}]   ;;  %s7635_s2 = inlined_call_operand.vmem [shape: f32[8,2,32], index: 2, kind: input, shape index: {}]   ;;  %s7636_s3 = inlined_call_operand.vmem [shape: f32[3,32,32], index: 3, kind: input, shape index: {}]   ;;  %s7637_s4 = inlined_call_operand.hbm [shape: f32[3,32,32], index: 4, kind: input, shape index: {}]   ;;  %s7638_s5 = inlined_call_operand.hbm [shape: f32[3,32,32], index: 5, kind: input, shape index: {}]   ;;  %s7639_s6 = inlined_call_operand.vmem [shape: f32[3,1,32], index: 6, kind: input, shape index: {}]   ;;  %s7640_s7 = inlined_call_operand.vmem [shape: f32[3,1,32], index: 7, kind: input, shape index: {}]   ;;  %s7641_s8 = inlined_call_operand.vmem [shape: f32[32,32], index: 8, kind: input, shape index: {}]   ;;  %s7642_s9 = inlined_call_operand.vmem [shape: f32[1,32], index: 9, kind: input, shape index: {}]   ;;  %s7643_s10 = inlined_call_operand.vmem [shape: f32[1,1,32], index: 10, kind: input, shape index: {}]   ;;  %s7644_s11 = inlined_call_operand.vmem [shape: f32[32,128], index: 11, kind: input, shape index: {}]   ;;  %s7645_s12 = inlined_call_operand.hbm [shape: f32[32,128], index: 12, kind: input, shape index: {}]   ;;  %s7646_s13 = inlined_call_operand.vmem [shape: f32[1,128], index: 13, kind: input, shape index: {}]   ;;  %s7647_s14 = inlined_call_operand.vmem [shape: f32[128,32], index: 14, kind: input, shape index: {}]   ;;  %s7648_s15 = inlined_call_operand.vmem [shape: f32[8,2,128], index: 15, kind: output, shape index: {}]  }
   0x1   :  { %21 = vsyncpa [#allocation5], 0  ;;  %s47_s20 = sshll.u32 %s7638_s5, 4  ;;  %s4891_s21 = smov [#allocation4]   ;;  %s48_s20 = int_to_ptr.hbm [resolvable:$true] %s47_s20 }
   0x2   :  { %s49_s22 = sshll.u32 %s4891_s21, 4  ;;  %s34_s25 = sshll.u32 %s7637_s4, 4  ;;  %s50_s22 = int_to_ptr.vmem [resolvable:$true] %s49_s22  ;;  %s35_s25 = int_to_ptr.hbm [resolvable:$true] %s34_s25 }
   0x3   :  { %s4892_s26 = smov 128   ;;  %s4893_s27 = smov 8  }
   0x4   :  { %55 = dma.hbm_to_vmem [thread:$0]  %s48_s20, 1536, %s50_s22, [#allocation5], %s4892_s26, %s4892_s26, %s4893_s27  }
   0x5   :  { %s4894_s28 = smov [#allocation2]   ;;  %s72_s17 = sshll.u32 %s7645_s12, 4  ;;  %s73_s17 = int_to_ptr.hbm [resolvable:$true] %s72_s17 }
   0x6   :  { %s36_s29 = sshll.u32 %s4894_s28, 4  ;;  %s4895_s5 = smov [#allocation6]   ;;  %s37_s29 = int_to_ptr.vmem [resolvable:$true] %s36_s29 }
   0x7   :  { %42 = dma.hbm_to_vmem [thread:$0]  %s35_s25, 1536, %s37_s29, [#allocation3], %s4892_s26, %s4892_s26, %s4893_s27  }
   0x8   :  { %s74_s18 = sshll.u32 %s4895_s5, 4  ;;  %s75_s18 = int_to_ptr.vmem [resolvable:$true] %s74_s18 }
   0x9   :  { %80 = dma.hbm_to_vmem [thread:$0]  %s73_s17, 512, %s75_s18, [#allocation5], %s4892_s26, %s4892_s26, %s4893_s27  }
   0xa   :  { %4887 = dma.done.wait [#allocation3], 1536  }
   0xb   :  { %4888 = vsyncadd [#allocation3], 4294965760 }
   0xc   :  { %4889 = dma.done.wait [#allocation5], 2048  }
   0xd   :  { %4890 = vsyncadd [#allocation5], 4294965248  ;;  %v4989_v0 = vld [vmem:[%s7641_s8 + $0x18] sm:$0xff]  ;;  %v4994_v1 = vld [vmem:[%s7641_s8 + $0x10] sm:$0xff]  ;;  %vm202_vm0 = vcmask 261120   ;;  %vm253_vm1 = vcmask 254976  }
   0xe   :  { %218 = vmatpush.msra.mxu0 %v4989_v0  ;;  %v5000_v2 = vld [vmem:[%s7641_s8 + $0x8] sm:$0xff]  ;;  %v5005_v3 = vld [vmem:[%s7641_s8] sm:$0xff]  ;;  %v5041_v11 = vld [vmem:[%s7647_s14 + $0x78] sm:$0xff]  ;;  %vm278_vm2 = vcmask 1041408  }
   0xf   :  { %v5012_v4 = vld [vmem:[%s7634_s1 + $0xe] sm:$0x3]  ;;  %v5020_v5 = vld [vmem:[%s7642_s9] ss:$0 sm:$0xff]  ;;  %v5025_v7 = vld [vmem:[%s7635_s2 + $0x8] sm:$0x3]  ;;  %365 = vmatpush.msra.mxu1 %v5041_v11 }
  0x10   :  { %219 = vmatpush.msra.mxu0 %v4994_v1  ;;  %v5030_v8 = vld [vmem:[%s7635_s2 + $0x4] sm:$0x3]  ;;  %v5035_v9 = vld [vmem:[%s7635_s2] sm:$0x3]  ;;  %v5046_v12 = vld [vmem:[%s7647_s14 + $0x70] sm:$0xff] }
  0x11   :  { %v5051_v13 = vld [vmem:[%s7635_s2 + $0xa] sm:$0x3]  ;;  %v5060_v17 = vld [vmem:[%s7635_s2 + $0x6] sm:$0x3]  ;;  %v5070_v19 = vld [vmem:[%s7635_s2 + $0x2] sm:$0x3]  ;;  %366 = vmatpush.msra.mxu1 %v5046_v12 }
  0x12   :  { %220 = vmatpush.msra.mxu0 %v5000_v2  ;;  %v5065_v18 = vld [vmem:[%s7647_s14 + $0x68] sm:$0xff]  ;;  %v5077_v21 = vld [vmem:[%s7647_s14 + $0x60] sm:$0xff]  ;;  %v5085_v24 = vld [vmem:[%s7647_s14 + $0x58] sm:$0xff] }
  0x13   :  { %367 = vmatpush.msra.mxu1 %v5065_v18  ;;  %v5090_v25 = vld [vmem:[%s7643_s10] ss:$0 sm:$0xff]  ;;  %v5096_v26 = vld [vmem:[%s7647_s14 + $0x50] sm:$0xff]  ;;  %v5102_v28 = vld [vmem:[%s7635_s2 + $0xe] sm:$0x3] }
  0x14   :  { %221 = vmatpush.msra.mxu0 %v5005_v3  ;;  %v5107_v29 = vld [vmem:[%s7647_s14 + $0x48] sm:$0xff]  ;;  %v5120_v35 = vld [vmem:[%s7647_s14 + $0x40] sm:$0xff]  ;;  %v5131_v42 = vld [vmem:[%s7647_s14 + $0x38] sm:$0xff] }
  0x15   :  { %4058 = vmatmul.msk.f32.vlgmr.msra.gmra.mxu0 %vm202_vm0, %v5012_v4  ;;  %368 = vmatpush.msra.mxu1 %v5077_v21  ;;  %7763 = vst [vmem:[#allocation9_spill] sm:$0xff] %v5107_v29  ;;  %v5113_v32 = vld [vmem:[%s7635_s2 + $0xc] sm:$0x3]  ;;  %v5138_v46 = vld [vmem:[%s7647_s14 + $0x30] sm:$0xff]  ;;  %v5153_v51 = vld [vmem:[%s7647_s14 + $0x20] sm:$0xff] }
  0x16   :  { %7764 = vst [vmem:[#allocation10_spill] sm:$0xff] %v5120_v35  ;;  %v5146_v49 = vld [vmem:[%s7647_s14 + $0x28] sm:$0xff]  ;;  %v5161_v54 = vld [vmem:[%s7647_s14 + $0x18] sm:$0xff]  ;;  %v5168_v58 = vld [vmem:[%s7647_s14 + $0x10] sm:$0xff] }
  0x17   :  { %369 = vmatpush.msra.mxu1 %v5085_v24  ;;  %7765 = vst [vmem:[#allocation11_spill] sm:$0xff] %v5131_v42  ;;  %v5175_v60 = vld [vmem:[%s7647_s14 + $0x8] sm:$0xff]  ;;  %v5182_v62 = vld [vmem:[%s7647_s14] sm:$0xff] }
  0x18   :  { %7766 = vst [vmem:[#allocation12_spill] sm:$0xff] %v5138_v46  ;;  %v196_v63 = vld [vmem:[%s7633_s0] sm:$0x3] }
  0x19   :  { %370 = vmatpush.msra.mxu1 %v5096_v26  ;;  %7767 = vst [vmem:[#allocation13_spill] sm:$0xff] %v5146_v49 }
  0x1a   :  { %7768 = vst [vmem:[#allocation14_spill] sm:$0xff] %v5153_v51 }
  0x1b   :  { %371 = vmatpush.msra.mxu1 %v5107_v29  ;;  %7769 = vst [vmem:[#allocation15_spill] sm:$0xff] %v5161_v54 }
  0x1c   :  { %7770 = vst [vmem:[#allocation16_spill] sm:$0xff] %v5168_v58 }
  0x1d   :  { %372 = vmatpush.msra.mxu1 %v5120_v35  ;;  %7771 = vst [vmem:[#allocation17_spill] sm:$0xff] %v5175_v60 }
  0x1e   :  { %7772 = vst [vmem:[#allocation18_spill] sm:$0xff] %v5182_v62 }
  0x1f   :  { %373 = vmatpush.msra.mxu1 %v5131_v42 }
  0x21   :  { %374 = vmatpush.msra.mxu1 %v5138_v46 }
  0x23   :  { %375 = vmatpush.msra.mxu1 %v5146_v49 }
  0x25   :  { %376 = vmatpush.msra.mxu1 %v5153_v51 }
  0x27   :  { %377 = vmatpush.msra.mxu1 %v5161_v54 }
  0x29   :  { %378 = vmatpush.msra.mxu1 %v5168_v58 }
  0x2b   :  { %379 = vmatpush.msra.mxu1 %v5175_v60 }
  0x2d   :  { %380 = vmatpush.msra.mxu1 %v5182_v62 }
  0x2e   :  { %381 = vmatmul.f32.vlgmr.msra.gmra.mxu1 %v196_v63 }
  0x2f   :  { %864 = vmatpush.msrb.mxu1 %v5041_v11 }
  0x31   :  { %865 = vmatpush.msrb.mxu1 %v5046_v12 }
  0x33   :  { %866 = vmatpush.msrb.mxu1 %v5065_v18 }
  0x35   :  { %867 = vmatpush.msrb.mxu1 %v5077_v21 }
  0x37   :  { %868 = vmatpush.msrb.mxu1 %v5085_v24 }
  0x39   :  { %869 = vmatpush.msrb.mxu1 %v5096_v26 }
  0x3b   :  { %870 = vmatpush.msrb.mxu1 %v5107_v29 }
  0x3d   :  { %871 = vmatpush.msrb.mxu1 %v5120_v35 }
  0x3f   :  { %872 = vmatpush.msrb.mxu1 %v5131_v42 }
  0x41   :  { %873 = vmatpush.msrb.mxu1 %v5138_v46 }
  0x43   :  { %874 = vmatpush.msrb.mxu1 %v5146_v49 }
  0x45   :  { %875 = vmatpush.msrb.mxu1 %v5153_v51 }
  0x47   :  { %876 = vmatpush.msrb.mxu1 %v5161_v54 }
  0x49   :  { %877 = vmatpush.msrb.mxu1 %v5168_v58 }
  0x4b   :  { %878 = vmatpush.msrb.mxu1 %v5175_v60 }
  0x4d   :  { %879 = vmatpush.msrb.mxu1 %v5182_v62 }
  0x4f   :  { %1343 = vmatpush.msra.mxu1 %v5041_v11 }
  0x51   :  { %1344 = vmatpush.msra.mxu1 %v5046_v12 }
  0x53   :  { %1345 = vmatpush.msra.mxu1 %v5065_v18 }
  0x55   :  { %1346 = vmatpush.msra.mxu1 %v5077_v21 }
  0x57   :  { %1347 = vmatpush.msra.mxu1 %v5085_v24 }
  0x59   :  { %1348 = vmatpush.msra.mxu1 %v5096_v26 }
  0x5b   :  { %1349 = vmatpush.msra.mxu1 %v5107_v29 }
  0x5d   :  { %1350 = vmatpush.msra.mxu1 %v5120_v35 }
  0x5f   :  { %1351 = vmatpush.msra.mxu1 %v5131_v42 }
  0x61   :  { %1352 = vmatpush.msra.mxu1 %v5138_v46 }
  0x63   :  { %1353 = vmatpush.msra.mxu1 %v5146_v49 }
  0x65   :  { %1354 = vmatpush.msra.mxu1 %v5153_v51 }
  0x67   :  { %1355 = vmatpush.msra.mxu1 %v5161_v54 }
  0x69   :  { %1356 = vmatpush.msra.mxu1 %v5168_v58  ;;  %v5393_v58 = vld [vmem:[%s7634_s1 + $0x6] sm:$0x3] }
  0x6a   :  { %7790 = vst [vmem:[#allocation36_spill] sm:$0xff] %v5393_v58 }
  0x6b   :  { %1357 = vmatpush.msra.mxu1 %v5175_v60 }
  0x6d   :  { %1358 = vmatpush.msra.mxu1 %v5182_v62 }
  0x92   :  { %v223_v6 = vpop.f32.mrf.mxu0 }
  0x93   :  { %v224_v10 = vadd.f32 %v5020_v5, %v223_v6 }
  0x95   :  { %v230_v14 = vadd.f32 %v224_v10, %v5025_v7  ;;  %v228_v15 = vadd.f32 %v224_v10, %v5030_v8  ;;  %v226_v16 = vadd.f32 %v224_v10, %v5035_v9  ;;  %v231_v20 = vadd.f32 %v224_v10, %v5051_v13 }
  0x96   :  { %v229_v22 = vadd.f32 %v224_v10, %v5060_v17  ;;  %v227_v23 = vadd.f32 %v224_v10, %v5070_v19  ;;  %v233_v38 = vadd.f32 %v224_v10, %v5102_v28  ;;  %v232_v41 = vadd.f32 %v224_v10, %v5113_v32 }
  0x97   :  { %4206 = vtanh.f32 %v230_v14 }
  0x98   :  { %4208 = vtanh.f32 %v228_v15 }
  0x99   :  { %4210 = vtanh.f32 %v226_v16 }
  0x9a   :  { %4212 = vtanh.f32 %v231_v20 }
  0x9b   :  { %4214 = vtanh.f32 %v229_v22 }
  0x9c   :  { %4216 = vtanh.f32 %v227_v23 }
  0x9d   :  { %v4207_v27 = vpop.eup %4206  ;;  %4218 = vtanh.f32 %v233_v38 }
  0x9e   :  { %v4209_v30 = vpop.eup %4208  ;;  %v249_v31 = vmul.f32 %v4207_v27, %v5090_v25  ;;  %4220 = vtanh.f32 %v232_v41 }
  0x9f   :  { %v4211_v33 = vpop.eup %4210  ;;  %v247_v34 = vmul.f32 %v4209_v30, %v5090_v25 }
  0xa0   :  { %v266_v36 = vsel %vm253_vm1, %v249_v31, 0.0  ;;  %v245_v37 = vmul.f32 %v4211_v33, %v5090_v25  ;;  %v4213_v39 = vpop.eup %4212 }
  0xa1   :  { %267 = vadd.xlane.f32.xlu2 %v266_v36  ;;  %v260_v40 = vsel %vm253_vm1, %v247_v34, 0.0  ;;  %v4215_v43 = vpop.eup %4214  ;;  %v250_v47 = vmul.f32 %v4213_v39, %v5090_v25 }
  0xa2   :  { %261 = vadd.xlane.f32.xlu1 %v260_v40  ;;  %v254_v44 = vsel %vm253_vm1, %v245_v37, 0.0  ;;  %v4217_v45 = vpop.eup %4216  ;;  %v248_v48 = vmul.f32 %v4215_v43, %v5090_v25 }
  0xa3   :  { %255 = vadd.xlane.f32.xlu0 %v254_v44  ;;  %v246_v50 = vmul.f32 %v4217_v45, %v5090_v25  ;;  %v269_v52 = vsel %vm253_vm1, %v250_v47, 0.0  ;;  %v4219_v55 = vpop.eup %4218 }
  0xa4   :  { %v263_v53 = vsel %vm253_vm1, %v248_v48, 0.0  ;;  %v4221_v57 = vpop.eup %4220  ;;  %v252_v59 = vmul.f32 %v4219_v55, %v5090_v25 }
  0xa5   :  { %v257_v56 = vsel %vm253_vm1, %v246_v50, 0.0  ;;  %v251_v61 = vmul.f32 %v4221_v57, %v5090_v25 }
  0xa6   :  { %v275_v6 = vsel %vm253_vm1, %v252_v59, 0.0  ;;  %v5234_v59 = vld [vmem:[%s7636_s3 + $0x18] sm:$0xff] }
  0xa7   :  { %v272_v10 = vsel %vm253_vm1, %v251_v61, 0.0  ;;  %v5239_v61 = vld [vmem:[%s7636_s3 + $0x10] sm:$0xff]  ;;  %423 = vmatpush.msra.mxu3 %v5234_v59 }
  0xa9   :  { %270 = vadd.xlane.f32.xlu2 %v269_v52  ;;  %424 = vmatpush.msra.mxu3 %v5239_v61 }
  0xaa   :  { %264 = vadd.xlane.f32.xlu1 %v263_v53 }
  0xab   :  { %258 = vadd.xlane.f32.xlu0 %v257_v56 }
  0xb2   :  { %276 = vadd.xlane.f32.xlu1 %v275_v6 }
  0xb3   :  { %273 = vadd.xlane.f32.xlu0 %v272_v10  ;;  %v5242_v10 = vld [vmem:[#allocation2 + $0x18] sm:$0xff] }
  0xb4   :  { %400 = vmatpush.msra.mxu2 %v5242_v10 }
 0x114   :  { %v268_v12 = vpop.xlane.xlu2 %267 }
 0x115   :  { %v262_v11 = vpop.xlane.xlu1 %261  ;;  %v283_v22 = vsel %vm278_vm2, %v268_v12, -inf }
 0x116   :  { %v256_v14 = vpop.xlane.xlu0 %255  ;;  %v281_v34 = vsel %vm278_vm2, %v262_v11, -inf }
 0x117   :  { %v279_v23 = vsel %vm278_vm2, %v256_v14, -inf }
 0x118   :  { %v284_v38 = vmax.f32 %v279_v23, %v283_v22  ;;  %v5266_v22 = vld [vmem:[#allocation2 + $0x28] sm:$0xff] }
 0x119   :  { %7776 = vst [vmem:[#allocation22_spill] sm:$0xff] %v5266_v22 }
 0x11c   :  { %v271_v18 = vpop.xlane.xlu2 %270 }
 0x11d   :  { %v265_v15 = vpop.xlane.xlu1 %264  ;;  %v285_v20 = vsel %vm278_vm2, %v271_v18, -inf }
 0x11e   :  { %v259_v16 = vpop.xlane.xlu0 %258  ;;  %v282_v27 = vsel %vm278_vm2, %v265_v15, -inf }
 0x11f   :  { %v280_v21 = vsel %vm278_vm2, %v259_v16, -inf }
 0x120   :  { %v286_v30 = vmax.f32 %v280_v21, %v285_v20  ;;  %v5258_v20 = vld [vmem:[#allocation2 + $0x8] sm:$0xff]  ;;  %v5263_v21 = vld [vmem:[%s7636_s3] sm:$0xff] }
 0x121   :  { %7774 = vst [vmem:[#allocation20_spill] sm:$0xff] %v5258_v20 }
 0x122   :  { %v291_v40 = vmax.f32 %v284_v38, %v286_v30  ;;  %7775 = vst [vmem:[#allocation21_spill] sm:$0xff] %v5263_v21 }
 0x125   :  { %v277_v26 = vpop.xlane.xlu1 %276 }
 0x126   :  { %v289_v31 = vsel %vm278_vm2, %v277_v26, -inf  ;;  %v274_v33 = vpop.xlane.xlu0 %273 }
 0x127   :  { %v290_v36 = vmax.f32 %v282_v27, %v289_v31  ;;  %v287_v37 = vsel %vm278_vm2, %v274_v33, -inf  ;;  %v5272_v27 = vld [vmem:[#allocation2] sm:$0xff]  ;;  %v5276_v31 = vld [vmem:[#allocation2 + $0x58] sm:$0xff] }
 0x128   :  { %v288_v39 = vmax.f32 %v281_v34, %v287_v37  ;;  %7777 = vst [vmem:[#allocation23_spill] sm:$0xff] %v5272_v27 }
 0x12a   :  { %v292_v41 = vmax.f32 %v288_v39, %v290_v36 }
 0x12c   :  { %v293_v43 = vmax.f32 %v291_v40, %v292_v41  ;;  %v5293_v40 = vld [vmem:[#allocation2 + $0x50] sm:$0xff] }
 0x12e   :  { %v294_v44 = vsub.f32 %v256_v14, %v293_v43  ;;  %v295_v45 = vsub.f32 %v259_v16, %v293_v43  ;;  %v296_v47 = vsub.f32 %v262_v11, %v293_v43  ;;  %v297_v48 = vsub.f32 %v265_v15, %v293_v43  ;;  %v5247_v11 = vld [vmem:[%s7636_s3 + $0x8] sm:$0xff]  ;;  %v5252_v14 = vld [vmem:[#allocation2 + $0x10] sm:$0xff] }
 0x12f   :  { %v298_v50 = vsub.f32 %v268_v12, %v293_v43  ;;  %v299_v56 = vsub.f32 %v271_v18, %v293_v43  ;;  %v300_v63 = vsub.f32 %v274_v33, %v293_v43  ;;  %v5250_v12 = vld [vmem:[#allocation2 + $0x38] sm:$0xff]  ;;  %v301_v15 = vsub.f32 %v277_v26, %v293_v43  ;;  %v5256_v18 = vld [vmem:[#allocation2 + $0x30] sm:$0xff]  ;;  %401 = vmatpush.msra.mxu2 %v5252_v14  ;;  %v5269_v26 = vpop.f32.mrf.mxu1  ;;  %v5279_v33 = vld [vmem:[#allocation2 + $0x20] sm:$0xff] }
 0x130   :  { %v302_v52 = vmul.f32 1.442695, %v294_v44  ;;  %v304_v53 = vmul.f32 1.442695, %v295_v45  ;;  %v306_v55 = vmul.f32 1.442695, %v296_v47  ;;  %447 = vmatpush.msrb.mxu0 %v5250_v12  ;;  %425 = vmatpush.msra.mxu3 %v5247_v11 }
 0x131   :  { %v308_v57 = vmul.f32 1.442695, %v297_v48  ;;  %v310_v6 = vmul.f32 1.442695, %v298_v50  ;;  %v312_v16 = vmul.f32 1.442695, %v299_v56  ;;  %402 = vmatpush.msra.mxu2 %v5258_v20 }
 0x132   :  { %4222 = vpow2.f32 %v302_v52  ;;  %7773 = vst [vmem:[#allocation19_spill] sm:$0xff] %v5256_v18  ;;  %v314_v23 = vmul.f32 1.442695, %v300_v63  ;;  %448 = vmatpush.msrb.mxu0 %v5256_v18  ;;  %v316_v36 = vmul.f32 1.442695, %v301_v15  ;;  %426 = vmatpush.msra.mxu3 %v5263_v21  ;;  %v5300_v45 = vld [vmem:[#allocation2 + $0x48] sm:$0xff] }
 0x133   :  { %4224 = vpow2.f32 %v304_v53  ;;  %7778 = vst [vmem:[#allocation24_spill] sm:$0xff] %v5279_v33  ;;  %4060 = vmatmul.msk.f32.vlgmr.msra.gmra.mxu3 %vm202_vm0, %v5269_v26  ;;  %403 = vmatpush.msra.mxu2 %v5272_v27  ;;  %v5304_v52 = vld [vmem:[#allocation2 + $0x40] sm:$0xff] }
 0x134   :  { %4226 = vpow2.f32 %v306_v55  ;;  %449 = vmatpush.msrb.mxu0 %v5266_v22  ;;  %491 = vmatpush.msrb.mxu3 %v5276_v31 }
 0x135   :  { %4228 = vpow2.f32 %v308_v57 }
 0x136   :  { %4230 = vpow2.f32 %v310_v6  ;;  %450 = vmatpush.msrb.mxu0 %v5279_v33  ;;  %492 = vmatpush.msrb.mxu3 %v5293_v40 }
 0x137   :  { %4232 = vpow2.f32 %v312_v16 }
 0x138   :  { %v5274_v30 = vpop.eup %4222  ;;  %4234 = vpow2.f32 %v314_v23  ;;  %493 = vmatpush.msrb.mxu3 %v5300_v45  ;;  %v5313_v23 = vld [vmem:[%s7636_s3 + $0x38] sm:$0xff] }
 0x139   :  { %v5281_v34 = vpop.eup %4224  ;;  %v318_v37 = vsel %vm278_vm2, %v5274_v30, 0.0  ;;  %4236 = vpow2.f32 %v316_v36  ;;  %7779 = vst [vmem:[#allocation25_spill] sm:$0xff] %v5313_v23  ;;  %467 = vmatpush.msrb.mxu2 %v5313_v23 }
 0x13a   :  { %v5287_v38 = vpop.eup %4226  ;;  %v319_v39 = vsel %vm278_vm2, %v5281_v34, 0.0  ;;  %494 = vmatpush.msrb.mxu3 %v5304_v52 }
 0x13b   :  { %v4229_v41 = vpop.eup %4228  ;;  %v320_v43 = vadd.f32 %v319_v39, %v318_v37  ;;  %v321_v44 = vsel %vm278_vm2, %v5287_v38, 0.0  ;;  %v5320_v37 = vld [vmem:[%s7636_s3 + $0x58] sm:$0xff]  ;;  %v5325_v39 = vld [vmem:[%s7636_s3 + $0x30] sm:$0xff] }
 0x13c   :  { %v4231_v47 = vpop.eup %4230  ;;  %v323_v50 = vsel %vm278_vm2, %v4229_v41, 0.0  ;;  %7780 = vst [vmem:[#allocation26_spill] sm:$0xff] %v5325_v39  ;;  %511 = vmatpush.msra.mxu0 %v5320_v37  ;;  %468 = vmatpush.msrb.mxu2 %v5325_v39 }
 0x13d   :  { %v322_v48 = vadd.f32 %v321_v44, %v320_v43  ;;  %v4233_v53 = vpop.eup %4232  ;;  %v325_v56 = vsel %vm278_vm2, %v4231_v47, 0.0  ;;  %v5330_v43 = vld [vmem:[%s7636_s3 + $0x50] sm:$0xff] }
 0x13e   :  { %v4235_v57 = vpop.eup %4234  ;;  %v327_v6 = vsel %vm278_vm2, %v4233_v53, 0.0  ;;  %512 = vmatpush.msra.mxu0 %v5330_v43 }
 0x13f   :  { %v324_v55 = vadd.f32 %v323_v50, %v322_v48  ;;  %v4237_v15 = vpop.eup %4236  ;;  %v329_v36 = vsel %vm278_vm2, %v4235_v57, 0.0  ;;  %v5333_v48 = vld [vmem:[#allocation4 + $0x38] sm:$0xff]  ;;  %v5338_v50 = vld [vmem:[%s7636_s3 + $0x28] sm:$0xff] }
 0x140   :  { %7781 = vst [vmem:[#allocation27_spill] sm:$0xff] %v5333_v48  ;;  %561 = vmatpush.msra.mxu3 %v5333_v48  ;;  %469 = vmatpush.msrb.mxu2 %v5338_v50  ;;  %v5363_v48 = vld [vmem:[%s7636_s3 + $0x40] sm:$0xff] }
 0x141   :  { %v326_v63 = vadd.f32 %v325_v56, %v324_v55  ;;  %7782 = vst [vmem:[#allocation28_spill] sm:$0xff] %v5338_v50  ;;  %v331_v55 = vsel %vm278_vm2, %v4237_v15, 0.0  ;;  %v5346_v56 = vld [vmem:[%s7636_s3 + $0x48] sm:$0xff] }
 0x142   :  { %513 = vmatpush.msra.mxu0 %v5346_v56 }
 0x143   :  { %v328_v16 = vadd.f32 %v327_v6, %v326_v63  ;;  %v5348_v63 = vld [vmem:[#allocation4 + $0x30] sm:$0xff] }
 0x144   :  { %7783 = vst [vmem:[#allocation29_spill] sm:$0xff] %v5348_v63  ;;  %562 = vmatpush.msra.mxu3 %v5348_v63  ;;  %514 = vmatpush.msra.mxu0 %v5363_v48  ;;  %v5375_v63 = vld [vmem:[%s7634_s1] sm:$0x3] }
 0x145   :  { %v330_v44 = vadd.f32 %v329_v36, %v328_v16  ;;  %v5354_v16 = vld [vmem:[%s7636_s3 + $0x20] sm:$0xff]  ;;  %v5356_v36 = vld [vmem:[#allocation4 + $0x28] sm:$0xff]  ;;  %7787 = vst [vmem:[#allocation33_spill] sm:$0xff] %v5375_v63 }
 0x146   :  { %7784 = vst [vmem:[#allocation30_spill] sm:$0xff] %v5354_v16  ;;  %470 = vmatpush.msrb.mxu2 %v5354_v16  ;;  %563 = vmatpush.msra.mxu3 %v5356_v36 }
 0x147   :  { %v332_v6 = vadd.f32 %v331_v55, %v330_v44  ;;  %7785 = vst [vmem:[#allocation31_spill] sm:$0xff] %v5356_v36  ;;  %v5369_v44 = vld [vmem:[#allocation4 + $0x20] sm:$0xff] }
 0x148   :  { %7786 = vst [vmem:[#allocation32_spill] sm:$0xff] %v5369_v44  ;;  %564 = vmatpush.msra.mxu3 %v5369_v44  ;;  %v5385_v36 = vld [vmem:[%s7634_s1 + $0x4] sm:$0x3] }
 0x149   :  { %4238 = vrcp.f32 %v332_v6  ;;  %v5380_v6 = vld [vmem:[%s7634_s1 + $0x2] sm:$0x3]  ;;  %7789 = vst [vmem:[#allocation35_spill] sm:$0xff] %v5385_v36 }
 0x14a   :  { %7788 = vst [vmem:[#allocation34_spill] sm:$0xff] %v5380_v6 }
 0x14f   :  { %v4239_v55 = vpop.eup %4238 }
 0x150   :  { %v334_v62 = vmul.f32 %v4239_v55, %v5274_v30  ;;  %v335_v44 = vmul.f32 %v4239_v55, %v5281_v34  ;;  %v336_v60 = vmul.f32 %v4239_v55, %v5287_v38  ;;  %v337_v54 = vmul.f32 %v4239_v55, %v4229_v41  ;;  %v5401_v30 = vld [vmem:[%s7634_s1 + $0x8] sm:$0x3] }
 0x151   :  { %v338_v51 = vmul.f32 %v4239_v55, %v4231_v47  ;;  %7791 = vst [vmem:[#allocation37_spill] sm:$0xff] %v5401_v30  ;;  %v339_v34 = vmul.f32 %v4239_v55, %v4233_v53  ;;  %v340_v47 = vmul.f32 %v4239_v55, %v4235_v57  ;;  %v5416_v53 = vld [vmem:[%s7634_s1 + $0xc] sm:$0x3] }
 0x152   :  { %v342_v49 = vmul.f32 %v334_v62, %v5375_v63  ;;  %v343_v46 = vmul.f32 %v335_v44, %v5380_v6  ;;  %v344_v42 = vmul.f32 %v336_v60, %v5385_v36  ;;  %v345_v38 = vmul.f32 %v337_v54, %v5393_v58  ;;  %v5409_v62 = vld [vmem:[%s7634_s1 + $0xa] sm:$0x3] }
 0x153   :  { %v346_v60 = vmul.f32 %v338_v51, %v5401_v30  ;;  %v348_v6 = vmul.f32 %v340_v47, %v5416_v53  ;;  %v5452_v47 = vld [vmem:[#allocation4 + $0x40] sm:$0xff] }
 0x154   :  { %v350_v35 = vsel %vm253_vm1, %v342_v49, 0.0  ;;  %v351_v29 = vsel %vm253_vm1, %v343_v46, 0.0  ;;  %v353_v44 = vsel %vm253_vm1, %v344_v42, 0.0  ;;  %v341_v49 = vmul.f32 %v4239_v55, %v4237_v15 }
 0x155   :  { %v352_v41 = vadd.f32 %v351_v29, %v350_v35  ;;  %v347_v46 = vmul.f32 %v339_v34, %v5409_v62  ;;  %v355_v58 = vsel %vm253_vm1, %v345_v38, 0.0  ;;  %v357_v29 = vsel %vm253_vm1, %v346_v60, 0.0  ;;  %v5426_v34 = vld [vmem:[#allocation4 + $0x18] sm:$0xff]  ;;  %v5458_v60 = vld [vmem:[#allocation6 + $0x10] sm:$0xff] }
 0x156   :  { %v349_v51 = vmul.f32 %v341_v49, %v5012_v4  ;;  %v361_v30 = vsel %vm253_vm1, %v348_v6, 0.0  ;;  %v5428_v38 = vld [vmem:[#allocation4 + $0x58] sm:$0xff]  ;;  %v5438_v6 = vld [vmem:[#allocation4 + $0x8] sm:$0xff] }
 0x157   :  { %v354_v54 = vadd.f32 %v353_v44, %v352_v41  ;;  %v359_v42 = vsel %vm253_vm1, %v347_v46, 0.0  ;;  %v5448_v41 = vld [vmem:[#allocation6 + $0x18] sm:$0xff]  ;;  %v5463_v44 = vld [vmem:[#allocation6 + $0x8] sm:$0xff] }
 0x158   :  { %v363_v15 = vsel %vm253_vm1, %v349_v51, 0.0 }
 0x159   :  { %v356_v36 = vadd.f32 %v355_v58, %v354_v54  ;;  %v5432_v58 = vld [vmem:[#allocation4 + $0x10] sm:$0xff]  ;;  %v5468_v54 = vld [vmem:[#allocation6] sm:$0xff] }
 0x15b   :  { %v358_v35 = vadd.f32 %v357_v29, %v356_v36  ;;  %v5436_v36 = vld [vmem:[#allocation4 + $0x50] sm:$0xff] }
 0x15d   :  { %v360_v57 = vadd.f32 %v359_v42, %v358_v35 }
 0x15f   :  { %v362_v63 = vadd.f32 %v361_v30, %v360_v57  ;;  %v5444_v30 = vld [vmem:[#allocation4] sm:$0xff] }
 0x161   :  { %v364_v55 = vadd.f32 %v363_v15, %v362_v63  ;;  %v5442_v63 = vld [vmem:[#allocation4 + $0x48] sm:$0xff]  ;;  %v5507_v15 = vld [vmem:[%s7639_s6] ss:$0 sm:$0xff] }
 0x162   :  { %7794 = vst [vmem:[#allocation40_spill] sm:$0xff] %v5507_v15 }
 0x163   :  { %4059 = vmatmul.msk.f32.vlgmr.msra.gmra.mxu2 %vm202_vm0, %v364_v55  ;;  %4061 = vmatmul.msk.f32.vlgmr.msrb.gmra.mxu0 %vm202_vm0, %v364_v55 }
 0x164   :  { %4063 = vmatmul.msk.f32.vlgmr.msrb.gmra.mxu3 %vm202_vm0, %v364_v55  ;;  %538 = vmatpush.msra.mxu2 %v5426_v34 }
 0x165   :  { %584 = vmatpush.msrb.mxu0 %v5428_v38 }
 0x166   :  { %539 = vmatpush.msra.mxu2 %v5432_v58 }
 0x167   :  { %585 = vmatpush.msrb.mxu0 %v5436_v36 }
 0x168   :  { %540 = vmatpush.msra.mxu2 %v5438_v6 }
 0x169   :  { %586 = vmatpush.msrb.mxu0 %v5442_v63 }
 0x16a   :  { %541 = vmatpush.msra.mxu2 %v5444_v30 }
 0x16b   :  { %4062 = vmatmul.msk.f32.vlgmr.msrb.gmra.mxu2 %vm202_vm0, %v5269_v26  ;;  %4064 = vmatmul.msk.f32.vlgmr.msra.gmra.mxu0 %vm202_vm0, %v5269_v26  ;;  %v5500_v26 = vld [vmem:[%s7639_s6 + $0x1] ss:$0 sm:$0xff] }
 0x16c   :  { %4066 = vmatmul.msk.f32.vlgmr.msra.gmra.mxu3 %vm202_vm0, %v5012_v4  ;;  %651 = vmatpush.msrb.mxu2 %v5448_v41  ;;  %7793 = vst [vmem:[#allocation39_spill] sm:$0xff] %v5500_v26 }
 0x16d   :  { %587 = vmatpush.msrb.mxu0 %v5452_v47 }
 0x16e   :  { %652 = vmatpush.msrb.mxu2 %v5458_v60 }
 0x16f   :  { %722 = vmatpush.msra.mxu0 %v4989_v0 }
 0x170   :  { %653 = vmatpush.msrb.mxu2 %v5463_v44 }
 0x171   :  { %723 = vmatpush.msra.mxu0 %v4994_v1 }
 0x172   :  { %654 = vmatpush.msrb.mxu2 %v5468_v54 }
 0x173   :  { %724 = vmatpush.msra.mxu0 %v5000_v2  ;;  %4065 = vmatmul.msk.f32.vlgmr.msra.gmra.mxu2 %vm202_vm0, %v5012_v4 }
 0x174   :  { %4067 = vmatmul.msk.f32.vlgmr.msrb.gmra.mxu0 %vm202_vm0, %v5012_v4  ;;  %899 = vmatpush.msra.mxu2 %v5242_v10 }
 0x175   :  { %725 = vmatpush.msra.mxu0 %v5005_v3  ;;  %v5495_v3 = vld [vmem:[%s7640_s7 + $0x1] ss:$0 sm:$0xff] }
 0x176   :  { %900 = vmatpush.msra.mxu2 %v5252_v14  ;;  %7792 = vst [vmem:[#allocation38_spill] sm:$0xff] %v5495_v3 }
 0x177   :  { %943 = vmatpush.msrb.mxu0 %v5250_v12 }
 0x178   :  { %901 = vmatpush.msra.mxu2 %v5258_v20 }
 0x179   :  { %944 = vmatpush.msrb.mxu0 %v5256_v18 }
 0x17a   :  { %902 = vmatpush.msra.mxu2 %v5272_v27 }
 0x17b   :  { %945 = vmatpush.msrb.mxu0 %v5266_v22  ;;  %4070 = vmatmul.msk.f32.vlgmr.msrb.gmra.mxu2 %vm202_vm0, %v364_v55 }
 0x17c   :  { %963 = vmatpush.msrb.mxu2 %v5313_v23 }
 0x17d   :  { %946 = vmatpush.msrb.mxu0 %v5279_v33 }
 0x17e   :  { %964 = vmatpush.msrb.mxu2 %v5325_v39 }
 0x180   :  { %965 = vmatpush.msrb.mxu2 %v5338_v50 }
 0x182   :  { %966 = vmatpush.msrb.mxu2 %v5354_v16  ;;  %v5512_v16 = vld [vmem:[%s7640_s7] ss:$0 sm:$0xff] }
 0x183   :  { %7795 = vst [vmem:[#allocation41_spill] sm:$0xff] %v5512_v16 }
 0x1b6   :  { %v428_v0 = vpop.f32.mrf.mxu3 }
 0x1e0   :  { %v452_v49 = vpop.f32.mrf.mxu0 }
 0x1e6   :  { %v405_v1 = vpop.f32.mrf.mxu2 }
 0x1e7   :  { %v496_v2 = vpop.f32.mrf.mxu3  ;;  %v429_v57 = vadd.f32 %v428_v0, %v405_v1 }
 0x1ee   :  { %v472_v46 = vpop.f32.mrf.mxu2 }
 0x1ef   :  { %v473_v29 = vadd.f32 %v472_v46, %v452_v49  ;;  %v566_v35 = vpop.f32.mrf.mxu3  ;;  %v434_v49 = vadd.f32 %v5507_v15, %v429_v57  ;;  %v5524_v57 = vld [vmem:[%s7644_s11 + $0x10] sm:$0xff] }
 0x1f0   :  { %v567_v51 = vadd.f32 %v5495_v3, %v566_v35 }
 0x1f1   :  { %v478_v42 = vadd.f32 %v5500_v26, %v473_v29 }
 0x1f3   :  { %v612_v55 = vadd.f32 %v567_v51, %v478_v42  ;;  %v5519_v42 = vld [vmem:[%s7644_s11 + $0x18] sm:$0xff] }
 0x1f4   :  { %674 = vmatpush.msrb.mxu3 %v5519_v42 }
 0x1f5   :  { %v4069_v50 = vmul.f32 -1.442695, %v612_v55  ;;  %v5536_v55 = vld [vmem:[%s7644_s11] sm:$0xff] }
 0x1f6   :  { %v543_v39 = vpop.f32.mrf.mxu2  ;;  %675 = vmatpush.msrb.mxu3 %v5524_v57  ;;  %7797 = vst [vmem:[#allocation43_spill] sm:$0xff] %v5536_v55 }
 0x1f7   :  { %4240 = vpow2.f32 %v4069_v50  ;;  %v544_v46 = vadd.f32 %v5512_v16, %v543_v39  ;;  %v5530_v39 = vld [vmem:[%s7644_s11 + $0x8] sm:$0xff] }
 0x1f8   :  { %7796 = vst [vmem:[#allocation42_spill] sm:$0xff] %v5530_v39  ;;  %676 = vmatpush.msrb.mxu3 %v5530_v39 }
 0x1f9   :  { %v592_v29 = vadd.f32 %v544_v46, %v434_v49 }
 0x1fa   :  { %677 = vmatpush.msrb.mxu3 %v5536_v55 }
 0x1fb   :  { %v4068_v0 = vmul.f32 -1.442695, %v592_v29 }
 0x1fc   :  { %922 = vmatpush.msra.mxu3 %v5234_v59 }
 0x1fd   :  { %v4241_v1 = vpop.eup %4240  ;;  %4242 = vpow2.f32 %v4068_v0 }
 0x1fe   :  { %v616_v35 = vadd.f32 1.0, %v4241_v1  ;;  %923 = vmatpush.msra.mxu3 %v5239_v61  ;;  %v5545_v1 = vld [vmem:[%s7640_s7 + $0x2] ss:$0 sm:$0xff] }
 0x1ff   :  { %v5552_v61 = vld [vmem:[%s7639_s6 + $0x2] ss:$0 sm:$0xff] }
 0x200   :  { %4244 = vrcp.f32 %v616_v35  ;;  %924 = vmatpush.msra.mxu3 %v5247_v11  ;;  %vm622_vm8 = vweird.f32 %v616_v35 }
 0x202   :  { %925 = vmatpush.msra.mxu3 %v5263_v21  ;;  %v628_v21 = vand.u32 2147483648, %v616_v35 }
 0x203   :  { %v4243_v3 = vpop.eup %4242 }
 0x204   :  { %v596_v51 = vadd.f32 1.0, %v4243_v3  ;;  %v516_v3 = vpop.f32.mrf.mxu0  ;;  %v629_v18 = vor.u32 1.1754944e-38, %v628_v21  ;;  %v5576_v21 = vld [vmem:[%s7646_s13] ss:$0 sm:$0xff] }
 0x205   :  { %v517_v59 = vadd.f32 %v516_v3, %v496_v2  ;;  %v626_v3 = vand.u32 2147483647, %v616_v35 }
 0x206   :  { %4246 = vrcp.f32 %v596_v51  ;;  %v4245_v50 = vpop.eup %4244  ;;  %v608_v15 = vand.u32 2147483648, %v596_v51  ;;  %v606_v33 = vand.u32 2147483647, %v596_v51  ;;  %vm602_vm4 = vweird.f32 %v596_v51 }
 0x207   :  { %v618_v49 = vmul.f32 %v4245_v50, %v616_v35  ;;  %vm623_vm7 = vweird.f32 %v4245_v50  ;;  %vm627_vm10 = vcmp.eq.f32.partialorder %v626_v3, 8.507059e+37 }
 0x208   :  { %vm607_vm6 = vcmp.eq.f32.partialorder %v606_v33, 8.507059e+37  ;;  %vm624_vm9 = vmor %vm622_vm8, %vm623_vm7 }
 0x209   :  { %v619_v0 = vsub.f32 1.0, %v618_v49 }
 0x20b   :  { %v620_v27 = vmul.f32 %v4245_v50, %v619_v0  ;;  %v522_v0 = vadd.f32 %v5552_v61, %v517_v59 }
 0x20c   :  { %v4247_v46 = vpop.eup %4246  ;;  %v589_v16 = vpop.f32.mrf.mxu0 }
 0x20d   :  { %v598_v29 = vmul.f32 %v4247_v46, %v596_v51  ;;  %vm603_vm3 = vweird.f32 %v4247_v46  ;;  %v590_v49 = vadd.f32 %v5545_v1, %v589_v16 }
 0x20e   :  { %vm604_vm5 = vmor %vm602_vm4, %vm603_vm3 }
 0x20f   :  { %v599_v26 = vsub.f32 1.0, %v598_v29  ;;  %v609_v29 = vor.u32 1.1754944e-38, %v608_v15 }
 0x211   :  { %v600_v23 = vmul.f32 %v4247_v46, %v599_v26  ;;  %v621_v26 = vadd.f32 %v4245_v50, %v620_v27  ;;  %v656_v27 = vpop.f32.mrf.mxu2 }
 0x213   :  { %v601_v55 = vadd.f32 %v4247_v46, %v600_v23  ;;  %v625_v39 = vsel %vm624_vm9, %v4245_v50, %v621_v26 }
 0x214   :  { %v630_v23 = vsel %vm627_vm10, %v629_v18, %v625_v39 }
 0x215   :  { %v605_v22 = vsel %vm604_vm5, %v4247_v46, %v601_v55  ;;  %v635_v16 = vsub.f32 1.0, %v630_v23  ;;  %v637_v33 = vmul.f32 %v630_v23, %v5012_v4  ;;  %v197_v46 = vlaneseq }
 0x216   :  { %v610_v11 = vsel %vm607_vm6, %v609_v29, %v605_v22 }
 0x217   :  { %v632_v2 = vmul.f32 %v610_v11, %v590_v49  ;;  %v5591_v59 = vand.u32 127, %v197_v46 }
 0x219   :  { %v633_v20 = vadd.f32 %v632_v2, %v522_v0 }
 0x21b   :  { %4248 = vtanh.f32 %v633_v20 }
 0x221   :  { %v4249_v15 = vpop.eup %4248 }
 0x222   :  { %v636_v51 = vmul.f32 %v4249_v15, %v635_v16 }
 0x224   :  { %v5557_v22 = vadd.f32 %v637_v33, %v636_v51 }
 0x226   :  { %4071 = vmatmul.msk.f32.vlgmr.msrb.gmra.mxu3 %vm202_vm0, %v5557_v22  ;;  %4073 = vmatmul.msk.f32.vlgmr.msra.gmra.mxu0 %vm202_vm0, %v5557_v22 }
 0x227   :  { %1004 = vmatpush.msra.mxu0 %v5320_v37  ;;  %984 = vmatpush.msrb.mxu3 %v5276_v31 }
 0x229   :  { %1005 = vmatpush.msra.mxu0 %v5330_v43  ;;  %985 = vmatpush.msrb.mxu3 %v5293_v40 }
 0x22b   :  { %1006 = vmatpush.msra.mxu0 %v5346_v56  ;;  %986 = vmatpush.msrb.mxu3 %v5300_v45 }
 0x22d   :  { %1007 = vmatpush.msra.mxu0 %v5363_v48  ;;  %987 = vmatpush.msrb.mxu3 %v5304_v52 }
 0x2a3   :  { %v727_v4 = vpop.f32.mrf.mxu0 }
 0x2a4   :  { %v728_v18 = vadd.f32 %v5020_v5, %v727_v4 }
 0x2a6   :  { %v730_v20 = vadd.f32 %v728_v18, %v5035_v9  ;;  %v733_v37 = vadd.f32 %v728_v18, %v5060_v17  ;;  %v736_v43 = vadd.f32 %v728_v18, %v5113_v32  ;;  %v731_v32 = vadd.f32 %v728_v18, %v5070_v19 }
 0x2a7   :  { %v734_v2 = vadd.f32 %v728_v18, %v5025_v7  ;;  %v737_v16 = vadd.f32 %v728_v18, %v5102_v28 }
 0x2a8   :  { %4250 = vtanh.f32 %v730_v20 }
 0x2a9   :  { %v679_v31 = vpop.f32.mrf.mxu3  ;;  %4252 = vtanh.f32 %v733_v37 }
 0x2aa   :  { %v680_v40 = vadd.f32 %v679_v31, %v656_v27  ;;  %4254 = vtanh.f32 %v736_v43  ;;  %v732_v27 = vadd.f32 %v728_v18, %v5030_v8 }
 0x2ab   :  { %4256 = vtanh.f32 %v731_v32  ;;  %v7684_v32 = vmov 1.0  }
 0x2ac   :  { %v685_v45 = vadd.f32 %v5576_v21, %v680_v40  ;;  %4258 = vtanh.f32 %v734_v2 }
 0x2ad   :  { %4260 = vtanh.f32 %v737_v16 }
 0x2ae   :  { %686 = vst [vmem:[%s7648_s15] sm:$0x3] %v685_v45  ;;  %v687_v5 = vsel %vm278_vm2, %v685_v45, -inf  ;;  %v4251_v9 = vpop.eup %4250  ;;  %4262 = vtanh.f32 %v732_v27  ;;  %v5648_v27 = vld [vmem:[%s7647_s14 + $0x50] sm:$0xff] }
 0x2af   :  { %688 = vmax.xlane.f32.xlu2 %v687_v5  ;;  %v746_v52 = vmul.f32 %v4251_v9, %v5090_v25  ;;  %v4253_v56 = vpop.eup %4252 }
 0x2b0   :  { %v749_v17 = vmul.f32 %v4253_v56, %v5090_v25  ;;  %v4255_v39 = vpop.eup %4254 }
 0x2b1   :  { %v754_v48 = vsel %vm253_vm1, %v746_v52, 0.0  ;;  %v752_v50 = vmul.f32 %v4255_v39, %v5090_v25  ;;  %v4257_v3 = vpop.eup %4256 }
 0x2b2   :  { %v763_v35 = vsel %vm253_vm1, %v749_v17, 0.0  ;;  %v747_v23 = vmul.f32 %v4257_v3, %v5090_v25  ;;  %v4259_v15 = vpop.eup %4258  ;;  %v5634_v3 = vld [vmem:[%s7647_s14 + $0x60] sm:$0xff] }
 0x2b3   :  { %v772_v55 = vsel %vm253_vm1, %v752_v50, 0.0  ;;  %v750_v51 = vmul.f32 %v4259_v15, %v5090_v25  ;;  %v4261_v4 = vpop.eup %4260 }
 0x2b4   :  { %v757_v19 = vsel %vm253_vm1, %v747_v23, 0.0  ;;  %v753_v7 = vmul.f32 %v4261_v4, %v5090_v25  ;;  %v4263_v5 = vpop.eup %4262 }
 0x2b5   :  { %v766_v33 = vsel %vm253_vm1, %v750_v51, 0.0  ;;  %v748_v9 = vmul.f32 %v4263_v5, %v5090_v25  ;;  %v7799_v5 = vld [vmem:[#allocation10_spill] sm:$0xff] }
 0x2b6   :  { %v775_v20 = vsel %vm253_vm1, %v753_v7, 0.0 }
 0x2b7   :  { %755 = vadd.xlane.f32.xlu2 %v754_v48  ;;  %v760_v52 = vsel %vm253_vm1, %v748_v9, 0.0 }
 0x2bf   :  { %764 = vadd.xlane.f32.xlu2 %v763_v35 }
 0x2c7   :  { %773 = vadd.xlane.f32.xlu2 %v772_v55 }
 0x322   :  { %v689_v49 = vpop.xlane.xlu2 %688 }
 0x323   :  { %vm690_vm11 = vcmp.eq.f32.partialorder %v685_v45, %v689_v49  ;;  %v735_v45 = vadd.f32 %v728_v18, %v5051_v13 }
 0x324   :  { %v691_v29 = vsel %vm690_vm11, %v5591_v59, 128 }
 0x325   :  { %v692_v11 = vsel %vm278_vm2, %v691_v29, 2147483647  ;;  %4264 = vtanh.f32 %v735_v45  ;;  %v5621_v29 = vld [vmem:[%s7647_s14 + $0x70] sm:$0xff] }
 0x326   :  { %v694_v26 = vshra.s32 %v692_v11, 16  ;;  %v693_v31 = vand.u32 65535, %v692_v11  ;;  %v5627_v11 = vld [vmem:[%s7647_s14 + $0x68] sm:$0xff] }
 0x328   :  { %v696_v0 = vcvt.s32.f32 %v694_v26  ;;  %v695_v40 = vcvt.s32.f32 %v693_v31 }
 0x32a   :  { %697 = vmin.xlane.f32.xlu0 %v696_v0  ;;  %v756_v56 = vpop.xlane.xlu2 %755 }
 0x32b   :  { %v4265_v43 = vpop.eup %4264 }
 0x32c   :  { %v751_v48 = vmul.f32 %v4265_v43, %v5090_v25  ;;  %v5615_v25 = vld [vmem:[%s7647_s14 + $0x78] sm:$0xff] }
 0x32e   :  { %v769_v8 = vsel %vm253_vm1, %v751_v48, 0.0 }
 0x332   :  { %758 = vadd.xlane.f32.xlu0 %v757_v19  ;;  %v765_v50 = vpop.xlane.xlu2 %764 }
 0x333   :  { %v781_v4 = vsel %vm278_vm2, %v765_v50, -inf }
 0x33a   :  { %767 = vadd.xlane.f32.xlu0 %v766_v33  ;;  %v774_v26 = vpop.xlane.xlu2 %773  ;;  %v778_v33 = vsel %vm278_vm2, %v756_v56, -inf }
 0x33b   :  { %v786_v23 = vsel %vm278_vm2, %v774_v26, -inf }
 0x342   :  { %776 = vadd.xlane.f32.xlu0 %v775_v20 }
 0x39d   :  { %v698_v28 = vpop.xlane.xlu0 %697 }
 0x39e   :  { %vm699_vm12 = vcmp.eq.f32.partialorder %v696_v0, %v698_v28  ;;  %v704_v35 = vcvt.f32.s32 %v698_v28 }
 0x39f   :  { %v700_v37 = vsel %vm699_vm12, %v695_v40, inf  ;;  %v7798_v40 = vld [vmem:[#allocation9_spill] sm:$0xff] }
 0x3a0   :  { %701 = vmin.xlane.f32.xlu1 %v700_v37  ;;  %v705_v13 = vshll.u32 %v704_v35, 16 }
 0x3a5   :  { %v759_v17 = vpop.xlane.xlu0 %758 }
 0x3a6   :  { %v779_v7 = vsel %vm278_vm2, %v759_v17, -inf }
 0x3a8   :  { %761 = vadd.xlane.f32.xlu1 %v760_v52  ;;  %v7800_v52 = vld [vmem:[#allocation11_spill] sm:$0xff] }
 0x3ad   :  { %v768_v55 = vpop.xlane.xlu0 %767 }
 0x3ae   :  { %v782_v16 = vsel %vm278_vm2, %v768_v55, -inf }
 0x3af   :  { %v783_v31 = vmax.f32 %v778_v33, %v782_v16 }
 0x3b0   :  { %770 = vadd.xlane.f32.xlu1 %v769_v8 }
 0x3b5   :  { %v777_v0 = vpop.xlane.xlu0 %776 }
 0x3b6   :  { %v788_v19 = vsel %vm278_vm2, %v777_v0, -inf }
 0x3b7   :  { %v789_v28 = vmax.f32 %v781_v4, %v788_v19  ;;  %v7802_v19 = vld [vmem:[#allocation13_spill] sm:$0xff]  ;;  %v7803_v4 = vld [vmem:[#allocation14_spill] sm:$0xff] }
 0x413   :  { %v702_v39 = vpop.xlane.xlu1 %701 }
 0x414   :  { %v703_v18 = vcvt.f32.s32 %v702_v39 }
 0x416   :  { %v706_v46 = vadd.s32 %v705_v13, %v703_v18  ;;  %v7801_v13 = vld [vmem:[#allocation12_spill] sm:$0xff] }
 0x418   :  { %vm707_vm13 = vcmp.eq.s32.totalorder %v5591_v59, %v706_v46 }
 0x419   :  { %4074 = vmatmul.msk.f32.vlgmr.msrb.gmra.mxu1 %vm707_vm13, %v7684_v32 }
 0x41a   :  { %1822 = vmatpush.msrb.mxu1 %v5615_v25 }
 0x41b   :  { %v762_v49 = vpop.xlane.xlu1 %761 }
 0x41c   :  { %1823 = vmatpush.msrb.mxu1 %v5621_v29  ;;  %v780_v2 = vsel %vm278_vm2, %v762_v49, -inf }
 0x41d   :  { %v787_v15 = vmax.f32 %v780_v2, %v786_v23 }
 0x41e   :  { %1824 = vmatpush.msrb.mxu1 %v5627_v11 }
 0x41f   :  { %v791_v45 = vmax.f32 %v787_v15, %v789_v28 }
 0x420   :  { %1825 = vmatpush.msrb.mxu1 %v5634_v3 }
 0x422   :  { %1826 = vmatpush.msrb.mxu1 %v5085_v24 }
 0x423   :  { %v771_v51 = vpop.xlane.xlu1 %770 }
 0x424   :  { %v784_v20 = vsel %vm278_vm2, %v771_v51, -inf  ;;  %1827 = vmatpush.msrb.mxu1 %v5648_v27 }
 0x425   :  { %v785_v24 = vmax.f32 %v779_v7, %v784_v20 }
 0x426   :  { %1828 = vmatpush.msrb.mxu1 %v7798_v40 }
 0x427   :  { %v790_v37 = vmax.f32 %v783_v31, %v785_v24  ;;  %v7806_v31 = vld [vmem:[#allocation17_spill] sm:$0xff] }
 0x428   :  { %1829 = vmatpush.msrb.mxu1 %v7799_v5 }
 0x429   :  { %v792_v9 = vmax.f32 %v790_v37, %v791_v45  ;;  %v7807_v45 = vld [vmem:[#allocation18_spill] sm:$0xff] }
 0x42a   :  { %1830 = vmatpush.msrb.mxu1 %v7800_v52 }
 0x42b   :  { %v793_v43 = vsub.f32 %v756_v56, %v792_v9  ;;  %v794_v48 = vsub.f32 %v759_v17, %v792_v9  ;;  %v795_v8 = vsub.f32 %v762_v49, %v792_v9  ;;  %v796_v35 = vsub.f32 %v765_v50, %v792_v9  ;;  %v7804_v50 = vld [vmem:[#allocation15_spill] sm:$0xff]  ;;  %v7805_v49 = vld [vmem:[#allocation16_spill] sm:$0xff] }
 0x42c   :  { %v797_v39 = vsub.f32 %v768_v55, %v792_v9  ;;  %1831 = vmatpush.msrb.mxu1 %v7801_v13  ;;  %v798_v23 = vsub.f32 %v771_v51, %v792_v9  ;;  %v799_v15 = vsub.f32 %v774_v26, %v792_v9  ;;  %v800_v56 = vsub.f32 %v777_v0, %v792_v9 }
 0x42d   :  { %v801_v18 = vmul.f32 1.442695, %v793_v43  ;;  %v803_v46 = vmul.f32 1.442695, %v794_v48  ;;  %v805_v2 = vmul.f32 1.442695, %v795_v8 }
 0x42e   :  { %v807_v16 = vmul.f32 1.442695, %v796_v35  ;;  %1832 = vmatpush.msrb.mxu1 %v7802_v19  ;;  %v809_v33 = vmul.f32 1.442695, %v797_v39  ;;  %v811_v17 = vmul.f32 1.442695, %v798_v23 }
 0x42f   :  { %4266 = vpow2.f32 %v801_v18  ;;  %v813_v55 = vmul.f32 1.442695, %v799_v15  ;;  %v815_v20 = vmul.f32 1.442695, %v800_v56 }
 0x430   :  { %4268 = vpow2.f32 %v803_v46  ;;  %1833 = vmatpush.msrb.mxu1 %v7803_v4 }
 0x431   :  { %4270 = vpow2.f32 %v805_v2 }
 0x432   :  { %4272 = vpow2.f32 %v807_v16  ;;  %1834 = vmatpush.msrb.mxu1 %v7804_v50 }
 0x433   :  { %4274 = vpow2.f32 %v809_v33 }
 0x434   :  { %1835 = vmatpush.msrb.mxu1 %v7805_v49  ;;  %4276 = vpow2.f32 %v811_v17 }
 0x435   :  { %v4267_v51 = vpop.eup %4266  ;;  %4278 = vpow2.f32 %v813_v55  ;;  %v7808_v55 = vld [vmem:[#allocation33_spill] sm:$0xff] }
 0x436   :  { %v4269_v7 = vpop.eup %4268  ;;  %v817_v26 = vsel %vm278_vm2, %v4267_v51, 0.0  ;;  %1836 = vmatpush.msrb.mxu1 %v7806_v31  ;;  %4280 = vpow2.f32 %v815_v20  ;;  %v7809_v20 = vld [vmem:[#allocation34_spill] sm:$0xff]  ;;  %v7810_v31 = vld [vmem:[#allocation35_spill] sm:$0xff] }
 0x437   :  { %v4271_v28 = vpop.eup %4270  ;;  %v818_v24 = vsel %vm278_vm2, %v4269_v7, 0.0 }
 0x438   :  { %v4273_v0 = vpop.eup %4272  ;;  %v819_v40 = vadd.f32 %v818_v24, %v817_v26  ;;  %1837 = vmatpush.msrb.mxu1 %v7807_v45  ;;  %v820_v37 = vsel %vm278_vm2, %v4271_v28, 0.0  ;;  %v7811_v45 = vld [vmem:[#allocation36_spill] sm:$0xff] }
 0x439   :  { %v4275_v5 = vpop.eup %4274  ;;  %v822_v52 = vsel %vm278_vm2, %v4273_v0, 0.0 }
 0x43a   :  { %v821_v9 = vadd.f32 %v820_v37, %v819_v40  ;;  %v4277_v43 = vpop.eup %4276  ;;  %v824_v8 = vsel %vm278_vm2, %v4275_v5, 0.0 }
 0x43b   :  { %v4279_v35 = vpop.eup %4278  ;;  %v826_v13 = vsel %vm278_vm2, %v4277_v43, 0.0 }
 0x43c   :  { %v823_v48 = vadd.f32 %v822_v52, %v821_v9  ;;  %v4281_v18 = vpop.eup %4280  ;;  %v828_v2 = vsel %vm278_vm2, %v4279_v35, 0.0 }
 0x43d   :  { %v830_v16 = vsel %vm278_vm2, %v4281_v18, 0.0 }
 0x43e   :  { %v825_v39 = vadd.f32 %v824_v8, %v823_v48  ;;  %v7812_v8 = vld [vmem:[#allocation37_spill] sm:$0xff] }
 0x440   :  { %v827_v46 = vadd.f32 %v826_v13, %v825_v39 }
 0x442   :  { %v829_v23 = vadd.f32 %v828_v2, %v827_v46 }
 0x444   :  { %v831_v19 = vadd.f32 %v830_v16, %v829_v23 }
 0x446   :  { %4282 = vrcp.f32 %v831_v19  ;;  %v5685_v19 = vld [vmem:[%s7634_s1 + $0xe] sm:$0x3] }
 0x44c   :  { %v4283_v15 = vpop.eup %4282 }
 0x44d   :  { %v833_v33 = vmul.f32 %v4283_v15, %v4267_v51  ;;  %v834_v4 = vmul.f32 %v4283_v15, %v4269_v7  ;;  %v835_v56 = vmul.f32 %v4283_v15, %v4271_v28  ;;  %v836_v17 = vmul.f32 %v4283_v15, %v4273_v0 }
 0x44e   :  { %v837_v50 = vmul.f32 %v4283_v15, %v4275_v5  ;;  %v838_v40 = vmul.f32 %v4283_v15, %v4277_v43  ;;  %v839_v28 = vmul.f32 %v4283_v15, %v4279_v35  ;;  %v840_v13 = vmul.f32 %v4283_v15, %v4281_v18 }
 0x44f   :  { %v841_v49 = vmul.f32 %v833_v33, %v7808_v55  ;;  %v842_v26 = vmul.f32 %v834_v4, %v7809_v20  ;;  %v843_v24 = vmul.f32 %v835_v56, %v7810_v31  ;;  %v844_v37 = vmul.f32 %v836_v17, %v7811_v45  ;;  %v7825_v56 = vld [vmem:[#allocation26_spill] sm:$0xff]  ;;  %v5766_v17 = vld [vmem:[%s7636_s3 + $0x10] sm:$0xff]  ;;  %v7828_v20 = vld [vmem:[#allocation21_spill] sm:$0xff] }
 0x450   :  { %v845_v51 = vmul.f32 %v837_v50, %v7812_v8  ;;  %v846_v5 = vmul.f32 %v838_v40, %v5409_v62  ;;  %v847_v2 = vmul.f32 %v839_v28, %v5416_v53  ;;  %v848_v35 = vmul.f32 %v5685_v19, %v840_v13  ;;  %v7826_v50 = vld [vmem:[#allocation28_spill] sm:$0xff]  ;;  %v5773_v55 = vld [vmem:[%s7636_s3 + $0x8] sm:$0xff] }
 0x451   :  { %v849_v9 = vsel %vm253_vm1, %v841_v49, 0.0  ;;  %v850_v52 = vsel %vm253_vm1, %v842_v26, 0.0  ;;  %v852_v7 = vsel %vm253_vm1, %v843_v24, 0.0  ;;  %v854_v39 = vsel %vm253_vm1, %v844_v37, 0.0  ;;  %v7827_v49 = vld [vmem:[#allocation30_spill] sm:$0xff] }
 0x452   :  { %v851_v48 = vadd.f32 %v850_v52, %v849_v9  ;;  %v856_v43 = vsel %vm253_vm1, %v845_v51, 0.0  ;;  %v858_v16 = vsel %vm253_vm1, %v846_v5, 0.0  ;;  %v860_v62 = vsel %vm253_vm1, %v847_v2, 0.0  ;;  %v7829_v9 = vld [vmem:[#allocation40_spill] sm:$0xff] }
 0x453   :  { %v862_v18 = vsel %vm253_vm1, %v848_v35, 0.0 }
 0x454   :  { %v853_v0 = vadd.f32 %v852_v7, %v851_v48  ;;  %v7830_v48 = vld [vmem:[#allocation41_spill] sm:$0xff] }
 0x456   :  { %v855_v46 = vadd.f32 %v854_v39, %v853_v0  ;;  %v7831_v39 = vld [vmem:[#allocation39_spill] sm:$0xff] }
 0x458   :  { %v857_v23 = vadd.f32 %v856_v43, %v855_v46  ;;  %v7832_v46 = vld [vmem:[#allocation38_spill] sm:$0xff] }
 0x45a   :  { %v859_v33 = vadd.f32 %v858_v16, %v857_v23 }
 0x45c   :  { %v861_v4 = vadd.f32 %v860_v62, %v859_v33 }
 0x45e   :  { %v863_v15 = vadd.f32 %v862_v18, %v861_v4 }
 0x460   :  { %4075 = vmatmul.msk.f32.vlgmr.msra.gmra.mxu2 %vm202_vm0, %v863_v15  ;;  %4077 = vmatmul.msk.f32.vlgmr.msrb.gmra.mxu0 %vm202_vm0, %v863_v15 }
 0x461   :  { %1025 = vmatpush.msra.mxu2 %v5426_v34  ;;  %1065 = vmatpush.msrb.mxu0 %v5428_v38  ;;  %v7813_v34 = vld [vmem:[#allocation27_spill] sm:$0xff]  ;;  %v5708_v38 = vld [vmem:[%s7641_s8 + $0x18] sm:$0xff] }
 0x463   :  { %1026 = vmatpush.msra.mxu2 %v5432_v58  ;;  %1066 = vmatpush.msrb.mxu0 %v5436_v36  ;;  %v7814_v58 = vld [vmem:[#allocation29_spill] sm:$0xff]  ;;  %v5716_v36 = vld [vmem:[%s7641_s8 + $0x10] sm:$0xff] }
 0x465   :  { %1027 = vmatpush.msra.mxu2 %v5438_v6  ;;  %1067 = vmatpush.msrb.mxu0 %v5442_v63  ;;  %v7815_v6 = vld [vmem:[#allocation31_spill] sm:$0xff]  ;;  %v5724_v63 = vld [vmem:[%s7641_s8 + $0x8] sm:$0xff] }
 0x467   :  { %1028 = vmatpush.msra.mxu2 %v5444_v30  ;;  %1068 = vmatpush.msrb.mxu0 %v5452_v47  ;;  %v7816_v30 = vld [vmem:[#allocation32_spill] sm:$0xff]  ;;  %v7817_v47 = vld [vmem:[#allocation19_spill] sm:$0xff] }
 0x496   :  { %v881_v53 = vpop.f32.mrf.mxu1 }
 0x497   :  { %4076 = vmatmul.msk.f32.vlgmr.msra.gmra.mxu3 %vm202_vm0, %v881_v53  ;;  %4078 = vmatmul.msk.f32.vlgmr.msrb.gmra.mxu2 %vm202_vm0, %v881_v53 }
 0x498   :  { %4080 = vmatmul.msk.f32.vlgmr.msra.gmra.mxu0 %vm202_vm0, %v881_v53  ;;  %1045 = vmatpush.msra.mxu3 %v7813_v34 }
 0x499   :  { %1132 = vmatpush.msrb.mxu2 %v5448_v41  ;;  %1201 = vmatpush.msra.mxu0 %v5708_v38  ;;  %v5738_v41 = vld [vmem:[%s7641_s8] sm:$0xff] }
 0x49a   :  { %1046 = vmatpush.msra.mxu3 %v7814_v58 }
 0x49b   :  { %1133 = vmatpush.msrb.mxu2 %v5458_v60  ;;  %1202 = vmatpush.msra.mxu0 %v5716_v36  ;;  %v7818_v60 = vld [vmem:[#allocation42_spill] sm:$0xff] }
 0x49c   :  { %1047 = vmatpush.msra.mxu3 %v7815_v6 }
 0x49d   :  { %1134 = vmatpush.msrb.mxu2 %v5463_v44  ;;  %1203 = vmatpush.msra.mxu0 %v5724_v63  ;;  %v7819_v44 = vld [vmem:[#allocation20_spill] sm:$0xff] }
 0x49e   :  { %1048 = vmatpush.msra.mxu3 %v7816_v30 }
 0x49f   :  { %4079 = vmatmul.msk.f32.vlgmr.msrb.gmra.mxu3 %vm202_vm0, %v863_v15  ;;  %4081 = vmatmul.msk.f32.vlgmr.msra.gmra.mxu2 %vm202_vm0, %v5557_v22 }
 0x4a0   :  { %4083 = vmatmul.msk.f32.vlgmr.msrb.gmra.mxu0 %vm202_vm0, %v5557_v22  ;;  %1135 = vmatpush.msrb.mxu2 %v5468_v54  ;;  %v7820_v54 = vld [vmem:[#allocation22_spill] sm:$0xff] }
 0x4a1   :  { %1155 = vmatpush.msrb.mxu3 %v5519_v42  ;;  %1204 = vmatpush.msra.mxu0 %v5738_v41  ;;  %v7823_v42 = vld [vmem:[#allocation24_spill] sm:$0xff] }
 0x4a2   :  { %1378 = vmatpush.msra.mxu2 %v5242_v10  ;;  %v7821_v10 = vld [vmem:[#allocation43_spill] sm:$0xff] }
 0x4a3   :  { %1422 = vmatpush.msrb.mxu0 %v5250_v12  ;;  %1156 = vmatpush.msrb.mxu3 %v5524_v57  ;;  %v7822_v12 = vld [vmem:[#allocation23_spill] sm:$0xff]  ;;  %v5759_v57 = vld [vmem:[%s7636_s3 + $0x18] sm:$0xff] }
 0x4a4   :  { %1379 = vmatpush.msra.mxu2 %v5252_v14  ;;  %v7824_v14 = vld [vmem:[#allocation25_spill] sm:$0xff] }
 0x4a5   :  { %1423 = vmatpush.msrb.mxu0 %v7817_v47  ;;  %1157 = vmatpush.msrb.mxu3 %v7818_v60 }
 0x4a6   :  { %1380 = vmatpush.msra.mxu2 %v7819_v44 }
 0x4a7   :  { %1424 = vmatpush.msrb.mxu0 %v7820_v54  ;;  %4082 = vmatmul.msk.f32.vlgmr.msra.gmra.mxu3 %vm202_vm0, %v5557_v22 }
 0x4a8   :  { %4086 = vmatmul.msk.f32.vlgmr.msrb.gmra.mxu2 %vm202_vm0, %v863_v15  ;;  %1158 = vmatpush.msrb.mxu3 %v7821_v10 }
 0x4a9   :  { %1381 = vmatpush.msra.mxu2 %v7822_v12  ;;  %1425 = vmatpush.msrb.mxu0 %v7823_v42 }
 0x4aa   :  { %1401 = vmatpush.msra.mxu3 %v5759_v57 }
 0x4ab   :  { %1442 = vmatpush.msrb.mxu2 %v7824_v14 }
 0x4ac   :  { %1402 = vmatpush.msra.mxu3 %v5766_v17 }
 0x4ad   :  { %1443 = vmatpush.msrb.mxu2 %v7825_v56 }
 0x4ae   :  { %1403 = vmatpush.msra.mxu3 %v5773_v55 }
 0x4af   :  { %1444 = vmatpush.msrb.mxu2 %v7826_v50 }
 0x4b0   :  { %1404 = vmatpush.msra.mxu3 %v7828_v20 }
 0x4b1   :  { %1445 = vmatpush.msrb.mxu2 %v7827_v49 }
 0x4dd   :  { %v948_v7 = vpop.f32.mrf.mxu0 }
 0x4e3   :  { %v904_v26 = vpop.f32.mrf.mxu2 }
 0x515   :  { %v1009_v33 = vpop.f32.mrf.mxu0 }
 0x51a   :  { %v927_v31 = vpop.f32.mrf.mxu3  ;;  %v968_v24 = vpop.f32.mrf.mxu2 }
 0x51b   :  { %v928_v40 = vadd.f32 %v927_v31, %v904_v26  ;;  %v969_v28 = vadd.f32 %v968_v24, %v948_v7  ;;  %v5797_v7 = vld [vmem:[#allocation2 + $0x58] sm:$0xff] }
 0x51d   :  { %v930_v52 = vadd.f32 %v7829_v9, %v928_v40  ;;  %v971_v13 = vadd.f32 %v7831_v39, %v969_v28  ;;  %v1070_v30 = vpop.f32.mrf.mxu0  ;;  %v5806_v28 = vld [vmem:[#allocation2 + $0x50] sm:$0xff]  ;;  %v5821_v39 = vld [vmem:[%s7636_s3 + $0x40] sm:$0xff] }
 0x51e   :  { %v1071_v10 = vadd.f32 %v5545_v1, %v1070_v30 }
 0x522   :  { %v989_v45 = vpop.f32.mrf.mxu3  ;;  %v1030_v37 = vpop.f32.mrf.mxu2 }
 0x523   :  { %v1031_v8 = vadd.f32 %v7830_v48, %v1030_v37  ;;  %v1010_v47 = vadd.f32 %v1009_v33, %v989_v45 }
 0x525   :  { %v1073_v51 = vadd.f32 %v1031_v8, %v930_v52  ;;  %v1012_v56 = vadd.f32 %v5552_v61, %v1010_v47 }
 0x527   :  { %v4084_v0 = vmul.f32 -1.442695, %v1073_v51  ;;  %v5794_v51 = vld [vmem:[%s7636_s3 + $0x58] sm:$0xff] }
 0x529   :  { %4284 = vpow2.f32 %v4084_v0  ;;  %v5812_v0 = vld [vmem:[%s7636_s3 + $0x48] sm:$0xff] }
 0x52a   :  { %v1050_v5 = vpop.f32.mrf.mxu3 }
 0x52b   :  { %v1051_v43 = vadd.f32 %v7832_v46, %v1050_v5  ;;  %v5815_v5 = vld [vmem:[#allocation2 + $0x48] sm:$0xff] }
 0x52d   :  { %v1093_v2 = vadd.f32 %v1051_v43, %v971_v13  ;;  %v5824_v13 = vld [vmem:[#allocation2 + $0x40] sm:$0xff] }
 0x52e   :  { %v5830_v43 = vld [vmem:[%s7642_s9] ss:$0 sm:$0xff] }
 0x52f   :  { %v4285_v23 = vpop.eup %4284  ;;  %v4085_v16 = vmul.f32 -1.442695, %v1093_v2 }
 0x530   :  { %v1077_v35 = vadd.f32 1.0, %v4285_v23  ;;  %v5838_v23 = vld [vmem:[%s7635_s2] sm:$0x3] }
 0x531   :  { %4286 = vpow2.f32 %v4085_v16 }
 0x532   :  { %4288 = vrcp.f32 %v1077_v35  ;;  %v1089_v34 = vand.u32 2147483648, %v1077_v35  ;;  %v1087_v6 = vand.u32 2147483647, %v1077_v35  ;;  %vm1083_vm15 = vweird.f32 %v1077_v35 }
 0x534   :  { %v1090_v54 = vor.u32 1.1754944e-38, %v1089_v34  ;;  %vm1088_vm4 = vcmp.eq.f32.partialorder %v1087_v6, 8.507059e+37  ;;  %v5863_v6 = vld [vmem:[%s7635_s2 + $0xc] sm:$0x3] }
 0x537   :  { %v4287_v62 = vpop.eup %4286 }
 0x538   :  { %v4289_v4 = vpop.eup %4288  ;;  %v1097_v18 = vadd.f32 1.0, %v4287_v62 }
 0x539   :  { %v1079_v15 = vmul.f32 %v4289_v4, %v1077_v35  ;;  %vm1084_vm14 = vweird.f32 %v4289_v4  ;;  %v1137_v35 = vpop.f32.mrf.mxu2 }
 0x53a   :  { %4290 = vrcp.f32 %v1097_v18  ;;  %vm1085_vm3 = vmor %vm1083_vm15, %vm1084_vm14  ;;  %v1109_v20 = vand.u32 2147483648, %v1097_v18  ;;  %v1107_v24 = vand.u32 2147483647, %v1097_v18  ;;  %vm1103_vm6 = vweird.f32 %v1097_v18 }
 0x53b   :  { %v1080_v53 = vsub.f32 1.0, %v1079_v15 }
 0x53c   :  { %v1110_v45 = vor.u32 1.1754944e-38, %v1109_v20  ;;  %vm1108_vm8 = vcmp.eq.f32.partialorder %v1107_v24, 8.507059e+37  ;;  %v5884_v24 = vld [vmem:[%s7635_s2 + $0x8] sm:$0x3] }
 0x53d   :  { %v1081_v58 = vmul.f32 %v4289_v4, %v1080_v53 }
 0x53f   :  { %v1082_v60 = vadd.f32 %v4289_v4, %v1081_v58 }
 0x540   :  { %v4291_v44 = vpop.eup %4290 }
 0x541   :  { %v1086_v12 = vsel %vm1085_vm3, %v4289_v4, %v1082_v60  ;;  %v1099_v42 = vmul.f32 %v4291_v44, %v1097_v18  ;;  %vm1104_vm5 = vweird.f32 %v4291_v44  ;;  %v5846_v18 = vld [vmem:[%s7635_s2 + $0x6] sm:$0x3] }
 0x542   :  { %v1091_v14 = vsel %vm1088_vm4, %v1090_v54, %v1086_v12  ;;  %vm1105_vm7 = vmor %vm1103_vm6, %vm1104_vm5 }
 0x543   :  { %v1113_v50 = vmul.f32 %v1091_v14, %v1071_v10  ;;  %v1100_v49 = vsub.f32 1.0, %v1099_v42  ;;  %v5875_v14 = vld [vmem:[%s7635_s2 + $0x2] sm:$0x3] }
 0x545   :  { %v1114_v26 = vadd.f32 %v1113_v50, %v1012_v56  ;;  %v1101_v31 = vmul.f32 %v4291_v44, %v1100_v49 }
 0x547   :  { %4292 = vtanh.f32 %v1114_v26  ;;  %v1102_v40 = vadd.f32 %v4291_v44, %v1101_v31 }
 0x549   :  { %v1106_v37 = vsel %vm1105_vm7, %v4291_v44, %v1102_v40 }
 0x54a   :  { %v1111_v1 = vsel %vm1108_vm8, %v1110_v45, %v1106_v37 }
 0x54b   :  { %v1116_v9 = vsub.f32 1.0, %v1111_v1  ;;  %v1118_v61 = vmul.f32 %v1111_v1, %v5557_v22  ;;  %v5803_v22 = vld [vmem:[%s7636_s3 + $0x50] sm:$0xff]  ;;  %v5892_v1 = vld [vmem:[%s7635_s2 + $0xe] sm:$0x3] }
 0x54d   :  { %v4293_v52 = vpop.eup %4292 }
 0x54e   :  { %v1117_v48 = vmul.f32 %v4293_v52, %v1116_v9 }
 0x550   :  { %v5785_v8 = vadd.f32 %v1118_v61, %v1117_v48 }
 0x552   :  { %4087 = vmatmul.msk.f32.vlgmr.msrb.gmra.mxu3 %vm202_vm0, %v5785_v8  ;;  %4090 = vmatmul.msk.f32.vlgmr.msra.gmra.mxu0 %vm202_vm0, %v5785_v8 }
 0x553   :  { %1483 = vmatpush.msra.mxu0 %v5794_v51  ;;  %1463 = vmatpush.msrb.mxu3 %v5797_v7 }
 0x555   :  { %1484 = vmatpush.msra.mxu0 %v5803_v22  ;;  %1464 = vmatpush.msrb.mxu3 %v5806_v28 }
 0x557   :  { %1485 = vmatpush.msra.mxu0 %v5812_v0  ;;  %1465 = vmatpush.msrb.mxu3 %v5815_v5 }
 0x559   :  { %1486 = vmatpush.msra.mxu0 %v5821_v39  ;;  %1466 = vmatpush.msrb.mxu3 %v5824_v13 }
 0x5cf   :  { %v1206_v46 = vpop.f32.mrf.mxu0 }
 0x5d0   :  { %v5833_v2 = vadd.f32 %v5830_v43, %v1206_v46 }
 0x5d2   :  { %v1209_v16 = vadd.f32 %v5838_v23, %v5833_v2  ;;  %v1212_v15 = vadd.f32 %v5846_v18, %v5833_v2  ;;  %v1215_v30 = vadd.f32 %v5863_v6, %v5833_v2  ;;  %v1210_v56 = vadd.f32 %v5875_v14, %v5833_v2 }
 0x5d3   :  { %v1213_v40 = vadd.f32 %v5884_v24, %v5833_v2  ;;  %v1216_v9 = vadd.f32 %v5892_v1, %v5833_v2 }
 0x5d4   :  { %4294 = vtanh.f32 %v1209_v16 }
 0x5d5   :  { %v1160_v33 = vpop.f32.mrf.mxu3  ;;  %4296 = vtanh.f32 %v1212_v15 }
 0x5d6   :  { %v1161_v62 = vadd.f32 %v1160_v33, %v1137_v35  ;;  %4298 = vtanh.f32 %v1215_v30 }
 0x5d7   :  { %4300 = vtanh.f32 %v1210_v56 }
 0x5d8   :  { %v1163_v4 = vadd.f32 %v5576_v21, %v1161_v62  ;;  %v5857_v21 = vld [vmem:[%s7643_s10] ss:$0 sm:$0xff]  ;;  %4302 = vtanh.f32 %v1213_v40  ;;  %v5904_v62 = vld [vmem:[%s7635_s2 + $0x4] sm:$0x3] }
 0x5d9   :  { %4304 = vtanh.f32 %v1216_v9 }
 0x5da   :  { %4088 = vst [vmem:[%s7648_s15 + $0x2] sm:$0x3] %v1163_v4  ;;  %v1166_v53 = vsel %vm278_vm2, %v1163_v4, -inf  ;;  %v4295_v34 = vpop.eup %4294 }
 0x5db   :  { %1167 = vmax.xlane.f32.xlu1 %v1166_v53  ;;  %v1225_v58 = vmul.f32 %v5857_v21, %v4295_v34  ;;  %v4297_v60 = vpop.eup %4296 }
 0x5dc   :  { %v1228_v44 = vmul.f32 %v5857_v21, %v4297_v60  ;;  %v4299_v10 = vpop.eup %4298 }
 0x5dd   :  { %v1233_v47 = vsel %vm253_vm1, %v1225_v58, 0.0  ;;  %v1231_v12 = vmul.f32 %v5857_v21, %v4299_v10  ;;  %v4301_v45 = vpop.eup %4300  ;;  %v5911_v58 = vld [vmem:[%s7635_s2 + $0xa] sm:$0x3] }
 0x5de   :  { %v1242_v54 = vsel %vm253_vm1, %v1228_v44, 0.0  ;;  %v1226_v37 = vmul.f32 %v5857_v21, %v4301_v45  ;;  %v4303_v48 = vpop.eup %4302  ;;  %v1214_v30 = vadd.f32 %v5911_v58, %v5833_v2 }
 0x5df   :  { %v1251_v42 = vsel %vm253_vm1, %v1231_v12, 0.0  ;;  %v1229_v61 = vmul.f32 %v5857_v21, %v4303_v48  ;;  %v4305_v16 = vpop.eup %4304 }
 0x5e0   :  { %v1236_v52 = vsel %vm253_vm1, %v1226_v37, 0.0  ;;  %v1232_v35 = vmul.f32 %v5857_v21, %v4305_v16 }
 0x5e1   :  { %v1245_v46 = vsel %vm253_vm1, %v1229_v61, 0.0 }
 0x5e2   :  { %v1254_v33 = vsel %vm253_vm1, %v1232_v35, 0.0 }
 0x5e3   :  { %1234 = vadd.xlane.f32.xlu1 %v1233_v47 }
 0x5eb   :  { %1243 = vadd.xlane.f32.xlu1 %v1242_v54 }
 0x5f3   :  { %1252 = vadd.xlane.f32.xlu1 %v1251_v42 }
 0x64e   :  { %v1168_v50 = vpop.xlane.xlu1 %1167 }
 0x64f   :  { %vm1169_vm9 = vcmp.eq.f32.partialorder %v1163_v4, %v1168_v50  ;;  %v1211_v4 = vadd.f32 %v5904_v62, %v5833_v2 }
 0x650   :  { %v1170_v49 = vsel %vm1169_vm9, %v5591_v59, 128 }
 0x651   :  { %v1171_v20 = vsel %vm278_vm2, %v1170_v49, 2147483647  ;;  %4306 = vtanh.f32 %v1211_v4 }
 0x652   :  { %v1173_v26 = vshra.s32 %v1171_v20, 16  ;;  %v1172_v15 = vand.u32 65535, %v1171_v20  ;;  %4308 = vtanh.f32 %v1214_v30  ;;  %v5943_v30 = vld [vmem:[%s7647_s14 + $0x48] sm:$0xff] }
 0x654   :  { %v1175_v31 = vcvt.s32.f32 %v1173_v26  ;;  %v1174_v34 = vcvt.s32.f32 %v1172_v15 }
 0x656   :  { %1176 = vmin.xlane.f32.xlu2 %v1175_v31  ;;  %v1235_v56 = vpop.xlane.xlu1 %1234 }
 0x657   :  { %v4307_v60 = vpop.eup %4306  ;;  %v1257_v35 = vsel %vm278_vm2, %v1235_v56, -inf }
 0x658   :  { %v1227_v44 = vmul.f32 %v5857_v21, %v4307_v60  ;;  %v4309_v10 = vpop.eup %4308 }
 0x659   :  { %v1230_v12 = vmul.f32 %v5857_v21, %v4309_v10 }
 0x65a   :  { %v1239_v54 = vsel %vm253_vm1, %v1227_v44, 0.0  ;;  %v5949_v44 = vld [vmem:[%s7647_s14 + $0x40] sm:$0xff] }
 0x65b   :  { %v1248_v42 = vsel %vm253_vm1, %v1230_v12, 0.0 }
 0x65e   :  { %1237 = vadd.xlane.f32.xlu2 %v1236_v52 }
 0x666   :  { %1246 = vadd.xlane.f32.xlu2 %v1245_v46 }
 0x66e   :  { %1255 = vadd.xlane.f32.xlu2 %v1254_v33 }
 0x6c9   :  { %v1177_v53 = vpop.xlane.xlu2 %1176 }
 0x6ca   :  { %vm1178_vm10 = vcmp.eq.f32.partialorder %v1175_v31, %v1177_v53  ;;  %v1183_v49 = vcvt.f32.s32 %v1177_v53  ;;  %v1244_v31 = vpop.xlane.xlu1 %1243 }
 0x6cb   :  { %v1179_v47 = vsel %vm1178_vm10, %v1174_v34, inf  ;;  %v1260_v33 = vsel %vm278_vm2, %v1244_v31, -inf }
 0x6cc   :  { %1180 = vmin.xlane.f32.xlu0 %v1179_v47  ;;  %v1184_v2 = vshll.u32 %v1183_v49, 16 }
 0x6d1   :  { %v1238_v50 = vpop.xlane.xlu2 %1237 }
 0x6d2   :  { %v1253_v9 = vpop.xlane.xlu1 %1252 }
 0x6d3   :  { %v1265_v61 = vsel %vm278_vm2, %v1253_v9, -inf }
 0x6d4   :  { %1240 = vadd.xlane.f32.xlu0 %v1239_v54  ;;  %v5955_v54 = vld [vmem:[%s7647_s14 + $0x38] sm:$0xff] }
 0x6d9   :  { %v1247_v40 = vpop.xlane.xlu2 %1246 }
 0x6da   :  { %v1261_v46 = vsel %vm278_vm2, %v1247_v40, -inf }
 0x6db   :  { %v1262_v15 = vmax.f32 %v1257_v35, %v1261_v46 }
 0x6dc   :  { %1249 = vadd.xlane.f32.xlu0 %v1248_v42 }
 0x6e1   :  { %v1256_v52 = vpop.xlane.xlu2 %1255 }
 0x6e2   :  { %v1267_v16 = vsel %vm278_vm2, %v1256_v52, -inf }
 0x6e3   :  { %v1268_v53 = vmax.f32 %v1260_v33, %v1267_v16 }
 0x73f   :  { %v1181_v20 = vpop.xlane.xlu0 %1180 }
 0x740   :  { %v1182_v26 = vcvt.f32.s32 %v1181_v20 }
 0x742   :  { %v1185_v45 = vadd.s32 %v1184_v2, %v1182_v26  ;;  %v5961_v2 = vld [vmem:[%s7647_s14 + $0x30] sm:$0xff] }
 0x744   :  { %vm1186_vm11 = vcmp.eq.s32.totalorder %v5591_v59, %v1185_v45 }
 0x745   :  { %4091 = vmatmul.msk.f32.vlgmr.msra.gmra.mxu1 %vm1186_vm11, %v7684_v32  ;;  %v6144_v32 = vld [vmem:[#allocation2 + $0x10] sm:$0xff] }
 0x746   :  { %2301 = vmatpush.msra.mxu1 %v5615_v25  ;;  %v5932_v25 = vld [vmem:[%s7647_s14 + $0x58] sm:$0xff]  ;;  %7848 = vst [vmem:[#allocation27_spill] sm:$0xff] %v6144_v32 }
 0x747   :  { %v1241_v37 = vpop.xlane.xlu0 %1240 }
 0x748   :  { %2302 = vmatpush.msra.mxu1 %v5621_v29  ;;  %v1259_v48 = vsel %vm278_vm2, %v1241_v37, -inf }
 0x749   :  { %v1266_v29 = vmax.f32 %v1259_v48, %v1265_v61 }
 0x74a   :  { %2303 = vmatpush.msra.mxu1 %v5627_v11 }
 0x74b   :  { %v1270_v47 = vmax.f32 %v1266_v29, %v1268_v53  ;;  %v5979_v29 = vld [vmem:[%s7647_s14 + $0x18] sm:$0xff] }
 0x74c   :  { %2304 = vmatpush.msra.mxu1 %v5634_v3  ;;  %v1258_v3 = vsel %vm278_vm2, %v1238_v50, -inf }
 0x74e   :  { %2305 = vmatpush.msra.mxu1 %v5932_v25 }
 0x74f   :  { %v1250_v11 = vpop.xlane.xlu0 %1249 }
 0x750   :  { %v1263_v4 = vsel %vm278_vm2, %v1250_v11, -inf  ;;  %2306 = vmatpush.msra.mxu1 %v5648_v27 }
 0x751   :  { %v1264_v34 = vmax.f32 %v1258_v3, %v1263_v4  ;;  %v5992_v4 = vld [vmem:[%s7647_s14 + $0x8] sm:$0xff] }
 0x752   :  { %2307 = vmatpush.msra.mxu1 %v5943_v30 }
 0x753   :  { %v1269_v60 = vmax.f32 %v1262_v15, %v1264_v34 }
 0x754   :  { %2308 = vmatpush.msra.mxu1 %v5949_v44 }
 0x755   :  { %v1271_v27 = vmax.f32 %v1269_v60, %v1270_v47  ;;  %v5999_v60 = vld [vmem:[%s7647_s14] sm:$0xff] }
 0x756   :  { %2309 = vmatpush.msra.mxu1 %v5955_v54 }
 0x757   :  { %v1272_v10 = vsub.f32 %v1235_v56, %v1271_v27  ;;  %v1273_v12 = vsub.f32 %v1238_v50, %v1271_v27  ;;  %v1274_v42 = vsub.f32 %v1241_v37, %v1271_v27  ;;  %v1275_v49 = vsub.f32 %v1244_v31, %v1271_v27  ;;  %v5967_v56 = vld [vmem:[%s7647_s14 + $0x28] sm:$0xff] }
 0x758   :  { %v1276_v20 = vsub.f32 %v1247_v40, %v1271_v27  ;;  %2310 = vmatpush.msra.mxu1 %v5961_v2  ;;  %v1277_v61 = vsub.f32 %v1250_v11, %v1271_v27  ;;  %v1278_v50 = vsub.f32 %v1253_v9, %v1271_v27  ;;  %v5973_v40 = vld [vmem:[%s7647_s14 + $0x20] sm:$0xff]  ;;  %v1279_v37 = vsub.f32 %v1256_v52, %v1271_v27  ;;  %v5985_v11 = vld [vmem:[%s7647_s14 + $0x10] sm:$0xff] }
 0x759   :  { %v1280_v26 = vmul.f32 1.442695, %v1272_v10  ;;  %v1282_v45 = vmul.f32 1.442695, %v1273_v12  ;;  %v1284_v48 = vmul.f32 1.442695, %v1274_v42 }
 0x75a   :  { %v1286_v46 = vmul.f32 1.442695, %v1275_v49  ;;  %2311 = vmatpush.msra.mxu1 %v5967_v56  ;;  %v1288_v31 = vmul.f32 1.442695, %v1276_v20  ;;  %v1290_v16 = vmul.f32 1.442695, %v1277_v61 }
 0x75b   :  { %4310 = vpow2.f32 %v1280_v26  ;;  %v1292_v9 = vmul.f32 1.442695, %v1278_v50  ;;  %v1294_v33 = vmul.f32 1.442695, %v1279_v37 }
 0x75c   :  { %4312 = vpow2.f32 %v1282_v45  ;;  %2312 = vmatpush.msra.mxu1 %v5973_v40 }
 0x75d   :  { %4314 = vpow2.f32 %v1284_v48 }
 0x75e   :  { %4316 = vpow2.f32 %v1286_v46  ;;  %2313 = vmatpush.msra.mxu1 %v5979_v29 }
 0x75f   :  { %4318 = vpow2.f32 %v1288_v31 }
 0x760   :  { %2314 = vmatpush.msra.mxu1 %v5985_v11  ;;  %4320 = vpow2.f32 %v1290_v16 }
 0x761   :  { %v4311_v35 = vpop.eup %4310  ;;  %4322 = vpow2.f32 %v1292_v9 }
 0x762   :  { %v4313_v52 = vpop.eup %4312  ;;  %v1296_v3 = vsel %vm278_vm2, %v4311_v35, 0.0  ;;  %2315 = vmatpush.msra.mxu1 %v5992_v4  ;;  %4324 = vpow2.f32 %v1294_v33 }
 0x763   :  { %v4315_v15 = vpop.eup %4314  ;;  %v1297_v53 = vsel %vm278_vm2, %v4313_v52, 0.0 }
 0x764   :  { %v4317_v34 = vpop.eup %4316  ;;  %v1298_v47 = vadd.f32 %v1297_v53, %v1296_v3  ;;  %2316 = vmatpush.msra.mxu1 %v5999_v60  ;;  %v1299_v27 = vsel %vm278_vm2, %v4315_v15, 0.0 }
 0x765   :  { %v4319_v10 = vpop.eup %4318  ;;  %v1301_v42 = vsel %vm278_vm2, %v4317_v34, 0.0 }
 0x766   :  { %v1300_v12 = vadd.f32 %v1299_v27, %v1298_v47  ;;  %v4321_v49 = vpop.eup %4320  ;;  %v1303_v26 = vsel %vm278_vm2, %v4319_v10, 0.0 }
 0x767   :  { %v4323_v45 = vpop.eup %4322  ;;  %v1305_v61 = vsel %vm278_vm2, %v4321_v49, 0.0 }
 0x768   :  { %v1302_v20 = vadd.f32 %v1301_v42, %v1300_v12  ;;  %v4325_v46 = vpop.eup %4324  ;;  %v1307_v31 = vsel %vm278_vm2, %v4323_v45, 0.0  ;;  %v6011_v42 = vld [vmem:[%s7634_s1] sm:$0x3] }
 0x769   :  { %v1309_v16 = vsel %vm278_vm2, %v4325_v46, 0.0 }
 0x76a   :  { %v1304_v48 = vadd.f32 %v1303_v26, %v1302_v20  ;;  %v6017_v26 = vld [vmem:[%s7634_s1 + $0x2] sm:$0x3] }
 0x76c   :  { %v1306_v50 = vadd.f32 %v1305_v61, %v1304_v48 }
 0x76e   :  { %v1308_v37 = vadd.f32 %v1307_v31, %v1306_v50 }
 0x770   :  { %v1310_v9 = vadd.f32 %v1309_v16, %v1308_v37  ;;  %v6037_v37 = vld [vmem:[%s7634_s1 + $0x8] sm:$0x3] }
 0x772   :  { %4326 = vrcp.f32 %v1310_v9 }
 0x778   :  { %v4327_v33 = vpop.eup %4326 }
 0x779   :  { %v1312_v3 = vmul.f32 %v4327_v33, %v4311_v35  ;;  %v1313_v53 = vmul.f32 %v4327_v33, %v4313_v52  ;;  %v1314_v47 = vmul.f32 %v4327_v33, %v4315_v15  ;;  %v1315_v27 = vmul.f32 %v4327_v33, %v4317_v34  ;;  %v6023_v35 = vld [vmem:[%s7634_s1 + $0x4] sm:$0x3]  ;;  %v6029_v34 = vld [vmem:[%s7634_s1 + $0x6] sm:$0x3] }
 0x77a   :  { %v1316_v12 = vmul.f32 %v4327_v33, %v4319_v10  ;;  %v1317_v15 = vmul.f32 %v4327_v33, %v4321_v49  ;;  %v1318_v9 = vmul.f32 %v4327_v33, %v4323_v45 }
 0x77b   :  { %v1320_v20 = vmul.f32 %v6011_v42, %v1312_v3  ;;  %v1321_v48 = vmul.f32 %v6017_v26, %v1313_v53  ;;  %v1322_v52 = vmul.f32 %v6023_v35, %v1314_v47  ;;  %v1323_v10 = vmul.f32 %v6029_v34, %v1315_v27  ;;  %v6044_v53 = vld [vmem:[%s7634_s1 + $0xa] sm:$0x3] }
 0x77c   :  { %v1324_v16 = vmul.f32 %v6037_v37, %v1316_v12  ;;  %v1325_v47 = vmul.f32 %v6044_v53, %v1317_v15  ;;  %v6052_v12 = vld [vmem:[%s7634_s1 + $0xc] sm:$0x3] }
 0x77d   :  { %v1328_v61 = vsel %vm253_vm1, %v1320_v20, 0.0  ;;  %v1329_v50 = vsel %vm253_vm1, %v1321_v48, 0.0  ;;  %v1331_v49 = vsel %vm253_vm1, %v1322_v52, 0.0  ;;  %v1333_v27 = vsel %vm253_vm1, %v1323_v10, 0.0 }
 0x77e   :  { %v1330_v31 = vadd.f32 %v1329_v50, %v1328_v61  ;;  %v1319_v20 = vmul.f32 %v4327_v33, %v4325_v46  ;;  %v1335_v61 = vsel %vm253_vm1, %v1324_v16, 0.0  ;;  %v1326_v45 = vmul.f32 %v6052_v12, %v1318_v9  ;;  %v6065_v16 = vld [vmem:[#allocation4 + $0x18] sm:$0xff] }
 0x77f   :  { %v1337_v50 = vsel %vm253_vm1, %v1325_v47, 0.0  ;;  %v6068_v9 = vld [vmem:[#allocation4 + $0x58] sm:$0xff]  ;;  %v6077_v47 = vld [vmem:[#allocation4 + $0x8] sm:$0xff] }
 0x780   :  { %v1332_v3 = vadd.f32 %v1331_v49, %v1330_v31  ;;  %v1327_v31 = vmul.f32 %v5685_v19, %v1319_v20  ;;  %v1339_v15 = vsel %vm253_vm1, %v1326_v45, 0.0  ;;  %v6071_v19 = vld [vmem:[#allocation4 + $0x10] sm:$0xff]  ;;  %v6083_v20 = vld [vmem:[#allocation4] sm:$0xff]  ;;  %v6092_v45 = vld [vmem:[#allocation4 + $0x38] sm:$0xff] }
 0x781   :  { %7834 = vst [vmem:[#allocation10_spill] sm:$0xff] %v6083_v20 }
 0x782   :  { %v1334_v48 = vadd.f32 %v1333_v27, %v1332_v3  ;;  %v1341_v46 = vsel %vm253_vm1, %v1327_v31, 0.0  ;;  %v6074_v3 = vld [vmem:[#allocation4 + $0x50] sm:$0xff]  ;;  %v6080_v27 = vld [vmem:[#allocation4 + $0x48] sm:$0xff]  ;;  %7836 = vst [vmem:[#allocation12_spill] sm:$0xff] %v6092_v45 }
 0x783   :  { %7833 = vst [vmem:[#allocation9_spill] sm:$0xff] %v6080_v27  ;;  %v6102_v31 = vld [vmem:[#allocation6 + $0x10] sm:$0xff] }
 0x784   :  { %v1336_v52 = vadd.f32 %v1335_v61, %v1334_v48  ;;  %v6086_v48 = vld [vmem:[#allocation4 + $0x40] sm:$0xff]  ;;  %7839 = vst [vmem:[#allocation15_spill] sm:$0xff] %v6102_v31 }
 0x785   :  { %7835 = vst [vmem:[#allocation11_spill] sm:$0xff] %v6086_v48 }
 0x786   :  { %v1338_v49 = vadd.f32 %v1337_v50, %v1336_v52  ;;  %v6095_v52 = vld [vmem:[#allocation6 + $0x18] sm:$0xff]  ;;  %v6099_v50 = vld [vmem:[#allocation4 + $0x30] sm:$0xff] }
 0x787   :  { %7837 = vst [vmem:[#allocation13_spill] sm:$0xff] %v6095_v52 }
 0x788   :  { %v1340_v10 = vadd.f32 %v1339_v15, %v1338_v49  ;;  %7838 = vst [vmem:[#allocation14_spill] sm:$0xff] %v6099_v50  ;;  %v6106_v49 = vld [vmem:[#allocation4 + $0x28] sm:$0xff] }
 0x789   :  { %7840 = vst [vmem:[#allocation16_spill] sm:$0xff] %v6106_v49  ;;  %v6109_v15 = vld [vmem:[#allocation6 + $0x8] sm:$0xff] }
 0x78a   :  { %v6059_v33 = vadd.f32 %v1341_v46, %v1340_v10  ;;  %7841 = vst [vmem:[#allocation17_spill] sm:$0xff] %v6109_v15  ;;  %v6132_v10 = vld [vmem:[#allocation2 + $0x18] sm:$0xff] }
 0x78b   :  { %7845 = vst [vmem:[#allocation35_spill] sm:$0xff] %v6132_v10  ;;  %v6135_v46 = vld [vmem:[#allocation2 + $0x38] sm:$0xff] }
 0x78c   :  { %4092 = vmatmul.msk.f32.vlgmr.msra.gmra.mxu2 %vm202_vm0, %v6059_v33  ;;  %4094 = vmatmul.msk.f32.vlgmr.msrb.gmra.mxu0 %vm202_vm0, %v6059_v33  ;;  %7846 = vst [vmem:[#allocation36_spill] sm:$0xff] %v6135_v46 }
 0x78d   :  { %1504 = vmatpush.msra.mxu2 %v6065_v16  ;;  %1544 = vmatpush.msrb.mxu0 %v6068_v9 }
 0x78f   :  { %1505 = vmatpush.msra.mxu2 %v6071_v19  ;;  %1545 = vmatpush.msrb.mxu0 %v6074_v3 }
 0x791   :  { %1506 = vmatpush.msra.mxu2 %v6077_v47  ;;  %1546 = vmatpush.msrb.mxu0 %v6080_v27 }
 0x793   :  { %1507 = vmatpush.msra.mxu2 %v6083_v20  ;;  %1547 = vmatpush.msrb.mxu0 %v6086_v48 }
 0x7c2   :  { %v1360_v61 = vpop.f32.mrf.mxu1 }
 0x7c3   :  { %4093 = vmatmul.msk.f32.vlgmr.msra.gmra.mxu3 %vm202_vm0, %v1360_v61  ;;  %4095 = vmatmul.msk.f32.vlgmr.msrb.gmra.mxu2 %vm202_vm0, %v1360_v61 }
 0x7c4   :  { %4097 = vmatmul.msk.f32.vlgmr.msra.gmra.mxu0 %vm202_vm0, %v1360_v61  ;;  %1524 = vmatpush.msra.mxu3 %v6092_v45  ;;  %v6141_v61 = vld [vmem:[%s7644_s11 + $0x10] sm:$0xff] }
 0x7c5   :  { %1611 = vmatpush.msrb.mxu2 %v6095_v52  ;;  %1680 = vmatpush.msra.mxu0 %v5708_v38  ;;  %v6113_v38 = vld [vmem:[#allocation4 + $0x20] sm:$0xff]  ;;  %7847 = vst [vmem:[#allocation37_spill] sm:$0xff] %v6141_v61 }
 0x7c6   :  { %1525 = vmatpush.msra.mxu3 %v6099_v50  ;;  %7842 = vst [vmem:[#allocation18_spill] sm:$0xff] %v6113_v38 }
 0x7c7   :  { %1612 = vmatpush.msrb.mxu2 %v6102_v31  ;;  %1681 = vmatpush.msra.mxu0 %v5716_v36  ;;  %v6122_v36 = vld [vmem:[#allocation6] sm:$0xff] }
 0x7c8   :  { %1526 = vmatpush.msra.mxu3 %v6106_v49  ;;  %7843 = vst [vmem:[#allocation33_spill] sm:$0xff] %v6122_v36  ;;  %v6226_v49 = vld [vmem:[%s7639_s6 + $0x1] ss:$0 sm:$0xff] }
 0x7c9   :  { %1613 = vmatpush.msrb.mxu2 %v6109_v15  ;;  %1682 = vmatpush.msra.mxu0 %v5724_v63  ;;  %v6128_v63 = vld [vmem:[%s7644_s11 + $0x18] sm:$0xff]  ;;  %7863 = vst [vmem:[#allocation21_spill] sm:$0xff] %v6226_v49 }
 0x7ca   :  { %1527 = vmatpush.msra.mxu3 %v6113_v38  ;;  %7844 = vst [vmem:[#allocation34_spill] sm:$0xff] %v6128_v63 }
 0x7cb   :  { %4096 = vmatmul.msk.f32.vlgmr.msrb.gmra.mxu3 %vm202_vm0, %v6059_v33  ;;  %4098 = vmatmul.msk.f32.vlgmr.msra.gmra.mxu2 %vm202_vm0, %v5785_v8 }
 0x7cc   :  { %4100 = vmatmul.msk.f32.vlgmr.msrb.gmra.mxu0 %vm202_vm0, %v5785_v8  ;;  %1614 = vmatpush.msrb.mxu2 %v6122_v36 }
 0x7cd   :  { %1634 = vmatpush.msrb.mxu3 %v6128_v63  ;;  %1683 = vmatpush.msra.mxu0 %v5738_v41  ;;  %v6147_v41 = vld [vmem:[#allocation2 + $0x30] sm:$0xff]  ;;  %v6220_v63 = vld [vmem:[%s7640_s7] ss:$0 sm:$0xff] }
 0x7ce   :  { %1857 = vmatpush.msra.mxu2 %v6132_v10  ;;  %7849 = vst [vmem:[#allocation29_spill] sm:$0xff] %v6147_v41  ;;  %v6153_v10 = vld [vmem:[%s7644_s11 + $0x8] sm:$0xff] }
 0x7cf   :  { %1901 = vmatpush.msrb.mxu0 %v6135_v46  ;;  %1635 = vmatpush.msrb.mxu3 %v6141_v61  ;;  %7850 = vst [vmem:[#allocation31_spill] sm:$0xff] %v6153_v10  ;;  %v6156_v46 = vld [vmem:[#allocation2 + $0x8] sm:$0xff] }
 0x7d0   :  { %1858 = vmatpush.msra.mxu2 %v6144_v32  ;;  %7851 = vst [vmem:[#allocation32_spill] sm:$0xff] %v6156_v46  ;;  %v6159_v61 = vld [vmem:[#allocation2 + $0x28] sm:$0xff]  ;;  %v6214_v32 = vld [vmem:[%s7639_s6] ss:$0 sm:$0xff] }
 0x7d1   :  { %1902 = vmatpush.msrb.mxu0 %v6147_v41  ;;  %1636 = vmatpush.msrb.mxu3 %v6153_v10  ;;  %7852 = vst [vmem:[#allocation19_spill] sm:$0xff] %v6159_v61  ;;  %v6169_v41 = vld [vmem:[%s7644_s11] sm:$0xff] }
 0x7d2   :  { %1859 = vmatpush.msra.mxu2 %v6156_v46  ;;  %7853 = vst [vmem:[#allocation42_spill] sm:$0xff] %v6169_v41  ;;  %v6172_v10 = vld [vmem:[#allocation2] sm:$0xff] }
 0x7d3   :  { %1903 = vmatpush.msrb.mxu0 %v6159_v61  ;;  %4099 = vmatmul.msk.f32.vlgmr.msra.gmra.mxu3 %vm202_vm0, %v5785_v8  ;;  %7854 = vst [vmem:[#allocation20_spill] sm:$0xff] %v6172_v10  ;;  %v6175_v46 = vld [vmem:[#allocation2 + $0x20] sm:$0xff]  ;;  %v6181_v61 = vld [vmem:[%s7636_s3 + $0x38] sm:$0xff] }
 0x7d4   :  { %4103 = vmatmul.msk.f32.vlgmr.msrb.gmra.mxu2 %vm202_vm0, %v6059_v33  ;;  %1637 = vmatpush.msrb.mxu3 %v6169_v41  ;;  %7855 = vst [vmem:[#allocation22_spill] sm:$0xff] %v6175_v46  ;;  %v6188_v33 = vld [vmem:[%s7636_s3 + $0x30] sm:$0xff] }
 0x7d5   :  { %1860 = vmatpush.msra.mxu2 %v6172_v10  ;;  %1904 = vmatpush.msrb.mxu0 %v6175_v46  ;;  %7856 = vst [vmem:[#allocation43_spill] sm:$0xff] %v6181_v61  ;;  %v6195_v46 = vld [vmem:[%s7636_s3 + $0x28] sm:$0xff] }
 0x7d6   :  { %1880 = vmatpush.msra.mxu3 %v5759_v57  ;;  %7857 = vst [vmem:[#allocation23_spill] sm:$0xff] %v6188_v33  ;;  %v6202_v57 = vld [vmem:[%s7636_s3 + $0x20] sm:$0xff] }
 0x7d7   :  { %1921 = vmatpush.msrb.mxu2 %v6181_v61  ;;  %7858 = vst [vmem:[#allocation24_spill] sm:$0xff] %v6195_v46 }
 0x7d8   :  { %1881 = vmatpush.msra.mxu3 %v5766_v17  ;;  %7859 = vst [vmem:[#allocation25_spill] sm:$0xff] %v6202_v57  ;;  %v6208_v17 = vld [vmem:[%s7636_s3] sm:$0xff] }
 0x7d9   :  { %1922 = vmatpush.msrb.mxu2 %v6188_v33  ;;  %7860 = vst [vmem:[#allocation26_spill] sm:$0xff] %v6208_v17 }
 0x7da   :  { %1882 = vmatpush.msra.mxu3 %v5773_v55  ;;  %7861 = vst [vmem:[#allocation28_spill] sm:$0xff] %v6214_v32 }
 0x7db   :  { %1923 = vmatpush.msrb.mxu2 %v6195_v46  ;;  %7862 = vst [vmem:[#allocation30_spill] sm:$0xff] %v6220_v63 }
 0x7dc   :  { %1883 = vmatpush.msra.mxu3 %v6208_v17 }
 0x7dd   :  { %1924 = vmatpush.msrb.mxu2 %v6202_v57 }
 0x809   :  { %v1427_v38 = vpop.f32.mrf.mxu0 }
 0x80f   :  { %v1383_v33 = vpop.f32.mrf.mxu2 }
 0x846   :  { %v1406_v61 = vpop.f32.mrf.mxu3  ;;  %v1447_v10 = vpop.f32.mrf.mxu2 }
 0x847   :  { %v1407_v46 = vadd.f32 %v1406_v61, %v1383_v33  ;;  %v1448_v15 = vadd.f32 %v1447_v10, %v1427_v38  ;;  %v1488_v10 = vpop.f32.mrf.mxu0 }
 0x849   :  { %v1409_v57 = vadd.f32 %v6214_v32, %v1407_v46  ;;  %v1450_v46 = vadd.f32 %v6226_v49, %v1448_v15  ;;  %v6232_v32 = vld [vmem:[%s7640_s7 + $0x1] ss:$0 sm:$0xff] }
 0x84a   :  { %7864 = vst [vmem:[#allocation40_spill] sm:$0xff] %v6232_v32 }
 0x84e   :  { %v1468_v41 = vpop.f32.mrf.mxu3  ;;  %v1509_v55 = vpop.f32.mrf.mxu2 }
 0x84f   :  { %v1510_v17 = vadd.f32 %v6220_v63, %v1509_v55  ;;  %v1549_v48 = vpop.f32.mrf.mxu0  ;;  %v1489_v20 = vadd.f32 %v1488_v10, %v1468_v41  ;;  %v6244_v41 = vld [vmem:[%s7639_s6 + $0x2] ss:$0 sm:$0xff] }
 0x851   :  { %v1552_v36 = vadd.f32 %v1510_v17, %v1409_v57 }
 0x853   :  { %v4101_v61 = vmul.f32 -1.442695, %v1552_v36 }
 0x855   :  { %4328 = vpow2.f32 %v4101_v61 }
 0x856   :  { %v1529_v33 = vpop.f32.mrf.mxu3 }
 0x857   :  { %v1530_v55 = vadd.f32 %v6232_v32, %v1529_v33 }
 0x859   :  { %v1572_v57 = vadd.f32 %v1530_v55, %v1450_v46 }
 0x85b   :  { %v4329_v17 = vpop.eup %4328  ;;  %v4102_v38 = vmul.f32 -1.442695, %v1572_v57  ;;  %v6238_v57 = vld [vmem:[%s7640_s7 + $0x2] ss:$0 sm:$0xff] }
 0x85c   :  { %v1556_v36 = vadd.f32 1.0, %v4329_v17  ;;  %7865 = vst [vmem:[#allocation41_spill] sm:$0xff] %v6238_v57  ;;  %v1550_v17 = vadd.f32 %v6238_v57, %v1549_v48 }
 0x85d   :  { %4330 = vpow2.f32 %v4102_v38 }
 0x85e   :  { %4332 = vrcp.f32 %v1556_v36  ;;  %v1568_v49 = vand.u32 2147483648, %v1556_v36  ;;  %v1566_v45 = vand.u32 2147483647, %v1556_v36  ;;  %vm1562_vm13 = vweird.f32 %v1556_v36 }
 0x860   :  { %v1569_v55 = vor.u32 1.1754944e-38, %v1568_v49  ;;  %vm1567_vm15 = vcmp.eq.f32.partialorder %v1566_v45, 8.507059e+37 }
 0x863   :  { %v4331_v61 = vpop.eup %4330 }
 0x864   :  { %v4333_v63 = vpop.eup %4332  ;;  %v1576_v31 = vadd.f32 1.0, %v4331_v61 }
 0x865   :  { %v1558_v50 = vmul.f32 %v4333_v63, %v1556_v36  ;;  %vm1563_vm12 = vweird.f32 %v4333_v63 }
 0x866   :  { %4334 = vrcp.f32 %v1576_v31  ;;  %vm1564_vm14 = vmor %vm1562_vm13, %vm1563_vm12  ;;  %v1588_v10 = vand.u32 2147483648, %v1576_v31  ;;  %v1586_v27 = vand.u32 2147483647, %v1576_v31  ;;  %vm1582_vm4 = vweird.f32 %v1576_v31 }
 0x867   :  { %v1559_v15 = vsub.f32 1.0, %v1558_v50 }
 0x868   :  { %v1589_v45 = vor.u32 1.1754944e-38, %v1588_v10  ;;  %vm1587_vm6 = vcmp.eq.f32.partialorder %v1586_v27, 8.507059e+37 }
 0x869   :  { %v1560_v52 = vmul.f32 %v4333_v63, %v1559_v15 }
 0x86b   :  { %v1561_v33 = vadd.f32 %v4333_v63, %v1560_v52  ;;  %v1491_v52 = vadd.f32 %v6244_v41, %v1489_v20 }
 0x86c   :  { %v4335_v46 = vpop.eup %4334 }
 0x86d   :  { %v1565_v38 = vsel %vm1564_vm14, %v4333_v63, %v1561_v33  ;;  %v1578_v50 = vmul.f32 %v4335_v46, %v1576_v31  ;;  %vm1583_vm3 = vweird.f32 %v4335_v46 }
 0x86e   :  { %v1570_v61 = vsel %vm1567_vm15, %v1569_v55, %v1565_v38  ;;  %vm1584_vm5 = vmor %vm1582_vm4, %vm1583_vm3 }
 0x86f   :  { %v1592_v36 = vmul.f32 %v1570_v61, %v1550_v17  ;;  %v1579_v49 = vsub.f32 1.0, %v1578_v50 }
 0x871   :  { %v1593_v15 = vadd.f32 %v1592_v36, %v1491_v52  ;;  %v1580_v32 = vmul.f32 %v4335_v46, %v1579_v49 }
 0x873   :  { %4336 = vtanh.f32 %v1593_v15  ;;  %v1581_v48 = vadd.f32 %v4335_v46, %v1580_v32 }
 0x875   :  { %v1585_v63 = vsel %vm1584_vm5, %v4335_v46, %v1581_v48 }
 0x876   :  { %v1590_v33 = vsel %vm1587_vm6, %v1589_v45, %v1585_v63 }
 0x877   :  { %v1595_v55 = vsub.f32 1.0, %v1590_v33  ;;  %v1597_v20 = vmul.f32 %v1590_v33, %v5785_v8 }
 0x879   :  { %v4337_v38 = vpop.eup %4336 }
 0x87a   :  { %v1596_v57 = vmul.f32 %v4337_v38, %v1595_v55 }
 0x87c   :  { %v6248_v17 = vadd.f32 %v1597_v20, %v1596_v57 }
 0x87e   :  { %4104 = vmatmul.msk.f32.vlgmr.msrb.gmra.mxu3 %vm202_vm0, %v6248_v17  ;;  %4107 = vmatmul.msk.f32.vlgmr.msra.gmra.mxu0 %vm202_vm0, %v6248_v17 }
 0x87f   :  { %1962 = vmatpush.msra.mxu0 %v5794_v51  ;;  %1942 = vmatpush.msrb.mxu3 %v5797_v7  ;;  %v1616_v51 = vpop.f32.mrf.mxu2 }
 0x881   :  { %1963 = vmatpush.msra.mxu0 %v5803_v22  ;;  %1943 = vmatpush.msrb.mxu3 %v5806_v28  ;;  %v6267_v22 = vld [vmem:[%s7646_s13] ss:$0 sm:$0xff] }
 0x883   :  { %1964 = vmatpush.msra.mxu0 %v5812_v0  ;;  %1944 = vmatpush.msrb.mxu3 %v5815_v5 }
 0x885   :  { %1965 = vmatpush.msra.mxu0 %v5821_v39  ;;  %1945 = vmatpush.msrb.mxu3 %v5824_v13 }
 0x8fb   :  { %v1685_v32 = vpop.f32.mrf.mxu0 }
 0x8fc   :  { %v1686_v8 = vadd.f32 %v5830_v43, %v1685_v32 }
 0x8fe   :  { %v1688_v27 = vadd.f32 %v5838_v23, %v1686_v8  ;;  %v1691_v0 = vadd.f32 %v5846_v18, %v1686_v8  ;;  %v1694_v43 = vadd.f32 %v5863_v6, %v1686_v8  ;;  %v1689_v36 = vadd.f32 %v5875_v14, %v1686_v8 }
 0x8ff   :  { %v1692_v45 = vadd.f32 %v5884_v24, %v1686_v8  ;;  %v1695_v55 = vadd.f32 %v5892_v1, %v1686_v8 }
 0x900   :  { %4338 = vtanh.f32 %v1688_v27 }
 0x901   :  { %v1639_v31 = vpop.f32.mrf.mxu3  ;;  %4340 = vtanh.f32 %v1691_v0  ;;  %v1693_v0 = vadd.f32 %v5911_v58, %v1686_v8 }
 0x902   :  { %v1640_v7 = vadd.f32 %v1639_v31, %v1616_v51  ;;  %4342 = vtanh.f32 %v1694_v43  ;;  %v1690_v31 = vadd.f32 %v5904_v62, %v1686_v8 }
 0x903   :  { %4344 = vtanh.f32 %v1689_v36 }
 0x904   :  { %v1642_v28 = vadd.f32 %v6267_v22, %v1640_v7  ;;  %4346 = vtanh.f32 %v1692_v45 }
 0x905   :  { %4348 = vtanh.f32 %v1695_v55  ;;  %v6323_v55 = vld [vmem:[%s7647_s14 + $0x60] sm:$0xff] }
 0x906   :  { %4105 = vst [vmem:[%s7648_s15 + $0x4] sm:$0x3] %v1642_v28  ;;  %v1645_v5 = vsel %vm278_vm2, %v1642_v28, -inf  ;;  %v4339_v39 = vpop.eup %4338  ;;  %4350 = vtanh.f32 %v1690_v31 }
 0x907   :  { %1646 = vmax.xlane.f32.xlu0 %v1645_v5  ;;  %v1704_v13 = vmul.f32 %v5857_v21, %v4339_v39  ;;  %v4341_v46 = vpop.eup %4340  ;;  %4352 = vtanh.f32 %v1693_v0 }
 0x908   :  { %v1707_v18 = vmul.f32 %v5857_v21, %v4341_v46  ;;  %v4343_v50 = vpop.eup %4342 }
 0x909   :  { %v1712_v23 = vsel %vm253_vm1, %v1704_v13, 0.0  ;;  %v1710_v61 = vmul.f32 %v5857_v21, %v4343_v50  ;;  %v4345_v63 = vpop.eup %4344 }
 0x90a   :  { %v1721_v57 = vsel %vm253_vm1, %v1707_v18, 0.0  ;;  %v1705_v33 = vmul.f32 %v5857_v21, %v4345_v63  ;;  %v4347_v38 = vpop.eup %4346 }
 0x90b   :  { %v1730_v52 = vsel %vm253_vm1, %v1710_v61, 0.0  ;;  %v1708_v20 = vmul.f32 %v5857_v21, %v4347_v38  ;;  %v4349_v27 = vpop.eup %4348 }
 0x90c   :  { %v1715_v14 = vsel %vm253_vm1, %v1705_v33, 0.0  ;;  %v1711_v24 = vmul.f32 %v5857_v21, %v4349_v27  ;;  %v4351_v39 = vpop.eup %4350 }
 0x90d   :  { %v1724_v32 = vsel %vm253_vm1, %v1708_v20, 0.0  ;;  %v1706_v13 = vmul.f32 %v5857_v21, %v4351_v39 }
 0x90e   :  { %v1733_v51 = vsel %vm253_vm1, %v1711_v24, 0.0 }
 0x90f   :  { %1713 = vadd.xlane.f32.xlu0 %v1712_v23  ;;  %v1718_v43 = vsel %vm253_vm1, %v1706_v13, 0.0  ;;  %v4353_v23 = vpop.eup %4352 }
 0x910   :  { %v1709_v46 = vmul.f32 %v5857_v21, %v4353_v23  ;;  %v6304_v21 = vld [vmem:[%s7647_s14 + $0x78] sm:$0xff] }
 0x912   :  { %v1727_v62 = vsel %vm253_vm1, %v1709_v46, 0.0 }
 0x917   :  { %1722 = vadd.xlane.f32.xlu0 %v1721_v57 }
 0x91f   :  { %1731 = vadd.xlane.f32.xlu0 %v1730_v52 }
 0x97a   :  { %v1647_v49 = vpop.xlane.xlu0 %1646 }
 0x97b   :  { %vm1648_vm7 = vcmp.eq.f32.partialorder %v1642_v28, %v1647_v49 }
 0x97c   :  { %v1649_v6 = vsel %vm1648_vm7, %v5591_v59, 128 }
 0x97d   :  { %v1650_v10 = vsel %vm278_vm2, %v1649_v6, 2147483647  ;;  %v7866_v6 = vmov 1.0  }
 0x97e   :  { %v1652_v15 = vshra.s32 %v1650_v10, 16  ;;  %v1651_v7 = vand.u32 65535, %v1650_v10 }
 0x980   :  { %v1654_v48 = vcvt.s32.f32 %v1652_v15  ;;  %v1653_v28 = vcvt.s32.f32 %v1651_v7  ;;  %v6310_v15 = vld [vmem:[%s7647_s14 + $0x70] sm:$0xff] }
 0x982   :  { %1655 = vmin.xlane.f32.xlu1 %v1654_v48  ;;  %v1714_v18 = vpop.xlane.xlu0 %1713 }
 0x983   :  { %v1736_v24 = vsel %vm278_vm2, %v1714_v18, -inf }
 0x98a   :  { %1716 = vadd.xlane.f32.xlu1 %v1715_v14  ;;  %v1723_v52 = vpop.xlane.xlu0 %1722 }
 0x992   :  { %1725 = vadd.xlane.f32.xlu1 %v1724_v32  ;;  %v1732_v45 = vpop.xlane.xlu0 %1731 }
 0x993   :  { %v1744_v14 = vsel %vm278_vm2, %v1732_v45, -inf }
 0x99a   :  { %1734 = vadd.xlane.f32.xlu1 %v1733_v51  ;;  %v1739_v51 = vsel %vm278_vm2, %v1723_v52, -inf }
 0x9f5   :  { %v1656_v1 = vpop.xlane.xlu1 %1655 }
 0x9f6   :  { %vm1657_vm8 = vcmp.eq.f32.partialorder %v1654_v48, %v1656_v1  ;;  %v1662_v50 = vcvt.f32.s32 %v1656_v1  ;;  %v6316_v48 = vld [vmem:[%s7647_s14 + $0x68] sm:$0xff]  ;;  %v6337_v1 = vld [vmem:[%s7647_s14 + $0x50] sm:$0xff] }
 0x9f7   :  { %v1658_v5 = vsel %vm1657_vm8, %v1653_v28, inf }
 0x9f8   :  { %1659 = vmin.xlane.f32.xlu2 %v1658_v5  ;;  %v1663_v58 = vshll.u32 %v1662_v50, 16 }
 0x9fd   :  { %v1717_v57 = vpop.xlane.xlu1 %1716 }
 0x9fe   :  { %v1737_v31 = vsel %vm278_vm2, %v1717_v57, -inf }
 0xa00   :  { %1719 = vadd.xlane.f32.xlu2 %v1718_v43 }
 0xa05   :  { %v1726_v36 = vpop.xlane.xlu1 %1725 }
 0xa06   :  { %v1740_v38 = vsel %vm278_vm2, %v1726_v36, -inf }
 0xa07   :  { %v1741_v28 = vmax.f32 %v1736_v24, %v1740_v38 }
 0xa08   :  { %1728 = vadd.xlane.f32.xlu2 %v1727_v62 }
 0xa0d   :  { %v1735_v63 = vpop.xlane.xlu1 %1734 }
 0xa0e   :  { %v1746_v20 = vsel %vm278_vm2, %v1735_v63, -inf }
 0xa0f   :  { %v1747_v0 = vmax.f32 %v1739_v51, %v1746_v20 }
 0xa6b   :  { %v1660_v61 = vpop.xlane.xlu2 %1659 }
 0xa6c   :  { %v1661_v8 = vcvt.f32.s32 %v1660_v61 }
 0xa6e   :  { %v1664_v49 = vadd.s32 %v1663_v58, %v1661_v8 }
 0xa70   :  { %vm1665_vm9 = vcmp.eq.s32.totalorder %v5591_v59, %v1664_v49 }
 0xa71   :  { %4108 = vmatmul.msk.f32.vlgmr.msrb.gmra.mxu1 %vm1665_vm9, %v7866_v6 }
 0xa72   :  { %2780 = vmatpush.msrb.mxu1 %v6304_v21 }
 0xa73   :  { %v1720_v10 = vpop.xlane.xlu2 %1719 }
 0xa74   :  { %2781 = vmatpush.msrb.mxu1 %v6310_v15  ;;  %v1738_v33 = vsel %vm278_vm2, %v1720_v10, -inf }
 0xa75   :  { %v1745_v32 = vmax.f32 %v1738_v33, %v1744_v14 }
 0xa76   :  { %2782 = vmatpush.msrb.mxu1 %v6316_v48 }
 0xa77   :  { %v1749_v5 = vmax.f32 %v1745_v32, %v1747_v0 }
 0xa78   :  { %2783 = vmatpush.msrb.mxu1 %v6323_v55 }
 0xa7a   :  { %2784 = vmatpush.msrb.mxu1 %v5932_v25 }
 0xa7b   :  { %v1729_v27 = vpop.xlane.xlu2 %1728 }
 0xa7c   :  { %v1742_v7 = vsel %vm278_vm2, %v1729_v27, -inf  ;;  %2785 = vmatpush.msrb.mxu1 %v6337_v1 }
 0xa7d   :  { %v1743_v25 = vmax.f32 %v1737_v31, %v1742_v7 }
 0xa7e   :  { %2786 = vmatpush.msrb.mxu1 %v5943_v30 }
 0xa7f   :  { %v1748_v39 = vmax.f32 %v1741_v28, %v1743_v25 }
 0xa80   :  { %2787 = vmatpush.msrb.mxu1 %v5949_v44 }
 0xa81   :  { %v1750_v13 = vmax.f32 %v1748_v39, %v1749_v5 }
 0xa82   :  { %2788 = vmatpush.msrb.mxu1 %v5955_v54 }
 0xa83   :  { %v1751_v43 = vsub.f32 %v1714_v18, %v1750_v13  ;;  %v1752_v23 = vsub.f32 %v1717_v57, %v1750_v13  ;;  %v1753_v46 = vsub.f32 %v1720_v10, %v1750_v13  ;;  %v1754_v62 = vsub.f32 %v1723_v52, %v1750_v13 }
 0xa84   :  { %v1755_v50 = vsub.f32 %v1726_v36, %v1750_v13  ;;  %2789 = vmatpush.msrb.mxu1 %v5961_v2  ;;  %v1756_v49 = vsub.f32 %v1729_v27, %v1750_v13  ;;  %v1757_v30 = vsub.f32 %v1732_v45, %v1750_v13  ;;  %v1758_v54 = vsub.f32 %v1735_v63, %v1750_v13 }
 0xa85   :  { %v1759_v61 = vmul.f32 1.442695, %v1751_v43  ;;  %v1761_v58 = vmul.f32 1.442695, %v1752_v23  ;;  %v1763_v8 = vmul.f32 1.442695, %v1753_v46 }
 0xa86   :  { %v1765_v33 = vmul.f32 1.442695, %v1754_v62  ;;  %2790 = vmatpush.msrb.mxu1 %v5967_v56  ;;  %v1767_v44 = vmul.f32 1.442695, %v1755_v50  ;;  %v1769_v18 = vmul.f32 1.442695, %v1756_v49 }
 0xa87   :  { %4354 = vpow2.f32 %v1759_v61  ;;  %v1771_v2 = vmul.f32 1.442695, %v1757_v30  ;;  %v1773_v56 = vmul.f32 1.442695, %v1758_v54 }
 0xa88   :  { %4356 = vpow2.f32 %v1761_v58  ;;  %2791 = vmatpush.msrb.mxu1 %v5973_v40 }
 0xa89   :  { %4358 = vpow2.f32 %v1763_v8 }
 0xa8a   :  { %4360 = vpow2.f32 %v1765_v33  ;;  %2792 = vmatpush.msrb.mxu1 %v5979_v29 }
 0xa8b   :  { %4362 = vpow2.f32 %v1767_v44 }
 0xa8c   :  { %2793 = vmatpush.msrb.mxu1 %v5985_v11  ;;  %4364 = vpow2.f32 %v1769_v18 }
 0xa8d   :  { %v4355_v57 = vpop.eup %4354  ;;  %4366 = vpow2.f32 %v1771_v2 }
 0xa8e   :  { %v4357_v52 = vpop.eup %4356  ;;  %v1775_v36 = vsel %vm278_vm2, %v4355_v57, 0.0  ;;  %2794 = vmatpush.msrb.mxu1 %v5992_v4  ;;  %4368 = vpow2.f32 %v1773_v56 }
 0xa8f   :  { %v4359_v10 = vpop.eup %4358  ;;  %v1776_v40 = vsel %vm278_vm2, %v4357_v52, 0.0 }
 0xa90   :  { %v4361_v45 = vpop.eup %4360  ;;  %v1777_v63 = vadd.f32 %v1776_v40, %v1775_v36  ;;  %2795 = vmatpush.msrb.mxu1 %v5999_v60  ;;  %v1778_v29 = vsel %vm278_vm2, %v4359_v10, 0.0 }
 0xa91   :  { %v4363_v14 = vpop.eup %4362  ;;  %v1780_v38 = vsel %vm278_vm2, %v4361_v45, 0.0 }
 0xa92   :  { %v1779_v11 = vadd.f32 %v1778_v29, %v1777_v63  ;;  %v4365_v20 = vpop.eup %4364  ;;  %v1782_v27 = vsel %vm278_vm2, %v4363_v14, 0.0 }
 0xa93   :  { %v4367_v4 = vpop.eup %4366  ;;  %v1784_v51 = vsel %vm278_vm2, %v4365_v20, 0.0 }
 0xa94   :  { %v1781_v32 = vadd.f32 %v1780_v38, %v1779_v11  ;;  %v4369_v31 = vpop.eup %4368  ;;  %v1786_v28 = vsel %vm278_vm2, %v4367_v4, 0.0  ;;  %v7869_v11 = vld [vmem:[#allocation11_spill] sm:$0xff] }
 0xa95   :  { %v1788_v0 = vsel %vm278_vm2, %v4369_v31, 0.0 }
 0xa96   :  { %v1783_v24 = vadd.f32 %v1782_v27, %v1781_v32  ;;  %v7874_v32 = vld [vmem:[#allocation16_spill] sm:$0xff]  ;;  %v7875_v27 = vld [vmem:[#allocation17_spill] sm:$0xff] }
 0xa98   :  { %v1785_v7 = vadd.f32 %v1784_v51, %v1783_v24  ;;  %v7876_v24 = vld [vmem:[#allocation18_spill] sm:$0xff]  ;;  %v7877_v51 = vld [vmem:[#allocation33_spill] sm:$0xff] }
 0xa9a   :  { %v1787_v60 = vadd.f32 %v1786_v28, %v1785_v7  ;;  %v6427_v7 = vld [vmem:[%s7641_s8] sm:$0xff]  ;;  %v7879_v28 = vld [vmem:[#allocation35_spill] sm:$0xff] }
 0xa9c   :  { %v1789_v25 = vadd.f32 %v1788_v0, %v1787_v60  ;;  %v7880_v60 = vld [vmem:[#allocation36_spill] sm:$0xff]  ;;  %v7881_v0 = vld [vmem:[#allocation37_spill] sm:$0xff] }
 0xa9e   :  { %4370 = vrcp.f32 %v1789_v25  ;;  %v7882_v25 = vld [vmem:[#allocation27_spill] sm:$0xff] }
 0xaa4   :  { %v4371_v5 = vpop.eup %4370 }
 0xaa5   :  { %v1791_v39 = vmul.f32 %v4371_v5, %v4355_v57  ;;  %v1792_v13 = vmul.f32 %v4371_v5, %v4357_v52  ;;  %v1793_v43 = vmul.f32 %v4371_v5, %v4359_v10  ;;  %v1794_v23 = vmul.f32 %v4371_v5, %v4361_v45 }
 0xaa6   :  { %v1795_v46 = vmul.f32 %v4371_v5, %v4363_v14  ;;  %v1796_v58 = vmul.f32 %v4371_v5, %v4365_v20  ;;  %v1797_v18 = vmul.f32 %v4371_v5, %v4367_v4  ;;  %v1798_v57 = vmul.f32 %v4371_v5, %v4369_v31  ;;  %v7868_v14 = vld [vmem:[#allocation10_spill] sm:$0xff]  ;;  %v6405_v20 = vld [vmem:[%s7641_s8 + $0x10] sm:$0xff]  ;;  %v7883_v5 = vld [vmem:[#allocation29_spill] sm:$0xff] }
 0xaa7   :  { %v1799_v62 = vmul.f32 %v6011_v42, %v1791_v39  ;;  %v1800_v50 = vmul.f32 %v6017_v26, %v1792_v13  ;;  %v1801_v61 = vmul.f32 %v6023_v35, %v1793_v43  ;;  %v1802_v8 = vmul.f32 %v6029_v34, %v1794_v23  ;;  %v6413_v4 = vld [vmem:[%s7641_s8 + $0x8] sm:$0xff]  ;;  %v7884_v39 = vld [vmem:[#allocation31_spill] sm:$0xff]  ;;  %v7885_v13 = vld [vmem:[#allocation32_spill] sm:$0xff] }
 0xaa8   :  { %v1803_v44 = vmul.f32 %v6037_v37, %v1795_v46  ;;  %v1804_v42 = vmul.f32 %v6044_v53, %v1796_v58  ;;  %v1805_v34 = vmul.f32 %v6052_v12, %v1797_v18  ;;  %v6374_v37 = vld [vmem:[%s7634_s1 + $0xe] sm:$0x3]  ;;  %v7867_v12 = vld [vmem:[#allocation9_spill] sm:$0xff]  ;;  %v7886_v43 = vld [vmem:[#allocation19_spill] sm:$0xff] }
 0xaa9   :  { %v1807_v49 = vsel %vm253_vm1, %v1799_v62, 0.0  ;;  %v1808_v33 = vsel %vm253_vm1, %v1800_v50, 0.0  ;;  %v1810_v54 = vsel %vm253_vm1, %v1801_v61, 0.0  ;;  %v1812_v26 = vsel %vm253_vm1, %v1802_v8, 0.0  ;;  %v7878_v31 = vld [vmem:[#allocation34_spill] sm:$0xff]  ;;  %v7888_v46 = vld [vmem:[#allocation20_spill] sm:$0xff] }
 0xaaa   :  { %v1809_v30 = vadd.f32 %v1808_v33, %v1807_v49  ;;  %v1814_v52 = vsel %vm253_vm1, %v1803_v44, 0.0  ;;  %v1816_v36 = vsel %vm253_vm1, %v1804_v42, 0.0  ;;  %v1806_v10 = vmul.f32 %v6374_v37, %v1798_v57  ;;  %v7887_v23 = vld [vmem:[#allocation42_spill] sm:$0xff]  ;;  %v7890_v50 = vld [vmem:[#allocation43_spill] sm:$0xff]  ;;  %v6448_v61 = vld [vmem:[%s7636_s3 + $0x18] sm:$0xff] }
 0xaab   :  { %v1818_v53 = vsel %vm253_vm1, %v1805_v34, 0.0  ;;  %v7889_v62 = vld [vmem:[#allocation22_spill] sm:$0xff]  ;;  %v7891_v58 = vld [vmem:[#allocation23_spill] sm:$0xff]  ;;  %v7892_v49 = vld [vmem:[#allocation24_spill] sm:$0xff] }
 0xaac   :  { %v1811_v2 = vadd.f32 %v1810_v54, %v1809_v30  ;;  %v1820_v63 = vsel %vm253_vm1, %v1806_v10, 0.0  ;;  %v6455_v8 = vld [vmem:[%s7636_s3 + $0x10] sm:$0xff]  ;;  %v6462_v33 = vld [vmem:[%s7636_s3 + $0x8] sm:$0xff]  ;;  %v7893_v30 = vld [vmem:[#allocation25_spill] sm:$0xff] }
 0xaad   :  { %v7894_v44 = vld [vmem:[#allocation26_spill] sm:$0xff] }
 0xaae   :  { %v1813_v35 = vadd.f32 %v1812_v26, %v1811_v2  ;;  %v7896_v34 = vld [vmem:[#allocation30_spill] sm:$0xff] }
 0xab0   :  { %v1815_v56 = vadd.f32 %v1814_v52, %v1813_v35  ;;  %v7895_v35 = vld [vmem:[#allocation28_spill] sm:$0xff] }
 0xab2   :  { %v1817_v40 = vadd.f32 %v1816_v36, %v1815_v56 }
 0xab4   :  { %v1819_v45 = vadd.f32 %v1818_v53, %v1817_v40 }
 0xab6   :  { %v1821_v29 = vadd.f32 %v1820_v63, %v1819_v45  ;;  %v7897_v63 = vld [vmem:[#allocation21_spill] sm:$0xff] }
 0xab8   :  { %4109 = vmatmul.msk.f32.vlgmr.msra.gmra.mxu2 %vm202_vm0, %v1821_v29  ;;  %4111 = vmatmul.msk.f32.vlgmr.msrb.gmra.mxu0 %vm202_vm0, %v1821_v29 }
 0xab9   :  { %1983 = vmatpush.msra.mxu2 %v6065_v16  ;;  %2023 = vmatpush.msrb.mxu0 %v6068_v9  ;;  %v7870_v16 = vld [vmem:[#allocation12_spill] sm:$0xff]  ;;  %v7871_v9 = vld [vmem:[#allocation13_spill] sm:$0xff] }
 0xabb   :  { %1984 = vmatpush.msra.mxu2 %v6071_v19  ;;  %2024 = vmatpush.msrb.mxu0 %v6074_v3  ;;  %v6397_v19 = vld [vmem:[%s7641_s8 + $0x18] sm:$0xff]  ;;  %v7872_v3 = vld [vmem:[#allocation14_spill] sm:$0xff] }
 0xabd   :  { %1985 = vmatpush.msra.mxu2 %v6077_v47  ;;  %2025 = vmatpush.msrb.mxu0 %v7867_v12  ;;  %v7873_v47 = vld [vmem:[#allocation15_spill] sm:$0xff]  ;;  %v7898_v12 = vld [vmem:[#allocation40_spill] sm:$0xff] }
 0xabf   :  { %1986 = vmatpush.msra.mxu2 %v7868_v14  ;;  %2026 = vmatpush.msrb.mxu0 %v7869_v11 }
 0xaee   :  { %v1839_v38 = vpop.f32.mrf.mxu1 }
 0xaef   :  { %4110 = vmatmul.msk.f32.vlgmr.msra.gmra.mxu3 %vm202_vm0, %v1839_v38  ;;  %4112 = vmatmul.msk.f32.vlgmr.msrb.gmra.mxu2 %vm202_vm0, %v1839_v38 }
 0xaf0   :  { %4114 = vmatmul.msk.f32.vlgmr.msra.gmra.mxu0 %vm202_vm0, %v1839_v38  ;;  %2003 = vmatpush.msra.mxu3 %v7870_v16 }
 0xaf1   :  { %2090 = vmatpush.msrb.mxu2 %v7871_v9  ;;  %2159 = vmatpush.msra.mxu0 %v6397_v19 }
 0xaf2   :  { %2004 = vmatpush.msra.mxu3 %v7872_v3 }
 0xaf3   :  { %2091 = vmatpush.msrb.mxu2 %v7873_v47  ;;  %2160 = vmatpush.msra.mxu0 %v6405_v20 }
 0xaf4   :  { %2005 = vmatpush.msra.mxu3 %v7874_v32 }
 0xaf5   :  { %2092 = vmatpush.msrb.mxu2 %v7875_v27  ;;  %2161 = vmatpush.msra.mxu0 %v6413_v4 }
 0xaf6   :  { %2006 = vmatpush.msra.mxu3 %v7876_v24 }
 0xaf7   :  { %4113 = vmatmul.msk.f32.vlgmr.msrb.gmra.mxu3 %vm202_vm0, %v1821_v29  ;;  %4115 = vmatmul.msk.f32.vlgmr.msra.gmra.mxu2 %vm202_vm0, %v6248_v17 }
 0xaf8   :  { %4117 = vmatmul.msk.f32.vlgmr.msrb.gmra.mxu0 %vm202_vm0, %v6248_v17  ;;  %2093 = vmatpush.msrb.mxu2 %v7877_v51 }
 0xaf9   :  { %2113 = vmatpush.msrb.mxu3 %v7878_v31  ;;  %2162 = vmatpush.msra.mxu0 %v6427_v7 }
 0xafa   :  { %2336 = vmatpush.msra.mxu2 %v7879_v28 }
 0xafb   :  { %2380 = vmatpush.msrb.mxu0 %v7880_v60  ;;  %2114 = vmatpush.msrb.mxu3 %v7881_v0 }
 0xafc   :  { %2337 = vmatpush.msra.mxu2 %v7882_v25 }
 0xafd   :  { %2381 = vmatpush.msrb.mxu0 %v7883_v5  ;;  %2115 = vmatpush.msrb.mxu3 %v7884_v39 }
 0xafe   :  { %2338 = vmatpush.msra.mxu2 %v7885_v13 }
 0xaff   :  { %2382 = vmatpush.msrb.mxu0 %v7886_v43  ;;  %4116 = vmatmul.msk.f32.vlgmr.msra.gmra.mxu3 %vm202_vm0, %v6248_v17  ;;  %v7899_v43 = vld [vmem:[#allocation41_spill] sm:$0xff] }
 0xb00   :  { %4120 = vmatmul.msk.f32.vlgmr.msrb.gmra.mxu2 %vm202_vm0, %v1821_v29  ;;  %2116 = vmatpush.msrb.mxu3 %v7887_v23 }
 0xb01   :  { %2339 = vmatpush.msra.mxu2 %v7888_v46  ;;  %2383 = vmatpush.msrb.mxu0 %v7889_v62 }
 0xb02   :  { %2359 = vmatpush.msra.mxu3 %v6448_v61 }
 0xb03   :  { %2400 = vmatpush.msrb.mxu2 %v7890_v50 }
 0xb04   :  { %2360 = vmatpush.msra.mxu3 %v6455_v8 }
 0xb05   :  { %2401 = vmatpush.msrb.mxu2 %v7891_v58 }
 0xb06   :  { %2361 = vmatpush.msra.mxu3 %v6462_v33 }
 0xb07   :  { %2402 = vmatpush.msrb.mxu2 %v7892_v49 }
 0xb08   :  { %2362 = vmatpush.msra.mxu3 %v7894_v44 }
 0xb09   :  { %2403 = vmatpush.msrb.mxu2 %v7893_v30 }
 0xb35   :  { %v1906_v10 = vpop.f32.mrf.mxu0 }
 0xb3b   :  { %v1862_v54 = vpop.f32.mrf.mxu2 }
 0xb6d   :  { %v1967_v3 = vpop.f32.mrf.mxu0 }
 0xb72   :  { %v1885_v18 = vpop.f32.mrf.mxu3  ;;  %v1926_v2 = vpop.f32.mrf.mxu2 }
 0xb73   :  { %v1886_v42 = vadd.f32 %v1885_v18, %v1862_v54  ;;  %v1927_v40 = vadd.f32 %v1926_v2, %v1906_v10  ;;  %v6483_v10 = vld [vmem:[%s7636_s3 + $0x58] sm:$0xff] }
 0xb75   :  { %v1888_v52 = vadd.f32 %v7895_v35, %v1886_v42  ;;  %v1929_v29 = vadd.f32 %v7897_v63, %v1927_v40  ;;  %v2028_v0 = vpop.f32.mrf.mxu0  ;;  %v6486_v40 = vld [vmem:[#allocation2 + $0x58] sm:$0xff]  ;;  %v6504_v63 = vld [vmem:[#allocation2 + $0x48] sm:$0xff] }
 0xb76   :  { %v2029_v23 = vadd.f32 %v7899_v43, %v2028_v0  ;;  %v6552_v0 = vld [vmem:[%s7635_s2 + $0xc] sm:$0x3] }
 0xb7a   :  { %v1947_v26 = vpop.f32.mrf.mxu3  ;;  %v1988_v57 = vpop.f32.mrf.mxu2 }
 0xb7b   :  { %v1989_v56 = vadd.f32 %v7896_v34, %v1988_v57  ;;  %v1968_v25 = vadd.f32 %v1967_v3, %v1947_v26 }
 0xb7d   :  { %v2031_v36 = vadd.f32 %v1989_v56, %v1888_v52  ;;  %v1970_v58 = vadd.f32 %v6244_v41, %v1968_v25 }
 0xb7f   :  { %v4118_v53 = vmul.f32 -1.442695, %v2031_v36 }
 0xb81   :  { %4372 = vpow2.f32 %v4118_v53  ;;  %v6495_v53 = vld [vmem:[#allocation2 + $0x50] sm:$0xff] }
 0xb82   :  { %v2008_v45 = vpop.f32.mrf.mxu3 }
 0xb83   :  { %v2009_v14 = vadd.f32 %v7898_v12, %v2008_v45  ;;  %v6501_v45 = vld [vmem:[%s7636_s3 + $0x48] sm:$0xff]  ;;  %v6513_v12 = vld [vmem:[#allocation2 + $0x40] sm:$0xff]  ;;  %v2095_v3 = vpop.f32.mrf.mxu2 }
 0xb85   :  { %v2051_v11 = vadd.f32 %v2009_v14, %v1929_v29  ;;  %v6510_v29 = vld [vmem:[%s7636_s3 + $0x40] sm:$0xff] }
 0xb87   :  { %v4373_v38 = vpop.eup %4372  ;;  %v4119_v16 = vmul.f32 -1.442695, %v2051_v11  ;;  %v6519_v11 = vld [vmem:[%s7642_s9] ss:$0 sm:$0xff] }
 0xb88   :  { %v2035_v9 = vadd.f32 1.0, %v4373_v38 }
 0xb89   :  { %4374 = vpow2.f32 %v4119_v16  ;;  %v6527_v16 = vld [vmem:[%s7635_s2] sm:$0x3] }
 0xb8a   :  { %4376 = vrcp.f32 %v2035_v9  ;;  %v2047_v31 = vand.u32 2147483648, %v2035_v9  ;;  %v2045_v60 = vand.u32 2147483647, %v2035_v9  ;;  %vm2041_vm11 = vweird.f32 %v2035_v9 }
 0xb8c   :  { %v2048_v13 = vor.u32 1.1754944e-38, %v2047_v31  ;;  %vm2046_vm13 = vcmp.eq.f32.partialorder %v2045_v60, 8.507059e+37 }
 0xb8f   :  { %v4375_v47 = vpop.eup %4374 }
 0xb90   :  { %v4377_v32 = vpop.eup %4376  ;;  %v2055_v27 = vadd.f32 1.0, %v4375_v47 }
 0xb91   :  { %v2037_v24 = vmul.f32 %v4377_v32, %v2035_v9  ;;  %vm2042_vm10 = vweird.f32 %v4377_v32 }
 0xb92   :  { %4378 = vrcp.f32 %v2055_v27  ;;  %vm2043_vm12 = vmor %vm2041_vm11, %vm2042_vm10  ;;  %v2067_v44 = vand.u32 2147483648, %v2055_v27  ;;  %v2065_v2 = vand.u32 2147483647, %v2055_v27  ;;  %vm2061_vm15 = vweird.f32 %v2055_v27 }
 0xb93   :  { %v2038_v51 = vsub.f32 1.0, %v2037_v24  ;;  %v6535_v24 = vld [vmem:[%s7635_s2 + $0x6] sm:$0x3] }
 0xb94   :  { %v2068_v26 = vor.u32 1.1754944e-38, %v2067_v44  ;;  %vm2066_vm4 = vcmp.eq.f32.partialorder %v2065_v2, 8.507059e+37  ;;  %v6573_v2 = vld [vmem:[%s7635_s2 + $0x8] sm:$0x3] }
 0xb95   :  { %v2039_v28 = vmul.f32 %v4377_v32, %v2038_v51 }
 0xb97   :  { %v2040_v5 = vadd.f32 %v4377_v32, %v2039_v28 }
 0xb98   :  { %v4379_v39 = vpop.eup %4378 }
 0xb99   :  { %v2044_v46 = vsel %vm2043_vm12, %v4377_v32, %v2040_v5  ;;  %v2057_v62 = vmul.f32 %v4379_v39, %v2055_v27  ;;  %vm2062_vm14 = vweird.f32 %v4379_v39 }
 0xb9a   :  { %v2049_v50 = vsel %vm2046_vm13, %v2048_v13, %v2044_v46  ;;  %vm2063_vm3 = vmor %vm2061_vm15, %vm2062_vm14 }
 0xb9b   :  { %v2071_v49 = vmul.f32 %v2049_v50, %v2029_v23  ;;  %v2058_v30 = vsub.f32 1.0, %v2057_v62  ;;  %v6564_v50 = vld [vmem:[%s7635_s2 + $0x2] sm:$0x3] }
 0xb9d   :  { %v2072_v54 = vadd.f32 %v2071_v49, %v1970_v58  ;;  %v2059_v18 = vmul.f32 %v4379_v39, %v2058_v30 }
 0xb9f   :  { %4380 = vtanh.f32 %v2072_v54  ;;  %v2060_v42 = vadd.f32 %v4379_v39, %v2059_v18 }
 0xba1   :  { %v2064_v57 = vsel %vm2063_vm3, %v4379_v39, %v2060_v42 }
 0xba2   :  { %v2069_v35 = vsel %vm2066_vm4, %v2068_v26, %v2064_v57 }
 0xba3   :  { %v2074_v52 = vsub.f32 1.0, %v2069_v35  ;;  %v2076_v41 = vmul.f32 %v2069_v35, %v6248_v17  ;;  %v6492_v17 = vld [vmem:[%s7636_s3 + $0x50] sm:$0xff]  ;;  %v6581_v35 = vld [vmem:[%s7635_s2 + $0xe] sm:$0x3] }
 0xba5   :  { %v4381_v34 = vpop.eup %4380 }
 0xba6   :  { %v2075_v56 = vmul.f32 %v4381_v34, %v2074_v52 }
 0xba8   :  { %v6474_v36 = vadd.f32 %v2076_v41, %v2075_v56 }
 0xbaa   :  { %4121 = vmatmul.msk.f32.vlgmr.msrb.gmra.mxu3 %vm202_vm0, %v6474_v36  ;;  %4124 = vmatmul.msk.f32.vlgmr.msra.gmra.mxu0 %vm202_vm0, %v6474_v36 }
 0xbab   :  { %2441 = vmatpush.msra.mxu0 %v6483_v10  ;;  %2421 = vmatpush.msrb.mxu3 %v6486_v40 }
 0xbad   :  { %2442 = vmatpush.msra.mxu0 %v6492_v17  ;;  %2422 = vmatpush.msrb.mxu3 %v6495_v53 }
 0xbaf   :  { %2443 = vmatpush.msra.mxu0 %v6501_v45  ;;  %2423 = vmatpush.msrb.mxu3 %v6504_v63 }
 0xbb1   :  { %2444 = vmatpush.msra.mxu0 %v6510_v29  ;;  %2424 = vmatpush.msrb.mxu3 %v6513_v12 }
 0xc27   :  { %v2164_v14 = vpop.f32.mrf.mxu0 }
 0xc28   :  { %v6522_v38 = vadd.f32 %v6519_v11, %v2164_v14 }
 0xc2a   :  { %v2167_v9 = vadd.f32 %v6527_v16, %v6522_v38  ;;  %v2170_v51 = vadd.f32 %v6535_v24, %v6522_v38  ;;  %v2173_v25 = vadd.f32 %v6552_v0, %v6522_v38  ;;  %v2168_v58 = vadd.f32 %v6564_v50, %v6522_v38 }
 0xc2b   :  { %v2171_v42 = vadd.f32 %v6573_v2, %v6522_v38  ;;  %v2174_v52 = vadd.f32 %v6581_v35, %v6522_v38 }
 0xc2c   :  { %4382 = vtanh.f32 %v2167_v9 }
 0xc2d   :  { %v2118_v47 = vpop.f32.mrf.mxu3  ;;  %4384 = vtanh.f32 %v2170_v51 }
 0xc2e   :  { %v2119_v32 = vadd.f32 %v2118_v47, %v2095_v3  ;;  %4386 = vtanh.f32 %v2173_v25 }
 0xc2f   :  { %4388 = vtanh.f32 %v2168_v58 }
 0xc30   :  { %v2121_v27 = vadd.f32 %v6267_v22, %v2119_v32  ;;  %v6546_v22 = vld [vmem:[%s7643_s10] ss:$0 sm:$0xff]  ;;  %4390 = vtanh.f32 %v2171_v42  ;;  %v6593_v32 = vld [vmem:[%s7635_s2 + $0x4] sm:$0x3] }
 0xc31   :  { %4392 = vtanh.f32 %v2174_v52 }
 0xc32   :  { %4122 = vst [vmem:[%s7648_s15 + $0x6] sm:$0x3] %v2121_v27  ;;  %v2124_v31 = vsel %vm278_vm2, %v2121_v27, -inf  ;;  %v4383_v28 = vpop.eup %4382 }
 0xc33   :  { %2125 = vmax.xlane.f32.xlu2 %v2124_v31  ;;  %v2183_v60 = vmul.f32 %v6546_v22, %v4383_v28  ;;  %v4385_v39 = vpop.eup %4384 }
 0xc34   :  { %v2186_v13 = vmul.f32 %v6546_v22, %v4385_v39  ;;  %v4387_v23 = vpop.eup %4386 }
 0xc35   :  { %v2191_v5 = vsel %vm253_vm1, %v2183_v60, 0.0  ;;  %v2189_v46 = vmul.f32 %v6546_v22, %v4387_v23  ;;  %v4389_v26 = vpop.eup %4388  ;;  %v6600_v60 = vld [vmem:[%s7635_s2 + $0xa] sm:$0x3] }
 0xc36   :  { %v2200_v43 = vsel %vm253_vm1, %v2186_v13, 0.0  ;;  %v2184_v57 = vmul.f32 %v6546_v22, %v4389_v26  ;;  %v4391_v56 = vpop.eup %4390  ;;  %v2172_v25 = vadd.f32 %v6600_v60, %v6522_v38 }
 0xc37   :  { %v2209_v62 = vsel %vm253_vm1, %v2189_v46, 0.0  ;;  %v2187_v41 = vmul.f32 %v6546_v22, %v4391_v56  ;;  %v4393_v9 = vpop.eup %4392 }
 0xc38   :  { %v2194_v34 = vsel %vm253_vm1, %v2184_v57, 0.0  ;;  %v2190_v3 = vmul.f32 %v6546_v22, %v4393_v9 }
 0xc39   :  { %v2203_v14 = vsel %vm253_vm1, %v2187_v41, 0.0 }
 0xc3a   :  { %v2212_v47 = vsel %vm253_vm1, %v2190_v3, 0.0 }
 0xc3b   :  { %2192 = vadd.xlane.f32.xlu2 %v2191_v5 }
 0xc43   :  { %2201 = vadd.xlane.f32.xlu2 %v2200_v43 }
 0xc4b   :  { %2210 = vadd.xlane.f32.xlu2 %v2209_v62 }
 0xca6   :  { %v2126_v49 = vpop.xlane.xlu2 %2125 }
 0xca7   :  { %vm2127_vm5 = vcmp.eq.f32.partialorder %v2121_v27, %v2126_v49  ;;  %v2169_v27 = vadd.f32 %v6593_v32, %v6522_v38 }
 0xca8   :  { %v2128_v30 = vsel %vm2127_vm5, %v5591_v59, 128 }
 0xca9   :  { %v2129_v44 = vsel %vm278_vm2, %v2128_v30, 2147483647  ;;  %4394 = vtanh.f32 %v2169_v27 }
 0xcaa   :  { %v2131_v54 = vshra.s32 %v2129_v44, 16  ;;  %v2130_v51 = vand.u32 65535, %v2129_v44  ;;  %4396 = vtanh.f32 %v2172_v25  ;;  %v6632_v25 = vld [vmem:[%s7647_s14 + $0x48] sm:$0xff] }
 0xcac   :  { %v2133_v18 = vcvt.s32.f32 %v2131_v54  ;;  %v2132_v28 = vcvt.s32.f32 %v2130_v51 }
 0xcae   :  { %2134 = vmin.xlane.f32.xlu0 %v2133_v18  ;;  %v2193_v58 = vpop.xlane.xlu2 %2192 }
 0xcaf   :  { %v4395_v39 = vpop.eup %4394  ;;  %v2215_v3 = vsel %vm278_vm2, %v2193_v58, -inf }
 0xcb0   :  { %v2185_v13 = vmul.f32 %v6546_v22, %v4395_v39  ;;  %v4397_v23 = vpop.eup %4396 }
 0xcb1   :  { %v2188_v46 = vmul.f32 %v6546_v22, %v4397_v23 }
 0xcb2   :  { %v2197_v43 = vsel %vm253_vm1, %v2185_v13, 0.0  ;;  %v6638_v13 = vld [vmem:[%s7647_s14 + $0x40] sm:$0xff] }
 0xcb3   :  { %v2206_v62 = vsel %vm253_vm1, %v2188_v46, 0.0 }
 0xcb6   :  { %2195 = vadd.xlane.f32.xlu0 %v2194_v34 }
 0xcbe   :  { %2204 = vadd.xlane.f32.xlu0 %v2203_v14 }
 0xcc6   :  { %2213 = vadd.xlane.f32.xlu0 %v2212_v47 }
 0xd21   :  { %v2135_v31 = vpop.xlane.xlu0 %2134 }
 0xd22   :  { %vm2136_vm6 = vcmp.eq.f32.partialorder %v2133_v18, %v2135_v31  ;;  %v2141_v30 = vcvt.f32.s32 %v2135_v31  ;;  %v2202_v18 = vpop.xlane.xlu2 %2201 }
 0xd23   :  { %v2137_v5 = vsel %vm2136_vm6, %v2132_v28, inf  ;;  %v2218_v47 = vsel %vm278_vm2, %v2202_v18, -inf }
 0xd24   :  { %2138 = vmin.xlane.f32.xlu1 %v2137_v5  ;;  %v2142_v38 = vshll.u32 %v2141_v30, 16 }
 0xd29   :  { %v2196_v49 = vpop.xlane.xlu0 %2195 }
 0xd2a   :  { %v2211_v52 = vpop.xlane.xlu2 %2210 }
 0xd2b   :  { %v2223_v41 = vsel %vm278_vm2, %v2211_v52, -inf }
 0xd2c   :  { %2198 = vadd.xlane.f32.xlu1 %v2197_v43  ;;  %v6644_v43 = vld [vmem:[%s7647_s14 + $0x38] sm:$0xff] }
 0xd31   :  { %v2205_v42 = vpop.xlane.xlu0 %2204 }
 0xd32   :  { %v2219_v14 = vsel %vm278_vm2, %v2205_v42, -inf }
 0xd33   :  { %v2220_v51 = vmax.f32 %v2215_v3, %v2219_v14 }
 0xd34   :  { %2207 = vadd.xlane.f32.xlu1 %v2206_v62 }
 0xd39   :  { %v2214_v34 = vpop.xlane.xlu0 %2213 }
 0xd3a   :  { %v2225_v9 = vsel %vm278_vm2, %v2214_v34, -inf }
 0xd3b   :  { %v2226_v31 = vmax.f32 %v2218_v47, %v2225_v9 }
 0xd97   :  { %v2139_v44 = vpop.xlane.xlu1 %2138 }
 0xd98   :  { %v2140_v54 = vcvt.f32.s32 %v2139_v44 }
 0xd9a   :  { %v2143_v26 = vadd.s32 %v2142_v38, %v2140_v54  ;;  %v6650_v38 = vld [vmem:[%s7647_s14 + $0x30] sm:$0xff] }
 0xd9c   :  { %vm2144_vm7 = vcmp.eq.s32.totalorder %v5591_v59, %v2143_v26 }
 0xd9d   :  { %4125 = vmatmul.msk.f32.vlgmr.msra.gmra.mxu1 %vm2144_vm7, %v7866_v6 }
 0xd9e   :  { %3259 = vmatpush.msra.mxu1 %v6304_v21  ;;  %v6621_v21 = vld [vmem:[%s7647_s14 + $0x58] sm:$0xff] }
 0xd9f   :  { %v2199_v57 = vpop.xlane.xlu1 %2198 }
 0xda0   :  { %3260 = vmatpush.msra.mxu1 %v6310_v15  ;;  %v2217_v56 = vsel %vm278_vm2, %v2199_v57, -inf }
 0xda1   :  { %v2224_v15 = vmax.f32 %v2217_v56, %v2223_v41 }
 0xda2   :  { %3261 = vmatpush.msra.mxu1 %v6316_v48 }
 0xda3   :  { %v2228_v5 = vmax.f32 %v2224_v15, %v2226_v31  ;;  %v6668_v15 = vld [vmem:[%s7647_s14 + $0x18] sm:$0xff] }
 0xda4   :  { %3262 = vmatpush.msra.mxu1 %v6323_v55  ;;  %v2216_v55 = vsel %vm278_vm2, %v2196_v49, -inf }
 0xda6   :  { %3263 = vmatpush.msra.mxu1 %v6621_v21 }
 0xda7   :  { %v2208_v48 = vpop.xlane.xlu1 %2207 }
 0xda8   :  { %v2221_v27 = vsel %vm278_vm2, %v2208_v48, -inf  ;;  %3264 = vmatpush.msra.mxu1 %v6337_v1 }
 0xda9   :  { %v2222_v28 = vmax.f32 %v2216_v55, %v2221_v27  ;;  %v6681_v27 = vld [vmem:[%s7647_s14 + $0x8] sm:$0xff] }
 0xdaa   :  { %3265 = vmatpush.msra.mxu1 %v6632_v25 }
 0xdab   :  { %v2227_v39 = vmax.f32 %v2220_v51, %v2222_v28 }
 0xdac   :  { %3266 = vmatpush.msra.mxu1 %v6638_v13 }
 0xdad   :  { %v2229_v1 = vmax.f32 %v2227_v39, %v2228_v5  ;;  %v6688_v39 = vld [vmem:[%s7647_s14] sm:$0xff] }
 0xdae   :  { %3267 = vmatpush.msra.mxu1 %v6644_v43 }
 0xdaf   :  { %v2230_v23 = vsub.f32 %v2193_v58, %v2229_v1  ;;  %v2231_v46 = vsub.f32 %v2196_v49, %v2229_v1  ;;  %v2232_v62 = vsub.f32 %v2199_v57, %v2229_v1  ;;  %v2233_v30 = vsub.f32 %v2202_v18, %v2229_v1  ;;  %v6656_v58 = vld [vmem:[%s7647_s14 + $0x28] sm:$0xff] }
 0xdb0   :  { %v2234_v44 = vsub.f32 %v2205_v42, %v2229_v1  ;;  %3268 = vmatpush.msra.mxu1 %v6650_v38  ;;  %v2235_v41 = vsub.f32 %v2208_v48, %v2229_v1  ;;  %v2236_v49 = vsub.f32 %v2211_v52, %v2229_v1  ;;  %v6662_v42 = vld [vmem:[%s7647_s14 + $0x20] sm:$0xff]  ;;  %v2237_v57 = vsub.f32 %v2214_v34, %v2229_v1  ;;  %v6674_v48 = vld [vmem:[%s7647_s14 + $0x10] sm:$0xff] }
 0xdb1   :  { %v2238_v54 = vmul.f32 1.442695, %v2230_v23  ;;  %v2240_v26 = vmul.f32 1.442695, %v2231_v46  ;;  %v2242_v56 = vmul.f32 1.442695, %v2232_v62 }
 0xdb2   :  { %v2244_v14 = vmul.f32 1.442695, %v2233_v30  ;;  %3269 = vmatpush.msra.mxu1 %v6656_v58  ;;  %v2246_v18 = vmul.f32 1.442695, %v2234_v44  ;;  %v2248_v9 = vmul.f32 1.442695, %v2235_v41 }
 0xdb3   :  { %4398 = vpow2.f32 %v2238_v54  ;;  %v2250_v52 = vmul.f32 1.442695, %v2236_v49  ;;  %v2252_v47 = vmul.f32 1.442695, %v2237_v57 }
 0xdb4   :  { %4400 = vpow2.f32 %v2240_v26  ;;  %3270 = vmatpush.msra.mxu1 %v6662_v42 }
 0xdb5   :  { %4402 = vpow2.f32 %v2242_v56 }
 0xdb6   :  { %4404 = vpow2.f32 %v2244_v14  ;;  %3271 = vmatpush.msra.mxu1 %v6668_v15 }
 0xdb7   :  { %4406 = vpow2.f32 %v2246_v18 }
 0xdb8   :  { %3272 = vmatpush.msra.mxu1 %v6674_v48  ;;  %4408 = vpow2.f32 %v2248_v9 }
 0xdb9   :  { %v4399_v3 = vpop.eup %4398  ;;  %4410 = vpow2.f32 %v2250_v52 }
 0xdba   :  { %v4401_v34 = vpop.eup %4400  ;;  %v2254_v55 = vsel %vm278_vm2, %v4399_v3, 0.0  ;;  %3273 = vmatpush.msra.mxu1 %v6681_v27  ;;  %4412 = vpow2.f32 %v2252_v47 }
 0xdbb   :  { %v4403_v51 = vpop.eup %4402  ;;  %v2255_v31 = vsel %vm278_vm2, %v4401_v34, 0.0 }
 0xdbc   :  { %v4405_v28 = vpop.eup %4404  ;;  %v2256_v5 = vadd.f32 %v2255_v31, %v2254_v55  ;;  %3274 = vmatpush.msra.mxu1 %v6688_v39  ;;  %v2257_v1 = vsel %vm278_vm2, %v4403_v51, 0.0 }
 0xdbd   :  { %v4407_v23 = vpop.eup %4406  ;;  %v2259_v62 = vsel %vm278_vm2, %v4405_v28, 0.0 }
 0xdbe   :  { %v2258_v46 = vadd.f32 %v2257_v1, %v2256_v5  ;;  %v4409_v30 = vpop.eup %4408  ;;  %v2261_v54 = vsel %vm278_vm2, %v4407_v23, 0.0 }
 0xdbf   :  { %v4411_v26 = vpop.eup %4410  ;;  %v2263_v41 = vsel %vm278_vm2, %v4409_v30, 0.0 }
 0xdc0   :  { %v2260_v44 = vadd.f32 %v2259_v62, %v2258_v46  ;;  %v4413_v14 = vpop.eup %4412  ;;  %v2265_v18 = vsel %vm278_vm2, %v4411_v26, 0.0  ;;  %v6700_v62 = vld [vmem:[%s7634_s1] sm:$0x3] }
 0xdc1   :  { %v2267_v9 = vsel %vm278_vm2, %v4413_v14, 0.0 }
 0xdc2   :  { %v2262_v56 = vadd.f32 %v2261_v54, %v2260_v44  ;;  %v6706_v54 = vld [vmem:[%s7634_s1 + $0x2] sm:$0x3] }
 0xdc4   :  { %v2264_v49 = vadd.f32 %v2263_v41, %v2262_v56 }
 0xdc6   :  { %v2266_v57 = vadd.f32 %v2265_v18, %v2264_v49 }
 0xdc8   :  { %v2268_v52 = vadd.f32 %v2267_v9, %v2266_v57  ;;  %v6726_v57 = vld [vmem:[%s7634_s1 + $0x8] sm:$0x3] }
 0xdca   :  { %4414 = vrcp.f32 %v2268_v52 }
 0xdd0   :  { %v4415_v47 = vpop.eup %4414 }
 0xdd1   :  { %v2270_v55 = vmul.f32 %v4415_v47, %v4399_v3  ;;  %v2271_v31 = vmul.f32 %v4415_v47, %v4401_v34  ;;  %v2272_v5 = vmul.f32 %v4415_v47, %v4403_v51  ;;  %v2273_v1 = vmul.f32 %v4415_v47, %v4405_v28  ;;  %v6712_v3 = vld [vmem:[%s7634_s1 + $0x4] sm:$0x3]  ;;  %v6718_v28 = vld [vmem:[%s7634_s1 + $0x6] sm:$0x3] }
 0xdd2   :  { %v2274_v46 = vmul.f32 %v4415_v47, %v4407_v23  ;;  %v2275_v51 = vmul.f32 %v4415_v47, %v4409_v30  ;;  %v2276_v52 = vmul.f32 %v4415_v47, %v4411_v26 }
 0xdd3   :  { %v2278_v44 = vmul.f32 %v6700_v62, %v2270_v55  ;;  %v2279_v56 = vmul.f32 %v6706_v54, %v2271_v31  ;;  %v2280_v34 = vmul.f32 %v6712_v3, %v2272_v5  ;;  %v2281_v23 = vmul.f32 %v6718_v28, %v2273_v1  ;;  %v6733_v31 = vld [vmem:[%s7634_s1 + $0xa] sm:$0x3] }
 0xdd4   :  { %v2282_v9 = vmul.f32 %v6726_v57, %v2274_v46  ;;  %v2283_v5 = vmul.f32 %v6733_v31, %v2275_v51  ;;  %v6741_v46 = vld [vmem:[%s7634_s1 + $0xc] sm:$0x3] }
 0xdd5   :  { %v2286_v41 = vsel %vm253_vm1, %v2278_v44, 0.0  ;;  %v2287_v49 = vsel %vm253_vm1, %v2279_v56, 0.0  ;;  %v2289_v30 = vsel %vm253_vm1, %v2280_v34, 0.0  ;;  %v2291_v1 = vsel %vm253_vm1, %v2281_v23, 0.0 }
 0xdd6   :  { %v2288_v18 = vadd.f32 %v2287_v49, %v2286_v41  ;;  %v2277_v44 = vmul.f32 %v4415_v47, %v4413_v14  ;;  %v2293_v41 = vsel %vm253_vm1, %v2282_v9, 0.0  ;;  %v2284_v26 = vmul.f32 %v6741_v46, %v2276_v52  ;;  %v6754_v9 = vld [vmem:[#allocation4 + $0x18] sm:$0xff] }
 0xdd7   :  { %v2295_v49 = vsel %vm253_vm1, %v2283_v5, 0.0  ;;  %v6757_v52 = vld [vmem:[#allocation4 + $0x58] sm:$0xff]  ;;  %v6766_v5 = vld [vmem:[#allocation4 + $0x8] sm:$0xff] }
 0xdd8   :  { %v2290_v55 = vadd.f32 %v2289_v30, %v2288_v18  ;;  %v2285_v18 = vmul.f32 %v6374_v37, %v2277_v44  ;;  %v2297_v51 = vsel %vm253_vm1, %v2284_v26, 0.0  ;;  %v6760_v37 = vld [vmem:[#allocation4 + $0x10] sm:$0xff]  ;;  %7900 = vst [vmem:[#allocation39_spill] sm:$0xff] %v6766_v5  ;;  %v6772_v44 = vld [vmem:[#allocation4] sm:$0xff]  ;;  %v6781_v26 = vld [vmem:[#allocation4 + $0x38] sm:$0xff] }
 0xdd9   :  { %7902 = vst [vmem:[#allocation9_spill] sm:$0xff] %v6772_v44 }
 0xdda   :  { %v2292_v56 = vadd.f32 %v2291_v1, %v2290_v55  ;;  %v2299_v14 = vsel %vm253_vm1, %v2285_v18, 0.0  ;;  %v6763_v55 = vld [vmem:[#allocation4 + $0x50] sm:$0xff]  ;;  %v6769_v1 = vld [vmem:[#allocation4 + $0x48] sm:$0xff]  ;;  %7904 = vst [vmem:[#allocation11_spill] sm:$0xff] %v6781_v26 }
 0xddb   :  { %7901 = vst [vmem:[#allocation38_spill] sm:$0xff] %v6769_v1  ;;  %v6791_v18 = vld [vmem:[#allocation6 + $0x10] sm:$0xff] }
 0xddc   :  { %v2294_v34 = vadd.f32 %v2293_v41, %v2292_v56  ;;  %v6775_v56 = vld [vmem:[#allocation4 + $0x40] sm:$0xff]  ;;  %7907 = vst [vmem:[#allocation14_spill] sm:$0xff] %v6791_v18 }
 0xddd   :  { %7903 = vst [vmem:[#allocation10_spill] sm:$0xff] %v6775_v56 }
 0xdde   :  { %v2296_v30 = vadd.f32 %v2295_v49, %v2294_v34  ;;  %v6784_v34 = vld [vmem:[#allocation6 + $0x18] sm:$0xff]  ;;  %v6788_v49 = vld [vmem:[#allocation4 + $0x30] sm:$0xff] }
 0xddf   :  { %7905 = vst [vmem:[#allocation12_spill] sm:$0xff] %v6784_v34 }
 0xde0   :  { %v2298_v23 = vadd.f32 %v2297_v51, %v2296_v30  ;;  %7906 = vst [vmem:[#allocation13_spill] sm:$0xff] %v6788_v49  ;;  %v6795_v30 = vld [vmem:[#allocation4 + $0x28] sm:$0xff] }
 0xde1   :  { %7908 = vst [vmem:[#allocation15_spill] sm:$0xff] %v6795_v30  ;;  %v6798_v51 = vld [vmem:[#allocation6 + $0x8] sm:$0xff] }
 0xde2   :  { %v6748_v47 = vadd.f32 %v2299_v14, %v2298_v23  ;;  %7909 = vst [vmem:[#allocation16_spill] sm:$0xff] %v6798_v51  ;;  %v6821_v23 = vld [vmem:[#allocation2 + $0x18] sm:$0xff] }
 0xde3   :  { %7913 = vst [vmem:[#allocation34_spill] sm:$0xff] %v6821_v23  ;;  %v6824_v14 = vld [vmem:[#allocation2 + $0x38] sm:$0xff] }
 0xde4   :  { %4126 = vmatmul.msk.f32.vlgmr.msra.gmra.mxu2 %vm202_vm0, %v6748_v47  ;;  %4128 = vmatmul.msk.f32.vlgmr.msrb.gmra.mxu0 %vm202_vm0, %v6748_v47  ;;  %7914 = vst [vmem:[#allocation35_spill] sm:$0xff] %v6824_v14 }
 0xde5   :  { %2462 = vmatpush.msra.mxu2 %v6754_v9  ;;  %2502 = vmatpush.msrb.mxu0 %v6757_v52 }
 0xde7   :  { %2463 = vmatpush.msra.mxu2 %v6760_v37  ;;  %2503 = vmatpush.msrb.mxu0 %v6763_v55 }
 0xde9   :  { %2464 = vmatpush.msra.mxu2 %v6766_v5  ;;  %2504 = vmatpush.msrb.mxu0 %v6769_v1 }
 0xdeb   :  { %2465 = vmatpush.msra.mxu2 %v6772_v44  ;;  %2505 = vmatpush.msrb.mxu0 %v6775_v56 }
 0xe1a   :  { %v2318_v41 = vpop.f32.mrf.mxu1 }
 0xe1b   :  { %4127 = vmatmul.msk.f32.vlgmr.msra.gmra.mxu3 %vm202_vm0, %v2318_v41  ;;  %4129 = vmatmul.msk.f32.vlgmr.msrb.gmra.mxu2 %vm202_vm0, %v2318_v41 }
 0xe1c   :  { %4131 = vmatmul.msk.f32.vlgmr.msra.gmra.mxu0 %vm202_vm0, %v2318_v41  ;;  %2482 = vmatpush.msra.mxu3 %v6781_v26  ;;  %v6830_v41 = vld [vmem:[%s7644_s11 + $0x10] sm:$0xff] }
 0xe1d   :  { %2569 = vmatpush.msrb.mxu2 %v6784_v34  ;;  %2638 = vmatpush.msra.mxu0 %v6397_v19  ;;  %v6802_v19 = vld [vmem:[#allocation4 + $0x20] sm:$0xff]  ;;  %7915 = vst [vmem:[#allocation36_spill] sm:$0xff] %v6830_v41 }
 0xe1e   :  { %2483 = vmatpush.msra.mxu3 %v6788_v49  ;;  %7910 = vst [vmem:[#allocation17_spill] sm:$0xff] %v6802_v19 }
 0xe1f   :  { %2570 = vmatpush.msrb.mxu2 %v6791_v18  ;;  %2639 = vmatpush.msra.mxu0 %v6405_v20  ;;  %v6811_v20 = vld [vmem:[#allocation6] sm:$0xff] }
 0xe20   :  { %2484 = vmatpush.msra.mxu3 %v6795_v30  ;;  %7911 = vst [vmem:[#allocation18_spill] sm:$0xff] %v6811_v20  ;;  %v6915_v18 = vld [vmem:[%s7639_s6 + $0x1] ss:$0 sm:$0xff] }
 0xe21   :  { %2571 = vmatpush.msrb.mxu2 %v6798_v51  ;;  %2640 = vmatpush.msra.mxu0 %v6413_v4  ;;  %v6817_v4 = vld [vmem:[%s7644_s11 + $0x18] sm:$0xff]  ;;  %7931 = vst [vmem:[#allocation30_spill] sm:$0xff] %v6915_v18 }
 0xe22   :  { %2485 = vmatpush.msra.mxu3 %v6802_v19  ;;  %7912 = vst [vmem:[#allocation33_spill] sm:$0xff] %v6817_v4 }
 0xe23   :  { %4130 = vmatmul.msk.f32.vlgmr.msrb.gmra.mxu3 %vm202_vm0, %v6748_v47  ;;  %4132 = vmatmul.msk.f32.vlgmr.msra.gmra.mxu2 %vm202_vm0, %v6474_v36 }
 0xe24   :  { %4134 = vmatmul.msk.f32.vlgmr.msrb.gmra.mxu0 %vm202_vm0, %v6474_v36  ;;  %2572 = vmatpush.msrb.mxu2 %v6811_v20  ;;  %v6833_v20 = vld [vmem:[#allocation2 + $0x10] sm:$0xff] }
 0xe25   :  { %2592 = vmatpush.msrb.mxu3 %v6817_v4  ;;  %2641 = vmatpush.msra.mxu0 %v6427_v7  ;;  %7916 = vst [vmem:[#allocation37_spill] sm:$0xff] %v6833_v20  ;;  %v6836_v7 = vld [vmem:[#allocation2 + $0x30] sm:$0xff]  ;;  %v6909_v4 = vld [vmem:[%s7640_s7] ss:$0 sm:$0xff] }
 0xe26   :  { %2815 = vmatpush.msra.mxu2 %v6821_v23  ;;  %7917 = vst [vmem:[#allocation27_spill] sm:$0xff] %v6836_v7  ;;  %v6842_v23 = vld [vmem:[%s7644_s11 + $0x8] sm:$0xff] }
 0xe27   :  { %2859 = vmatpush.msrb.mxu0 %v6824_v14  ;;  %2593 = vmatpush.msrb.mxu3 %v6830_v41  ;;  %7918 = vst [vmem:[#allocation29_spill] sm:$0xff] %v6842_v23  ;;  %v6845_v14 = vld [vmem:[#allocation2 + $0x8] sm:$0xff] }
 0xe28   :  { %2816 = vmatpush.msra.mxu2 %v6833_v20  ;;  %7919 = vst [vmem:[#allocation31_spill] sm:$0xff] %v6845_v14  ;;  %v6848_v41 = vld [vmem:[#allocation2 + $0x28] sm:$0xff]  ;;  %v6903_v20 = vld [vmem:[%s7639_s6] ss:$0 sm:$0xff] }
 0xe29   :  { %2860 = vmatpush.msrb.mxu0 %v6836_v7  ;;  %2594 = vmatpush.msrb.mxu3 %v6842_v23  ;;  %7920 = vst [vmem:[#allocation32_spill] sm:$0xff] %v6848_v41  ;;  %v6858_v7 = vld [vmem:[%s7644_s11] sm:$0xff] }
 0xe2a   :  { %2817 = vmatpush.msra.mxu2 %v6845_v14  ;;  %7921 = vst [vmem:[#allocation19_spill] sm:$0xff] %v6858_v7  ;;  %v6861_v23 = vld [vmem:[#allocation2] sm:$0xff] }
 0xe2b   :  { %2861 = vmatpush.msrb.mxu0 %v6848_v41  ;;  %4133 = vmatmul.msk.f32.vlgmr.msra.gmra.mxu3 %vm202_vm0, %v6474_v36  ;;  %7922 = vst [vmem:[#allocation42_spill] sm:$0xff] %v6861_v23  ;;  %v6864_v14 = vld [vmem:[#allocation2 + $0x20] sm:$0xff]  ;;  %v6870_v41 = vld [vmem:[%s7636_s3 + $0x38] sm:$0xff] }
 0xe2c   :  { %4137 = vmatmul.msk.f32.vlgmr.msrb.gmra.mxu2 %vm202_vm0, %v6748_v47  ;;  %2595 = vmatpush.msrb.mxu3 %v6858_v7  ;;  %7923 = vst [vmem:[#allocation20_spill] sm:$0xff] %v6864_v14  ;;  %v6877_v47 = vld [vmem:[%s7636_s3 + $0x30] sm:$0xff] }
 0xe2d   :  { %2818 = vmatpush.msra.mxu2 %v6861_v23  ;;  %2862 = vmatpush.msrb.mxu0 %v6864_v14  ;;  %7924 = vst [vmem:[#allocation22_spill] sm:$0xff] %v6870_v41  ;;  %v6884_v14 = vld [vmem:[%s7636_s3 + $0x28] sm:$0xff] }
 0xe2e   :  { %2838 = vmatpush.msra.mxu3 %v6448_v61  ;;  %7925 = vst [vmem:[#allocation43_spill] sm:$0xff] %v6877_v47  ;;  %v6891_v61 = vld [vmem:[%s7636_s3 + $0x20] sm:$0xff] }
 0xe2f   :  { %2879 = vmatpush.msrb.mxu2 %v6870_v41  ;;  %7926 = vst [vmem:[#allocation23_spill] sm:$0xff] %v6884_v14 }
 0xe30   :  { %2839 = vmatpush.msra.mxu3 %v6455_v8  ;;  %7927 = vst [vmem:[#allocation24_spill] sm:$0xff] %v6891_v61  ;;  %v6897_v8 = vld [vmem:[%s7636_s3] sm:$0xff] }
 0xe31   :  { %2880 = vmatpush.msrb.mxu2 %v6877_v47  ;;  %7928 = vst [vmem:[#allocation25_spill] sm:$0xff] %v6897_v8 }
 0xe32   :  { %2840 = vmatpush.msra.mxu3 %v6462_v33  ;;  %7929 = vst [vmem:[#allocation26_spill] sm:$0xff] %v6903_v20 }
 0xe33   :  { %2881 = vmatpush.msrb.mxu2 %v6884_v14  ;;  %7930 = vst [vmem:[#allocation28_spill] sm:$0xff] %v6909_v4 }
 0xe34   :  { %2841 = vmatpush.msra.mxu3 %v6897_v8 }
 0xe35   :  { %2882 = vmatpush.msrb.mxu2 %v6891_v61 }
 0xe61   :  { %v2385_v51 = vpop.f32.mrf.mxu0 }
 0xe67   :  { %v2341_v47 = vpop.f32.mrf.mxu2 }
 0xe9e   :  { %v2364_v41 = vpop.f32.mrf.mxu3  ;;  %v2405_v23 = vpop.f32.mrf.mxu2 }
 0xe9f   :  { %v2365_v14 = vadd.f32 %v2364_v41, %v2341_v47  ;;  %v2406_v30 = vadd.f32 %v2405_v23, %v2385_v51  ;;  %v2446_v23 = vpop.f32.mrf.mxu0 }
 0xea1   :  { %v2367_v61 = vadd.f32 %v6903_v20, %v2365_v14  ;;  %v2408_v14 = vadd.f32 %v6915_v18, %v2406_v30  ;;  %v6921_v20 = vld [vmem:[%s7640_s7 + $0x1] ss:$0 sm:$0xff] }
 0xea2   :  { %7932 = vst [vmem:[#allocation21_spill] sm:$0xff] %v6921_v20 }
 0xea6   :  { %v2426_v7 = vpop.f32.mrf.mxu3  ;;  %v2467_v33 = vpop.f32.mrf.mxu2 }
 0xea7   :  { %v2468_v8 = vadd.f32 %v6909_v4, %v2467_v33  ;;  %v2507_v44 = vpop.f32.mrf.mxu0  ;;  %v2447_v1 = vadd.f32 %v2446_v23, %v2426_v7  ;;  %v6933_v7 = vld [vmem:[%s7639_s6 + $0x2] ss:$0 sm:$0xff] }
 0xea9   :  { %v2510_v19 = vadd.f32 %v2468_v8, %v2367_v61 }
 0xeab   :  { %v4135_v41 = vmul.f32 -1.442695, %v2510_v19 }
 0xead   :  { %4416 = vpow2.f32 %v4135_v41 }
 0xeae   :  { %v2487_v47 = vpop.f32.mrf.mxu3 }
 0xeaf   :  { %v2488_v33 = vadd.f32 %v6921_v20, %v2487_v47 }
 0xeb1   :  { %v2530_v61 = vadd.f32 %v2488_v33, %v2408_v14 }
 0xeb3   :  { %v4417_v8 = vpop.eup %4416  ;;  %v4136_v51 = vmul.f32 -1.442695, %v2530_v61  ;;  %v6927_v61 = vld [vmem:[%s7640_s7 + $0x2] ss:$0 sm:$0xff] }
 0xeb4   :  { %v2514_v19 = vadd.f32 1.0, %v4417_v8  ;;  %7933 = vst [vmem:[#allocation40_spill] sm:$0xff] %v6927_v61  ;;  %v2508_v8 = vadd.f32 %v6927_v61, %v2507_v44 }
 0xeb5   :  { %4418 = vpow2.f32 %v4136_v51 }
 0xeb6   :  { %4420 = vrcp.f32 %v2514_v19  ;;  %v2526_v18 = vand.u32 2147483648, %v2514_v19  ;;  %v2524_v56 = vand.u32 2147483647, %v2514_v19  ;;  %vm2520_vm9 = vweird.f32 %v2514_v19 }
 0xeb8   :  { %v2527_v33 = vor.u32 1.1754944e-38, %v2526_v18  ;;  %vm2525_vm11 = vcmp.eq.f32.partialorder %v2524_v56, 8.507059e+37 }
 0xebb   :  { %v4419_v41 = vpop.eup %4418 }
 0xebc   :  { %v4421_v4 = vpop.eup %4420  ;;  %v2534_v49 = vadd.f32 1.0, %v4419_v41 }
 0xebd   :  { %v2516_v34 = vmul.f32 %v4421_v4, %v2514_v19  ;;  %vm2521_vm8 = vweird.f32 %v4421_v4 }
 0xebe   :  { %4422 = vrcp.f32 %v2534_v49  ;;  %vm2522_vm10 = vmor %vm2520_vm9, %vm2521_vm8  ;;  %v2546_v23 = vand.u32 2147483648, %v2534_v49  ;;  %v2544_v5 = vand.u32 2147483647, %v2534_v49  ;;  %vm2540_vm13 = vweird.f32 %v2534_v49 }
 0xebf   :  { %v2517_v30 = vsub.f32 1.0, %v2516_v34 }
 0xec0   :  { %v2547_v56 = vor.u32 1.1754944e-38, %v2546_v23  ;;  %vm2545_vm15 = vcmp.eq.f32.partialorder %v2544_v5, 8.507059e+37 }
 0xec1   :  { %v2518_v26 = vmul.f32 %v4421_v4, %v2517_v30 }
 0xec3   :  { %v2519_v47 = vadd.f32 %v4421_v4, %v2518_v26  ;;  %v2449_v26 = vadd.f32 %v6933_v7, %v2447_v1 }
 0xec4   :  { %v4423_v14 = vpop.eup %4422 }
 0xec5   :  { %v2523_v51 = vsel %vm2522_vm10, %v4421_v4, %v2519_v47  ;;  %v2536_v34 = vmul.f32 %v4423_v14, %v2534_v49  ;;  %vm2541_vm12 = vweird.f32 %v4423_v14 }
 0xec6   :  { %v2528_v41 = vsel %vm2525_vm11, %v2527_v33, %v2523_v51  ;;  %vm2542_vm14 = vmor %vm2540_vm13, %vm2541_vm12 }
 0xec7   :  { %v2550_v19 = vmul.f32 %v2528_v41, %v2508_v8  ;;  %v2537_v18 = vsub.f32 1.0, %v2536_v34 }
 0xec9   :  { %v2551_v30 = vadd.f32 %v2550_v19, %v2449_v26  ;;  %v2538_v20 = vmul.f32 %v4423_v14, %v2537_v18 }
 0xecb   :  { %4424 = vtanh.f32 %v2551_v30  ;;  %v2539_v44 = vadd.f32 %v4423_v14, %v2538_v20 }
 0xecd   :  { %v2543_v4 = vsel %vm2542_vm14, %v4423_v14, %v2539_v44 }
 0xece   :  { %v2548_v47 = vsel %vm2545_vm15, %v2547_v56, %v2543_v4 }
 0xecf   :  { %v2553_v33 = vsub.f32 1.0, %v2548_v47  ;;  %v2555_v1 = vmul.f32 %v2548_v47, %v6474_v36 }
 0xed1   :  { %v4425_v51 = vpop.eup %4424 }
 0xed2   :  { %v2554_v61 = vmul.f32 %v4425_v51, %v2553_v33 }
 0xed4   :  { %v6937_v8 = vadd.f32 %v2555_v1, %v2554_v61 }
 0xed6   :  { %4138 = vmatmul.msk.f32.vlgmr.msrb.gmra.mxu3 %vm202_vm0, %v6937_v8  ;;  %4141 = vmatmul.msk.f32.vlgmr.msra.gmra.mxu0 %vm202_vm0, %v6937_v8 }
 0xed7   :  { %2920 = vmatpush.msra.mxu0 %v6483_v10  ;;  %2900 = vmatpush.msrb.mxu3 %v6486_v40  ;;  %v2574_v10 = vpop.f32.mrf.mxu2 }
 0xed9   :  { %2921 = vmatpush.msra.mxu0 %v6492_v17  ;;  %2901 = vmatpush.msrb.mxu3 %v6495_v53  ;;  %v6956_v17 = vld [vmem:[%s7646_s13] ss:$0 sm:$0xff] }
 0xedb   :  { %2922 = vmatpush.msra.mxu0 %v6501_v45  ;;  %2902 = vmatpush.msrb.mxu3 %v6504_v63 }
 0xedd   :  { %2923 = vmatpush.msra.mxu0 %v6510_v29  ;;  %2903 = vmatpush.msrb.mxu3 %v6513_v12 }
 0xf53   :  { %v2643_v36 = vpop.f32.mrf.mxu0 }
 0xf54   :  { %v2644_v5 = vadd.f32 %v6519_v11, %v2643_v36 }
 0xf56   :  { %v2646_v49 = vadd.f32 %v6527_v16, %v2644_v5  ;;  %v2649_v45 = vadd.f32 %v6535_v24, %v2644_v5  ;;  %v2652_v11 = vadd.f32 %v6552_v0, %v2644_v5  ;;  %v2647_v19 = vadd.f32 %v6564_v50, %v2644_v5 }
 0xf57   :  { %v2650_v56 = vadd.f32 %v6573_v2, %v2644_v5  ;;  %v2653_v33 = vadd.f32 %v6581_v35, %v2644_v5 }
 0xf58   :  { %4426 = vtanh.f32 %v2646_v49 }
 0xf59   :  { %v2597_v20 = vpop.f32.mrf.mxu3  ;;  %4428 = vtanh.f32 %v2649_v45  ;;  %v2651_v45 = vadd.f32 %v6600_v60, %v2644_v5 }
 0xf5a   :  { %v2598_v40 = vadd.f32 %v2597_v20, %v2574_v10  ;;  %4430 = vtanh.f32 %v2652_v11  ;;  %v2648_v20 = vadd.f32 %v6593_v32, %v2644_v5 }
 0xf5b   :  { %4432 = vtanh.f32 %v2647_v19 }
 0xf5c   :  { %v2600_v53 = vadd.f32 %v6956_v17, %v2598_v40  ;;  %4434 = vtanh.f32 %v2650_v56 }
 0xf5d   :  { %4436 = vtanh.f32 %v2653_v33 }
 0xf5e   :  { %4139 = vst [vmem:[%s7648_s15 + $0x8] sm:$0x3] %v2600_v53  ;;  %v2603_v63 = vsel %vm278_vm2, %v2600_v53, -inf  ;;  %v4427_v29 = vpop.eup %4426  ;;  %4438 = vtanh.f32 %v2648_v20 }
 0xf5f   :  { %2604 = vmax.xlane.f32.xlu1 %v2603_v63  ;;  %v2662_v12 = vmul.f32 %v6546_v22, %v4427_v29  ;;  %v4429_v14 = vpop.eup %4428  ;;  %4440 = vtanh.f32 %v2651_v45 }
 0xf60   :  { %v2665_v24 = vmul.f32 %v6546_v22, %v4429_v14  ;;  %v4431_v34 = vpop.eup %4430 }
 0xf61   :  { %v2670_v16 = vsel %vm253_vm1, %v2662_v12, 0.0  ;;  %v2668_v41 = vmul.f32 %v6546_v22, %v4431_v34  ;;  %v4433_v4 = vpop.eup %4432 }
 0xf62   :  { %v2679_v61 = vsel %vm253_vm1, %v2665_v24, 0.0  ;;  %v2663_v47 = vmul.f32 %v6546_v22, %v4433_v4  ;;  %v4435_v51 = vpop.eup %4434 }
 0xf63   :  { %v2688_v26 = vsel %vm253_vm1, %v2668_v41, 0.0  ;;  %v2666_v1 = vmul.f32 %v6546_v22, %v4435_v51  ;;  %v4437_v49 = vpop.eup %4436 }
 0xf64   :  { %v2673_v50 = vsel %vm253_vm1, %v2663_v47, 0.0  ;;  %v2669_v2 = vmul.f32 %v6546_v22, %v4437_v49  ;;  %v4439_v29 = vpop.eup %4438  ;;  %v4739_v47 = vld [vmem:[%s7647_s14 + $0x60] sm:$0xff] }
 0xf65   :  { %v2682_v36 = vsel %vm253_vm1, %v2666_v1, 0.0  ;;  %v2664_v12 = vmul.f32 %v6546_v22, %v4439_v29 }
 0xf66   :  { %v2691_v10 = vsel %vm253_vm1, %v2669_v2, 0.0 }
 0xf67   :  { %2671 = vadd.xlane.f32.xlu1 %v2670_v16  ;;  %v2676_v11 = vsel %vm253_vm1, %v2664_v12, 0.0  ;;  %v4441_v16 = vpop.eup %4440 }
 0xf68   :  { %v2667_v14 = vmul.f32 %v6546_v22, %v4441_v16  ;;  %v4736_v22 = vld [vmem:[%s7647_s14 + $0x78] sm:$0xff] }
 0xf6a   :  { %v2685_v32 = vsel %vm253_vm1, %v2667_v14, 0.0 }
 0xf6f   :  { %2680 = vadd.xlane.f32.xlu1 %v2679_v61 }
 0xf77   :  { %2689 = vadd.xlane.f32.xlu1 %v2688_v26 }
 0xfd2   :  { %v2605_v18 = vpop.xlane.xlu1 %2604 }
 0xfd3   :  { %vm2606_vm3 = vcmp.eq.f32.partialorder %v2600_v53, %v2605_v18 }
 0xfd4   :  { %v2607_v0 = vsel %vm2606_vm3, %v5591_v59, 128 }
 0xfd5   :  { %v2608_v23 = vsel %vm278_vm2, %v2607_v0, 2147483647 }
 0xfd6   :  { %v2610_v30 = vshra.s32 %v2608_v23, 16  ;;  %v2609_v40 = vand.u32 65535, %v2608_v23  ;;  %v4737_v23 = vld [vmem:[%s7647_s14 + $0x70] sm:$0xff] }
 0xfd8   :  { %v2612_v44 = vcvt.s32.f32 %v2610_v30  ;;  %v2611_v53 = vcvt.s32.f32 %v2609_v40  ;;  %v4738_v30 = vld [vmem:[%s7647_s14 + $0x68] sm:$0xff]  ;;  %v4740_v40 = vld [vmem:[%s7647_s14 + $0x50] sm:$0xff] }
 0xfda   :  { %2613 = vmin.xlane.f32.xlu2 %v2612_v44  ;;  %v2672_v24 = vpop.xlane.xlu1 %2671 }
 0xfdb   :  { %v2694_v49 = vsel %vm278_vm2, %v2672_v24, -inf }
 0xfe2   :  { %2674 = vadd.xlane.f32.xlu2 %v2673_v50  ;;  %v2681_v26 = vpop.xlane.xlu1 %2680 }
 0xfe3   :  { %v2697_v2 = vsel %vm278_vm2, %v2681_v26, -inf }
 0xfea   :  { %2683 = vadd.xlane.f32.xlu2 %v2682_v36 }
 0xff2   :  { %2692 = vadd.xlane.f32.xlu2 %v2691_v10 }
0x104d   :  { %v2614_v35 = vpop.xlane.xlu2 %2613 }
0x104e   :  { %vm2615_vm4 = vcmp.eq.f32.partialorder %v2612_v44, %v2614_v35  ;;  %v2620_v34 = vcvt.f32.s32 %v2614_v35  ;;  %v2690_v44 = vpop.xlane.xlu1 %2689 }
0x104f   :  { %v2616_v63 = vsel %vm2615_vm4, %v2611_v53, inf  ;;  %v2702_v33 = vsel %vm278_vm2, %v2690_v44, -inf }
0x1050   :  { %2617 = vmin.xlane.f32.xlu0 %v2616_v63  ;;  %v2621_v60 = vshll.u32 %v2620_v34, 16 }
0x1055   :  { %v2675_v61 = vpop.xlane.xlu2 %2674 }
0x1056   :  { %v2695_v10 = vsel %vm278_vm2, %v2675_v61, -inf }
0x1058   :  { %2677 = vadd.xlane.f32.xlu0 %v2676_v11 }
0x105d   :  { %v2684_v19 = vpop.xlane.xlu2 %2683 }
0x105e   :  { %v2698_v50 = vsel %vm278_vm2, %v2684_v19, -inf }
0x105f   :  { %v2699_v35 = vmax.f32 %v2694_v49, %v2698_v50 }
0x1060   :  { %2686 = vadd.xlane.f32.xlu0 %v2685_v32 }
0x1065   :  { %v2693_v56 = vpop.xlane.xlu2 %2692 }
0x1066   :  { %v2704_v51 = vsel %vm278_vm2, %v2693_v56, -inf }
0x1067   :  { %v2705_v53 = vmax.f32 %v2697_v2, %v2704_v51 }
0x10c3   :  { %v2618_v41 = vpop.xlane.xlu0 %2617 }
0x10c4   :  { %v2619_v5 = vcvt.f32.s32 %v2618_v41 }
0x10c6   :  { %v2622_v18 = vadd.s32 %v2621_v60, %v2619_v5 }
0x10c8   :  { %vm2623_vm5 = vcmp.eq.s32.totalorder %v5591_v59, %v2622_v18 }
0x10c9   :  { %4142 = vmatmul.msk.f32.vlgmr.msrb.gmra.mxu1 %vm2623_vm5, %v7866_v6 }
0x10ca   :  { %3738 = vmatpush.msrb.mxu1 %v4736_v22 }
0x10cb   :  { %v2678_v0 = vpop.xlane.xlu0 %2677 }
0x10cc   :  { %3739 = vmatpush.msrb.mxu1 %v4737_v23  ;;  %v2696_v4 = vsel %vm278_vm2, %v2678_v0, -inf }
0x10cd   :  { %v2703_v1 = vmax.f32 %v2696_v4, %v2702_v33 }
0x10ce   :  { %3740 = vmatpush.msrb.mxu1 %v4738_v30 }
0x10d0   :  { %3741 = vmatpush.msrb.mxu1 %v4739_v47 }
0x10d2   :  { %3742 = vmatpush.msrb.mxu1 %v6621_v21  ;;  %v2707_v21 = vmax.f32 %v2703_v1, %v2705_v53 }
0x10d3   :  { %v2687_v36 = vpop.xlane.xlu0 %2686 }
0x10d4   :  { %v2700_v20 = vsel %vm278_vm2, %v2687_v36, -inf  ;;  %3743 = vmatpush.msrb.mxu1 %v4740_v40 }
0x10d5   :  { %v2701_v45 = vmax.f32 %v2695_v10, %v2700_v20 }
0x10d6   :  { %3744 = vmatpush.msrb.mxu1 %v6632_v25 }
0x10d7   :  { %v2706_v63 = vmax.f32 %v2699_v35, %v2701_v45 }
0x10d8   :  { %3745 = vmatpush.msrb.mxu1 %v6638_v13 }
0x10d9   :  { %v2708_v29 = vmax.f32 %v2706_v63, %v2707_v21 }
0x10da   :  { %3746 = vmatpush.msrb.mxu1 %v6644_v43 }
0x10db   :  { %v2709_v12 = vsub.f32 %v2672_v24, %v2708_v29  ;;  %v2710_v11 = vsub.f32 %v2675_v61, %v2708_v29  ;;  %v2711_v16 = vsub.f32 %v2678_v0, %v2708_v29  ;;  %v2712_v14 = vsub.f32 %v2681_v26, %v2708_v29 }
0x10dc   :  { %v2713_v32 = vsub.f32 %v2684_v19, %v2708_v29  ;;  %3747 = vmatpush.msrb.mxu1 %v6650_v38  ;;  %v2714_v5 = vsub.f32 %v2687_v36, %v2708_v29  ;;  %v2715_v25 = vsub.f32 %v2690_v44, %v2708_v29  ;;  %v2716_v43 = vsub.f32 %v2693_v56, %v2708_v29 }
0x10dd   :  { %v2717_v34 = vmul.f32 1.442695, %v2709_v12  ;;  %v2719_v41 = vmul.f32 1.442695, %v2710_v11  ;;  %v2721_v60 = vmul.f32 1.442695, %v2711_v16 }
0x10de   :  { %v2723_v18 = vmul.f32 1.442695, %v2712_v14  ;;  %3748 = vmatpush.msrb.mxu1 %v6656_v58  ;;  %v2725_v13 = vmul.f32 1.442695, %v2713_v32  ;;  %v2727_v24 = vmul.f32 1.442695, %v2714_v5 }
0x10df   :  { %4442 = vpow2.f32 %v2717_v34  ;;  %v2729_v38 = vmul.f32 1.442695, %v2715_v25  ;;  %v2731_v58 = vmul.f32 1.442695, %v2716_v43 }
0x10e0   :  { %4444 = vpow2.f32 %v2719_v41  ;;  %3749 = vmatpush.msrb.mxu1 %v6662_v42 }
0x10e1   :  { %4446 = vpow2.f32 %v2721_v60 }
0x10e2   :  { %4448 = vpow2.f32 %v2723_v18  ;;  %3750 = vmatpush.msrb.mxu1 %v6668_v15 }
0x10e3   :  { %4450 = vpow2.f32 %v2725_v13 }
0x10e4   :  { %3751 = vmatpush.msrb.mxu1 %v6674_v48  ;;  %4452 = vpow2.f32 %v2727_v24 }
0x10e5   :  { %v4443_v61 = vpop.eup %4442  ;;  %4454 = vpow2.f32 %v2729_v38 }
0x10e6   :  { %v4445_v26 = vpop.eup %4444  ;;  %v2733_v19 = vsel %vm278_vm2, %v4443_v61, 0.0  ;;  %3752 = vmatpush.msrb.mxu1 %v6681_v27  ;;  %4456 = vpow2.f32 %v2731_v58 }
0x10e7   :  { %v4447_v22 = vpop.eup %4446  ;;  %v2734_v42 = vsel %vm278_vm2, %v4445_v26, 0.0 }
0x10e8   :  { %v4449_v0 = vpop.eup %4448  ;;  %v2735_v23 = vadd.f32 %v2734_v42, %v2733_v19  ;;  %3753 = vmatpush.msrb.mxu1 %v6688_v39  ;;  %v2736_v15 = vsel %vm278_vm2, %v4447_v22, 0.0  ;;  %v7935_v19 = vld [vmem:[#allocation38_spill] sm:$0xff] }
0x10e9   :  { %v4451_v30 = vpop.eup %4450  ;;  %v2738_v44 = vsel %vm278_vm2, %v4449_v0, 0.0  ;;  %v7937_v42 = vld [vmem:[#allocation10_spill] sm:$0xff] }
0x10ea   :  { %v2737_v48 = vadd.f32 %v2736_v15, %v2735_v23  ;;  %v4453_v56 = vpop.eup %4452  ;;  %v2740_v47 = vsel %vm278_vm2, %v4451_v30, 0.0  ;;  %v7941_v23 = vld [vmem:[#allocation14_spill] sm:$0xff]  ;;  %v7079_v15 = vld [vmem:[%s7641_s8 + $0x10] sm:$0xff] }
0x10eb   :  { %v4455_v27 = vpop.eup %4454  ;;  %v2742_v50 = vsel %vm278_vm2, %v4453_v56, 0.0 }
0x10ec   :  { %v2739_v4 = vadd.f32 %v2738_v44, %v2737_v48  ;;  %v4457_v51 = vpop.eup %4456  ;;  %v2744_v36 = vsel %vm278_vm2, %v4455_v27, 0.0  ;;  %v7943_v48 = vld [vmem:[#allocation16_spill] sm:$0xff]  ;;  %v7087_v44 = vld [vmem:[%s7641_s8 + $0x8] sm:$0xff] }
0x10ed   :  { %v2746_v49 = vsel %vm278_vm2, %v4457_v51, 0.0 }
0x10ee   :  { %v2741_v33 = vadd.f32 %v2740_v47, %v2739_v4  ;;  %v7945_v4 = vld [vmem:[#allocation18_spill] sm:$0xff]  ;;  %v7946_v47 = vld [vmem:[#allocation33_spill] sm:$0xff] }
0x10f0   :  { %v2743_v1 = vadd.f32 %v2742_v50, %v2741_v33  ;;  %v7947_v33 = vld [vmem:[#allocation34_spill] sm:$0xff]  ;;  %v7948_v50 = vld [vmem:[#allocation35_spill] sm:$0xff] }
0x10f2   :  { %v2745_v39 = vadd.f32 %v2744_v36, %v2743_v1  ;;  %v7950_v1 = vld [vmem:[#allocation37_spill] sm:$0xff]  ;;  %v7951_v36 = vld [vmem:[#allocation27_spill] sm:$0xff] }
0x10f4   :  { %v2747_v2 = vadd.f32 %v2746_v49, %v2745_v39  ;;  %v7952_v39 = vld [vmem:[#allocation29_spill] sm:$0xff]  ;;  %v7953_v49 = vld [vmem:[#allocation31_spill] sm:$0xff] }
0x10f6   :  { %4458 = vrcp.f32 %v2747_v2  ;;  %v7954_v2 = vld [vmem:[#allocation32_spill] sm:$0xff] }
0x10fc   :  { %v4459_v10 = vpop.eup %4458 }
0x10fd   :  { %v2749_v20 = vmul.f32 %v4459_v10, %v4443_v61  ;;  %v2750_v40 = vmul.f32 %v4459_v10, %v4445_v26  ;;  %v2751_v35 = vmul.f32 %v4459_v10, %v4447_v22  ;;  %v2752_v53 = vmul.f32 %v4459_v10, %v4449_v0  ;;  %v7936_v22 = vld [vmem:[#allocation9_spill] sm:$0xff] }
0x10fe   :  { %v2753_v45 = vmul.f32 %v4459_v10, %v4451_v30  ;;  %v2754_v12 = vmul.f32 %v4459_v10, %v4453_v56  ;;  %v2755_v60 = vmul.f32 %v4459_v10, %v4455_v27  ;;  %v2756_v18 = vmul.f32 %v4459_v10, %v4457_v51  ;;  %v7942_v30 = vld [vmem:[#allocation15_spill] sm:$0xff]  ;;  %v7944_v56 = vld [vmem:[#allocation17_spill] sm:$0xff]  ;;  %v7949_v51 = vld [vmem:[#allocation36_spill] sm:$0xff] }
0x10ff   :  { %v2757_v21 = vmul.f32 %v6700_v62, %v2749_v20  ;;  %v2758_v63 = vmul.f32 %v6706_v54, %v2750_v40  ;;  %v2759_v29 = vmul.f32 %v6712_v3, %v2751_v35  ;;  %v2760_v11 = vmul.f32 %v6718_v28, %v2752_v53  ;;  %v7101_v27 = vld [vmem:[%s7641_s8] sm:$0xff]  ;;  %v7955_v10 = vld [vmem:[#allocation19_spill] sm:$0xff]  ;;  %v7956_v20 = vld [vmem:[#allocation42_spill] sm:$0xff] }
0x1100   :  { %v2761_v34 = vmul.f32 %v6726_v57, %v2753_v45  ;;  %v2762_v62 = vmul.f32 %v6733_v31, %v2754_v12  ;;  %v2763_v28 = vmul.f32 %v6741_v46, %v2755_v60  ;;  %v7048_v57 = vld [vmem:[%s7634_s1 + $0xe] sm:$0x3]  ;;  %v7934_v46 = vld [vmem:[#allocation39_spill] sm:$0xff]  ;;  %v7957_v40 = vld [vmem:[#allocation20_spill] sm:$0xff] }
0x1101   :  { %v2765_v16 = vsel %vm253_vm1, %v2757_v21, 0.0  ;;  %v2766_v14 = vsel %vm253_vm1, %v2758_v63, 0.0  ;;  %v2768_v41 = vsel %vm253_vm1, %v2759_v29, 0.0  ;;  %v2770_v54 = vsel %vm253_vm1, %v2760_v11, 0.0  ;;  %v7958_v35 = vld [vmem:[#allocation22_spill] sm:$0xff]  ;;  %v7122_v53 = vld [vmem:[%s7636_s3 + $0x18] sm:$0xff] }
0x1102   :  { %v2767_v32 = vadd.f32 %v2766_v14, %v2765_v16  ;;  %v2772_v25 = vsel %vm253_vm1, %v2761_v34, 0.0  ;;  %v2774_v43 = vsel %vm253_vm1, %v2762_v62, 0.0  ;;  %v2764_v24 = vmul.f32 %v7048_v57, %v2756_v18  ;;  %v7959_v45 = vld [vmem:[#allocation43_spill] sm:$0xff]  ;;  %v7136_v29 = vld [vmem:[%s7636_s3 + $0x8] sm:$0xff]  ;;  %v7961_v12 = vld [vmem:[#allocation24_spill] sm:$0xff] }
0x1103   :  { %v2776_v31 = vsel %vm253_vm1, %v2763_v28, 0.0  ;;  %v7129_v21 = vld [vmem:[%s7636_s3 + $0x10] sm:$0xff]  ;;  %v7962_v11 = vld [vmem:[#allocation25_spill] sm:$0xff] }
0x1104   :  { %v2769_v5 = vadd.f32 %v2768_v41, %v2767_v32  ;;  %v2778_v26 = vsel %vm253_vm1, %v2764_v24, 0.0  ;;  %v7960_v63 = vld [vmem:[#allocation23_spill] sm:$0xff]  ;;  %v7965_v24 = vld [vmem:[#allocation30_spill] sm:$0xff] }
0x1106   :  { %v2771_v3 = vadd.f32 %v2770_v54, %v2769_v5  ;;  %v7963_v5 = vld [vmem:[#allocation26_spill] sm:$0xff]  ;;  %v7964_v54 = vld [vmem:[#allocation28_spill] sm:$0xff] }
0x1108   :  { %v2773_v13 = vadd.f32 %v2772_v25, %v2771_v3 }
0x110a   :  { %v2775_v38 = vadd.f32 %v2774_v43, %v2773_v13 }
0x110c   :  { %v2777_v61 = vadd.f32 %v2776_v31, %v2775_v38  ;;  %v7966_v31 = vld [vmem:[#allocation21_spill] sm:$0xff] }
0x110e   :  { %v2779_v58 = vadd.f32 %v2778_v26, %v2777_v61 }
0x1110   :  { %4143 = vmatmul.msk.f32.vlgmr.msra.gmra.mxu2 %vm202_vm0, %v2779_v58  ;;  %4145 = vmatmul.msk.f32.vlgmr.msrb.gmra.mxu0 %vm202_vm0, %v2779_v58 }
0x1111   :  { %2941 = vmatpush.msra.mxu2 %v6754_v9  ;;  %2981 = vmatpush.msrb.mxu0 %v6757_v52  ;;  %v7938_v9 = vld [vmem:[#allocation11_spill] sm:$0xff]  ;;  %v7939_v52 = vld [vmem:[#allocation12_spill] sm:$0xff] }
0x1113   :  { %2942 = vmatpush.msra.mxu2 %v6760_v37  ;;  %2982 = vmatpush.msrb.mxu0 %v6763_v55  ;;  %v7071_v37 = vld [vmem:[%s7641_s8 + $0x18] sm:$0xff]  ;;  %v7940_v55 = vld [vmem:[#allocation13_spill] sm:$0xff] }
0x1115   :  { %2943 = vmatpush.msra.mxu2 %v7934_v46  ;;  %2983 = vmatpush.msrb.mxu0 %v7935_v19 }
0x1117   :  { %2944 = vmatpush.msra.mxu2 %v7936_v22  ;;  %2984 = vmatpush.msrb.mxu0 %v7937_v42 }
0x1146   :  { %v2797_v0 = vpop.f32.mrf.mxu1 }
0x1147   :  { %4144 = vmatmul.msk.f32.vlgmr.msra.gmra.mxu3 %vm202_vm0, %v2797_v0  ;;  %4146 = vmatmul.msk.f32.vlgmr.msrb.gmra.mxu2 %vm202_vm0, %v2797_v0 }
0x1148   :  { %4148 = vmatmul.msk.f32.vlgmr.msra.gmra.mxu0 %vm202_vm0, %v2797_v0  ;;  %2961 = vmatpush.msra.mxu3 %v7938_v9 }
0x1149   :  { %3048 = vmatpush.msrb.mxu2 %v7939_v52  ;;  %3117 = vmatpush.msra.mxu0 %v7071_v37 }
0x114a   :  { %2962 = vmatpush.msra.mxu3 %v7940_v55 }
0x114b   :  { %3049 = vmatpush.msrb.mxu2 %v7941_v23  ;;  %3118 = vmatpush.msra.mxu0 %v7079_v15 }
0x114c   :  { %2963 = vmatpush.msra.mxu3 %v7942_v30 }
0x114d   :  { %3050 = vmatpush.msrb.mxu2 %v7943_v48  ;;  %3119 = vmatpush.msra.mxu0 %v7087_v44 }
0x114e   :  { %2964 = vmatpush.msra.mxu3 %v7944_v56 }
0x114f   :  { %4147 = vmatmul.msk.f32.vlgmr.msrb.gmra.mxu3 %vm202_vm0, %v2779_v58  ;;  %4149 = vmatmul.msk.f32.vlgmr.msra.gmra.mxu2 %vm202_vm0, %v6937_v8 }
0x1150   :  { %4151 = vmatmul.msk.f32.vlgmr.msrb.gmra.mxu0 %vm202_vm0, %v6937_v8  ;;  %3051 = vmatpush.msrb.mxu2 %v7945_v4 }
0x1151   :  { %3071 = vmatpush.msrb.mxu3 %v7946_v47  ;;  %3120 = vmatpush.msra.mxu0 %v7101_v27 }
0x1152   :  { %3294 = vmatpush.msra.mxu2 %v7947_v33 }
0x1153   :  { %3338 = vmatpush.msrb.mxu0 %v7948_v50  ;;  %3072 = vmatpush.msrb.mxu3 %v7949_v51  ;;  %v7967_v51 = vld [vmem:[#allocation40_spill] sm:$0xff] }
0x1154   :  { %3295 = vmatpush.msra.mxu2 %v7950_v1 }
0x1155   :  { %3339 = vmatpush.msrb.mxu0 %v7951_v36  ;;  %3073 = vmatpush.msrb.mxu3 %v7952_v39 }
0x1156   :  { %3296 = vmatpush.msra.mxu2 %v7953_v49 }
0x1157   :  { %3340 = vmatpush.msrb.mxu0 %v7954_v2  ;;  %4150 = vmatmul.msk.f32.vlgmr.msra.gmra.mxu3 %vm202_vm0, %v6937_v8 }
0x1158   :  { %4154 = vmatmul.msk.f32.vlgmr.msrb.gmra.mxu2 %vm202_vm0, %v2779_v58  ;;  %3074 = vmatpush.msrb.mxu3 %v7955_v10 }
0x1159   :  { %3297 = vmatpush.msra.mxu2 %v7956_v20  ;;  %3341 = vmatpush.msrb.mxu0 %v7957_v40 }
0x115a   :  { %3317 = vmatpush.msra.mxu3 %v7122_v53 }
0x115b   :  { %3358 = vmatpush.msrb.mxu2 %v7958_v35 }
0x115c   :  { %3318 = vmatpush.msra.mxu3 %v7129_v21 }
0x115d   :  { %3359 = vmatpush.msrb.mxu2 %v7959_v45 }
0x115e   :  { %3319 = vmatpush.msra.mxu3 %v7136_v29 }
0x115f   :  { %3360 = vmatpush.msrb.mxu2 %v7960_v63 }
0x1160   :  { %3320 = vmatpush.msra.mxu3 %v7962_v11 }
0x1161   :  { %3361 = vmatpush.msrb.mxu2 %v7961_v12 }
0x118d   :  { %v2864_v25 = vpop.f32.mrf.mxu0 }
0x1193   :  { %v2820_v16 = vpop.f32.mrf.mxu2 }
0x11c5   :  { %v2925_v22 = vpop.f32.mrf.mxu0 }
0x11ca   :  { %v2843_v14 = vpop.f32.mrf.mxu3  ;;  %v2884_v32 = vpop.f32.mrf.mxu2 }
0x11cb   :  { %v2844_v34 = vadd.f32 %v2843_v14, %v2820_v16  ;;  %v2885_v28 = vadd.f32 %v2884_v32, %v2864_v25  ;;  %v7184_v25 = vld [vmem:[%s7636_s3 + $0x40] sm:$0xff] }
0x11cd   :  { %v2846_v62 = vadd.f32 %v7963_v5, %v2844_v34  ;;  %v2887_v38 = vadd.f32 %v7965_v24, %v2885_v28  ;;  %v2986_v56 = vpop.f32.mrf.mxu0  ;;  %v7157_v5 = vld [vmem:[%s7636_s3 + $0x58] sm:$0xff]  ;;  %v7187_v28 = vld [vmem:[#allocation2 + $0x40] sm:$0xff] }
0x11ce   :  { %v2987_v1 = vadd.f32 %v7967_v51, %v2986_v56 }
0x11d2   :  { %v2905_v41 = vpop.f32.mrf.mxu3  ;;  %v2946_v60 = vpop.f32.mrf.mxu2 }
0x11d3   :  { %v2947_v18 = vadd.f32 %v7964_v54, %v2946_v60  ;;  %v2926_v4 = vadd.f32 %v2925_v22, %v2905_v41  ;;  %v7169_v54 = vld [vmem:[#allocation2 + $0x50] sm:$0xff] }
0x11d5   :  { %v2989_v3 = vadd.f32 %v2947_v18, %v2846_v62  ;;  %v2928_v2 = vadd.f32 %v6933_v7, %v2926_v4  ;;  %v7160_v62 = vld [vmem:[#allocation2 + $0x58] sm:$0xff]  ;;  %v7175_v18 = vld [vmem:[%s7636_s3 + $0x48] sm:$0xff] }
0x11d7   :  { %v4152_v13 = vmul.f32 -1.442695, %v2989_v3  ;;  %v7178_v3 = vld [vmem:[#allocation2 + $0x48] sm:$0xff] }
0x11d9   :  { %4460 = vpow2.f32 %v4152_v13 }
0x11da   :  { %v2966_v43 = vpop.f32.mrf.mxu3 }
0x11db   :  { %v2967_v61 = vadd.f32 %v7966_v31, %v2966_v43  ;;  %v7193_v43 = vld [vmem:[%s7642_s9] ss:$0 sm:$0xff] }
0x11dd   :  { %v3009_v26 = vadd.f32 %v2967_v61, %v2887_v38  ;;  %v7201_v38 = vld [vmem:[%s7635_s2] sm:$0x3]  ;;  %v3053_v61 = vpop.f32.mrf.mxu2 }
0x11df   :  { %v4461_v58 = vpop.eup %4460  ;;  %v4153_v46 = vmul.f32 -1.442695, %v3009_v26 }
0x11e0   :  { %v2993_v19 = vadd.f32 1.0, %v4461_v58 }
0x11e1   :  { %4462 = vpow2.f32 %v4153_v46 }
0x11e2   :  { %4464 = vrcp.f32 %v2993_v19  ;;  %v3005_v23 = vand.u32 2147483648, %v2993_v19  ;;  %v3003_v48 = vand.u32 2147483647, %v2993_v19  ;;  %vm2999_vm7 = vweird.f32 %v2993_v19 }
0x11e4   :  { %v3006_v50 = vor.u32 1.1754944e-38, %v3005_v23  ;;  %vm3004_vm9 = vcmp.eq.f32.partialorder %v3003_v48, 8.507059e+37 }
0x11e7   :  { %v4463_v42 = vpop.eup %4462 }
0x11e8   :  { %v4465_v0 = vpop.eup %4464  ;;  %v3013_v9 = vadd.f32 1.0, %v4463_v42 }
0x11e9   :  { %v2995_v52 = vmul.f32 %v4465_v0, %v2993_v19  ;;  %vm3000_vm6 = vweird.f32 %v4465_v0  ;;  %v7209_v19 = vld [vmem:[%s7635_s2 + $0x6] sm:$0x3] }
0x11ea   :  { %4466 = vrcp.f32 %v3013_v9  ;;  %vm3001_vm8 = vmor %vm2999_vm7, %vm3000_vm6  ;;  %v3025_v40 = vand.u32 2147483648, %v3013_v9  ;;  %v3023_v63 = vand.u32 2147483647, %v3013_v9  ;;  %vm3019_vm11 = vweird.f32 %v3013_v9 }
0x11eb   :  { %v2996_v55 = vsub.f32 1.0, %v2995_v52  ;;  %v7226_v52 = vld [vmem:[%s7635_s2 + $0xc] sm:$0x3] }
0x11ec   :  { %v3026_v11 = vor.u32 1.1754944e-38, %v3025_v40  ;;  %vm3024_vm13 = vcmp.eq.f32.partialorder %v3023_v63, 8.507059e+37 }
0x11ed   :  { %v2997_v30 = vmul.f32 %v4465_v0, %v2996_v55 }
0x11ef   :  { %v2998_v47 = vadd.f32 %v4465_v0, %v2997_v30 }
0x11f0   :  { %v4467_v33 = vpop.eup %4466 }
0x11f1   :  { %v3002_v36 = vsel %vm3001_vm8, %v4465_v0, %v2998_v47  ;;  %v3015_v39 = vmul.f32 %v4467_v33, %v3013_v9  ;;  %vm3020_vm10 = vweird.f32 %v4467_v33 }
0x11f2   :  { %v3007_v49 = vsel %vm3004_vm9, %v3006_v50, %v3002_v36  ;;  %vm3021_vm12 = vmor %vm3019_vm11, %vm3020_vm10  ;;  %v7238_v50 = vld [vmem:[%s7635_s2 + $0x2] sm:$0x3] }
0x11f3   :  { %v3029_v10 = vmul.f32 %v3007_v49, %v2987_v1  ;;  %v3016_v20 = vsub.f32 1.0, %v3015_v39 }
0x11f5   :  { %v3030_v35 = vadd.f32 %v3029_v10, %v2928_v2  ;;  %v3017_v45 = vmul.f32 %v4467_v33, %v3016_v20  ;;  %v7247_v10 = vld [vmem:[%s7635_s2 + $0x8] sm:$0x3] }
0x11f7   :  { %4468 = vtanh.f32 %v3030_v35  ;;  %v3018_v12 = vadd.f32 %v4467_v33, %v3017_v45  ;;  %v7255_v45 = vld [vmem:[%s7635_s2 + $0xe] sm:$0x3] }
0x11f9   :  { %v3022_v16 = vsel %vm3021_vm12, %v4467_v33, %v3018_v12 }
0x11fa   :  { %v3027_v14 = vsel %vm3024_vm13, %v3026_v11, %v3022_v16 }
0x11fb   :  { %v3032_v32 = vsub.f32 1.0, %v3027_v14  ;;  %v3034_v7 = vmul.f32 %v3027_v14, %v6937_v8  ;;  %v7166_v8 = vld [vmem:[%s7636_s3 + $0x50] sm:$0xff] }
0x11fd   :  { %v4469_v34 = vpop.eup %4468 }
0x11fe   :  { %v3033_v41 = vmul.f32 %v4469_v34, %v3032_v32 }
0x1200   :  { %v7148_v60 = vadd.f32 %v3034_v7, %v3033_v41  ;;  %v7267_v7 = vld [vmem:[%s7635_s2 + $0x4] sm:$0x3] }
0x1202   :  { %4155 = vmatmul.msk.f32.vlgmr.msrb.gmra.mxu3 %vm202_vm0, %v7148_v60  ;;  %4158 = vmatmul.msk.f32.vlgmr.msra.gmra.mxu0 %vm202_vm0, %v7148_v60 }
0x1203   :  { %3399 = vmatpush.msra.mxu0 %v7157_v5  ;;  %3379 = vmatpush.msrb.mxu3 %v7160_v62 }
0x1205   :  { %3400 = vmatpush.msra.mxu0 %v7166_v8  ;;  %3380 = vmatpush.msrb.mxu3 %v7169_v54 }
0x1207   :  { %3401 = vmatpush.msra.mxu0 %v7175_v18  ;;  %3381 = vmatpush.msrb.mxu3 %v7178_v3 }
0x1209   :  { %3402 = vmatpush.msra.mxu0 %v7184_v25  ;;  %3382 = vmatpush.msrb.mxu3 %v7187_v28 }
0x127f   :  { %v3122_v13 = vpop.f32.mrf.mxu0 }
0x1280   :  { %v7196_v24 = vadd.f32 %v7193_v43, %v3122_v13 }
0x1282   :  { %v3125_v31 = vadd.f32 %v7201_v38, %v7196_v24  ;;  %v3128_v22 = vadd.f32 %v7209_v19, %v7196_v24  ;;  %v3131_v55 = vadd.f32 %v7226_v52, %v7196_v24  ;;  %v3126_v51 = vadd.f32 %v7238_v50, %v7196_v24 }
0x1283   :  { %v3129_v20 = vadd.f32 %v7247_v10, %v7196_v24  ;;  %v3132_v63 = vadd.f32 %v7255_v45, %v7196_v24  ;;  %v3127_v13 = vadd.f32 %v7267_v7, %v7196_v24 }
0x1284   :  { %4470 = vtanh.f32 %v3125_v31 }
0x1285   :  { %v3076_v26 = vpop.f32.mrf.mxu3  ;;  %4472 = vtanh.f32 %v3128_v22 }
0x1286   :  { %v3077_v58 = vadd.f32 %v3076_v26, %v3053_v61  ;;  %4474 = vtanh.f32 %v3131_v55 }
0x1287   :  { %4476 = vtanh.f32 %v3126_v51 }
0x1288   :  { %v3079_v46 = vadd.f32 %v6956_v17, %v3077_v58  ;;  %v7220_v17 = vld [vmem:[%s7643_s10] ss:$0 sm:$0xff]  ;;  %4478 = vtanh.f32 %v3129_v20  ;;  %v7274_v58 = vld [vmem:[%s7635_s2 + $0xa] sm:$0x3] }
0x1289   :  { %4480 = vtanh.f32 %v3132_v63 }
0x128a   :  { %4156 = vst [vmem:[%s7648_s15 + $0xa] sm:$0x3] %v3079_v46  ;;  %v3082_v42 = vsel %vm278_vm2, %v3079_v46, -inf  ;;  %v4471_v0 = vpop.eup %4470  ;;  %4482 = vtanh.f32 %v3127_v13 }
0x128b   :  { %3083 = vmax.xlane.f32.xlu0 %v3082_v42  ;;  %v3141_v9 = vmul.f32 %v7220_v17, %v4471_v0  ;;  %v4473_v30 = vpop.eup %4472 }
0x128c   :  { %v3144_v48 = vmul.f32 %v7220_v17, %v4473_v30  ;;  %v4475_v4 = vpop.eup %4474 }
0x128d   :  { %v3149_v23 = vsel %vm253_vm1, %v3141_v9, 0.0  ;;  %v3147_v47 = vmul.f32 %v7220_v17, %v4475_v4  ;;  %v4477_v40 = vpop.eup %4476 }
0x128e   :  { %v3158_v56 = vsel %vm253_vm1, %v3144_v48, 0.0  ;;  %v3142_v35 = vmul.f32 %v7220_v17, %v4477_v40  ;;  %v4479_v11 = vpop.eup %4478 }
0x128f   :  { %v3167_v33 = vsel %vm253_vm1, %v3147_v47, 0.0  ;;  %v3145_v16 = vmul.f32 %v7220_v17, %v4479_v11  ;;  %v4481_v32 = vpop.eup %4480 }
0x1290   :  { %v3152_v12 = vsel %vm253_vm1, %v3142_v35, 0.0  ;;  %v3148_v34 = vmul.f32 %v7220_v17, %v4481_v32  ;;  %v4483_v42 = vpop.eup %4482 }
0x1291   :  { %v3161_v14 = vsel %vm253_vm1, %v3145_v16, 0.0  ;;  %v3143_v0 = vmul.f32 %v7220_v17, %v4483_v42 }
0x1292   :  { %v3170_v41 = vsel %vm253_vm1, %v3148_v34, 0.0 }
0x1293   :  { %3150 = vadd.xlane.f32.xlu0 %v3149_v23  ;;  %v3155_v9 = vsel %vm253_vm1, %v3143_v0, 0.0 }
0x129b   :  { %3159 = vadd.xlane.f32.xlu0 %v3158_v56 }
0x12a3   :  { %3168 = vadd.xlane.f32.xlu0 %v3167_v33 }
0x12fe   :  { %v3084_v1 = vpop.xlane.xlu0 %3083 }
0x12ff   :  { %vm3085_vm14 = vcmp.eq.f32.partialorder %v3079_v46, %v3084_v1  ;;  %v3130_v46 = vadd.f32 %v7274_v58, %v7196_v24 }
0x1300   :  { %v3086_v36 = vsel %vm3085_vm14, %v5591_v59, 128 }
0x1301   :  { %v3087_v39 = vsel %vm278_vm2, %v3086_v36, 2147483647  ;;  %4484 = vtanh.f32 %v3130_v46 }
0x1302   :  { %v3089_v49 = vshra.s32 %v3087_v39, 16  ;;  %v3088_v31 = vand.u32 65535, %v3087_v39 }
0x1304   :  { %v3091_v2 = vcvt.s32.f32 %v3089_v49  ;;  %v3090_v26 = vcvt.s32.f32 %v3088_v31 }
0x1306   :  { %3092 = vmin.xlane.f32.xlu1 %v3091_v2  ;;  %v3151_v48 = vpop.xlane.xlu0 %3150 }
0x1307   :  { %v4485_v55 = vpop.eup %4484  ;;  %v3173_v16 = vsel %vm278_vm2, %v3151_v48, -inf }
0x1308   :  { %v3146_v23 = vmul.f32 %v7220_v17, %v4485_v55 }
0x130a   :  { %v3164_v30 = vsel %vm253_vm1, %v3146_v23, 0.0 }
0x130e   :  { %3153 = vadd.xlane.f32.xlu1 %v3152_v12  ;;  %v3160_v51 = vpop.xlane.xlu0 %3159 }
0x1316   :  { %3162 = vadd.xlane.f32.xlu1 %v3161_v14  ;;  %v3169_v49 = vpop.xlane.xlu0 %3168  ;;  %v3176_v14 = vsel %vm278_vm2, %v3160_v51, -inf }
0x1317   :  { %v3181_v40 = vsel %vm278_vm2, %v3169_v49, -inf }
0x131e   :  { %3171 = vadd.xlane.f32.xlu1 %v3170_v41 }
0x1379   :  { %v3093_v61 = vpop.xlane.xlu1 %3092 }
0x137a   :  { %vm3094_vm15 = vcmp.eq.f32.partialorder %v3091_v2, %v3093_v61  ;;  %v3099_v4 = vcvt.f32.s32 %v3093_v61 }
0x137b   :  { %v3095_v22 = vsel %vm3094_vm15, %v3090_v26, inf }
0x137c   :  { %3096 = vmin.xlane.f32.xlu2 %v3095_v22  ;;  %v3100_v24 = vshll.u32 %v3099_v4, 16 }
0x1381   :  { %v3154_v56 = vpop.xlane.xlu1 %3153 }
0x1382   :  { %v3174_v32 = vsel %vm278_vm2, %v3154_v56, -inf }
0x1384   :  { %3156 = vadd.xlane.f32.xlu2 %v3155_v9 }
0x1389   :  { %v3163_v1 = vpop.xlane.xlu1 %3162 }
0x138a   :  { %v3177_v35 = vsel %vm278_vm2, %v3163_v1, -inf }
0x138b   :  { %v3178_v41 = vmax.f32 %v3173_v16, %v3177_v35 }
0x138c   :  { %3165 = vadd.xlane.f32.xlu2 %v3164_v30 }
0x1391   :  { %v3172_v2 = vpop.xlane.xlu1 %3171 }
0x1392   :  { %v3183_v63 = vsel %vm278_vm2, %v3172_v2, -inf }
0x1393   :  { %v3184_v13 = vmax.f32 %v3176_v14, %v3183_v63 }
0x13ef   :  { %v3097_v47 = vpop.xlane.xlu2 %3096 }
0x13f0   :  { %v3098_v33 = vcvt.f32.s32 %v3097_v47 }
0x13f2   :  { %v3101_v36 = vadd.s32 %v3100_v24, %v3098_v33 }
0x13f4   :  { %vm3102_vm3 = vcmp.eq.s32.totalorder %v5591_v59, %v3101_v36 }
0x13f5   :  { %4159 = vmatmul.msk.f32.vlgmr.msra.gmra.mxu1 %vm3102_vm3, %v7866_v6 }
0x13f7   :  { %v3157_v39 = vpop.xlane.xlu2 %3156 }
0x13f8   :  { %v3175_v20 = vsel %vm278_vm2, %v3157_v39, -inf }
0x13f9   :  { %v3182_v12 = vmax.f32 %v3175_v20, %v3181_v40 }
0x13fb   :  { %v3186_v61 = vmax.f32 %v3182_v12, %v3184_v13 }
0x13ff   :  { %v3166_v11 = vpop.xlane.xlu2 %3165 }
0x1400   :  { %v3179_v34 = vsel %vm278_vm2, %v3166_v11, -inf }
0x1401   :  { %v3180_v31 = vmax.f32 %v3174_v32, %v3179_v34 }
0x1403   :  { %v3185_v26 = vmax.f32 %v3178_v41, %v3180_v31 }
0x1405   :  { %v3187_v46 = vmax.f32 %v3185_v26, %v3186_v61 }
0x1407   :  { %v3188_v22 = vsub.f32 %v3151_v48, %v3187_v46  ;;  %v3189_v42 = vsub.f32 %v3154_v56, %v3187_v46  ;;  %v3190_v0 = vsub.f32 %v3157_v39, %v3187_v46  ;;  %v3191_v9 = vsub.f32 %v3160_v51, %v3187_v46 }
0x1408   :  { %v3192_v55 = vsub.f32 %v3163_v1, %v3187_v46  ;;  %v3193_v47 = vsub.f32 %v3166_v11, %v3187_v46  ;;  %v3194_v33 = vsub.f32 %v3169_v49, %v3187_v46  ;;  %v3195_v20 = vsub.f32 %v3172_v2, %v3187_v46 }
0x1409   :  { %v3196_v23 = vmul.f32 1.442695, %v3188_v22  ;;  %v3198_v30 = vmul.f32 1.442695, %v3189_v42  ;;  %v3200_v4 = vmul.f32 1.442695, %v3190_v0 }
0x140a   :  { %v3202_v24 = vmul.f32 1.442695, %v3191_v9  ;;  %v3204_v36 = vmul.f32 1.442695, %v3192_v55  ;;  %v3206_v40 = vmul.f32 1.442695, %v3193_v47 }
0x140b   :  { %4486 = vpow2.f32 %v3196_v23  ;;  %v3208_v35 = vmul.f32 1.442695, %v3194_v33  ;;  %v3210_v51 = vmul.f32 1.442695, %v3195_v20  ;;  %v7303_v33 = vld [vmem:[%s7634_s1] sm:$0x3] }
0x140c   :  { %4488 = vpow2.f32 %v3198_v30  ;;  %v7309_v20 = vld [vmem:[%s7634_s1 + $0x2] sm:$0x3] }
0x140d   :  { %4490 = vpow2.f32 %v3200_v4 }
0x140e   :  { %4492 = vpow2.f32 %v3202_v24 }
0x140f   :  { %4494 = vpow2.f32 %v3204_v36 }
0x1410   :  { %4496 = vpow2.f32 %v3206_v40 }
0x1411   :  { %v4487_v48 = vpop.eup %4486  ;;  %4498 = vpow2.f32 %v3208_v35  ;;  %v7315_v35 = vld [vmem:[%s7634_s1 + $0x4] sm:$0x3] }
0x1412   :  { %v4489_v56 = vpop.eup %4488  ;;  %v3212_v1 = vsel %vm278_vm2, %v4487_v48, 0.0  ;;  %4500 = vpow2.f32 %v3210_v51  ;;  %v7321_v51 = vld [vmem:[%s7634_s1 + $0x6] sm:$0x3] }
0x1413   :  { %v4491_v39 = vpop.eup %4490  ;;  %v3213_v63 = vsel %vm278_vm2, %v4489_v56, 0.0 }
0x1414   :  { %v4493_v12 = vpop.eup %4492  ;;  %v3214_v49 = vadd.f32 %v3213_v63, %v3212_v1  ;;  %v3215_v11 = vsel %vm278_vm2, %v4491_v39, 0.0 }
0x1415   :  { %v4495_v16 = vpop.eup %4494  ;;  %v3217_v14 = vsel %vm278_vm2, %v4493_v12, 0.0 }
0x1416   :  { %v3216_v2 = vadd.f32 %v3215_v11, %v3214_v49  ;;  %v4497_v32 = vpop.eup %4496  ;;  %v3219_v41 = vsel %vm278_vm2, %v4495_v16, 0.0  ;;  %v7329_v11 = vld [vmem:[%s7634_s1 + $0x8] sm:$0x3] }
0x1417   :  { %v4499_v13 = vpop.eup %4498  ;;  %v3221_v61 = vsel %vm278_vm2, %v4497_v32, 0.0 }
0x1418   :  { %v3218_v34 = vadd.f32 %v3217_v14, %v3216_v2  ;;  %v4501_v26 = vpop.eup %4500  ;;  %v3223_v22 = vsel %vm278_vm2, %v4499_v13, 0.0 }
0x1419   :  { %v3225_v0 = vsel %vm278_vm2, %v4501_v26, 0.0 }
0x141a   :  { %v3220_v31 = vadd.f32 %v3219_v41, %v3218_v34 }
0x141c   :  { %v3222_v46 = vadd.f32 %v3221_v61, %v3220_v31  ;;  %v7343_v61 = vld [vmem:[%s7634_s1 + $0xc] sm:$0x3] }
0x141e   :  { %v3224_v42 = vadd.f32 %v3223_v22, %v3222_v46 }
0x1420   :  { %v3226_v9 = vadd.f32 %v3225_v0, %v3224_v42 }
0x1422   :  { %4502 = vrcp.f32 %v3226_v9 }
0x1428   :  { %v4503_v55 = vpop.eup %4502 }
0x1429   :  { %v3228_v23 = vmul.f32 %v4503_v55, %v4487_v48  ;;  %v3229_v30 = vmul.f32 %v4503_v55, %v4489_v56  ;;  %v3230_v4 = vmul.f32 %v4503_v55, %v4491_v39  ;;  %v3231_v47 = vmul.f32 %v4503_v55, %v4493_v12 }
0x142a   :  { %v3232_v24 = vmul.f32 %v4503_v55, %v4495_v16  ;;  %v3233_v56 = vmul.f32 %v4503_v55, %v4497_v32  ;;  %v3234_v49 = vmul.f32 %v4503_v55, %v4499_v13  ;;  %v7336_v32 = vld [vmem:[%s7634_s1 + $0xa] sm:$0x3]  ;;  %v3235_v13 = vmul.f32 %v4503_v55, %v4501_v26 }
0x142b   :  { %v3236_v36 = vmul.f32 %v7303_v33, %v3228_v23  ;;  %v3237_v40 = vmul.f32 %v7309_v20, %v3229_v30  ;;  %v3238_v48 = vmul.f32 %v7315_v35, %v3230_v4  ;;  %v3239_v1 = vmul.f32 %v7321_v51, %v3231_v47  ;;  %v7357_v47 = vld [vmem:[#allocation4 + $0x18] sm:$0xff] }
0x142c   :  { %v3240_v16 = vmul.f32 %v7329_v11, %v3232_v24  ;;  %v3241_v34 = vmul.f32 %v7336_v32, %v3233_v56  ;;  %v3242_v46 = vmul.f32 %v7343_v61, %v3234_v49  ;;  %v3243_v9 = vmul.f32 %v7048_v57, %v3235_v13  ;;  %v7360_v24 = vld [vmem:[#allocation4 + $0x58] sm:$0xff]  ;;  %v7363_v57 = vld [vmem:[#allocation4 + $0x10] sm:$0xff]  ;;  %v7375_v56 = vld [vmem:[#allocation4] sm:$0xff] }
0x142d   :  { %v3244_v39 = vsel %vm253_vm1, %v3236_v36, 0.0  ;;  %v3245_v63 = vsel %vm253_vm1, %v3237_v40, 0.0  ;;  %v3247_v2 = vsel %vm253_vm1, %v3238_v48, 0.0  ;;  %v3249_v41 = vsel %vm253_vm1, %v3239_v1, 0.0  ;;  %v7366_v36 = vld [vmem:[#allocation4 + $0x50] sm:$0xff]  ;;  %v7369_v40 = vld [vmem:[#allocation4 + $0x8] sm:$0xff] }
0x142e   :  { %v3246_v12 = vadd.f32 %v3245_v63, %v3244_v39  ;;  %v3251_v22 = vsel %vm253_vm1, %v3240_v16, 0.0  ;;  %v3253_v0 = vsel %vm253_vm1, %v3241_v34, 0.0  ;;  %v3255_v30 = vsel %vm253_vm1, %v3242_v46, 0.0  ;;  %v7372_v48 = vld [vmem:[#allocation4 + $0x48] sm:$0xff]  ;;  %v7378_v1 = vld [vmem:[#allocation4 + $0x40] sm:$0xff]  ;;  %v7384_v63 = vld [vmem:[#allocation4 + $0x38] sm:$0xff] }
0x142f   :  { %v3257_v26 = vsel %vm253_vm1, %v3243_v9, 0.0  ;;  %v7391_v49 = vld [vmem:[#allocation4 + $0x30] sm:$0xff]  ;;  %v4791_v34 = vld [vmem:[#allocation2 + $0x18] sm:$0xff]  ;;  %v4800_v9 = vld [vmem:[#allocation2] sm:$0xff] }
0x1430   :  { %v3248_v14 = vadd.f32 %v3247_v2, %v3246_v12  ;;  %v7387_v12 = vld [vmem:[#allocation6 + $0x18] sm:$0xff]  ;;  %v7394_v16 = vld [vmem:[#allocation6 + $0x10] sm:$0xff]  ;;  %v7398_v2 = vld [vmem:[#allocation4 + $0x28] sm:$0xff] }
0x1431   :  { %v7427_v13 = vld [vmem:[%s7644_s11 + $0x10] sm:$0xff] }
0x1432   :  { %v3250_v31 = vadd.f32 %v3249_v41, %v3248_v14  ;;  %v7401_v14 = vld [vmem:[#allocation6 + $0x8] sm:$0xff]  ;;  %v4792_v41 = vld [vmem:[#allocation2 + $0x38] sm:$0xff]  ;;  %7970 = vst [vmem:[#allocation38_spill] sm:$0xff] %v7427_v13  ;;  %v4795_v46 = vld [vmem:[#allocation2 + $0x30] sm:$0xff] }
0x1434   :  { %v3252_v42 = vadd.f32 %v3251_v22, %v3250_v31  ;;  %v4794_v31 = vld [vmem:[#allocation2 + $0x10] sm:$0xff]  ;;  %v7433_v22 = vld [vmem:[%s7644_s11 + $0x8] sm:$0xff] }
0x1435   :  { %7971 = vst [vmem:[#allocation9_spill] sm:$0xff] %v7433_v22 }
0x1436   :  { %v3254_v23 = vadd.f32 %v3253_v0, %v3252_v42  ;;  %v4798_v42 = vld [vmem:[#allocation2 + $0x28] sm:$0xff]  ;;  %v7443_v0 = vld [vmem:[%s7644_s11] sm:$0xff] }
0x1437   :  { %7972 = vst [vmem:[#allocation10_spill] sm:$0xff] %v7443_v0 }
0x1438   :  { %v3256_v4 = vadd.f32 %v3255_v30, %v3254_v23  ;;  %v4801_v23 = vld [vmem:[#allocation2 + $0x20] sm:$0xff]  ;;  %v4802_v30 = vld [vmem:[%s7636_s3 + $0x38] sm:$0xff] }
0x143a   :  { %v7351_v55 = vadd.f32 %v3257_v26, %v3256_v4  ;;  %v4803_v4 = vld [vmem:[%s7636_s3 + $0x30] sm:$0xff]  ;;  %v4804_v26 = vld [vmem:[%s7636_s3 + $0x28] sm:$0xff] }
0x143c   :  { %4160 = vmatmul.msk.f32.vlgmr.msra.gmra.mxu2 %vm202_vm0, %v7351_v55  ;;  %4162 = vmatmul.msk.f32.vlgmr.msrb.gmra.mxu0 %vm202_vm0, %v7351_v55 }
0x143d   :  { %3420 = vmatpush.msra.mxu2 %v7357_v47  ;;  %3460 = vmatpush.msrb.mxu0 %v7360_v24 }
0x143f   :  { %3421 = vmatpush.msra.mxu2 %v7363_v57  ;;  %3461 = vmatpush.msrb.mxu0 %v7366_v36 }
0x1441   :  { %3422 = vmatpush.msra.mxu2 %v7369_v40  ;;  %3462 = vmatpush.msrb.mxu0 %v7372_v48 }
0x1443   :  { %3423 = vmatpush.msra.mxu2 %v7375_v56  ;;  %3463 = vmatpush.msrb.mxu0 %v7378_v1 }
0x1472   :  { %v3276_v39 = vpop.f32.mrf.mxu1 }
0x1473   :  { %4161 = vmatmul.msk.f32.vlgmr.msra.gmra.mxu3 %vm202_vm0, %v3276_v39  ;;  %4163 = vmatmul.msk.f32.vlgmr.msrb.gmra.mxu2 %vm202_vm0, %v3276_v39 }
0x1474   :  { %4165 = vmatmul.msk.f32.vlgmr.msra.gmra.mxu0 %vm202_vm0, %v3276_v39  ;;  %3440 = vmatpush.msra.mxu3 %v7384_v63 }
0x1475   :  { %3527 = vmatpush.msrb.mxu2 %v7387_v12  ;;  %3596 = vmatpush.msra.mxu0 %v7071_v37  ;;  %v7405_v37 = vld [vmem:[#allocation4 + $0x20] sm:$0xff] }
0x1476   :  { %3441 = vmatpush.msra.mxu3 %v7391_v49 }
0x1477   :  { %3528 = vmatpush.msrb.mxu2 %v7394_v16  ;;  %3597 = vmatpush.msra.mxu0 %v7079_v15  ;;  %v7414_v15 = vld [vmem:[#allocation6] sm:$0xff] }
0x1478   :  { %3442 = vmatpush.msra.mxu3 %v7398_v2  ;;  %7968 = vst [vmem:[#allocation41_spill] sm:$0xff] %v7414_v15 }
0x1479   :  { %3529 = vmatpush.msrb.mxu2 %v7401_v14  ;;  %3598 = vmatpush.msra.mxu0 %v7087_v44  ;;  %v7420_v44 = vld [vmem:[%s7644_s11 + $0x18] sm:$0xff] }
0x147a   :  { %3443 = vmatpush.msra.mxu3 %v7405_v37  ;;  %7969 = vst [vmem:[#allocation39_spill] sm:$0xff] %v7420_v44 }
0x147b   :  { %4164 = vmatmul.msk.f32.vlgmr.msrb.gmra.mxu3 %vm202_vm0, %v7351_v55  ;;  %4166 = vmatmul.msk.f32.vlgmr.msra.gmra.mxu2 %vm202_vm0, %v7148_v60 }
0x147c   :  { %4168 = vmatmul.msk.f32.vlgmr.msrb.gmra.mxu0 %vm202_vm0, %v7148_v60  ;;  %3530 = vmatpush.msrb.mxu2 %v7414_v15 }
0x147d   :  { %3550 = vmatpush.msrb.mxu3 %v7420_v44  ;;  %3599 = vmatpush.msra.mxu0 %v7101_v27  ;;  %v4797_v27 = vld [vmem:[#allocation2 + $0x8] sm:$0xff] }
0x147e   :  { %3773 = vmatpush.msra.mxu2 %v4791_v34 }
0x147f   :  { %3817 = vmatpush.msrb.mxu0 %v4792_v41  ;;  %3551 = vmatpush.msrb.mxu3 %v7427_v13 }
0x1480   :  { %3774 = vmatpush.msra.mxu2 %v4794_v31 }
0x1481   :  { %3818 = vmatpush.msrb.mxu0 %v4795_v46  ;;  %3552 = vmatpush.msrb.mxu3 %v7433_v22 }
0x1482   :  { %3775 = vmatpush.msra.mxu2 %v4797_v27 }
0x1483   :  { %3819 = vmatpush.msrb.mxu0 %v4798_v42  ;;  %4167 = vmatmul.msk.f32.vlgmr.msra.gmra.mxu3 %vm202_vm0, %v7148_v60  ;;  %v7473_v42 = vld [vmem:[%s7640_s7] ss:$0 sm:$0xff] }
0x1484   :  { %4171 = vmatmul.msk.f32.vlgmr.msrb.gmra.mxu2 %vm202_vm0, %v7351_v55  ;;  %3553 = vmatpush.msrb.mxu3 %v7443_v0  ;;  %v4805_v55 = vld [vmem:[%s7636_s3 + $0x20] sm:$0xff]  ;;  %7974 = vst [vmem:[#allocation12_spill] sm:$0xff] %v7473_v42 }
0x1485   :  { %3776 = vmatpush.msra.mxu2 %v4800_v9  ;;  %3820 = vmatpush.msrb.mxu0 %v4801_v23 }
0x1486   :  { %3796 = vmatpush.msra.mxu3 %v7122_v53  ;;  %v4806_v53 = vld [vmem:[%s7636_s3] sm:$0xff] }
0x1487   :  { %3837 = vmatpush.msrb.mxu2 %v4802_v30 }
0x1488   :  { %3797 = vmatpush.msra.mxu3 %v7129_v21 }
0x1489   :  { %3838 = vmatpush.msrb.mxu2 %v4803_v4 }
0x148a   :  { %3798 = vmatpush.msra.mxu3 %v7136_v29  ;;  %v7467_v29 = vld [vmem:[%s7639_s6] ss:$0 sm:$0xff] }
0x148b   :  { %3839 = vmatpush.msrb.mxu2 %v4804_v26  ;;  %7973 = vst [vmem:[#allocation11_spill] sm:$0xff] %v7467_v29 }
0x148c   :  { %3799 = vmatpush.msra.mxu3 %v4806_v53  ;;  %v7479_v53 = vld [vmem:[%s7639_s6 + $0x1] ss:$0 sm:$0xff] }
0x148d   :  { %3840 = vmatpush.msrb.mxu2 %v4805_v55  ;;  %7975 = vst [vmem:[#allocation13_spill] sm:$0xff] %v7479_v53 }
0x14b9   :  { %v3343_v30 = vpop.f32.mrf.mxu0 }
0x14bf   :  { %v3299_v39 = vpop.f32.mrf.mxu2 }
0x14f6   :  { %v3322_v34 = vpop.f32.mrf.mxu3  ;;  %v3363_v21 = vpop.f32.mrf.mxu2 }
0x14f7   :  { %v3323_v41 = vadd.f32 %v3322_v34, %v3299_v39  ;;  %v3364_v4 = vadd.f32 %v3363_v21, %v3343_v30  ;;  %v7485_v34 = vld [vmem:[%s7640_s7 + $0x1] ss:$0 sm:$0xff] }
0x14f8   :  { %7976 = vst [vmem:[#allocation14_spill] sm:$0xff] %v7485_v34 }
0x14f9   :  { %v3325_v27 = vadd.f32 %v7467_v29, %v3323_v41  ;;  %v3366_v39 = vadd.f32 %v7479_v53, %v3364_v4 }
0x14fe   :  { %v3384_v31 = vpop.f32.mrf.mxu3  ;;  %v3425_v46 = vpop.f32.mrf.mxu2 }
0x14ff   :  { %v3426_v9 = vadd.f32 %v7473_v42, %v3425_v46 }
0x1501   :  { %v3468_v23 = vadd.f32 %v3426_v9, %v3325_v27 }
0x1503   :  { %v4169_v26 = vmul.f32 -1.442695, %v3468_v23  ;;  %v3404_v23 = vpop.f32.mrf.mxu0 }
0x1504   :  { %v3405_v44 = vadd.f32 %v3404_v23, %v3384_v31  ;;  %v7497_v31 = vld [vmem:[%s7639_s6 + $0x2] ss:$0 sm:$0xff] }
0x1505   :  { %4504 = vpow2.f32 %v4169_v26 }
0x1506   :  { %v3445_v55 = vpop.f32.mrf.mxu3 }
0x1507   :  { %v3446_v41 = vadd.f32 %v7485_v34, %v3445_v55 }
0x1509   :  { %v3488_v46 = vadd.f32 %v3446_v41, %v3366_v39 }
0x150b   :  { %v4505_v27 = vpop.eup %4504  ;;  %v4170_v21 = vmul.f32 -1.442695, %v3488_v46  ;;  %v3465_v13 = vpop.f32.mrf.mxu0  ;;  %v7491_v46 = vld [vmem:[%s7640_s7 + $0x2] ss:$0 sm:$0xff] }
0x150c   :  { %v3472_v9 = vadd.f32 1.0, %v4505_v27  ;;  %7977 = vst [vmem:[#allocation15_spill] sm:$0xff] %v7491_v46  ;;  %v3466_v27 = vadd.f32 %v7491_v46, %v3465_v13 }
0x150d   :  { %4506 = vpow2.f32 %v4170_v21 }
0x150e   :  { %4508 = vrcp.f32 %v3472_v9  ;;  %v3484_v53 = vand.u32 2147483648, %v3472_v9  ;;  %v3482_v22 = vand.u32 2147483647, %v3472_v9  ;;  %vm3478_vm5 = vweird.f32 %v3472_v9 }
0x1510   :  { %v3485_v41 = vor.u32 1.1754944e-38, %v3484_v53  ;;  %vm3483_vm7 = vcmp.eq.f32.partialorder %v3482_v22, 8.507059e+37 }
0x1513   :  { %v4507_v30 = vpop.eup %4506 }
0x1514   :  { %v4509_v26 = vpop.eup %4508  ;;  %v3492_v42 = vadd.f32 1.0, %v4507_v30 }
0x1515   :  { %v3474_v29 = vmul.f32 %v4509_v26, %v3472_v9  ;;  %vm3479_vm4 = vweird.f32 %v4509_v26 }
0x1516   :  { %4510 = vrcp.f32 %v3492_v42  ;;  %vm3480_vm6 = vmor %vm3478_vm5, %vm3479_vm4  ;;  %v3504_v23 = vand.u32 2147483648, %v3492_v42  ;;  %v3502_v15 = vand.u32 2147483647, %v3492_v42  ;;  %vm3498_vm9 = vweird.f32 %v3492_v42 }
0x1517   :  { %v3475_v4 = vsub.f32 1.0, %v3474_v29 }
0x1518   :  { %v3505_v22 = vor.u32 1.1754944e-38, %v3504_v23  ;;  %vm3503_vm11 = vcmp.eq.f32.partialorder %v3502_v15, 8.507059e+37 }
0x1519   :  { %v3476_v0 = vmul.f32 %v4509_v26, %v3475_v4 }
0x151b   :  { %v3477_v55 = vadd.f32 %v4509_v26, %v3476_v0  ;;  %v3407_v0 = vadd.f32 %v7497_v31, %v3405_v44 }
0x151c   :  { %v4511_v39 = vpop.eup %4510 }
0x151d   :  { %v3481_v21 = vsel %vm3480_vm6, %v4509_v26, %v3477_v55  ;;  %v3494_v29 = vmul.f32 %v4511_v39, %v3492_v42  ;;  %vm3499_vm8 = vweird.f32 %v4511_v39 }
0x151e   :  { %v3486_v30 = vsel %vm3483_vm7, %v3485_v41, %v3481_v21  ;;  %vm3500_vm10 = vmor %vm3498_vm9, %vm3499_vm8 }
0x151f   :  { %v3508_v9 = vmul.f32 %v3486_v30, %v3466_v27  ;;  %v3495_v53 = vsub.f32 1.0, %v3494_v29 }
0x1521   :  { %v3509_v4 = vadd.f32 %v3508_v9, %v3407_v0  ;;  %v3496_v34 = vmul.f32 %v4511_v39, %v3495_v53 }
0x1523   :  { %4512 = vtanh.f32 %v3509_v4  ;;  %v3497_v13 = vadd.f32 %v4511_v39, %v3496_v34 }
0x1525   :  { %v3501_v26 = vsel %vm3500_vm10, %v4511_v39, %v3497_v13 }
0x1526   :  { %v3506_v55 = vsel %vm3503_vm11, %v3505_v22, %v3501_v26 }
0x1527   :  { %v3511_v41 = vsub.f32 1.0, %v3506_v55  ;;  %v3513_v44 = vmul.f32 %v3506_v55, %v7148_v60 }
0x1529   :  { %v4513_v21 = vpop.eup %4512 }
0x152a   :  { %v3512_v46 = vmul.f32 %v4513_v21, %v3511_v41 }
0x152c   :  { %v7501_v27 = vadd.f32 %v3513_v44, %v3512_v46 }
0x152e   :  { %4172 = vmatmul.msk.f32.vlgmr.msrb.gmra.mxu3 %vm202_vm0, %v7501_v27  ;;  %4175 = vmatmul.msk.f32.vlgmr.msra.gmra.mxu0 %vm202_vm0, %v7501_v27 }
0x152f   :  { %3878 = vmatpush.msra.mxu0 %v7157_v5  ;;  %3858 = vmatpush.msrb.mxu3 %v7160_v62  ;;  %v3532_v5 = vpop.f32.mrf.mxu2 }
0x1531   :  { %3879 = vmatpush.msra.mxu0 %v7166_v8  ;;  %3859 = vmatpush.msrb.mxu3 %v7169_v54  ;;  %v7520_v8 = vld [vmem:[%s7646_s13] ss:$0 sm:$0xff] }
0x1533   :  { %3880 = vmatpush.msra.mxu0 %v7175_v18  ;;  %3860 = vmatpush.msrb.mxu3 %v7178_v3 }
0x1535   :  { %3881 = vmatpush.msra.mxu0 %v7184_v25  ;;  %3861 = vmatpush.msrb.mxu3 %v7187_v28 }
0x15ab   :  { %v3601_v60 = vpop.f32.mrf.mxu0 }
0x15ac   :  { %v3602_v15 = vadd.f32 %v7193_v43, %v3601_v60 }
0x15ae   :  { %v3604_v42 = vadd.f32 %v7201_v38, %v3602_v15  ;;  %v3607_v18 = vadd.f32 %v7209_v19, %v3602_v15  ;;  %v3610_v43 = vadd.f32 %v7226_v52, %v3602_v15  ;;  %v3605_v9 = vadd.f32 %v7238_v50, %v3602_v15 }
0x15af   :  { %v3608_v22 = vadd.f32 %v7247_v10, %v3602_v15  ;;  %v3611_v41 = vadd.f32 %v7255_v45, %v3602_v15 }
0x15b0   :  { %4514 = vtanh.f32 %v3604_v42 }
0x15b1   :  { %v3555_v34 = vpop.f32.mrf.mxu3  ;;  %4516 = vtanh.f32 %v3607_v18  ;;  %v3609_v18 = vadd.f32 %v7274_v58, %v3602_v15 }
0x15b2   :  { %v3556_v62 = vadd.f32 %v3555_v34, %v3532_v5  ;;  %4518 = vtanh.f32 %v3610_v43  ;;  %v3606_v34 = vadd.f32 %v7267_v7, %v3602_v15 }
0x15b3   :  { %4520 = vtanh.f32 %v3605_v9 }
0x15b4   :  { %v3558_v54 = vadd.f32 %v7520_v8, %v3556_v62  ;;  %4522 = vtanh.f32 %v3608_v22 }
0x15b5   :  { %4524 = vtanh.f32 %v3611_v41 }
0x15b6   :  { %4173 = vst [vmem:[%s7648_s15 + $0xc] sm:$0x3] %v3558_v54  ;;  %v3561_v3 = vsel %vm278_vm2, %v3558_v54, -inf  ;;  %v4515_v25 = vpop.eup %4514  ;;  %4526 = vtanh.f32 %v3606_v34 }
0x15b7   :  { %3562 = vmax.xlane.f32.xlu2 %v3561_v3  ;;  %v3620_v28 = vmul.f32 %v7220_v17, %v4515_v25  ;;  %v4517_v39 = vpop.eup %4516  ;;  %4528 = vtanh.f32 %v3609_v18 }
0x15b8   :  { %v3623_v19 = vmul.f32 %v7220_v17, %v4517_v39  ;;  %v4519_v29 = vpop.eup %4518 }
0x15b9   :  { %v3628_v38 = vsel %vm253_vm1, %v3620_v28, 0.0  ;;  %v3626_v30 = vmul.f32 %v7220_v17, %v4519_v29  ;;  %v4521_v26 = vpop.eup %4520 }
0x15ba   :  { %v3637_v46 = vsel %vm253_vm1, %v3623_v19, 0.0  ;;  %v3621_v55 = vmul.f32 %v7220_v17, %v4521_v26  ;;  %v4523_v21 = vpop.eup %4522 }
0x15bb   :  { %v3646_v0 = vsel %vm253_vm1, %v3626_v30, 0.0  ;;  %v3624_v44 = vmul.f32 %v7220_v17, %v4523_v21  ;;  %v4525_v42 = vpop.eup %4524 }
0x15bc   :  { %v3631_v50 = vsel %vm253_vm1, %v3621_v55, 0.0  ;;  %v3627_v10 = vmul.f32 %v7220_v17, %v4525_v42  ;;  %v4527_v25 = vpop.eup %4526 }
0x15bd   :  { %v3640_v60 = vsel %vm253_vm1, %v3624_v44, 0.0  ;;  %v3622_v28 = vmul.f32 %v7220_v17, %v4527_v25 }
0x15be   :  { %v3649_v5 = vsel %vm253_vm1, %v3627_v10, 0.0 }
0x15bf   :  { %3629 = vadd.xlane.f32.xlu2 %v3628_v38  ;;  %v3634_v43 = vsel %vm253_vm1, %v3622_v28, 0.0  ;;  %v4529_v38 = vpop.eup %4528 }
0x15c0   :  { %v3625_v39 = vmul.f32 %v7220_v17, %v4529_v38 }
0x15c2   :  { %v3643_v7 = vsel %vm253_vm1, %v3625_v39, 0.0 }
0x15c7   :  { %3638 = vadd.xlane.f32.xlu2 %v3637_v46 }
0x15cf   :  { %3647 = vadd.xlane.f32.xlu2 %v3646_v0 }
0x162a   :  { %v3563_v53 = vpop.xlane.xlu2 %3562 }
0x162b   :  { %vm3564_vm12 = vcmp.eq.f32.partialorder %v3558_v54, %v3563_v53 }
0x162c   :  { %v3565_v52 = vsel %vm3564_vm12, %v5591_v59, 128 }
0x162d   :  { %v3566_v23 = vsel %vm278_vm2, %v3565_v52, 2147483647 }
0x162e   :  { %v3568_v4 = vshra.s32 %v3566_v23, 16  ;;  %v3567_v62 = vand.u32 65535, %v3566_v23 }
0x1630   :  { %v3570_v13 = vcvt.s32.f32 %v3568_v4  ;;  %v3569_v54 = vcvt.s32.f32 %v3567_v62 }
0x1632   :  { %3571 = vmin.xlane.f32.xlu0 %v3570_v13  ;;  %v3630_v19 = vpop.xlane.xlu2 %3629 }
0x163a   :  { %3632 = vadd.xlane.f32.xlu0 %v3631_v50  ;;  %v3639_v0 = vpop.xlane.xlu2 %3638  ;;  %v3652_v50 = vsel %vm278_vm2, %v3630_v19, -inf }
0x163b   :  { %v3655_v21 = vsel %vm278_vm2, %v3639_v0, -inf }
0x1642   :  { %3641 = vadd.xlane.f32.xlu0 %v3640_v60  ;;  %v3648_v23 = vpop.xlane.xlu2 %3647 }
0x164a   :  { %3650 = vadd.xlane.f32.xlu0 %v3649_v5 }
0x16a5   :  { %v3572_v45 = vpop.xlane.xlu0 %3571 }
0x16a6   :  { %vm3573_vm13 = vcmp.eq.f32.partialorder %v3570_v13, %v3572_v45  ;;  %v3578_v29 = vcvt.f32.s32 %v3572_v45  ;;  %v3660_v13 = vsel %vm278_vm2, %v3648_v23, -inf }
0x16a7   :  { %v3574_v3 = vsel %vm3573_vm13, %v3569_v54, inf }
0x16a8   :  { %3575 = vmin.xlane.f32.xlu1 %v3574_v3  ;;  %v3579_v58 = vshll.u32 %v3578_v29, 16 }
0x16ad   :  { %v3633_v46 = vpop.xlane.xlu0 %3632 }
0x16b0   :  { %3635 = vadd.xlane.f32.xlu1 %v3634_v43 }
0x16b5   :  { %v3642_v9 = vpop.xlane.xlu0 %3641 }
0x16b6   :  { %v3656_v22 = vsel %vm278_vm2, %v3642_v9, -inf }
0x16b7   :  { %v3657_v44 = vmax.f32 %v3652_v50, %v3656_v22 }
0x16b8   :  { %3644 = vadd.xlane.f32.xlu1 %v3643_v7 }
0x16bd   :  { %v3651_v4 = vpop.xlane.xlu0 %3650 }
0x16be   :  { %v3662_v26 = vsel %vm278_vm2, %v3651_v4, -inf }
0x16bf   :  { %v3663_v60 = vmax.f32 %v3655_v21, %v3662_v26 }
0x171b   :  { %v3576_v30 = vpop.xlane.xlu1 %3575 }
0x171c   :  { %v3577_v15 = vcvt.f32.s32 %v3576_v30 }
0x171e   :  { %v3580_v53 = vadd.s32 %v3579_v58, %v3577_v15 }
0x1720   :  { %vm3581_vm14 = vcmp.eq.s32.totalorder %v5591_v59, %v3580_v53  ;;  %v3653_v59 = vsel %vm278_vm2, %v3633_v46, -inf }
0x1721   :  { %4176 = vmatmul.msk.f32.vlgmr.msrb.gmra.mxu1 %vm3581_vm14, %v7866_v6 }
0x1723   :  { %v3636_v52 = vpop.xlane.xlu1 %3635 }
0x1724   :  { %v3654_v17 = vsel %vm278_vm2, %v3636_v52, -inf }
0x1725   :  { %v3661_v55 = vmax.f32 %v3654_v17, %v3660_v13 }
0x1727   :  { %v3665_v10 = vmax.f32 %v3661_v55, %v3663_v60 }
0x172b   :  { %v3645_v41 = vpop.xlane.xlu1 %3644 }
0x172c   :  { %v3658_v6 = vsel %vm278_vm2, %v3645_v41, -inf }
0x172d   :  { %v3659_v42 = vmax.f32 %v3653_v59, %v3658_v6 }
0x172f   :  { %v3664_v5 = vmax.f32 %v3657_v44, %v3659_v42 }
0x1731   :  { %v3666_v34 = vmax.f32 %v3664_v5, %v3665_v10 }
0x1733   :  { %v3667_v62 = vsub.f32 %v3630_v19, %v3666_v34  ;;  %v3668_v45 = vsub.f32 %v3633_v46, %v3666_v34  ;;  %v3669_v54 = vsub.f32 %v3636_v52, %v3666_v34  ;;  %v3670_v18 = vsub.f32 %v3639_v0, %v3666_v34 }
0x1734   :  { %v3671_v3 = vsub.f32 %v3642_v9, %v3666_v34  ;;  %v3672_v38 = vsub.f32 %v3645_v41, %v3666_v34  ;;  %v3673_v7 = vsub.f32 %v3648_v23, %v3666_v34  ;;  %v3674_v30 = vsub.f32 %v3651_v4, %v3666_v34 }
0x1735   :  { %v3675_v25 = vmul.f32 1.442695, %v3667_v62  ;;  %v3677_v28 = vmul.f32 1.442695, %v3668_v45  ;;  %v3679_v43 = vmul.f32 1.442695, %v3669_v54 }
0x1736   :  { %v3681_v39 = vmul.f32 1.442695, %v3670_v18  ;;  %v3683_v29 = vmul.f32 1.442695, %v3671_v3  ;;  %v3685_v58 = vmul.f32 1.442695, %v3672_v38 }
0x1737   :  { %4530 = vpow2.f32 %v3675_v25  ;;  %v3687_v15 = vmul.f32 1.442695, %v3673_v7  ;;  %v3689_v0 = vmul.f32 1.442695, %v3674_v30 }
0x1738   :  { %4532 = vpow2.f32 %v3677_v28 }
0x1739   :  { %4534 = vpow2.f32 %v3679_v43 }
0x173a   :  { %4536 = vpow2.f32 %v3681_v39 }
0x173b   :  { %4538 = vpow2.f32 %v3683_v29 }
0x173c   :  { %4540 = vpow2.f32 %v3685_v58 }
0x173d   :  { %v4531_v19 = vpop.eup %4530  ;;  %4542 = vpow2.f32 %v3687_v15 }
0x173e   :  { %v4533_v46 = vpop.eup %4532  ;;  %v3691_v9 = vsel %vm278_vm2, %v4531_v19, 0.0  ;;  %4544 = vpow2.f32 %v3689_v0 }
0x173f   :  { %v4535_v53 = vpop.eup %4534  ;;  %v3692_v52 = vsel %vm278_vm2, %v4533_v46, 0.0 }
0x1740   :  { %v4537_v17 = vpop.eup %4536  ;;  %v3693_v23 = vadd.f32 %v3692_v52, %v3691_v9  ;;  %v3694_v13 = vsel %vm278_vm2, %v4535_v53, 0.0 }
0x1741   :  { %v4539_v22 = vpop.eup %4538  ;;  %v3696_v26 = vsel %vm278_vm2, %v4537_v17, 0.0 }
0x1742   :  { %v3695_v4 = vadd.f32 %v3694_v13, %v3693_v23  ;;  %v4541_v55 = vpop.eup %4540  ;;  %v3698_v50 = vsel %vm278_vm2, %v4539_v22, 0.0 }
0x1743   :  { %v4543_v21 = vpop.eup %4542  ;;  %v3700_v6 = vsel %vm278_vm2, %v4541_v55, 0.0 }
0x1744   :  { %v3697_v41 = vadd.f32 %v3696_v26, %v3695_v4  ;;  %v4545_v44 = vpop.eup %4544  ;;  %v3702_v42 = vsel %vm278_vm2, %v4543_v21, 0.0 }
0x1745   :  { %v3704_v5 = vsel %vm278_vm2, %v4545_v44, 0.0 }
0x1746   :  { %v3699_v59 = vadd.f32 %v3698_v50, %v3697_v41 }
0x1748   :  { %v3701_v60 = vadd.f32 %v3700_v6, %v3699_v59  ;;  %v7985_v6 = vld [vmem:[#allocation13_spill] sm:$0xff] }
0x174a   :  { %v3703_v10 = vadd.f32 %v3702_v42, %v3701_v60  ;;  %v7986_v60 = vld [vmem:[#allocation14_spill] sm:$0xff] }
0x174c   :  { %v3705_v34 = vadd.f32 %v3704_v5, %v3703_v10 }
0x174e   :  { %4546 = vrcp.f32 %v3705_v34 }
0x1754   :  { %v4547_v62 = vpop.eup %4546 }
0x1755   :  { %v3707_v45 = vmul.f32 %v4547_v62, %v4531_v19  ;;  %v3708_v54 = vmul.f32 %v4547_v62, %v4533_v46  ;;  %v3709_v18 = vmul.f32 %v4547_v62, %v4535_v53  ;;  %v3710_v3 = vmul.f32 %v4547_v62, %v4537_v17 }
0x1756   :  { %v3711_v25 = vmul.f32 %v4547_v62, %v4539_v22  ;;  %v3712_v39 = vmul.f32 %v4547_v62, %v4541_v55  ;;  %v3713_v15 = vmul.f32 %v4547_v62, %v4543_v21  ;;  %v3714_v9 = vmul.f32 %v4547_v62, %v4545_v44 }
0x1757   :  { %v3715_v28 = vmul.f32 %v7303_v33, %v3707_v45  ;;  %v3716_v43 = vmul.f32 %v7309_v20, %v3708_v54  ;;  %v3717_v38 = vmul.f32 %v7315_v35, %v3709_v18  ;;  %v3718_v7 = vmul.f32 %v7321_v51, %v3710_v3 }
0x1758   :  { %v3719_v19 = vmul.f32 %v7329_v11, %v3711_v25  ;;  %v3720_v33 = vmul.f32 %v7336_v32, %v3712_v39  ;;  %v3721_v53 = vmul.f32 %v7343_v61, %v3713_v15  ;;  %v4814_v11 = vld [vmem:[%s7634_s1 + $0xe] sm:$0x3] }
0x1759   :  { %v3723_v29 = vsel %vm253_vm1, %v3715_v28, 0.0  ;;  %v3724_v30 = vsel %vm253_vm1, %v3716_v43, 0.0  ;;  %v3726_v46 = vsel %vm253_vm1, %v3717_v38, 0.0  ;;  %v3728_v20 = vsel %vm253_vm1, %v3718_v7, 0.0 }
0x175a   :  { %v3725_v58 = vadd.f32 %v3724_v30, %v3723_v29  ;;  %v3730_v51 = vsel %vm253_vm1, %v3719_v19, 0.0  ;;  %v3732_v17 = vsel %vm253_vm1, %v3720_v33, 0.0  ;;  %v3722_v23 = vmul.f32 %v4814_v11, %v3714_v9  ;;  %v7987_v19 = vld [vmem:[#allocation15_spill] sm:$0xff] }
0x175b   :  { %v3734_v22 = vsel %vm253_vm1, %v3721_v53, 0.0 }
0x175c   :  { %v3727_v0 = vadd.f32 %v3726_v46, %v3725_v58  ;;  %v3736_v4 = vsel %vm253_vm1, %v3722_v23, 0.0 }
0x175e   :  { %v3729_v35 = vadd.f32 %v3728_v20, %v3727_v0 }
0x1760   :  { %v3731_v52 = vadd.f32 %v3730_v51, %v3729_v35 }
0x1762   :  { %v3733_v13 = vadd.f32 %v3732_v17, %v3731_v52 }
0x1764   :  { %v3735_v32 = vadd.f32 %v3734_v22, %v3733_v13 }
0x1766   :  { %v3737_v26 = vadd.f32 %v3736_v4, %v3735_v32 }
0x1768   :  { %4177 = vmatmul.msk.f32.vlgmr.msra.gmra.mxu2 %vm202_vm0, %v3737_v26  ;;  %4179 = vmatmul.msk.f32.vlgmr.msrb.gmra.mxu0 %vm202_vm0, %v3737_v26 }
0x1769   :  { %3899 = vmatpush.msra.mxu2 %v7357_v47  ;;  %3939 = vmatpush.msrb.mxu0 %v7360_v24  ;;  %v7978_v47 = vld [vmem:[#allocation41_spill] sm:$0xff]  ;;  %v7979_v24 = vld [vmem:[#allocation39_spill] sm:$0xff] }
0x176b   :  { %3900 = vmatpush.msra.mxu2 %v7363_v57  ;;  %3940 = vmatpush.msrb.mxu0 %v7366_v36  ;;  %v7980_v57 = vld [vmem:[#allocation38_spill] sm:$0xff]  ;;  %v7981_v36 = vld [vmem:[#allocation9_spill] sm:$0xff] }
0x176d   :  { %3901 = vmatpush.msra.mxu2 %v7369_v40  ;;  %3941 = vmatpush.msrb.mxu0 %v7372_v48  ;;  %v7982_v40 = vld [vmem:[#allocation10_spill] sm:$0xff] }
0x176f   :  { %3902 = vmatpush.msra.mxu2 %v7375_v56  ;;  %3942 = vmatpush.msrb.mxu0 %v7378_v1 }
0x179e   :  { %v3755_v61 = vpop.f32.mrf.mxu1 }
0x179f   :  { %4178 = vmatmul.msk.f32.vlgmr.msra.gmra.mxu3 %vm202_vm0, %v3755_v61  ;;  %4180 = vmatmul.msk.f32.vlgmr.msrb.gmra.mxu2 %vm202_vm0, %v3755_v61 }
0x17a0   :  { %4182 = vmatmul.msk.f32.vlgmr.msra.gmra.mxu0 %vm202_vm0, %v3755_v61  ;;  %3919 = vmatpush.msra.mxu3 %v7384_v63 }
0x17a1   :  { %4006 = vmatpush.msrb.mxu2 %v7387_v12 }
0x17a2   :  { %3920 = vmatpush.msra.mxu3 %v7391_v49 }
0x17a3   :  { %4007 = vmatpush.msrb.mxu2 %v7394_v16  ;;  %v7983_v16 = vld [vmem:[#allocation11_spill] sm:$0xff] }
0x17a4   :  { %3921 = vmatpush.msra.mxu3 %v7398_v2 }
0x17a5   :  { %4008 = vmatpush.msrb.mxu2 %v7401_v14  ;;  %v7984_v14 = vld [vmem:[#allocation12_spill] sm:$0xff] }
0x17a6   :  { %3922 = vmatpush.msra.mxu3 %v7405_v37 }
0x17a7   :  { %4181 = vmatmul.msk.f32.vlgmr.msrb.gmra.mxu3 %vm202_vm0, %v3737_v26  ;;  %4183 = vmatmul.msk.f32.vlgmr.msra.gmra.mxu2 %vm202_vm0, %v7501_v27 }
0x17a8   :  { %4185 = vmatmul.msk.f32.vlgmr.msrb.gmra.mxu0 %vm202_vm0, %v7501_v27  ;;  %4009 = vmatpush.msrb.mxu2 %v7978_v47 }
0x17a9   :  { %4029 = vmatpush.msrb.mxu3 %v7979_v24 }
0x17ab   :  { %4030 = vmatpush.msrb.mxu3 %v7980_v57 }
0x17ad   :  { %4031 = vmatpush.msrb.mxu3 %v7981_v36 }
0x17af   :  { %4184 = vmatmul.msk.f32.vlgmr.msra.gmra.mxu3 %vm202_vm0, %v7501_v27  ;;  %4188 = vmatmul.msk.f32.vlgmr.msrb.gmra.mxu2 %vm202_vm0, %v3737_v26 }
0x17b0   :  { %4032 = vmatpush.msrb.mxu3 %v7982_v40 }
0x17e5   :  { %v3822_v41 = vpop.f32.mrf.mxu0 }
0x17eb   :  { %v3778_v48 = vpop.f32.mrf.mxu2 }
0x181d   :  { %v3883_v45 = vpop.f32.mrf.mxu0 }
0x1822   :  { %v3801_v56 = vpop.f32.mrf.mxu3  ;;  %v3842_v1 = vpop.f32.mrf.mxu2 }
0x1823   :  { %v3802_v63 = vadd.f32 %v3801_v56, %v3778_v48  ;;  %v3843_v50 = vadd.f32 %v3842_v1, %v3822_v41 }
0x1825   :  { %v3804_v2 = vadd.f32 %v7983_v16, %v3802_v63  ;;  %v3845_v44 = vadd.f32 %v7985_v6, %v3843_v50  ;;  %v3944_v7 = vpop.f32.mrf.mxu0 }
0x1826   :  { %v3945_v46 = vadd.f32 %v7987_v19, %v3944_v7 }
0x182a   :  { %v3863_v12 = vpop.f32.mrf.mxu3  ;;  %v3904_v49 = vpop.f32.mrf.mxu2 }
0x182b   :  { %v3905_v37 = vadd.f32 %v7984_v14, %v3904_v49  ;;  %v3884_v29 = vadd.f32 %v3883_v45, %v3863_v12 }
0x182d   :  { %v3947_v55 = vadd.f32 %v3905_v37, %v3804_v2  ;;  %v3886_v9 = vadd.f32 %v7497_v31, %v3884_v29 }
0x182f   :  { %v4186_v21 = vmul.f32 -1.442695, %v3947_v55 }
0x1831   :  { %4548 = vpow2.f32 %v4186_v21 }
0x1832   :  { %v3924_v59 = vpop.f32.mrf.mxu3  ;;  %v4011_v24 = vpop.f32.mrf.mxu2 }
0x1833   :  { %v3925_v42 = vadd.f32 %v7986_v60, %v3924_v59 }
0x1835   :  { %v3967_v10 = vadd.f32 %v3925_v42, %v3845_v44 }
0x1837   :  { %v4549_v5 = vpop.eup %4548  ;;  %v4187_v34 = vmul.f32 -1.442695, %v3967_v10 }
0x1838   :  { %v3951_v62 = vadd.f32 1.0, %v4549_v5 }
0x1839   :  { %4550 = vpow2.f32 %v4187_v34 }
0x183a   :  { %4552 = vrcp.f32 %v3951_v62  ;;  %v3963_v43 = vand.u32 2147483648, %v3951_v62  ;;  %v3961_v39 = vand.u32 2147483647, %v3951_v62  ;;  %vm3957_vm2 = vweird.f32 %v3951_v62 }
0x183c   :  { %v3964_v15 = vor.u32 1.1754944e-38, %v3963_v43  ;;  %vm3962_vm3 = vcmp.eq.f32.partialorder %v3961_v39, 8.507059e+37 }
0x183f   :  { %v4551_v54 = vpop.eup %4550 }
0x1840   :  { %v4553_v18 = vpop.eup %4552  ;;  %v3971_v3 = vadd.f32 1.0, %v4551_v54 }
0x1841   :  { %v3953_v25 = vmul.f32 %v4553_v18, %v3951_v62  ;;  %vm3958_vm1 = vweird.f32 %v4553_v18 }
0x1842   :  { %4554 = vrcp.f32 %v3971_v3  ;;  %vm3959_vm15 = vmor %vm3957_vm2, %vm3958_vm1  ;;  %v3983_v51 = vand.u32 2147483648, %v3971_v3  ;;  %v3981_v11 = vand.u32 2147483647, %v3971_v3  ;;  %vm3977_vm5 = vweird.f32 %v3971_v3 }
0x1843   :  { %v3954_v28 = vsub.f32 1.0, %v3953_v25 }
0x1844   :  { %v3984_v13 = vor.u32 1.1754944e-38, %v3983_v51  ;;  %vm3982_vm7 = vcmp.eq.f32.partialorder %v3981_v11, 8.507059e+37 }
0x1845   :  { %v3955_v38 = vmul.f32 %v4553_v18, %v3954_v28 }
0x1847   :  { %v3956_v30 = vadd.f32 %v4553_v18, %v3955_v38 }
0x1848   :  { %v4555_v58 = vpop.eup %4554 }
0x1849   :  { %v3960_v0 = vsel %vm3959_vm15, %v4553_v18, %v3956_v30  ;;  %v3973_v33 = vmul.f32 %v4555_v58, %v3971_v3  ;;  %vm3978_vm4 = vweird.f32 %v4555_v58 }
0x184a   :  { %v3965_v20 = vsel %vm3962_vm3, %v3964_v15, %v3960_v0  ;;  %vm3979_vm6 = vmor %vm3977_vm5, %vm3978_vm4 }
0x184b   :  { %v3987_v35 = vmul.f32 %v3965_v20, %v3945_v46  ;;  %v3974_v53 = vsub.f32 1.0, %v3973_v33 }
0x184d   :  { %v3988_v52 = vadd.f32 %v3987_v35, %v3886_v9  ;;  %v3975_v17 = vmul.f32 %v4555_v58, %v3974_v53 }
0x184f   :  { %4556 = vtanh.f32 %v3988_v52  ;;  %v3976_v23 = vadd.f32 %v4555_v58, %v3975_v17 }
0x1851   :  { %v3980_v22 = vsel %vm3979_vm6, %v4555_v58, %v3976_v23 }
0x1852   :  { %v3985_v32 = vsel %vm3982_vm7, %v3984_v13, %v3980_v22 }
0x1853   :  { %v3990_v4 = vsub.f32 1.0, %v3985_v32  ;;  %v3992_v31 = vmul.f32 %v3985_v32, %v7501_v27 }
0x1855   :  { %v4557_v26 = vpop.eup %4556 }
0x1856   :  { %v3991_v61 = vmul.f32 %v4557_v26, %v3990_v4 }
0x1858   :  { %v3993_v47 = vadd.f32 %v3992_v31, %v3991_v61 }
0x185a   :  { %4189 = vmatmul.msk.f32.vlgmr.msrb.gmra.mxu3 %vm202_vm0, %v3993_v47 }
0x18dd   :  { %v4034_v57 = vpop.f32.mrf.mxu3 }
0x18de   :  { %v4035_v36 = vadd.f32 %v4034_v57, %v4011_v24 }
0x18e0   :  { %v4037_v40 = vadd.f32 %v7520_v8, %v4035_v36 }
0x18e2   :  { %4190 = vst [vmem:[%s7648_s15 + $0xe] sm:$0x3] %v4037_v40 }
0x18e3   :  { %4044 = vsyncpa [#allocation3], 1 }
0x18e4   :  { %4045 = vsyncpa [#allocation5], 1 }

</bundles_post_ra>
